<compile_context>
chip_gen: v5e
topology: v5e:2x2
jax: 0.10.0
libtpu: 0.0.40
codegen_flags: <defaults>
</compile_context>

<pallas_src>
import functools

import jax
import jax.numpy as jnp
import numpy as np
from jax.experimental import pallas as pl
from jax.experimental.pallas import tpu as pltpu

EPS = 1e-5


def _elu(z):
    # PyTorch nn.ELU (alpha=1): z if z > 0 else exp(z) - 1.  (ELU(0) == 0.)
    return jnp.where(z > 0, z, jnp.exp(z) - 1.0)


# ----------------------------------------------------------------------------- kernel


def dilated_conv_unit_kernel(
    x_ref,                       # (1, Cin, H*W)   input, channel-major per batch
    g1_ref, b1_ref, a1_ref,      # (1, Cin, 1)     norm1 params (gathered by noise_scale_idx)
    g2_ref, b2_ref, a2_ref,      # (1, Cout, 1)    norm2 params
    w1_ref,                      # (Cout, 9*Cin)   conv1 weight, cols ordered (kh, kw, cin)
    bias1_ref,                   # (Cout, 1)
    w2_ref,                      # (Cout, 9*Cout)  conv2 weight
    bias2_ref,                   # (Cout, 1)
    o_ref,                       # (1, Cout, H*W)
    pad1_ref,                    # VMEM (Cin,  H+2*dil, W+2*dil)  zero-pad scratch
    taps1_ref,                   # VMEM (9*Cin,  H*W)             im2col scratch
    pad2_ref,                    # VMEM (Cout, H+2,     W+2)
    taps2_ref,                   # VMEM (9*Cout, H*W)
    *, H, W, c_in, c_out, dil, eps,
):
    hw = H * W

    def cond_inst_norm(v, g, b, a, nch):
        # v: (C, HW) channel-major; spatial statistics reduce over the lane axis.
        mu = jnp.mean(v, axis=1, keepdims=True)                           # (C, 1)
        var = jnp.sum((v - mu) ** 2, axis=1, keepdims=True) / (hw - 1)    # unbiased (torch.var)
        xn = g * ((v - mu) * jax.lax.rsqrt(var + eps)) + b
        m = jnp.mean(mu, axis=0, keepdims=True)                           # (1, 1) cross-channel
        if nch == 1:
            s = jnp.ones_like(mu)
        else:
            vm = jnp.sum((mu - m) ** 2, axis=0, keepdims=True) / (nch - 1)
            s = jnp.sqrt(vm + eps)
        return xn + a * (mu - m) / s

    def conv3x3_same(h, pad_ref, taps_ref, w2d, bias, d, c):
        # h: (c, HW).  'same' 3x3 conv with dilation d: zero-pad by d into VMEM,
        # build the (9*c, HW) im2col tap matrix, one MXU matmul.
        pad_ref[...] = jnp.zeros_like(pad_ref)
        pad_ref[:, d:d + H, d:d + W] = h.reshape(c, H, W)
        xp = pad_ref[...]
        for kh in range(3):
            for kw in range(3):
                k = kh * 3 + kw
                taps_ref[k * c:(k + 1) * c, :] = (
                    xp[:, kh * d:kh * d + H, kw * d:kw * d + W].reshape(c, hw))
        return jnp.dot(w2d, taps_ref[...], preferred_element_type=jnp.float32) + bias

    x = x_ref[0].astype(jnp.float32)                                      # (Cin, HW)

    h = cond_inst_norm(x, g1_ref[0], b1_ref[0], a1_ref[0], c_in)
    h = _elu(h)
    h = conv3x3_same(h, pad1_ref, taps1_ref, w1_ref[...], bias1_ref[...], dil, c_in)

    h = cond_inst_norm(h, g2_ref[0], b2_ref[0], a2_ref[0], c_out)
    h = _elu(h)
    h = conv3x3_same(h, pad2_ref, taps2_ref, w2_ref[...], bias2_ref[...], 1, c_out)

    o_ref[0] = h.astype(o_ref.dtype)


# ----------------------------------------------------------------------------- wrapper


def dilated_conv_unit(x_nchw, noise_scale_idx, params, *, dilation=2, eps=EPS):
    B, Cin, H, W = x_nchw.shape
    Cout = params["w1"].shape[0]
    HW = H * W

    x = x_nchw.reshape(B, Cin, HW)                      # free, contiguous

    def gather(p, c):                                   # (n_noise, c) -> (B, c, 1)
        return p[noise_scale_idx].reshape(B, c, 1)

    g1, b1, a1 = (gather(params[k], Cin) for k in ("g1", "b1", "a1"))
    g2, b2, a2 = (gather(params[k], Cout) for k in ("g2", "b2", "a2"))

    # (Cout, Cin, 3, 3) -> (Cout, kh, kw, Cin) -> (Cout, 9*Cin) to match im2col row order.
    w1 = jnp.transpose(params["w1"], (0, 2, 3, 1)).reshape(Cout, 9 * Cin)
    w2 = jnp.transpose(params["w2"], (0, 2, 3, 1)).reshape(Cout, 9 * Cout)
    bias1 = params["bias1"].reshape(Cout, 1)
    bias2 = params["bias2"].reshape(Cout, 1)

    kern = functools.partial(dilated_conv_unit_kernel, H=H, W=W,
                             c_in=Cin, c_out=Cout, dil=dilation, eps=eps)

    per_batch = lambda c, n: pl.BlockSpec((1, c, n), lambda b: (b, 0, 0))
    shared2d = lambda r, c: pl.BlockSpec((r, c), lambda b: (0, 0))

    in_specs = [
        per_batch(Cin, HW),
        per_batch(Cin, 1), per_batch(Cin, 1), per_batch(Cin, 1),
        per_batch(Cout, 1), per_batch(Cout, 1), per_batch(Cout, 1),
        shared2d(Cout, 9 * Cin), shared2d(Cout, 1),
        shared2d(Cout, 9 * Cout), shared2d(Cout, 1),
    ]

    out = pl.pallas_call(
        kern,
        grid=(B,),
        in_specs=in_specs,
        out_specs=pl.BlockSpec((1, Cout, HW), lambda b: (b, 0, 0)),
        out_shape=jax.ShapeDtypeStruct((B, Cout, HW), x_nchw.dtype),
        scratch_shapes=[
            pltpu.VMEM((Cin, H + 2 * dilation, W + 2 * dilation), jnp.float32),
            pltpu.VMEM((9 * Cin, HW), jnp.float32),
            pltpu.VMEM((Cout, H + 2, W + 2), jnp.float32),
            pltpu.VMEM((9 * Cout, HW), jnp.float32),
        ],
        compiler_params=pltpu.CompilerParams(dimension_semantics=("parallel",)),
    )(x, g1, b1, a1, g2, b2, a2, w1, bias1, w2, bias2)

    return out.reshape(B, Cout, H, W)                   # already NCHW


# ----------------------------------------------------------------------------- pure-JAX reference


def _ref_unit(x, idx, params, dilation=2, eps=EPS):
    def cin_ref(x, g, b, a):
        mu = jnp.mean(x, axis=(2, 3), keepdims=True)
        var = jnp.var(x, axis=(2, 3), keepdims=True, ddof=1)
        xn = g[:, :, None, None] * (x - mu) / jnp.sqrt(var + eps) + b[:, :, None, None]
        m = jnp.mean(mu, axis=1, keepdims=True)
        if x.shape[1] == 1:
            s = jnp.ones_like(mu)
        else:
            s = jnp.sqrt(jnp.var(mu, axis=1, keepdims=True, ddof=1) + eps)
        return xn + a[:, :, None, None] * (mu - m) / s

    def conv(h, w, b, d):
        y = jax.lax.conv_general_dilated(
            h, w, window_strides=(1, 1), padding=((d, d), (d, d)),
            rhs_dilation=(d, d),
            dimension_numbers=("NCHW", "OIHW", "NCHW"),
            precision=jax.lax.Precision.HIGHEST)
        return y + b[None, :, None, None]

    h = cin_ref(x, params["g1"][idx], params["b1"][idx], params["a1"][idx])
    h = _elu(h)
    h = conv(h, params["w1"], params["bias1"], dilation)
    h = cin_ref(h, params["g2"][idx], params["b2"][idx], params["a2"][idx])
    h = _elu(h)
    h = conv(h, params["w2"], params["bias2"], 1)
    return h


# ----------------------------------------------------------------------------- main


def _init_params(key, cin, cout, n_noise_scale):
    ks = jax.random.split(key, 10)
    return {
        "g1": 1.0 + 0.1 * jax.random.normal(ks[0], (n_noise_scale, cin), jnp.float32),
        "b1": 0.1 * jax.random.normal(ks[1], (n_noise_scale, cin), jnp.float32),
        "a1": 0.1 * jax.random.normal(ks[2], (n_noise_scale, cin), jnp.float32),
        "g2": 1.0 + 0.1 * jax.random.normal(ks[3], (n_noise_scale, cout), jnp.float32),
        "b2": 0.1 * jax.random.normal(ks[4], (n_noise_scale, cout), jnp.float32),
        "a2": 0.1 * jax.random.normal(ks[5], (n_noise_scale, cout), jnp.float32),
        "w1": 0.1 * jax.random.normal(ks[6], (cout, cin, 3, 3), jnp.float32),
        "bias1": 0.1 * jax.random.normal(ks[7], (cout,), jnp.float32),
        "w2": 0.1 * jax.random.normal(ks[8], (cout, cout, 3, 3), jnp.float32),
        "bias2": 0.1 * jax.random.normal(ks[9], (cout,), jnp.float32),
    }


if __name__ == "__main__":
    B, Cin, Cout, H, W = 2, 4, 8, 16, 16
    n_noise_scale = 10
    dilation = 2

    key = jax.random.PRNGKey(0)
    kx, kp = jax.random.split(key)
    x = jax.random.normal(kx, (B, Cin, H, W), jnp.float32)
    noise_scale_idx = jnp.array([3, 7], dtype=jnp.int32)
    params = _init_params(kp, Cin, Cout, n_noise_scale)

    fwd = jax.jit(functools.partial(dilated_conv_unit, dilation=dilation))
    out = jax.block_until_ready(fwd(x, noise_scale_idx, params))
    ref = jax.block_until_ready(_ref_unit(x, noise_scale_idx, params, dilation=dilation))

    assert out.shape == (B, Cout, H, W), out.shape
    max_err = float(jnp.max(jnp.abs(out - ref)))
    # 2e-2 headroom: kernel matmuls run at default (single-pass bf16) MXU precision,
    # reference convs are fp32 HIGHEST; a real semantic bug would be O(0.1+).
    assert np.isfinite(max_err) and max_err < 2e-2, f"mismatch vs reference: {max_err}"
    print("KERNEL_OK")
</pallas_src>

<mosaic_0001>
module attributes {stable_mosaic.version = 11 : i64} {
  func.func @dilated_conv_unit_kernel(%arg0: i32, %arg1: memref<1x4x256xf32, #tpu.memory_space<vmem>>, %arg2: memref<1x4x1xf32, #tpu.memory_space<vmem>>, %arg3: memref<1x4x1xf32, #tpu.memory_space<vmem>>, %arg4: memref<1x4x1xf32, #tpu.memory_space<vmem>>, %arg5: memref<1x8x1xf32, #tpu.memory_space<vmem>>, %arg6: memref<1x8x1xf32, #tpu.memory_space<vmem>>, %arg7: memref<1x8x1xf32, #tpu.memory_space<vmem>>, %arg8: memref<8x36xf32, #tpu.memory_space<vmem>>, %arg9: memref<8x1xf32, #tpu.memory_space<vmem>>, %arg10: memref<8x72xf32, #tpu.memory_space<vmem>>, %arg11: memref<8x1xf32, #tpu.memory_space<vmem>>, %arg12: memref<1x8x256xf32, #tpu.memory_space<vmem>>, %arg13: memref<4x20x20xf32, #tpu.memory_space<vmem>>, %arg14: memref<36x256xf32, #tpu.memory_space<vmem>>, %arg15: memref<8x18x18xf32, #tpu.memory_space<vmem>>, %arg16: memref<72x256xf32, #tpu.memory_space<vmem>>) attributes {dimension_semantics = [#tpu.dimension_semantics<parallel>], iteration_bounds = array<i64: 2>, scalar_prefetch = 0 : i64, scratch_operands = 4 : i64, tpu.core_type = #tpu.core_type<tc>, window_params = [{transform_indices = @transform_0, window_bounds = array<i64: 1, 4, 256>}, {transform_indices = @transform_1, window_bounds = array<i64: 1, 4, 1>}, {transform_indices = @transform_2, window_bounds = array<i64: 1, 4, 1>}, {transform_indices = @transform_3, window_bounds = array<i64: 1, 4, 1>}, {transform_indices = @transform_4, window_bounds = array<i64: 1, 8, 1>}, {transform_indices = @transform_5, window_bounds = array<i64: 1, 8, 1>}, {transform_indices = @transform_6, window_bounds = array<i64: 1, 8, 1>}, {pipeline_mode = #tpu.pipeline_mode<synchronous>, transform_indices = @transform_7, window_bounds = array<i64: 8, 36>}, {pipeline_mode = #tpu.pipeline_mode<synchronous>, transform_indices = @transform_8, window_bounds = array<i64: 8, 1>}, {pipeline_mode = #tpu.pipeline_mode<synchronous>, transform_indices = @transform_9, window_bounds = array<i64: 8, 72>}, {pipeline_mode = #tpu.pipeline_mode<synchronous>, transform_indices = @transform_10, window_bounds = array<i64: 8, 1>}, {transform_indices = @transform_11, window_bounds = array<i64: 1, 8, 256>}]} {
    %c0 = arith.constant 0 : index
    %c0_0 = arith.constant 0 : index
    %c0_1 = arith.constant 0 : index
    %0 = vector.load %arg1[%c0, %c0_0, %c0_1] : memref<1x4x256xf32, #tpu.memory_space<vmem>>, vector<1x4x256xf32>
    %1 = vector.shape_cast %0 : vector<1x4x256xf32> to vector<4x256xf32>
    %c0_2 = arith.constant 0 : index
    %c0_3 = arith.constant 0 : index
    %c0_4 = arith.constant 0 : index
    %2 = vector.load %arg2[%c0_2, %c0_3, %c0_4] : memref<1x4x1xf32, #tpu.memory_space<vmem>>, vector<1x4x1xf32>
    %3 = vector.shape_cast %2 : vector<1x4x1xf32> to vector<4x1xf32>
    %c0_5 = arith.constant 0 : index
    %c0_6 = arith.constant 0 : index
    %c0_7 = arith.constant 0 : index
    %4 = vector.load %arg3[%c0_5, %c0_6, %c0_7] : memref<1x4x1xf32, #tpu.memory_space<vmem>>, vector<1x4x1xf32>
    %5 = vector.shape_cast %4 : vector<1x4x1xf32> to vector<4x1xf32>
    %c0_8 = arith.constant 0 : index
    %c0_9 = arith.constant 0 : index
    %c0_10 = arith.constant 0 : index
    %6 = vector.load %arg4[%c0_8, %c0_9, %c0_10] : memref<1x4x1xf32, #tpu.memory_space<vmem>>, vector<1x4x1xf32>
    %7 = vector.shape_cast %6 : vector<1x4x1xf32> to vector<4x1xf32>
    %cst = arith.constant dense<0.000000e+00> : vector<4xf32>
    %8 = vector.multi_reduction <add>, %1, %cst [1] : vector<4x256xf32> to vector<4xf32>
    %9 = vector.shape_cast %8 : vector<4xf32> to vector<4x1xf32>
    %cst_11 = arith.constant 2.560000e+02 : f32
    %10 = vector.broadcast %cst_11 : f32 to vector<4x1xf32>
    %11 = arith.divf %9, %10 : vector<4x1xf32>
    %12 = vector.broadcast %11 : vector<4x1xf32> to vector<4x256xf32>
    %13 = arith.subf %1, %12 : vector<4x256xf32>
    %14 = arith.mulf %13, %13 : vector<4x256xf32>
    %cst_12 = arith.constant dense<0.000000e+00> : vector<4xf32>
    %15 = vector.multi_reduction <add>, %14, %cst_12 [1] : vector<4x256xf32> to vector<4xf32>
    %16 = vector.shape_cast %15 : vector<4xf32> to vector<4x1xf32>
    %cst_13 = arith.constant 2.550000e+02 : f32
    %17 = vector.broadcast %cst_13 : f32 to vector<4x1xf32>
    %18 = arith.divf %16, %17 : vector<4x1xf32>
    %19 = vector.broadcast %11 : vector<4x1xf32> to vector<4x256xf32>
    %20 = arith.subf %1, %19 : vector<4x256xf32>
    %cst_14 = arith.constant 9.99999974E-6 : f32
    %21 = vector.broadcast %cst_14 : f32 to vector<4x1xf32>
    %22 = arith.addf %18, %21 : vector<4x1xf32>
    %23 = math.rsqrt %22 : vector<4x1xf32>
    %24 = vector.broadcast %23 : vector<4x1xf32> to vector<4x256xf32>
    %25 = arith.mulf %20, %24 : vector<4x256xf32>
    %26 = vector.broadcast %3 : vector<4x1xf32> to vector<4x256xf32>
    %27 = arith.mulf %26, %25 : vector<4x256xf32>
    %28 = vector.broadcast %5 : vector<4x1xf32> to vector<4x256xf32>
    %29 = arith.addf %27, %28 : vector<4x256xf32>
    %cst_15 = arith.constant dense<0.000000e+00> : vector<1xf32>
    %30 = vector.multi_reduction <add>, %11, %cst_15 [0] : vector<4x1xf32> to vector<1xf32>
    %31 = vector.shape_cast %30 : vector<1xf32> to vector<1x1xf32>
    %cst_16 = arith.constant 4.000000e+00 : f32
    %32 = vector.broadcast %cst_16 : f32 to vector<1x1xf32>
    %33 = arith.divf %31, %32 : vector<1x1xf32>
    %34 = vector.broadcast %33 : vector<1x1xf32> to vector<4x1xf32>
    %35 = arith.subf %11, %34 : vector<4x1xf32>
    %36 = arith.mulf %35, %35 : vector<4x1xf32>
    %cst_17 = arith.constant dense<0.000000e+00> : vector<1xf32>
    %37 = vector.multi_reduction <add>, %36, %cst_17 [0] : vector<4x1xf32> to vector<1xf32>
    %38 = vector.shape_cast %37 : vector<1xf32> to vector<1x1xf32>
    %cst_18 = arith.constant 3.000000e+00 : f32
    %39 = vector.broadcast %cst_18 : f32 to vector<1x1xf32>
    %40 = arith.divf %38, %39 : vector<1x1xf32>
    %cst_19 = arith.constant 9.99999974E-6 : f32
    %41 = vector.broadcast %cst_19 : f32 to vector<1x1xf32>
    %42 = arith.addf %40, %41 : vector<1x1xf32>
    %43 = math.sqrt %42 : vector<1x1xf32>
    %44 = vector.broadcast %33 : vector<1x1xf32> to vector<4x1xf32>
    %45 = arith.subf %11, %44 : vector<4x1xf32>
    %46 = arith.mulf %7, %45 : vector<4x1xf32>
    %47 = vector.broadcast %43 : vector<1x1xf32> to vector<4x1xf32>
    %48 = arith.divf %46, %47 : vector<4x1xf32>
    %49 = vector.broadcast %48 : vector<4x1xf32> to vector<4x256xf32>
    %50 = arith.addf %29, %49 : vector<4x256xf32>
    %cst_20 = arith.constant 0.000000e+00 : f32
    %51 = vector.broadcast %cst_20 : f32 to vector<4x256xf32>
    %52 = arith.cmpf ogt, %50, %51 : vector<4x256xf32>
    %53 = math.exp %50 : vector<4x256xf32>
    %cst_21 = arith.constant 1.000000e+00 : f32
    %54 = vector.broadcast %cst_21 : f32 to vector<4x256xf32>
    %55 = arith.subf %53, %54 : vector<4x256xf32>
    %56 = arith.select %52, %50, %55 : vector<4x256xi1>, vector<4x256xf32>
    %c0_22 = arith.constant 0 : index
    %c0_23 = arith.constant 0 : index
    %57 = vector.load %arg8[%c0_22, %c0_23] : memref<8x36xf32, #tpu.memory_space<vmem>>, vector<8x36xf32>
    %c0_24 = arith.constant 0 : index
    %c0_25 = arith.constant 0 : index
    %58 = vector.load %arg9[%c0_24, %c0_25] : memref<8x1xf32, #tpu.memory_space<vmem>>, vector<8x1xf32>
    %cst_26 = arith.constant 0.000000e+00 : f32
    %59 = vector.broadcast %cst_26 : f32 to vector<4x20x20xf32>
    %c0_27 = arith.constant 0 : index
    %c0_28 = arith.constant 0 : index
    %c0_29 = arith.constant 0 : index
    %60 = vector.load %arg13[%c0_27, %c0_28, %c0_29] : memref<4x20x20xf32, #tpu.memory_space<vmem>>, vector<4x20x20xf32>
    tpu.vector_store %arg13[%c0_27, %c0_28, %c0_29], %59 {strides = array<i32>} : memref<4x20x20xf32, #tpu.memory_space<vmem>>, vector<4x20x20xf32>,
    %61 = vector.shape_cast %56 : vector<4x256xf32> to vector<4x16x16xf32>
    %c0_30 = arith.constant 0 : index
    %c2 = arith.constant 2 : index
    %c2_31 = arith.constant 2 : index
    %62 = vector.load %arg13[%c0_30, %c2, %c2_31] : memref<4x20x20xf32, #tpu.memory_space<vmem>>, vector<4x16x16xf32>
    tpu.vector_store %arg13[%c0_30, %c2, %c2_31], %61 {strides = array<i32>} : memref<4x20x20xf32, #tpu.memory_space<vmem>>, vector<4x16x16xf32>,
    %c0_32 = arith.constant 0 : index
    %c0_33 = arith.constant 0 : index
    %c0_34 = arith.constant 0 : index
    %63 = vector.load %arg13[%c0_32, %c0_33, %c0_34] : memref<4x20x20xf32, #tpu.memory_space<vmem>>, vector<4x20x20xf32>
    %64 = vector.extract_strided_slice %63 {offsets = [0, 0, 0], sizes = [4, 16, 16], strides = [1, 1, 1]} : vector<4x20x20xf32> to vector<4x16x16xf32>
    %65 = vector.shape_cast %64 : vector<4x16x16xf32> to vector<4x256xf32>
    %c0_35 = arith.constant 0 : index
    %c0_36 = arith.constant 0 : index
    %66 = vector.load %arg14[%c0_35, %c0_36] : memref<36x256xf32, #tpu.memory_space<vmem>>, vector<4x256xf32>
    tpu.vector_store %arg14[%c0_35, %c0_36], %65 {strides = array<i32>} : memref<36x256xf32, #tpu.memory_space<vmem>>, vector<4x256xf32>,
    %67 = vector.extract_strided_slice %63 {offsets = [0, 0, 2], sizes = [4, 16, 16], strides = [1, 1, 1]} : vector<4x20x20xf32> to vector<4x16x16xf32>
    %68 = vector.shape_cast %67 : vector<4x16x16xf32> to vector<4x256xf32>
    %c4 = arith.constant 4 : index
    %c0_37 = arith.constant 0 : index
    %69 = vector.load %arg14[%c4, %c0_37] : memref<36x256xf32, #tpu.memory_space<vmem>>, vector<4x256xf32>
    tpu.vector_store %arg14[%c4, %c0_37], %68 {strides = array<i32>} : memref<36x256xf32, #tpu.memory_space<vmem>>, vector<4x256xf32>,
    %70 = vector.extract_strided_slice %63 {offsets = [0, 0, 4], sizes = [4, 16, 16], strides = [1, 1, 1]} : vector<4x20x20xf32> to vector<4x16x16xf32>
    %71 = vector.shape_cast %70 : vector<4x16x16xf32> to vector<4x256xf32>
    %c8 = arith.constant 8 : index
    %c0_38 = arith.constant 0 : index
    %72 = vector.load %arg14[%c8, %c0_38] : memref<36x256xf32, #tpu.memory_space<vmem>>, vector<4x256xf32>
    tpu.vector_store %arg14[%c8, %c0_38], %71 {strides = array<i32>} : memref<36x256xf32, #tpu.memory_space<vmem>>, vector<4x256xf32>,
    %73 = vector.extract_strided_slice %63 {offsets = [0, 2, 0], sizes = [4, 16, 16], strides = [1, 1, 1]} : vector<4x20x20xf32> to vector<4x16x16xf32>
    %74 = vector.shape_cast %73 : vector<4x16x16xf32> to vector<4x256xf32>
    %c12 = arith.constant 12 : index
    %c0_39 = arith.constant 0 : index
    %75 = vector.load %arg14[%c12, %c0_39] : memref<36x256xf32, #tpu.memory_space<vmem>>, vector<4x256xf32>
    tpu.vector_store %arg14[%c12, %c0_39], %74 {strides = array<i32>} : memref<36x256xf32, #tpu.memory_space<vmem>>, vector<4x256xf32>,
    %76 = vector.extract_strided_slice %63 {offsets = [0, 2, 2], sizes = [4, 16, 16], strides = [1, 1, 1]} : vector<4x20x20xf32> to vector<4x16x16xf32>
    %77 = vector.shape_cast %76 : vector<4x16x16xf32> to vector<4x256xf32>
    %c16 = arith.constant 16 : index
    %c0_40 = arith.constant 0 : index
    %78 = vector.load %arg14[%c16, %c0_40] : memref<36x256xf32, #tpu.memory_space<vmem>>, vector<4x256xf32>
    tpu.vector_store %arg14[%c16, %c0_40], %77 {strides = array<i32>} : memref<36x256xf32, #tpu.memory_space<vmem>>, vector<4x256xf32>,
    %79 = vector.extract_strided_slice %63 {offsets = [0, 2, 4], sizes = [4, 16, 16], strides = [1, 1, 1]} : vector<4x20x20xf32> to vector<4x16x16xf32>
    %80 = vector.shape_cast %79 : vector<4x16x16xf32> to vector<4x256xf32>
    %c20 = arith.constant 20 : index
    %c0_41 = arith.constant 0 : index
    %81 = vector.load %arg14[%c20, %c0_41] : memref<36x256xf32, #tpu.memory_space<vmem>>, vector<4x256xf32>
    tpu.vector_store %arg14[%c20, %c0_41], %80 {strides = array<i32>} : memref<36x256xf32, #tpu.memory_space<vmem>>, vector<4x256xf32>,
    %82 = vector.extract_strided_slice %63 {offsets = [0, 4, 0], sizes = [4, 16, 16], strides = [1, 1, 1]} : vector<4x20x20xf32> to vector<4x16x16xf32>
    %83 = vector.shape_cast %82 : vector<4x16x16xf32> to vector<4x256xf32>
    %c24 = arith.constant 24 : index
    %c0_42 = arith.constant 0 : index
    %84 = vector.load %arg14[%c24, %c0_42] : memref<36x256xf32, #tpu.memory_space<vmem>>, vector<4x256xf32>
    tpu.vector_store %arg14[%c24, %c0_42], %83 {strides = array<i32>} : memref<36x256xf32, #tpu.memory_space<vmem>>, vector<4x256xf32>,
    %85 = vector.extract_strided_slice %63 {offsets = [0, 4, 2], sizes = [4, 16, 16], strides = [1, 1, 1]} : vector<4x20x20xf32> to vector<4x16x16xf32>
    %86 = vector.shape_cast %85 : vector<4x16x16xf32> to vector<4x256xf32>
    %c28 = arith.constant 28 : index
    %c0_43 = arith.constant 0 : index
    %87 = vector.load %arg14[%c28, %c0_43] : memref<36x256xf32, #tpu.memory_space<vmem>>, vector<4x256xf32>
    tpu.vector_store %arg14[%c28, %c0_43], %86 {strides = array<i32>} : memref<36x256xf32, #tpu.memory_space<vmem>>, vector<4x256xf32>,
    %88 = vector.extract_strided_slice %63 {offsets = [0, 4, 4], sizes = [4, 16, 16], strides = [1, 1, 1]} : vector<4x20x20xf32> to vector<4x16x16xf32>
    %89 = vector.shape_cast %88 : vector<4x16x16xf32> to vector<4x256xf32>
    %c32 = arith.constant 32 : index
    %c0_44 = arith.constant 0 : index
    %90 = vector.load %arg14[%c32, %c0_44] : memref<36x256xf32, #tpu.memory_space<vmem>>, vector<4x256xf32>
    tpu.vector_store %arg14[%c32, %c0_44], %89 {strides = array<i32>} : memref<36x256xf32, #tpu.memory_space<vmem>>, vector<4x256xf32>,
    %c0_45 = arith.constant 0 : index
    %c0_46 = arith.constant 0 : index
    %91 = vector.load %arg14[%c0_45, %c0_46] : memref<36x256xf32, #tpu.memory_space<vmem>>, vector<36x256xf32>
    %cst_47 = arith.constant dense<0.000000e+00> : vector<8x256xf32>
    %92 = tpu.matmul %57, %91, %cst_47 {dimension_numbers = #tpu.dot_dimension_numbers<[1], [0], [0], [1], [0, 0, 1, 1], [], []>} : vector<8x36xf32>, vector<36x256xf32>, vector<8x256xf32> -> vector<8x256xf32>
    %93 = vector.broadcast %58 : vector<8x1xf32> to vector<8x256xf32>
    %94 = arith.addf %92, %93 : vector<8x256xf32>
    %c0_48 = arith.constant 0 : index
    %c0_49 = arith.constant 0 : index
    %c0_50 = arith.constant 0 : index
    %95 = vector.load %arg5[%c0_48, %c0_49, %c0_50] : memref<1x8x1xf32, #tpu.memory_space<vmem>>, vector<1x8x1xf32>
    %96 = vector.shape_cast %95 : vector<1x8x1xf32> to vector<8x1xf32>
    %c0_51 = arith.constant 0 : index
    %c0_52 = arith.constant 0 : index
    %c0_53 = arith.constant 0 : index
    %97 = vector.load %arg6[%c0_51, %c0_52, %c0_53] : memref<1x8x1xf32, #tpu.memory_space<vmem>>, vector<1x8x1xf32>
    %98 = vector.shape_cast %97 : vector<1x8x1xf32> to vector<8x1xf32>
    %c0_54 = arith.constant 0 : index
    %c0_55 = arith.constant 0 : index
    %c0_56 = arith.constant 0 : index
    %99 = vector.load %arg7[%c0_54, %c0_55, %c0_56] : memref<1x8x1xf32, #tpu.memory_space<vmem>>, vector<1x8x1xf32>
    %100 = vector.shape_cast %99 : vector<1x8x1xf32> to vector<8x1xf32>
    %cst_57 = arith.constant dense<0.000000e+00> : vector<8xf32>
    %101 = vector.multi_reduction <add>, %94, %cst_57 [1] : vector<8x256xf32> to vector<8xf32>
    %102 = vector.shape_cast %101 : vector<8xf32> to vector<8x1xf32>
    %cst_58 = arith.constant 2.560000e+02 : f32
    %103 = vector.broadcast %cst_58 : f32 to vector<8x1xf32>
    %104 = arith.divf %102, %103 : vector<8x1xf32>
    %105 = vector.broadcast %104 : vector<8x1xf32> to vector<8x256xf32>
    %106 = arith.subf %94, %105 : vector<8x256xf32>
    %107 = arith.mulf %106, %106 : vector<8x256xf32>
    %cst_59 = arith.constant dense<0.000000e+00> : vector<8xf32>
    %108 = vector.multi_reduction <add>, %107, %cst_59 [1] : vector<8x256xf32> to vector<8xf32>
    %109 = vector.shape_cast %108 : vector<8xf32> to vector<8x1xf32>
    %cst_60 = arith.constant 2.550000e+02 : f32
    %110 = vector.broadcast %cst_60 : f32 to vector<8x1xf32>
    %111 = arith.divf %109, %110 : vector<8x1xf32>
    %112 = vector.broadcast %104 : vector<8x1xf32> to vector<8x256xf32>
    %113 = arith.subf %94, %112 : vector<8x256xf32>
    %cst_61 = arith.constant 9.99999974E-6 : f32
    %114 = vector.broadcast %cst_61 : f32 to vector<8x1xf32>
    %115 = arith.addf %111, %114 : vector<8x1xf32>
    %116 = math.rsqrt %115 : vector<8x1xf32>
    %117 = vector.broadcast %116 : vector<8x1xf32> to vector<8x256xf32>
    %118 = arith.mulf %113, %117 : vector<8x256xf32>
    %119 = vector.broadcast %96 : vector<8x1xf32> to vector<8x256xf32>
    %120 = arith.mulf %119, %118 : vector<8x256xf32>
    %121 = vector.broadcast %98 : vector<8x1xf32> to vector<8x256xf32>
    %122 = arith.addf %120, %121 : vector<8x256xf32>
    %cst_62 = arith.constant dense<0.000000e+00> : vector<1xf32>
    %123 = vector.multi_reduction <add>, %104, %cst_62 [0] : vector<8x1xf32> to vector<1xf32>
    %124 = vector.shape_cast %123 : vector<1xf32> to vector<1x1xf32>
    %cst_63 = arith.constant 8.000000e+00 : f32
    %125 = vector.broadcast %cst_63 : f32 to vector<1x1xf32>
    %126 = arith.divf %124, %125 : vector<1x1xf32>
    %127 = vector.broadcast %126 : vector<1x1xf32> to vector<8x1xf32>
    %128 = arith.subf %104, %127 : vector<8x1xf32>
    %129 = arith.mulf %128, %128 : vector<8x1xf32>
    %cst_64 = arith.constant dense<0.000000e+00> : vector<1xf32>
    %130 = vector.multi_reduction <add>, %129, %cst_64 [0] : vector<8x1xf32> to vector<1xf32>
    %131 = vector.shape_cast %130 : vector<1xf32> to vector<1x1xf32>
    %cst_65 = arith.constant 7.000000e+00 : f32
    %132 = vector.broadcast %cst_65 : f32 to vector<1x1xf32>
    %133 = arith.divf %131, %132 : vector<1x1xf32>
    %cst_66 = arith.constant 9.99999974E-6 : f32
    %134 = vector.broadcast %cst_66 : f32 to vector<1x1xf32>
    %135 = arith.addf %133, %134 : vector<1x1xf32>
    %136 = math.sqrt %135 : vector<1x1xf32>
    %137 = vector.broadcast %126 : vector<1x1xf32> to vector<8x1xf32>
    %138 = arith.subf %104, %137 : vector<8x1xf32>
    %139 = arith.mulf %100, %138 : vector<8x1xf32>
    %140 = vector.broadcast %136 : vector<1x1xf32> to vector<8x1xf32>
    %141 = arith.divf %139, %140 : vector<8x1xf32>
    %142 = vector.broadcast %141 : vector<8x1xf32> to vector<8x256xf32>
    %143 = arith.addf %122, %142 : vector<8x256xf32>
    %cst_67 = arith.constant 0.000000e+00 : f32
    %144 = vector.broadcast %cst_67 : f32 to vector<8x256xf32>
    %145 = arith.cmpf ogt, %143, %144 : vector<8x256xf32>
    %146 = math.exp %143 : vector<8x256xf32>
    %cst_68 = arith.constant 1.000000e+00 : f32
    %147 = vector.broadcast %cst_68 : f32 to vector<8x256xf32>
    %148 = arith.subf %146, %147 : vector<8x256xf32>
    %149 = arith.select %145, %143, %148 : vector<8x256xi1>, vector<8x256xf32>
    %c0_69 = arith.constant 0 : index
    %c0_70 = arith.constant 0 : index
    %150 = vector.load %arg10[%c0_69, %c0_70] : memref<8x72xf32, #tpu.memory_space<vmem>>, vector<8x72xf32>
    %c0_71 = arith.constant 0 : index
    %c0_72 = arith.constant 0 : index
    %151 = vector.load %arg11[%c0_71, %c0_72] : memref<8x1xf32, #tpu.memory_space<vmem>>, vector<8x1xf32>
    %cst_73 = arith.constant 0.000000e+00 : f32
    %152 = vector.broadcast %cst_73 : f32 to vector<8x18x18xf32>
    %c0_74 = arith.constant 0 : index
    %c0_75 = arith.constant 0 : index
    %c0_76 = arith.constant 0 : index
    %153 = vector.load %arg15[%c0_74, %c0_75, %c0_76] : memref<8x18x18xf32, #tpu.memory_space<vmem>>, vector<8x18x18xf32>
    tpu.vector_store %arg15[%c0_74, %c0_75, %c0_76], %152 {strides = array<i32>} : memref<8x18x18xf32, #tpu.memory_space<vmem>>, vector<8x18x18xf32>,
    %154 = vector.shape_cast %149 : vector<8x256xf32> to vector<8x16x16xf32>
    %c0_77 = arith.constant 0 : index
    %c1 = arith.constant 1 : index
    %c1_78 = arith.constant 1 : index
    %155 = vector.load %arg15[%c0_77, %c1, %c1_78] : memref<8x18x18xf32, #tpu.memory_space<vmem>>, vector<8x16x16xf32>
    tpu.vector_store %arg15[%c0_77, %c1, %c1_78], %154 {strides = array<i32>} : memref<8x18x18xf32, #tpu.memory_space<vmem>>, vector<8x16x16xf32>,
    %c0_79 = arith.constant 0 : index
    %c0_80 = arith.constant 0 : index
    %c0_81 = arith.constant 0 : index
    %156 = vector.load %arg15[%c0_79, %c0_80, %c0_81] : memref<8x18x18xf32, #tpu.memory_space<vmem>>, vector<8x18x18xf32>
    %157 = vector.extract_strided_slice %156 {offsets = [0, 0, 0], sizes = [8, 16, 16], strides = [1, 1, 1]} : vector<8x18x18xf32> to vector<8x16x16xf32>
    %158 = vector.shape_cast %157 : vector<8x16x16xf32> to vector<8x256xf32>
    %c0_82 = arith.constant 0 : index
    %c0_83 = arith.constant 0 : index
    %159 = vector.load %arg16[%c0_82, %c0_83] : memref<72x256xf32, #tpu.memory_space<vmem>>, vector<8x256xf32>
    tpu.vector_store %arg16[%c0_82, %c0_83], %158 {strides = array<i32>} : memref<72x256xf32, #tpu.memory_space<vmem>>, vector<8x256xf32>,
    %160 = vector.extract_strided_slice %156 {offsets = [0, 0, 1], sizes = [8, 16, 16], strides = [1, 1, 1]} : vector<8x18x18xf32> to vector<8x16x16xf32>
    %161 = vector.shape_cast %160 : vector<8x16x16xf32> to vector<8x256xf32>
    %c8_84 = arith.constant 8 : index
    %c0_85 = arith.constant 0 : index
    %162 = vector.load %arg16[%c8_84, %c0_85] : memref<72x256xf32, #tpu.memory_space<vmem>>, vector<8x256xf32>
    tpu.vector_store %arg16[%c8_84, %c0_85], %161 {strides = array<i32>} : memref<72x256xf32, #tpu.memory_space<vmem>>, vector<8x256xf32>,
    %163 = vector.extract_strided_slice %156 {offsets = [0, 0, 2], sizes = [8, 16, 16], strides = [1, 1, 1]} : vector<8x18x18xf32> to vector<8x16x16xf32>
    %164 = vector.shape_cast %163 : vector<8x16x16xf32> to vector<8x256xf32>
    %c16_86 = arith.constant 16 : index
    %c0_87 = arith.constant 0 : index
    %165 = vector.load %arg16[%c16_86, %c0_87] : memref<72x256xf32, #tpu.memory_space<vmem>>, vector<8x256xf32>
    tpu.vector_store %arg16[%c16_86, %c0_87], %164 {strides = array<i32>} : memref<72x256xf32, #tpu.memory_space<vmem>>, vector<8x256xf32>,
    %166 = vector.extract_strided_slice %156 {offsets = [0, 1, 0], sizes = [8, 16, 16], strides = [1, 1, 1]} : vector<8x18x18xf32> to vector<8x16x16xf32>
    %167 = vector.shape_cast %166 : vector<8x16x16xf32> to vector<8x256xf32>
    %c24_88 = arith.constant 24 : index
    %c0_89 = arith.constant 0 : index
    %168 = vector.load %arg16[%c24_88, %c0_89] : memref<72x256xf32, #tpu.memory_space<vmem>>, vector<8x256xf32>
    tpu.vector_store %arg16[%c24_88, %c0_89], %167 {strides = array<i32>} : memref<72x256xf32, #tpu.memory_space<vmem>>, vector<8x256xf32>,
    %169 = vector.extract_strided_slice %156 {offsets = [0, 1, 1], sizes = [8, 16, 16], strides = [1, 1, 1]} : vector<8x18x18xf32> to vector<8x16x16xf32>
    %170 = vector.shape_cast %169 : vector<8x16x16xf32> to vector<8x256xf32>
    %c32_90 = arith.constant 32 : index
    %c0_91 = arith.constant 0 : index
    %171 = vector.load %arg16[%c32_90, %c0_91] : memref<72x256xf32, #tpu.memory_space<vmem>>, vector<8x256xf32>
    tpu.vector_store %arg16[%c32_90, %c0_91], %170 {strides = array<i32>} : memref<72x256xf32, #tpu.memory_space<vmem>>, vector<8x256xf32>,
    %172 = vector.extract_strided_slice %156 {offsets = [0, 1, 2], sizes = [8, 16, 16], strides = [1, 1, 1]} : vector<8x18x18xf32> to vector<8x16x16xf32>
    %173 = vector.shape_cast %172 : vector<8x16x16xf32> to vector<8x256xf32>
    %c40 = arith.constant 40 : index
    %c0_92 = arith.constant 0 : index
    %174 = vector.load %arg16[%c40, %c0_92] : memref<72x256xf32, #tpu.memory_space<vmem>>, vector<8x256xf32>
    tpu.vector_store %arg16[%c40, %c0_92], %173 {strides = array<i32>} : memref<72x256xf32, #tpu.memory_space<vmem>>, vector<8x256xf32>,
    %175 = vector.extract_strided_slice %156 {offsets = [0, 2, 0], sizes = [8, 16, 16], strides = [1, 1, 1]} : vector<8x18x18xf32> to vector<8x16x16xf32>
    %176 = vector.shape_cast %175 : vector<8x16x16xf32> to vector<8x256xf32>
    %c48 = arith.constant 48 : index
    %c0_93 = arith.constant 0 : index
    %177 = vector.load %arg16[%c48, %c0_93] : memref<72x256xf32, #tpu.memory_space<vmem>>, vector<8x256xf32>
    tpu.vector_store %arg16[%c48, %c0_93], %176 {strides = array<i32>} : memref<72x256xf32, #tpu.memory_space<vmem>>, vector<8x256xf32>,
    %178 = vector.extract_strided_slice %156 {offsets = [0, 2, 1], sizes = [8, 16, 16], strides = [1, 1, 1]} : vector<8x18x18xf32> to vector<8x16x16xf32>
    %179 = vector.shape_cast %178 : vector<8x16x16xf32> to vector<8x256xf32>
    %c56 = arith.constant 56 : index
    %c0_94 = arith.constant 0 : index
    %180 = vector.load %arg16[%c56, %c0_94] : memref<72x256xf32, #tpu.memory_space<vmem>>, vector<8x256xf32>
    tpu.vector_store %arg16[%c56, %c0_94], %179 {strides = array<i32>} : memref<72x256xf32, #tpu.memory_space<vmem>>, vector<8x256xf32>,
    %181 = vector.extract_strided_slice %156 {offsets = [0, 2, 2], sizes = [8, 16, 16], strides = [1, 1, 1]} : vector<8x18x18xf32> to vector<8x16x16xf32>
    %182 = vector.shape_cast %181 : vector<8x16x16xf32> to vector<8x256xf32>
    %c64 = arith.constant 64 : index
    %c0_95 = arith.constant 0 : index
    %183 = vector.load %arg16[%c64, %c0_95] : memref<72x256xf32, #tpu.memory_space<vmem>>, vector<8x256xf32>
    tpu.vector_store %arg16[%c64, %c0_95], %182 {strides = array<i32>} : memref<72x256xf32, #tpu.memory_space<vmem>>, vector<8x256xf32>,
    %c0_96 = arith.constant 0 : index
    %c0_97 = arith.constant 0 : index
    %184 = vector.load %arg16[%c0_96, %c0_97] : memref<72x256xf32, #tpu.memory_space<vmem>>, vector<72x256xf32>
    %cst_98 = arith.constant dense<0.000000e+00> : vector<8x256xf32>
    %185 = tpu.matmul %150, %184, %cst_98 {dimension_numbers = #tpu.dot_dimension_numbers<[1], [0], [0], [1], [0, 0, 1, 1], [], []>} : vector<8x72xf32>, vector<72x256xf32>, vector<8x256xf32> -> vector<8x256xf32>
    %186 = vector.broadcast %151 : vector<8x1xf32> to vector<8x256xf32>
    %187 = arith.addf %185, %186 : vector<8x256xf32>
    %c0_99 = arith.constant 0 : index
    %c0_100 = arith.constant 0 : index
    %c0_101 = arith.constant 0 : index
    %188 = vector.load %arg12[%c0_99, %c0_100, %c0_101] : memref<1x8x256xf32, #tpu.memory_space<vmem>>, vector<1x8x256xf32>
    %189 = vector.shape_cast %188 : vector<1x8x256xf32> to vector<8x256xf32>
    %190 = vector.shape_cast %187 : vector<8x256xf32> to vector<1x8x256xf32>
    tpu.vector_store %arg12[%c0_99, %c0_100, %c0_101], %190 {strides = array<i32>} : memref<1x8x256xf32, #tpu.memory_space<vmem>>, vector<1x8x256xf32>,
    return
  }
  func.func @transform_0(%arg0: i32) -> (i32, i32, i32) {
    %c0_i32 = arith.constant 0 : i32
    %c0_i32_0 = arith.constant 0 : i32
    %c0_i32_1 = arith.constant 0 : i32
    return %arg0, %c0_i32, %c0_i32_0 : i32, i32, i32
  }
  func.func @transform_1(%arg0: i32) -> (i32, i32, i32) {
    %c0_i32 = arith.constant 0 : i32
    %c0_i32_0 = arith.constant 0 : i32
    %c0_i32_1 = arith.constant 0 : i32
    return %arg0, %c0_i32, %c0_i32_0 : i32, i32, i32
  }
  func.func @transform_2(%arg0: i32) -> (i32, i32, i32) {
    %c0_i32 = arith.constant 0 : i32
    %c0_i32_0 = arith.constant 0 : i32
    %c0_i32_1 = arith.constant 0 : i32
    return %arg0, %c0_i32, %c0_i32_0 : i32, i32, i32
  }
  func.func @transform_3(%arg0: i32) -> (i32, i32, i32) {
    %c0_i32 = arith.constant 0 : i32
    %c0_i32_0 = arith.constant 0 : i32
    %c0_i32_1 = arith.constant 0 : i32
    return %arg0, %c0_i32, %c0_i32_0 : i32, i32, i32
  }
  func.func @transform_4(%arg0: i32) -> (i32, i32, i32) {
    %c0_i32 = arith.constant 0 : i32
    %c0_i32_0 = arith.constant 0 : i32
    %c0_i32_1 = arith.constant 0 : i32
    return %arg0, %c0_i32, %c0_i32_0 : i32, i32, i32
  }
  func.func @transform_5(%arg0: i32) -> (i32, i32, i32) {
    %c0_i32 = arith.constant 0 : i32
    %c0_i32_0 = arith.constant 0 : i32
    %c0_i32_1 = arith.constant 0 : i32
    return %arg0, %c0_i32, %c0_i32_0 : i32, i32, i32
  }
  func.func @transform_6(%arg0: i32) -> (i32, i32, i32) {
    %c0_i32 = arith.constant 0 : i32
    %c0_i32_0 = arith.constant 0 : i32
    %c0_i32_1 = arith.constant 0 : i32
    return %arg0, %c0_i32, %c0_i32_0 : i32, i32, i32
  }
  func.func @transform_7(%arg0: i32) -> (i32, i32) {
    %c0_i32 = arith.constant 0 : i32
    %c0_i32_0 = arith.constant 0 : i32
    %c0_i32_1 = arith.constant 0 : i32
    return %c0_i32, %c0_i32_0 : i32, i32
  }
  func.func @transform_8(%arg0: i32) -> (i32, i32) {
    %c0_i32 = arith.constant 0 : i32
    %c0_i32_0 = arith.constant 0 : i32
    %c0_i32_1 = arith.constant 0 : i32
    return %c0_i32, %c0_i32_0 : i32, i32
  }
  func.func @transform_9(%arg0: i32) -> (i32, i32) {
    %c0_i32 = arith.constant 0 : i32
    %c0_i32_0 = arith.constant 0 : i32
    %c0_i32_1 = arith.constant 0 : i32
    return %c0_i32, %c0_i32_0 : i32, i32
  }
  func.func @transform_10(%arg0: i32) -> (i32, i32) {
    %c0_i32 = arith.constant 0 : i32
    %c0_i32_0 = arith.constant 0 : i32
    %c0_i32_1 = arith.constant 0 : i32
    return %c0_i32, %c0_i32_0 : i32, i32
  }
  func.func @transform_11(%arg0: i32) -> (i32, i32, i32) {
    %c0_i32 = arith.constant 0 : i32
    %c0_i32_0 = arith.constant 0 : i32
    %c0_i32_1 = arith.constant 0 : i32
    return %arg0, %c0_i32, %c0_i32_0 : i32, i32, i32
  }
}

</mosaic_0001>

<bundles_post_ra>
// kernel: dilated_conv_unit.1
= control target key start
LH: loop header
LB: loop body
LE: loop exit
PB: predicated region body
PF: predicated region fallthrough
CT: control target
= control target key end

     0   :  { %s7357_s17 = smov 0   ;;  %s12703_s0 = inlined_call_operand.vmem [shape: f32[2,4,256], index: 0, kind: input, shape index: {}]   ;;  %s12704_s1 = inlined_call_operand.vmem [shape: f32[2,4,1], index: 1, kind: input, shape index: {}]   ;;  %s12705_s2 = inlined_call_operand.vmem [shape: f32[2,4,1], index: 2, kind: input, shape index: {}]   ;;  %s12706_s3 = inlined_call_operand.vmem [shape: f32[2,4,1], index: 3, kind: input, shape index: {}]   ;;  %s12707_s4 = inlined_call_operand.vmem [shape: f32[2,8,1], index: 4, kind: input, shape index: {}]   ;;  %s12708_s5 = inlined_call_operand.vmem [shape: f32[2,8,1], index: 5, kind: input, shape index: {}]   ;;  %s12709_s6 = inlined_call_operand.vmem [shape: f32[2,8,1], index: 6, kind: input, shape index: {}]   ;;  %s12710_s7 = inlined_call_operand.vmem [shape: f32[8,36], index: 7, kind: input, shape index: {}]   ;;  %s12711_s8 = inlined_call_operand.vmem [shape: f32[8,1], index: 8, kind: input, shape index: {}]   ;;  %s12712_s9 = inlined_call_operand.vmem [shape: f32[8,72], index: 9, kind: input, shape index: {}]   ;;  %s12713_s10 = inlined_call_operand.vmem [shape: f32[8,1], index: 10, kind: input, shape index: {}]   ;;  %s12714_s11 = inlined_call_operand.vmem [shape: f32[2,8,256], index: 11, kind: output, shape index: {}]  }
   0x1 LB: > { %s6651_s18 = sadd.s32 4294967295, %s7272_s17   ;;  %p6655_p0 = scmp.ge.s32.totalorder %s7272_s17, 1  ;;  %s7272_s17 = sphi %s7357_s17, %s21_s17  }
   0x2   : > { %p391_p1 = scmp.lt.s32.totalorder %s7272_s17, 3 }
   0x4   : > { %p392_p2 = pnand %p6655_p0, %p391_p1 }
   0x6   : > { %395 = sbr.rel (%p392_p2) target bundleno = 2570 (0xa0a), region = 64 }
   0xb   : > { %p455_p3 = scmp.lt.s32.totalorder %s6651_s18, 1  ;;  %vm499_vm0 = vcmask 1043456   ;;  %v7274_v6 = vmov 256.0   ;;  %v7275_v11 = vmov 4.0   ;;  %v7276_v12 = vmov 0   ;;  %s7280_s14 = smov 80  }
   0xc   : > { %7234 = vrcp.f32 %v7274_v6  ;;  %6711 = vset.pattern.permute.xlu1 %v7276_v12  ;;  %6712 = vset.pattern.permute.xlu2 %v7276_v12  ;;  %v7277_v16 = vmov 839922192   ;;  %v7278_v31 = vmov 3.0   ;;  %s7281_s15 = smov 96   ;;  %s7282_s16 = smov 112  }
   0xd   : > { %s13365_s18 = smov (!%p455_p3, %s6651_s18), 1  ;;  %7236 = vrcp.f32 %v7275_v11  ;;  %7233 = vset.pattern.permute.xlu0 %v7276_v12  ;;  %v7387_v17 = vunpack.c.l.s4 %v7277_v16  ;;  %s7283_s20 = smov 48  }
   0xe   : > { %s7368_s19 = sshll.u32 %s13365_s18, 3  ;;  %s7377_s23 = sshll.u32 %s13365_s18, 2  ;;  %7238 = vrcp.f32 %v7278_v31 }
   0xf   : > { %s459_s22 = scalar_lea.vmem %s12703_s0, %s7368_s19  ;;  %s463_s26 = scalar_lea.vmem %s12704_s1, %s7377_s23  ;;  %v516_v21 = vunpack.c.0.s8 %v7387_v17 }
  0x10   : > { %v489_v0 = vld [vmem:[%s459_s22] sm:$0xff]  ;;  %s467_s29 = scalar_lea.vmem %s12705_s2, %s7377_s23  ;;  %s471_s13 = scalar_lea.vmem %s12706_s3, %s7377_s23 }
  0x11   : > { %494 = vst [vmem:[#allocation1] ss:$2 sm:$0xff] %v489_v0  ;;  %v490_v10 = vld [vmem:[%s463_s26] sm:$0xf]  ;;  %s7284_s21 = smov 64   ;;  %s7285_s22 = smov 16  }
  0x12   : > { %v7235_v7 = vpop.eup %7234  ;;  %560 = vperm.xlu1 %6711, %v490_v10   ;;  %v491_v18 = vld [vmem:[%s467_s29] sm:$0xf]  ;;  %s7286_s23 = smov 32   ;;  %s7289_s24 = smov 2  }
  0x13   : > { %v506_v8 = vmul.f32 256.0, %v7235_v7  ;;  %v7237_v14 = vpop.eup %7236  ;;  %vm510_vm1 = vweird.f32 %v7235_v7  ;;  %s7291_s25 = smov 126   ;;  %s7292_s26 = smov 124  }
  0x14   : > { %v586_v19 = vmul.f32 4.0, %v7237_v14  ;;  %vm590_vm2 = vweird.f32 %v7237_v14  ;;  %v7239_v36 = vpop.eup %7238  ;;  %s475_s12 = scalar_lea.vmem %s12707_s4, %s7368_s19 }
  0x15   : > { %v507_v9 = vsub.f32 1.0, %v506_v8  ;;  %v603_v40 = vmul.f32 3.0, %v7239_v36  ;;  %vm607_vm3 = vweird.f32 %v7239_v36 }
  0x16   : > { %v587_v24 = vsub.f32 1.0, %v586_v19 }
  0x17   : > { %v508_v13 = vmul.f32 %v7235_v7, %v507_v9  ;;  %v604_v49 = vsub.f32 1.0, %v603_v40 }
  0x18   : > { %v495_v1 = vld.sshfl [vmem:[#allocation1] sm:$0xff pattern:$0x75316420]  ;;  %v496_v2 = vld.sshfl [vmem:[#allocation1 + $0x8] sm:$0xff pattern:$0x75316420]  ;;  %v588_v29 = vmul.f32 %v7237_v14, %v587_v24 }
  0x19   : > { %v500_v3 = vsel %vm499_vm0, %v495_v1, 0.0  ;;  %v501_v4 = vsel %vm499_vm0, %v496_v2, 0.0  ;;  %v509_v15 = vadd.f32 %v7235_v7, %v508_v13  ;;  %v605_v52 = vmul.f32 %v7239_v36, %v604_v49 }
  0x1a   : > { %v502_v5 = vadd.f32 %v501_v4, %v500_v3  ;;  %573 = vperm.xlu1 %6711, %v491_v18   ;;  %v589_v34 = vadd.f32 %v7237_v14, %v588_v29  ;;  %v7279_v24 = vmov 255.0  }
  0x1b   : > { %v7389_v20 = vsel %vm510_vm1, %v7235_v7, %v509_v15  ;;  %v606_v55 = vadd.f32 %v7239_v36, %v605_v52  ;;  %vm717_vm1 = vcmask 1047556  }
  0x1c   : > { %503 = vadd.xlane.f32.xlu0 %v502_v5  ;;  %12872 = vst [vmem:[#allocation6_spill] sm:$0xff] %v7389_v20  ;;  %v591_v38 = vsel %vm590_vm2, %v7237_v14, %v589_v34  ;;  %v492_v14 = vld [vmem:[%s471_s13] sm:$0xf]  ;;  %vm658_vm2 = vcmask 162816   ;;  %s7296_s13 = smov 127  }
  0x1d   : > { %v608_v58 = vsel %vm607_vm3, %v7239_v36, %v606_v55  ;;  %vm661_vm3 = vcmask 158720  }
  0x8f   : > { %v504_v22 = vpop.xlane.xlu0 %503 }
  0x90   : > { %v512_v23 = vmul.f32 %v7389_v20, %v504_v22 }
  0x92   : > { %v517_v25 = vperm.slane %v512_v23, %v516_v21  ;;  %v578_v26 = vsel %vm499_vm0, %v512_v23, 0.0 }
  0x93   : > { %v579_v27 = vrot.slane %v578_v26, 4 }
  0x94   : > { %v7396_v28 = vsub.f32 %v489_v0, %v517_v25 }
  0x95   : > { %v580_v30 = vadd.f32 %v579_v27, %v578_v26 }
  0x96   : > { %v520_v32 = vmul.f32 %v7396_v28, %v7396_v28 }
  0x97   : > { %v581_v33 = vrot.slane %v580_v30, 2 }
  0x98   : > { %522 = vst [vmem:[#allocation1] ss:$2 sm:$0xff] %v520_v32 }
  0x99   : > { %v582_v35 = vadd.f32 %v581_v33, %v580_v30 }
  0x9b   : > { %v583_v37 = vrot.slane %v582_v35, 1 }
  0x9d   : > { %v584_v39 = vadd.f32 %v583_v37, %v582_v35 }
  0x9f   : > { %v523_v41 = vld.sshfl [vmem:[#allocation1] sm:$0xff pattern:$0x75316420]  ;;  %v524_v42 = vld.sshfl [vmem:[#allocation1 + $0x8] sm:$0xff pattern:$0x75316420]  ;;  %v592_v43 = vmul.f32 %v591_v38, %v584_v39 }
  0xa0   : > { %v527_v44 = vsel %vm499_vm0, %v523_v41, 0.0  ;;  %v528_v45 = vsel %vm499_vm0, %v524_v42, 0.0 }
  0xa1   : > { %v529_v46 = vadd.f32 %v528_v45, %v527_v44  ;;  %v593_v47 = vsub.f32 %v512_v23, %v592_v43  ;;  %v561_v44 = vpop.permute.xlu1 %560 }
  0xa3   : > { %530 = vadd.xlane.f32.xlu0 %v529_v46  ;;  %v594_v48 = vmul.f32 %v593_v47, %v593_v47  ;;  %v623_v18 = vmul.f32 %v593_v47, %v492_v14 }
  0xa5   : > { %v595_v50 = vsel %vm499_vm0, %v594_v48, 0.0 }
  0xa6   : > { %v596_v51 = vrot.slane %v595_v50, 4 }
  0xa8   : > { %v597_v53 = vadd.f32 %v596_v51, %v595_v50 }
  0xa9   : > { %v574_v49 = vpop.permute.xlu1 %573 }
  0xaa   : > { %v598_v54 = vrot.slane %v597_v53, 2 }
  0xac   : > { %v599_v56 = vadd.f32 %v598_v54, %v597_v53 }
  0xae   : > { %v600_v57 = vrot.slane %v599_v56, 1 }
  0xb0   : > { %v601_v59 = vadd.f32 %v600_v57, %v599_v56 }
  0xb2   : > { %v609_v60 = vmul.f32 %v608_v58, %v601_v59 }
  0xb4   : > { %v610_v61 = vadd.f32 1e-05, %v609_v60 }
  0xb6   : > { %7240 = vrsqrt.f32 %v610_v61  ;;  %vm618_vm4 = vcmp.eq.f32.partialorder %v610_v61, inf  ;;  %v621_v5 = vand.u32 2147483648, %v610_v61  ;;  %vm620_vm5 = vcmp.eq.f32.partialorder %v610_v61, 0.0 }
  0xbc   : > { %v7241_v62 = vpop.eup %7240 }
  0xbd   : > { %v612_v63 = vmul.f32 %v7241_v62, %v610_v61 }
  0xbf   : > { %v613_v0 = vmul.f32 %v7241_v62, %v612_v63 }
  0xc1   : > { %v614_v1 = vmul.f32 0.5, %v613_v0 }
  0xc3   : > { %v615_v2 = vsub.f32 1.5, %v614_v1 }
  0xc5   : > { %v616_v3 = vmul.f32 %v7241_v62, %v615_v2  ;;  %v7287_v2 = vmov 1983009808  }
  0xc7   : > { %v617_v4 = vmul.f32 %v616_v3, %v610_v61  ;;  %v720_v3 = vunpack.c.l.s4 %v7287_v2 }
  0xc9   : > { %v619_v6 = vsel %vm618_vm4, %v610_v61, %v617_v4  ;;  %vm861_vm4 = vcmask 146448  }
  0xca   : > { %v622_v7 = vsel %vm620_vm5, %v621_v5, %v619_v6  ;;  %v7428_v6 = vunpack.c.0.s8 %v720_v3  ;;  %vm1507_vm5 = vcmask 1045504  }
  0xcb   : > { %7242 = vrcp.f32 %v622_v7  ;;  %v635_v11 = vand.u32 2147483648, %v622_v7  ;;  %v633_v13 = vand.u32 2147483647, %v622_v7  ;;  %vm629_vm7 = vweird.f32 %v622_v7 }
  0xcc   : > { %7244 = vrcp.f32 %v7279_v24 }
  0xcd   : > { %v636_v16 = vor.u32 1.1754944e-38, %v635_v11  ;;  %vm634_vm9 = vcmp.eq.f32.partialorder %v633_v13, 8.507059e+37 }
  0xd1   : > { %v7243_v8 = vpop.eup %7242 }
  0xd2   : > { %v625_v9 = vmul.f32 %v7243_v8, %v622_v7  ;;  %vm630_vm6 = vweird.f32 %v7243_v8  ;;  %v7245_v25 = vpop.eup %7244 }
  0xd3   : > { %vm631_vm8 = vmor %vm629_vm7, %vm630_vm6  ;;  %v533_v26 = vmul.f32 255.0, %v7245_v25  ;;  %vm537_vm10 = vweird.f32 %v7245_v25  ;;  %vm1050_vm6 = vcmask 130048   ;;  %vm1052_vm7 = vcmask 261120  }
  0xd4   : > { %v626_v10 = vsub.f32 1.0, %v625_v9 }
  0xd5   : > { %v534_v27 = vsub.f32 1.0, %v533_v26 }
  0xd6   : > { %v627_v12 = vmul.f32 %v7243_v8, %v626_v10 }
  0xd7   : > { %v535_v29 = vmul.f32 %v7245_v25, %v534_v27 }
  0xd8   : > { %v628_v15 = vadd.f32 %v7243_v8, %v627_v12  ;;  %v7288_v12 = vmov 1934713408  }
  0xd9   : > { %v536_v30 = vadd.f32 %v7245_v25, %v535_v29  ;;  %v746_v13 = vunpack.c.l.s4 %v7288_v12 }
  0xda   : > { %v632_v19 = vsel %vm631_vm8, %v7243_v8, %v628_v15  ;;  %vm1054_vm8 = vcmask 392192  }
  0xdb   : > { %v637_v22 = vsel %vm634_vm9, %v636_v16, %v632_v19  ;;  %v7407_v31 = vsel %vm537_vm10, %v7245_v25, %v536_v30  ;;  %vm1056_vm9 = vcmask 523264   ;;  %vm1058_vm10 = vcmask 654336  }
  0xdc   : > { %v638_v23 = vmul.f32 %v637_v22, %v623_v18  ;;  %12873 = vst [vmem:[#allocation7_spill] sm:$0xff] %v7407_v31  ;;  %v7436_v22 = vunpack.c.0.s8 %v746_v13 }
  0xde   : > { %641 = vperm.xlu2 %6712, %v638_v23  }
 0x116   : > { %v531_v32 = vpop.xlane.xlu0 %530 }
 0x117   : > { %v539_v33 = vmul.f32 %v7407_v31, %v531_v32 }
 0x119   : > { %v540_v34 = vadd.f32 1e-05, %v539_v33 }
 0x11b   : > { %7246 = vrsqrt.f32 %v540_v34  ;;  %vm547_vm12 = vweird.f32 %v540_v34 }
 0x121   : > { %v7247_v35 = vpop.eup %7246 }
 0x122   : > { %v542_v36 = vmul.f32 %v7247_v35, %v540_v34  ;;  %vm548_vm11 = vweird.f32 %v7247_v35 }
 0x123   : > { %vm549_vm13 = vmor %vm547_vm12, %vm548_vm11  ;;  %vm1060_vm11 = vcmask 785408   ;;  %vm1062_vm12 = vcmask 916480  }
 0x124   : > { %v543_v37 = vmul.f32 %v7247_v35, %v542_v36 }
 0x126   : > { %v544_v38 = vmul.f32 0.5, %v543_v37 }
 0x128   : > { %v545_v39 = vsub.f32 1.5, %v544_v38 }
 0x12a   : > { %v546_v40 = vmul.f32 %v7247_v35, %v545_v39 }
 0x12c   : > { %v550_v41 = vsel %vm549_vm13, %v7247_v35, %v546_v40  ;;  %vm2797_vm13 = vcmask 293888  }
 0x12d   : > { %v555_v42 = vperm.slane %v550_v41, %v516_v21 }
 0x12f   : > { %v557_v43 = vmul.f32 %v555_v42, %v7396_v28 }
 0x131   : > { %564 = vst [vmem:[#allocation1] ss:$2 sm:$0xff] %v557_v43 }
 0x138   : > { %v565_v45 = vld.sshfl [vmem:[#allocation1] sm:$0xff pattern:$0x75316420]  ;;  %v566_v46 = vld.sshfl [vmem:[#allocation1 + $0x8] sm:$0xff pattern:$0x75316420]  ;;  %v642_v52 = vpop.permute.xlu2 %641 }
 0x139   : > { %v569_v47 = vmul.f32 %v565_v45, %v561_v44  ;;  %v570_v48 = vmul.f32 %v566_v46, %v561_v44 }
 0x13b   : > { %v576_v50 = vadd.f32 %v574_v49, %v569_v47  ;;  %v577_v51 = vadd.f32 %v574_v49, %v570_v48  ;;  %v12715_v49 = vmov 0.0  }
 0x13c   : > { %663 = vst.msk [vmem:[#allocation2 + $0x18] sm:$0xff] %vm658_vm2, %v12715_v49 }
 0x13d   : > { %v644_v53 = vadd.f32 %v642_v52, %v576_v50  ;;  %v645_v54 = vadd.f32 %v642_v52, %v577_v51  ;;  %664 = vst.msk [vmem:[#allocation2 + $0x20] sm:$0xff] %vm658_vm2, %v12715_v49 }
 0x13e   : > { %659 = vst.msk [vmem:[#allocation2] sm:$0xff] %vm658_vm2, %v12715_v49 }
 0x13f   : > { %v648_v55 = vmul.f32 1.442695, %v644_v53  ;;  %v650_v56 = vmul.f32 1.442695, %v645_v54  ;;  %vm646_vm14 = vcmp.gt.f32.partialorder %v644_v53, 0.0  ;;  %vm647_vm15 = vcmp.gt.f32.partialorder %v645_v54, 0.0 }
 0x140   : > { %660 = vst.msk [vmem:[#allocation2 + $0x8] sm:$0xff] %vm658_vm2, %v12715_v49 }
 0x141   : > { %7248 = vpow2.f32 %v648_v55  ;;  %666 = vst.msk [vmem:[#allocation2 + $0x30] sm:$0xff] %vm658_vm2, %v12715_v49 }
 0x142   : > { %7250 = vpow2.f32 %v650_v56  ;;  %667 = vst.msk [vmem:[#allocation2 + $0x38] sm:$0xff] %vm658_vm2, %v12715_v49 }
 0x143   : > { %669 = vst.msk [vmem:[#allocation2 + $0x48] sm:$0xff] %vm658_vm2, %v12715_v49 }
 0x144   : > { %670 = vst.msk [vmem:[#allocation2 + $0x50] sm:$0xff] %vm658_vm2, %v12715_v49 }
 0x145   : > { %668 = vst.msk [vmem:[#allocation2 + $0x40] sm:$0xf] %vm661_vm3, %v12715_v49 }
 0x146   : > { %662 = vst.msk [vmem:[#allocation2 + $0x10] sm:$0xf] %vm661_vm3, %v12715_v49 }
 0x147   : > { %v7249_v17 = vpop.eup %7248  ;;  %665 = vst.msk [vmem:[#allocation2 + $0x28] sm:$0xf] %vm661_vm3, %v12715_v49 }
 0x148   : > { %v6666_v21 = vadd.f32 -1.0, %v7249_v17  ;;  %v7251_v57 = vpop.eup %7250  ;;  %671 = vst.msk [vmem:[#allocation2 + $0x58] sm:$0xf] %vm661_vm3, %v12715_v49 }
 0x149   : > { %v6667_v58 = vadd.f32 -1.0, %v7251_v57 }
 0x14a   : > { %v654_v28 = vsel %vm646_vm14, %v644_v53, %v6666_v21 }
 0x14b   : > { %679 = vrot.lane.b32.xlu1 %v654_v28, %s7280_s14  ;;  %676 = vrot.lane.b32.xlu0 %v654_v28, %s7281_s15  ;;  %v655_v59 = vsel %vm647_vm15, %v645_v54, %v6667_v58 }
 0x14c   : > { %673 = vrot.lane.b32.xlu2 %v654_v28, %s7282_s16 }
 0x153   : > { %685 = vrot.lane.b32.xlu1 %v654_v28, %s7283_s20  ;;  %698 = vrot.lane.b32.xlu0 %v655_v59, %s7281_s15 }
 0x154   : > { %682 = vrot.lane.b32.xlu2 %v654_v28, %s7284_s21 }
 0x15b   : > { %691 = vrot.lane.b32.xlu1 %v654_v28, %s7285_s22  ;;  %707 = vrot.lane.b32.xlu0 %v655_v59, %s7283_s20 }
 0x15c   : > { %688 = vrot.lane.b32.xlu2 %v654_v28, %s7286_s23 }
 0x163   : > { %701 = vrot.lane.b32.xlu1 %v655_v59, %s7280_s14 }
 0x164   : > { %695 = vrot.lane.b32.xlu2 %v655_v59, %s7282_s16 }
 0x16b   : > { %710 = vrot.lane.b32.xlu1 %v655_v59, %s7286_s23 }
 0x16c   : > { %704 = vrot.lane.b32.xlu2 %v655_v59, %s7284_s21 }
 0x174   : > { %713 = vrot.lane.b32.xlu2 %v655_v59, %s7285_s22 }
 0x1a6   : > { %v674_v60 = vpop.permute.xlu2 %673 }
 0x1ae   : > { %v683_v61 = vpop.permute.xlu2 %682 }
 0x1b6   : > { %v689_v62 = vpop.permute.xlu2 %688 }
 0x1b7   : > { %v729_v15 = vrot.slane %v689_v62, 4 }
 0x1b9   : > { %v730_v25 = vsel %vm717_vm1, %v729_v15, %v683_v61 }
 0x1ba   : > { %v734_v30 = vperm.slane %v730_v25, %v7428_v6 }
 0x1bc   : > { %v755_v58 = vrot.slane %v734_v30, 4 }
 0x1bd   : > { %v680_v63 = vpop.permute.xlu1 %679  ;;  %v677_v4 = vpop.permute.xlu0 %676 }
 0x1be   : > { %v696_v0 = vpop.permute.xlu2 %695  ;;  %v723_v1 = vrot.slane %v680_v63, 4  ;;  %v716_v8 = vrot.slane %v677_v4, 4 }
 0x1c0   : > { %v724_v5 = vsel %vm717_vm1, %v723_v1, %v674_v60  ;;  %v718_v11 = vsel %vm717_vm1, %v716_v8, %v654_v28 }
 0x1c1   : > { %v7431_v9 = vperm.slane %v724_v5, %v7428_v6  ;;  %v722_v16 = vperm.slane %v718_v11, %v7428_v6 }
 0x1c3   : > { %v741_v14 = vrot.slane %v7431_v9, 4  ;;  %v743_v56 = vrot.slane %v722_v16, 4 }
 0x1c5   : > { %v686_v7 = vpop.permute.xlu1 %685  ;;  %v699_v23 = vpop.permute.xlu0 %698  ;;  %v742_v24 = vsel %vm717_vm1, %v741_v14, %v722_v16 }
 0x1c6   : > { %v705_v10 = vpop.permute.xlu2 %704  ;;  %v748_v29 = vperm.slane %v742_v24, %v7436_v22  ;;  %v773_v34 = vrot.slane %v699_v23, 4 }
 0x1c8   : > { %v767_v40 = vrot.slane %v748_v29, 4  ;;  %v774_v41 = vsel %vm717_vm1, %v773_v34, %v655_v59 }
 0x1c9   : > { %v778_v50 = vperm.slane %v774_v41, %v7428_v6 }
 0x1cb   : > { %v799_v59 = vrot.slane %v778_v50, 4 }
 0x1cd   : > { %v692_v18 = vpop.permute.xlu1 %691  ;;  %v708_v45 = vpop.permute.xlu0 %707 }
 0x1ce   : > { %v735_v19 = vrot.slane %v692_v18, 4  ;;  %v714_v33 = vpop.permute.xlu2 %713 }
 0x1cf   : > { %v791_v37 = vrot.slane %v714_v33, 4 }
 0x1d0   : > { %v736_v26 = vsel %vm717_vm1, %v735_v19, %v686_v7 }
 0x1d1   : > { %v740_v27 = vperm.slane %v736_v26, %v7428_v6  ;;  %v792_v47 = vsel %vm717_vm1, %v791_v37, %v708_v45 }
 0x1d2   : > { %v796_v52 = vperm.slane %v792_v47, %v7428_v6 }
 0x1d3   : > { %v753_v32 = vrot.slane %v740_v27, 4  ;;  %v756_v3 = vsel %vm717_vm1, %v740_v27, %v755_v58 }
 0x1d4   : > { %v809_v28 = vrot.slane %v796_v52, 4  ;;  %v764_v12 = vperm.slane %v756_v3, %v7436_v22 }
 0x1d5   : > { %v702_v35 = vpop.permute.xlu1 %701  ;;  %v754_v36 = vsel %vm717_vm1, %v753_v32, %v734_v30 }
 0x1d6   : > { %v779_v38 = vrot.slane %v702_v35, 4  ;;  %v760_v39 = vperm.slane %v754_v36, %v7436_v22  ;;  %v769_v15 = vrot.slane %v764_v12, 4 }
 0x1d8   : > { %v780_v42 = vsel %vm717_vm1, %v779_v38, %v696_v0  ;;  %v768_v43 = vsel %vm717_vm1, %v760_v39, %v767_v40  ;;  %v765_v44 = vrot.slane %v760_v39, 4  ;;  %v744_v0 = vsel %vm717_vm1, %v7431_v9, %v743_v56 }
 0x1d9   : > { %v784_v46 = vperm.slane %v780_v42, %v7428_v6  ;;  %841 = vrot.lane.b32.xlu2 %v768_v43, %s7289_s24  ;;  %v752_v8 = vperm.slane %v744_v0, %v7436_v22 }
 0x1da   : > { %v766_v48 = vsel %vm717_vm1, %v765_v44, %v748_v29 }
 0x1db   : > { %v797_v51 = vrot.slane %v784_v46, 4  ;;  %837 = vrot.lane.b32.xlu0 %v766_v48, %s7289_s24  ;;  %v800_v1 = vsel %vm717_vm1, %v784_v46, %v799_v59  ;;  %v771_v14 = vrot.slane %v752_v8, 4  ;;  %v770_v18 = vsel %vm717_vm1, %v769_v15, %v752_v8 }
 0x1dc   : > { %v808_v11 = vperm.slane %v800_v1, %v7436_v22 }
 0x1dd   : > { %v711_v53 = vpop.permute.xlu1 %710  ;;  %v798_v54 = vsel %vm717_vm1, %v797_v51, %v778_v50  ;;  %v772_v16 = vsel %vm717_vm1, %v764_v12, %v771_v14 }
 0x1de   : > { %v785_v55 = vrot.slane %v711_v53, 4  ;;  %v804_v21 = vperm.slane %v798_v54, %v7436_v22  ;;  %v827_v19 = vrot.slane %v808_v11, 4 }
 0x1e0   : > { %v786_v17 = vsel %vm717_vm1, %v785_v55, %v705_v10  ;;  %v823_v63 = vrot.slane %v804_v21, 4 }
 0x1e1   : > { %v790_v57 = vperm.slane %v786_v17, %v7428_v6 }
 0x1e3   : > { %v811_v60 = vrot.slane %v790_v57, 4  ;;  %v810_v61 = vsel %vm717_vm1, %v809_v28, %v790_v57 }
 0x1e4   : > { %v816_v62 = vperm.slane %v810_v61, %v7436_v22 }
 0x1e5   : > { %v812_v2 = vsel %vm717_vm1, %v796_v52, %v811_v60 }
 0x1e6   : > { %v824_v4 = vsel %vm717_vm1, %v816_v62, %v823_v63  ;;  %v821_v5 = vrot.slane %v816_v62, 4  ;;  %v820_v7 = vperm.slane %v812_v2, %v7436_v22 }
 0x1e7   : > { %843 = vrot.lane.b32.xlu0 %v824_v4, %s7289_s24 }
 0x1e8   : > { %v822_v10 = vsel %vm717_vm1, %v821_v5, %v804_v21  ;;  %v825_v9 = vrot.slane %v820_v7, 4  ;;  %v828_v23 = vsel %vm717_vm1, %v820_v7, %v827_v19 }
 0x1e9   : > { %839 = vrot.lane.b32.xlu1 %v822_v10, %s7289_s24 }
 0x1ea   : > { %v826_v13 = vsel %vm717_vm1, %v825_v9, %v808_v11 }
 0x1eb   : > { %847 = vrot.lane.b32.xlu2 %v826_v13, %s7289_s24 }
 0x1ef   : > { %849 = vrot.lane.b32.xlu0 %v772_v16, %s7289_s24 }
 0x1f1   : > { %845 = vrot.lane.b32.xlu1 %v770_v18, %s7289_s24 }
 0x1f9   : > { %851 = vrot.lane.b32.xlu1 %v828_v23, %s7289_s24 }
 0x233   : > { %v842_v24 = vpop.permute.xlu2 %841 }
 0x234   : > { %864 = vst.msk [vmem:[#allocation2 + $0x1a] sm:$0xff] %vm861_vm4, %v842_v24 }
 0x23b   : > { %v7504_v25 = vld [vmem:[#allocation2 + $0x18] sm:$0xff] }
 0x23c   : > { %1085 = vrot.lane.b32.xlu0 %v7504_v25, %s7291_s25  ;;  %v896_v38 = vrot.slane %v7504_v25, 4 }
 0x245   : > { %v848_v26 = vpop.permute.xlu2 %847 }
 0x246   : > { %867 = vst.msk [vmem:[#allocation2 + $0x3a] sm:$0xff] %vm861_vm4, %v848_v26 }
 0x24d   : > { %v838_v27 = vpop.permute.xlu0 %837  ;;  %v7618_v16 = vld [vmem:[#allocation2 + $0x40] sm:$0xf] }
 0x24e   : > { %862 = vst.msk [vmem:[#allocation2 + $0x2] sm:$0xff] %vm861_vm4, %v838_v27 }
 0x255   : > { %v7510_v29 = vld [vmem:[#allocation2] sm:$0xff] }
 0x256   : > { %1081 = vrot.lane.b32.xlu1 %v7510_v29, %s7291_s25  ;;  %v884_v42 = vrot.slane %v7510_v29, 4  ;;  %v1508_v43 = vrot.slane %v7510_v29, 2 }
 0x259   : > { %v844_v30 = vpop.permute.xlu0 %843 }
 0x25a   : > { %865 = vst.msk [vmem:[#allocation2 + $0x22] sm:$0xff] %vm861_vm4, %v844_v30 }
 0x25b   : > { %v840_v32 = vpop.permute.xlu1 %839 }
 0x25c   : > { %863 = vst.msk [vmem:[#allocation2 + $0xa] sm:$0xff] %vm861_vm4, %v840_v32  ;;  %v1513_v32 = vrot.slane %v7504_v25, 2 }
 0x261   : > { %v850_v33 = vpop.permute.xlu0 %849  ;;  %v7516_v34 = vld [vmem:[#allocation2 + $0x20] sm:$0xff]  ;;  %v7577_v60 = vld [vmem:[#allocation2 + $0x28] sm:$0xf] }
 0x262   : > { %868 = vst.msk [vmem:[#allocation2 + $0x4a] sm:$0xff] %vm861_vm4, %v850_v33  ;;  %1087 = vrot.lane.b32.xlu1 %v7516_v34, %s7291_s25  ;;  %v7522_v35 = vrot.slane %v7516_v34, 4  ;;  %v1514_v2 = vrot.slane %v7516_v34, 2  ;;  %v1516_v4 = vrot.slane %v7577_v60, 2  ;;  %v1521_v33 = vrot.slane %v7618_v16, 2 }
 0x263   : > { %v846_v36 = vpop.permute.xlu1 %845  ;;  %v7524_v37 = vld [vmem:[#allocation2 + $0x8] sm:$0xff]  ;;  %v7595_v5 = vld [vmem:[#allocation2 + $0x10] sm:$0xf] }
 0x264   : > { %866 = vst.msk [vmem:[#allocation2 + $0x32] sm:$0xff] %vm861_vm4, %v846_v36  ;;  %1083 = vrot.lane.b32.xlu2 %v7524_v37, %s7291_s25  ;;  %v7531_v39 = vrot.slane %v7524_v37, 4  ;;  %v1509_v40 = vrot.slane %v7524_v37, 2  ;;  %v7536_v41 = vsel %vm499_vm0, %v896_v38, %v7522_v35  ;;  %v1511_v18 = vrot.slane %v7595_v5, 2 }
 0x265   : > { %v7622_v19 = vsel %vm1507_vm5, %v1514_v2, %v1516_v4 }
 0x266   : > { %v7542_v44 = vsel %vm499_vm0, %v884_v42, %v7531_v39  ;;  %v7551_v46 = vsel %vm1507_vm5, %v1508_v43, %v1509_v40  ;;  %v7644_v43 = vsel %vm1507_vm5, %v1513_v32, %v1514_v2 }
 0x267   : > { %v1538_v21 = vrot.slane %v7551_v46, 4 }
 0x269   : > { %v7544_v45 = vld [vmem:[#allocation2 + $0x48] sm:$0xff] }
 0x26a   : > { %1093 = vrot.lane.b32.xlu1 %v7544_v45, %s7291_s25  ;;  %v894_v47 = vrot.slane %v7544_v45, 4  ;;  %v897_v48 = vsel %vm717_vm1, %v7544_v45, %v896_v38  ;;  %v1523_v24 = vrot.slane %v7544_v45, 2 }
 0x26b   : > { %v852_v50 = vpop.permute.xlu1 %851  ;;  %v7556_v51 = vld [vmem:[#allocation2 + $0x30] sm:$0xff]  ;;  %v877_v52 = vld [vmem:[#allocation2 + $0x38] sm:$0xff]  ;;  %v905_v53 = vperm.slane %v897_v48, %v7428_v6 }
 0x26c   : > { %869 = vst.msk [vmem:[#allocation2 + $0x52] sm:$0xff] %vm861_vm4, %v852_v50  ;;  %1089 = vrot.lane.b32.xlu2 %v7556_v51, %s7291_s25  ;;  %1091 = vrot.lane.b32.xlu0 %v877_v52, %s7291_s25  ;;  %v1519_v54 = vrot.slane %v877_v52, 2  ;;  %v1518_v55 = vrot.slane %v7556_v51, 2  ;;  %v882_v56 = vrot.slane %v7556_v51, 4  ;;  %v7565_v17 = vrot.slane %v877_v52, 4 }
 0x26d   : > { %v885_v28 = vsel %vm717_vm1, %v7556_v51, %v884_v42  ;;  %v895_v57 = vsel %vm717_vm1, %v894_v47, %v7504_v25  ;;  %v941_v58 = vsel %vm717_vm1, %v877_v52, %v7531_v39  ;;  %v918_v0 = vrot.slane %v905_v53, 4 }
 0x26e   : > { %v7575_v59 = vsel %vm1507_vm5, %v1518_v55, %v1519_v54  ;;  %v7581_v61 = vsel %vm499_vm0, %v882_v56, %v7565_v17  ;;  %v893_v1 = vperm.slane %v885_v28, %v7428_v6  ;;  %v939_v11 = vsel %vm717_vm1, %v7565_v17, %v7524_v37 }
 0x26f   : > { %v1536_v62 = vrot.slane %v7575_v59, 4  ;;  %v7586_v63 = vsel %vm717_vm1, %v7575_v59, %v1538_v21  ;;  %v883_v9 = vsel %vm717_vm1, %v882_v56, %v7510_v29  ;;  %v945_v27 = vperm.slane %v939_v11, %v7428_v6 }
 0x270   : > { %v920_v7 = vrot.slane %v893_v1, 4  ;;  %v7607_v12 = vsel %vm717_vm1, %v918_v0, %v893_v1  ;;  %v889_v30 = vperm.slane %v883_v9, %v7428_v6  ;;  %v901_v42 = vperm.slane %v895_v57, %v7428_v6 }
 0x271   : > { %v1537_v3 = vsel %vm717_vm1, %v1536_v62, %v7551_v46  ;;  %v7657_v50 = vsel %vm1507_vm5, %v1519_v54, %v1521_v33  ;;  %v964_v55 = vrot.slane %v945_v27, 4  ;;  %v949_v21 = vperm.slane %v941_v58, %v7428_v6 }
 0x272   : > { %1299 = vrot.lane.b32.xlu1 %v7504_v25, %s7292_s26  ;;  %v7625_v23 = vsel %vm717_vm1, %v905_v53, %v920_v7  ;;  %v1606_v25 = vrot.slane %v7622_v19, 4  ;;  %v908_v56 = vrot.slane %v889_v30, 4  ;;  %v906_v62 = vrot.slane %v901_v42, 4 }
 0x273   : > { %v7597_v8 = vld [vmem:[#allocation2 + $0x50] sm:$0xff]  ;;  %v7599_v10 = vld [vmem:[#allocation2 + $0x58] sm:$0xf]  ;;  %v1550_v58 = vrot.slane %v7644_v43, 4  ;;  %v976_v0 = vrot.slane %v949_v21, 4  ;;  %v1592_v4 = vrot.slane %v7657_v50, 4 }
 0x274   : > { %1095 = vrot.lane.b32.xlu2 %v7597_v8, %s7291_s25  ;;  %1297 = vrot.lane.b32.xlu0 %v7524_v37, %s7292_s26  ;;  %v1524_v13 = vrot.slane %v7597_v8, 2  ;;  %v1526_v14 = vrot.slane %v7599_v10, 2  ;;  %v7616_v15 = vrot.slane %v7597_v8, 4  ;;  %v953_v28 = vsel %vm717_vm1, %v7597_v8, %v7522_v35 }
 0x275   : > { %v7675_v54 = vsel %vm717_vm1, %v901_v42, %v908_v56  ;;  %v961_v57 = vperm.slane %v953_v28, %v7428_v6  ;;  %v1547_v42 = vperm.slane %v7586_v63, %v7428_v6 }
 0x276   : > { %v7630_v26 = vsel %vm499_vm0, %v894_v47, %v7616_v15  ;;  %v7637_v36 = vsel %vm1507_vm5, %v1524_v13, %v1526_v14  ;;  %v7640_v38 = vsel %vm1507_vm5, %v1523_v24, %v1524_v13  ;;  %v7649_v47 = vsel %vm1507_vm5, %v1509_v40, %v1511_v18 }
 0x277   : > { %v951_v48 = vsel %vm717_vm1, %v7616_v15, %v7516_v34  ;;  %v1607_v37 = vsel %vm717_vm1, %v7637_v36, %v1606_v25  ;;  %v1548_v40 = vrot.slane %v7640_v38, 4  ;;  %v974_v2 = vrot.slane %v961_v57, 4 }
 0x278   : > { %v957_v53 = vperm.slane %v951_v48, %v7428_v6  ;;  %v1615_v1 = vperm.slane %v1607_v37, %v7428_v6  ;;  %v1594_v7 = vrot.slane %v7649_v47, 4  ;;  %v7687_v11 = vsel %vm717_vm1, %v961_v57, %v976_v0 }
 0x279   : > { %v1549_v9 = vsel %vm717_vm1, %v1548_v40, %v7644_v43  ;;  %v1551_v13 = vsel %vm717_vm1, %v7640_v38, %v1550_v58  ;;  %v7694_v14 = vsel %vm717_vm1, %v974_v2, %v949_v21  ;;  %v1593_v48 = vsel %vm717_vm1, %v1592_v4, %v7649_v47 }
 0x27a   : > { %1305 = vrot.lane.b32.xlu1 %v877_v52, %s7292_s26  ;;  %v7672_v52 = vsel %vm717_vm1, %v957_v53, %v964_v55  ;;  %v1555_v18 = vperm.slane %v1549_v9, %v7428_v6  ;;  %v1595_v32 = vsel %vm717_vm1, %v7657_v50, %v1594_v7  ;;  %v1628_v33 = vrot.slane %v1615_v1, 4 }
 0x27b   : > { %v1559_v25 = vperm.slane %v1551_v13, %v7428_v6  ;;  %v1603_v56 = vperm.slane %v1595_v32, %v7428_v6  ;;  %v1599_v37 = vperm.slane %v1593_v48, %v7428_v6  ;;  %v1574_v40 = vrot.slane %v1547_v42, 4 }
 0x27c   : > { %1295 = vrot.lane.b32.xlu2 %v7510_v29, %s7292_s26  ;;  %1303 = vrot.lane.b32.xlu0 %v7556_v51, %s7292_s26  ;;  %v7681_v29 = vsel %vm717_vm1, %v906_v62, %v889_v30  ;;  %v1543_v51 = vperm.slane %v1537_v3, %v7428_v6  ;;  %v962_v30 = vrot.slane %v957_v53, 4  ;;  %v1604_v53 = vrot.slane %v7637_v36, 4 }
 0x27d   : > { %v7719_v63 = vsel %vm717_vm1, %v1628_v33, %v1603_v56  ;;  %v7725_v21 = vsel %vm717_vm1, %v1559_v25, %v1574_v40  ;;  %v1618_v57 = vrot.slane %v1599_v37, 4  ;;  %v1630_v62 = vrot.slane %v1603_v56, 4 }
 0x27e   : > { %v1562_v24 = vrot.slane %v1543_v51, 4  ;;  %v7715_v55 = vsel %vm717_vm1, %v962_v30, %v945_v27  ;;  %v1560_v7 = vrot.slane %v1555_v18, 4  ;;  %v973_v13 = vperm.slane %v7672_v52, %v7436_v22 }
 0x27f   : > { %v7741_v0 = vsel %vm717_vm1, %v1615_v1, %v1630_v62 }
 0x280   : > { %v7700_v3 = vsel %vm717_vm1, %v1555_v18, %v1562_v24  ;;  %v7749_v9 = vsel %vm717_vm1, %v1560_v7, %v1543_v51  ;;  %v925_v18 = vperm.slane %v7607_v12, %v7436_v22  ;;  %v985_v12 = vperm.slane %v7687_v11, %v7436_v22 }
 0x281   : > { %v2190_v7 = vrot.slane %v7536_v41, 4  ;;  %v8050_v20 = vperm.slane %v7749_v9, %v7436_v22 }
 0x282   : > { %1730 = vrot.lane.b32.xlu1 %v7644_v43, %s7291_s25 }
 0x284   : > { %1301 = vrot.lane.b32.xlu2 %v7516_v34, %s7292_s26  ;;  %1309 = vrot.lane.b32.xlu0 %v7597_v8, %s7292_s26  ;;  %v1572_v34 = vrot.slane %v1559_v25, 4  ;;  %v1605_v8 = vsel %vm717_vm1, %v1604_v53, %v7622_v19 }
 0x285   : > { %v1611_v27 = vperm.slane %v1605_v8, %v7428_v6 }
 0x286   : > { %v7728_v28 = vsel %vm717_vm1, %v1572_v34, %v1547_v42  ;;  %v7873_v42 = vperm.slane %v7681_v29, %v7436_v22  ;;  %v7890_v34 = vperm.slane %v7715_v55, %v7436_v22  ;;  %v2191_v55 = vsel %vm717_vm1, %v7630_v26, %v2190_v7 }
 0x287   : > { %v7738_v58 = vsel %vm717_vm1, %v1611_v27, %v1618_v57  ;;  %v1616_v2 = vrot.slane %v1611_v27, 4 }
 0x289   : > { %v7744_v4 = vsel %vm717_vm1, %v1616_v2, %v1599_v37  ;;  %v930_v37 = vrot.slane %v7873_v42, 4  ;;  %v986_v2 = vrot.slane %v7890_v34, 4 }
 0x28a   : > { %1736 = vrot.lane.b32.xlu1 %v7657_v50, %s7291_s25 }
 0x28b   : > { %v931_v40 = vsel %vm717_vm1, 0.0, %v930_v37 }
 0x28c   : > { %1307 = vrot.lane.b32.xlu2 %v7544_v45, %s7292_s26  ;;  %1728 = vrot.lane.b32.xlu0 %v7649_v47, %s7291_s25  ;;  %v2151_v45 = vrot.slane %v7595_v5, 4 }
 0x292   : > { %1936 = vrot.lane.b32.xlu1 %v7649_v47, %s7292_s26  ;;  %v929_v47 = vperm.slane %v7625_v23, %v7436_v22  ;;  %v917_v23 = vperm.slane %v7675_v54, %v7436_v22  ;;  %v981_v54 = vperm.slane %v7694_v14, %v7436_v22  ;;  %v934_v14 = vrot.slane %v925_v18, 4 }
 0x294   : > { %1726 = vrot.lane.b32.xlu2 %v7551_v46, %s7291_s25  ;;  %1734 = vrot.lane.b32.xlu0 %v7575_v59, %s7291_s25  ;;  %v932_v30 = vrot.slane %v917_v23, 4  ;;  %v990_v48 = vrot.slane %v981_v54, 4  ;;  %v935_v29 = vsel %vm717_vm1, 0.0, %v934_v14  ;;  %v936_v62 = vrot.slane %v929_v47, 4 }
 0x296   : > { %v933_v52 = vsel %vm717_vm1, 0.0, %v932_v30  ;;  %v991_v11 = vsel %vm717_vm1, 0.0, %v990_v48  ;;  %v988_v30 = vrot.slane %v973_v13, 4 }
 0x29a   : > { %1942 = vrot.lane.b32.xlu1 %v7575_v59, %s7292_s26  ;;  %v7770_v59 = vsel %vm499_vm0, %v7531_v39, %v2151_v45  ;;  %v2166_v39 = vrot.slane %v7599_v10, 4  ;;  %v7904_v45 = vperm.slane %v7700_v3, %v7436_v22  ;;  %v2178_v3 = vrot.slane %v7542_v44, 4 }
 0x29b   : > { %v2234_v37 = vrot.slane %v7770_v59, 4 }
 0x29c   : > { %1732 = vrot.lane.b32.xlu2 %v7622_v19, %s7291_s25  ;;  %1740 = vrot.lane.b32.xlu0 %v7637_v36, %s7291_s25  ;;  %v2179_v48 = vsel %vm717_vm1, %v7581_v61, %v2178_v3 }
 0x2a2   : > { %1948 = vrot.lane.b32.xlu1 %v7637_v36, %s7292_s26  ;;  %v2161_v36 = vrot.slane %v7618_v16, 4 }
 0x2a4   : > { %1738 = vrot.lane.b32.xlu2 %v7640_v38, %s7291_s25  ;;  %1934 = vrot.lane.b32.xlu0 %v7551_v46, %s7292_s26  ;;  %v7787_v46 = vsel %vm499_vm0, %v7616_v15, %v2166_v39  ;;  %v7807_v15 = vsel %vm499_vm0, %v7565_v17, %v2161_v36  ;;  %v937_v39 = vsel %vm717_vm1, 0.0, %v936_v62 }
 0x2aa   : > { %2362 = vrot.lane.b32.xlu1 %v7770_v59, %s7291_s25 }
 0x2ac   : > { %1938 = vrot.lane.b32.xlu2 %v7644_v43, %s7292_s26  ;;  %1940 = vrot.lane.b32.xlu0 %v7622_v19, %s7292_s26  ;;  %v2156_v19 = vrot.slane %v7577_v60, 4 }
 0x2ae   : > { %v7803_v10 = vsel %vm499_vm0, %v7522_v35, %v2156_v19  ;;  %v987_v19 = vsel %vm717_vm1, 0.0, %v986_v2 }
 0x2b2   : > { %2368 = vrot.lane.b32.xlu1 %v7581_v61, %s7291_s25 }
 0x2b4   : > { %1944 = vrot.lane.b32.xlu2 %v7657_v50, %s7292_s26  ;;  %1946 = vrot.lane.b32.xlu0 %v7640_v38, %s7292_s26  ;;  %v7833_v38 = vpop.permute.xlu0 %1085 }
 0x2ba   : > { %2374 = vrot.lane.b32.xlu1 %v7787_v46, %s7291_s25 }
 0x2bc   : > { %2364 = vrot.lane.b32.xlu2 %v7536_v41, %s7291_s25  ;;  %2360 = vrot.lane.b32.xlu0 %v7542_v44, %s7291_s25 }
 0x2be   : > { %v7795_v5 = vpop.permute.xlu2 %1083 }
 0x2c2   : > { %2574 = vrot.lane.b32.xlu1 %v7542_v44, %s7292_s26 }
 0x2c4   : > { %2366 = vrot.lane.b32.xlu0 %v7803_v10, %s7291_s25  ;;  %2370 = vrot.lane.b32.xlu2 %v7807_v15, %s7291_s25 }
 0x2c6   : > { %v7813_v60 = vpop.permute.xlu2 %1089 }
 0x2c8   : > { %v7817_v16 = vpop.permute.xlu1 %1081 }
 0x2ca   : > { %2580 = vrot.lane.b32.xlu1 %v7803_v10, %s7292_s26 }
 0x2cc   : > { %2372 = vrot.lane.b32.xlu0 %v7630_v26, %s7291_s25  ;;  %2576 = vrot.lane.b32.xlu2 %v7770_v59, %s7292_s26 }
 0x2ce   : > { %v7823_v35 = vpop.permute.xlu2 %1095 }
 0x2d2   : > { %2586 = vrot.lane.b32.xlu1 %v7630_v26, %s7292_s26 }
 0x2d4   : > { %v7827_v17 = vpop.permute.xlu1 %1087  ;;  %2578 = vrot.lane.b32.xlu0 %v7536_v41, %s7292_s26  ;;  %2582 = vrot.lane.b32.xlu2 %v7581_v61, %s7292_s26 }
 0x2d6   : > { %v7835_v43 = vpop.permute.xlu2 %1295 }
 0x2da   : > { %1015 = vrot.lane.b32.xlu1 %v929_v47, %s7281_s15  ;;  %v2199_v47 = vperm.slane %v2191_v55, %v7428_v6 }
 0x2dc   : > { %v7840_v50 = vpop.permute.xlu1 %1093  ;;  %2584 = vrot.lane.b32.xlu0 %v7807_v15, %s7292_s26  ;;  %2588 = vrot.lane.b32.xlu2 %v7787_v46, %s7292_s26  ;;  %v2212_v14 = vrot.slane %v2199_v47, 4  ;;  %s479_s26 = scalar_lea.vmem %s12708_s5, %s7368_s19 }
 0x2de   : > { %v7846_v1 = vpop.permute.xlu0 %1091  ;;  %v7848_v51 = vpop.permute.xlu2 %1301 }
 0x2e2   : > { %1027 = vrot.lane.b32.xlu1 %v973_v13, %s7286_s23  ;;  %v2187_v13 = vperm.slane %v2179_v48, %v7428_v6  ;;  %v1579_v48 = vperm.slane %v7728_v28, %v7436_v22 }
 0x2e4   : > { %v7857_v24 = vpop.permute.xlu1 %1299  ;;  %999 = vrot.lane.b32.xlu0 %v917_v23, %s7286_s23  ;;  %1007 = vrot.lane.b32.xlu2 %v925_v18, %s7284_s21  ;;  %v2213_v62 = vsel %vm717_vm1, %v2212_v14, %v2187_v13 }
 0x2e6   : > { %v7861_v32 = vpop.permute.xlu0 %1297  ;;  %v7863_v33 = vpop.permute.xlu2 %1307 }
 0x2ea   : > { %1003 = vrot.lane.b32.xlu1 %v933_v52, %s7283_s20  ;;  %v992_v52 = vrot.slane %v985_v12, 4 }
 0x2ec   : > { %v7875_v25 = vpop.permute.xlu1 %1305  ;;  %1035 = vrot.lane.b32.xlu0 %v981_v54, %s7284_s21  ;;  %1043 = vrot.lane.b32.xlu2 %v985_v12, %s7281_s15  ;;  %v7924_v54 = vperm.slane %v7719_v63, %v7436_v22  ;;  %v2246_v12 = vrot.slane %v7803_v10, 4  ;;  %v2235_v63 = vsel %vm717_vm1, %v7807_v15, %v2234_v37  ;;  %v2188_v37 = vrot.slane %v7630_v26, 4 }
 0x2ee   : > { %v7879_v53 = vpop.permute.xlu0 %1303  ;;  %v7881_v56 = vpop.permute.xlu2 %1726  ;;  %v2247_v55 = vsel %vm717_vm1, %v7787_v46, %v2246_v12  ;;  %v2189_v26 = vsel %vm717_vm1, %v2188_v37, %v7536_v41  ;;  %v1588_v41 = vrot.slane %v1579_v48, 4  ;;  %v2214_v37 = vrot.slane %v2187_v13, 4 }
 0x2ef   : > { %v2255_v3 = vperm.slane %v2247_v55, %v7428_v6  ;;  %v1639_v55 = vperm.slane %v7741_v0, %v7436_v22 }
 0x2f0   : > { %v1589_v31 = vsel %vm717_vm1, 0.0, %v1588_v41 }
 0x2f2   : > { %1039 = vrot.lane.b32.xlu1 %v991_v11, %s7280_s14  ;;  %v989_v11 = vsel %vm717_vm1, 0.0, %v988_v30  ;;  %v2176_v30 = vrot.slane %v7581_v61, 4 }
 0x2f4   : > { %v7892_v8 = vpop.permute.xlu1 %1730  ;;  %1011 = vrot.lane.b32.xlu0 %v935_v29, %s7280_s14  ;;  %995 = vrot.lane.b32.xlu2 %v931_v40, %s7285_s22  ;;  %v993_v29 = vsel %vm717_vm1, 0.0, %v992_v52  ;;  %v7958_v52 = vperm.slane %v7725_v21, %v7436_v22 }
 0x2f6   : > { %v7896_v27 = vpop.permute.xlu0 %1309  ;;  %v7898_v57 = vpop.permute.xlu2 %1732 }
 0x2fa   : > { %1653 = vrot.lane.b32.xlu1 %v7904_v45, %s7286_s23 }
 0x2fc   : > { %v7912_v36 = vpop.permute.xlu1 %1736  ;;  %1019 = vrot.lane.b32.xlu2 %v937_v39, %s7282_s16  ;;  %1023 = vrot.lane.b32.xlu0 %v987_v19, %s7285_s22  ;;  %v2243_v39 = vperm.slane %v2235_v63, %v7428_v6  ;;  %v7950_v19 = vperm.slane %v2213_v62, %v7436_v22  ;;  %v2232_v62 = vrot.slane %v7807_v15, 4 }
 0x2fe   : > { %v7918_v23 = vpop.permute.xlu0 %1728  ;;  %v7920_v18 = vpop.permute.xlu2 %1738  ;;  %v2270_v14 = vrot.slane %v2243_v39, 4 }
 0x300   : > { %v2271_v61 = vsel %vm717_vm1, %v2255_v3, %v2270_v14  ;;  %v2244_v14 = vrot.slane %v7787_v46, 4  ;;  %v2215_v46 = vsel %vm717_vm1, %v2199_v47, %v2214_v37 }
 0x301   : > { %v7976_v28 = vperm.slane %v2271_v61, %v7436_v22 }
 0x302   : > { %1689 = vrot.lane.b32.xlu1 %v7924_v54, %s7284_s21  ;;  %v2245_v49 = vsel %vm717_vm1, %v2244_v14, %v7803_v10  ;;  %v2268_v10 = vrot.slane %v2255_v3, 4 }
 0x303   : > { %v8023_v47 = vperm.slane %v2245_v49, %v7428_v6 }
 0x304   : > { %v7937_v40 = vpop.permute.xlu1 %1936  ;;  %1031 = vrot.lane.b32.xlu2 %v989_v11, %s7283_s20  ;;  %1047 = vrot.lane.b32.xlu0 %v993_v29, %s7282_s16  ;;  %v2177_v29 = vsel %vm717_vm1, %v2176_v30, %v7542_v44  ;;  %v7986_v44 = vperm.slane %v7738_v58, %v7436_v22  ;;  %v2195_v30 = vperm.slane %v2189_v26, %v7428_v6 }
 0x305   : > { %v2183_v63 = vperm.slane %v2177_v29, %v7428_v6  ;;  %v2233_v58 = vsel %vm717_vm1, %v2232_v62, %v7770_v59  ;;  %v8020_v62 = vperm.slane %v2215_v46, %v7436_v22  ;;  %v2269_v49 = vsel %vm717_vm1, %v2268_v10, %v2243_v39 }
 0x306   : > { %v7942_v2 = vpop.permute.xlu0 %1734  ;;  %v7944_v7 = vpop.permute.xlu2 %1938  ;;  %v8013_v13 = vperm.slane %v2233_v58, %v7428_v6  ;;  %v8043_v58 = vperm.slane %v2269_v49, %v7436_v22  ;;  %v2200_v46 = vrot.slane %v2195_v30, 4  ;;  %v1646_v39 = vrot.slane %v1639_v55, 4 }
 0x307   : > { %v2202_v15 = vrot.slane %v2183_v63, 4  ;;  %v1586_v49 = vrot.slane %v7904_v45, 4 }
 0x309   : > { %v2203_v26 = vsel %vm717_vm1, %v2195_v30, %v2202_v15  ;;  %v1587_v45 = vsel %vm717_vm1, 0.0, %v1586_v49 }
 0x30a   : > { %2301 = vrot.lane.b32.xlu1 %v7950_v19, %s7284_s21  ;;  %v8017_v59 = vperm.slane %v2203_v26, %v7436_v22 }
 0x30c   : > { %v7963_v11 = vpop.permute.xlu1 %1942  ;;  %1669 = vrot.lane.b32.xlu2 %v7958_v52, %s7281_s15  ;;  %1661 = vrot.lane.b32.xlu0 %v1579_v48, %s7284_s21  ;;  %v8010_v48 = vperm.slane %v7744_v4, %v7436_v22  ;;  %v2258_v4 = vrot.slane %v8013_v13, 4 }
 0x30d   : > { %v1958_v30 = vrot.slane %v7963_v11, 4 }
 0x30e   : > { %v7971_v21 = vpop.permute.xlu0 %1740  ;;  %v7973_v12 = vpop.permute.xlu2 %1944  ;;  %12876 = vst [vmem:[#allocation10_spill] sm:$0xff] %v8010_v48  ;;  %v2259_v3 = vsel %vm717_vm1, %v8023_v47, %v2258_v4  ;;  %v2201_v4 = vsel %vm717_vm1, %v2200_v46, %v2183_v63 }
 0x30f   : > { %v8046_v26 = vperm.slane %v2259_v3, %v7436_v22  ;;  %v1584_v3 = vrot.slane %v8050_v20, 4 }
 0x311   : > { %v1585_v46 = vsel %vm717_vm1, 0.0, %v1584_v3  ;;  %v1644_v3 = vrot.slane %v7924_v54, 4  ;;  %v2230_v54 = vrot.slane %v8020_v62, 4 }
 0x312   : > { %2337 = vrot.lane.b32.xlu1 %v7976_v28, %s7281_s15 }
 0x314   : > { %v7992_v61 = vpop.permute.xlu1 %1948  ;;  %1681 = vrot.lane.b32.xlu2 %v7986_v44, %s7286_s23  ;;  %1697 = vrot.lane.b32.xlu0 %v1639_v55, %s7281_s15 }
 0x315   : > { %12874 = vst [vmem:[#allocation8_spill] sm:$0xff] %v7992_v61 }
 0x316   : > { %v7999_v29 = vpop.permute.xlu0 %1934  ;;  %v8001_v0 = vpop.permute.xlu2 %2364 }
 0x317   : > { %12875 = vst [vmem:[#allocation9_spill] sm:$0xff] %v8001_v0 }
 0x31a   : > { %1665 = vrot.lane.b32.xlu1 %v1589_v31, %s7280_s14  ;;  %v1640_v31 = vrot.slane %v8010_v48, 4  ;;  %v8073_v48 = vperm.slane %v2201_v4, %v7436_v22 }
 0x31c   : > { %v8025_v14 = vpop.permute.xlu1 %2362  ;;  %2293 = vrot.lane.b32.xlu2 %v8017_v59, %s7286_s23  ;;  %2309 = vrot.lane.b32.xlu0 %v8020_v62, %s7281_s15  ;;  %v1641_v37 = vsel %vm717_vm1, 0.0, %v1640_v31  ;;  %12880 = vst [vmem:[#allocation14_spill] sm:$0xff] %v8073_v48 }
 0x31d   : > { %12877 = vst [vmem:[#allocation11_spill] sm:$0xff] %v8025_v14 }
 0x31e   : > { %v8033_v41 = vpop.permute.xlu0 %1940  ;;  %v8035_v15 = vpop.permute.xlu2 %2370 }
 0x31f   : > { %12878 = vst [vmem:[#allocation12_spill] sm:$0xff] %v8035_v15  ;;  %v1647_v15 = vsel %vm717_vm1, 0.0, %v1646_v39  ;;  %v2224_v39 = vrot.slane %v8073_v48, 4  ;;  %v2256_v48 = vrot.slane %v8023_v47, 4 }
 0x321   : > { %v2257_v47 = vsel %vm717_vm1, %v2256_v48, %v8013_v13  ;;  %v2282_v48 = vrot.slane %v8046_v26, 4  ;;  %v1107_v13 = vrot.slane %v7817_v16, 4 }
 0x322   : > { %1677 = vrot.lane.b32.xlu1 %v1641_v37, %s7285_s22  ;;  %v1959_v37 = vsel %vm717_vm1, %v1958_v30, %v7999_v29 }
 0x323   : > { %v8082_v61 = vperm.slane %v1959_v37, %v7428_v6  ;;  %v1590_v37 = vrot.slane %v7958_v52, 4 }
 0x324   : > { %v8052_v14 = vpop.permute.xlu1 %2368  ;;  %2329 = vrot.lane.b32.xlu2 %v8043_v58, %s7284_s21  ;;  %2321 = vrot.lane.b32.xlu0 %v8046_v26, %s7286_s23 }
 0x325   : > { %12879 = vst [vmem:[#allocation13_spill] sm:$0xff] %v8052_v14 }
 0x326   : > { %v8058_v10 = vpop.permute.xlu0 %1946  ;;  %v8060_v31 = vpop.permute.xlu2 %2576 }
 0x327   : > { %v1970_v9 = vrot.slane %v8058_v10, 4 }
 0x329   : > { %v1971_v55 = vsel %vm717_vm1, %v1970_v9, %v7944_v7 }
 0x32a   : > { %v8076_v63 = vperm.slane %v1971_v55, %v7428_v6  ;;  %1701 = vrot.lane.b32.xlu1 %v1647_v15, %s7282_s16  ;;  %v2225_v55 = vsel %vm717_vm1, 0.0, %v2224_v39  ;;  %v2228_v39 = vrot.slane %v7950_v19, 4 }
 0x32c   : > { %v1982_v30 = vrot.slane %v8076_v63, 4  ;;  %v8085_v9 = vpop.permute.xlu1 %2374  ;;  %1657 = vrot.lane.b32.xlu2 %v1587_v45, %s7283_s20  ;;  %1649 = vrot.lane.b32.xlu0 %v1585_v46, %s7285_s22  ;;  %v1645_v45 = vsel %vm717_vm1, 0.0, %v1644_v3  ;;  %v1591_v46 = vsel %vm717_vm1, 0.0, %v1590_v37  ;;  %v1642_v3 = vrot.slane %v7986_v44, 4 }
 0x32d   : > { %12881 = vst [vmem:[#allocation15_spill] sm:$0xff] %v8085_v9  ;;  %v1105_v37 = vrot.slane %v7813_v60, 4  ;;  %v2229_v62 = vsel %vm717_vm1, 0.0, %v2228_v39 }
 0x32e   : > { %v8090_v4 = vpop.permute.xlu0 %2360  ;;  %v8092_v15 = vpop.permute.xlu2 %2582  ;;  %v8096_v49 = vsel %vm717_vm1, %v1982_v30, %v8082_v61 }
 0x32f   : > { %12882 = vst [vmem:[#allocation16_spill] sm:$0xff] %v8092_v15  ;;  %v1106_v19 = vsel %vm717_vm1, %v1105_v37, %v7817_v16  ;;  %v1175_v16 = vrot.slane %v7827_v17, 4 }
 0x330   : > { %12883 = vst [vmem:[#allocation17_spill] sm:$0xff] %v8096_v49  ;;  %v8125_v49 = vperm.slane %v2257_v47, %v7436_v22  ;;  %v2226_v47 = vrot.slane %v8017_v59, 4  ;;  %v8143_v37 = vperm.slane %v1106_v19, %v7428_v6 }
 0x332   : > { %2289 = vrot.lane.b32.xlu1 %v2225_v55, %s7285_s22  ;;  %v2231_v55 = vsel %vm717_vm1, 0.0, %v2230_v54  ;;  %12886 = vst [vmem:[#allocation20_spill] sm:$0xff] %v8125_v49  ;;  %v2280_v26 = vrot.slane %v8125_v49, 4 }
 0x334   : > { %v8105_v9 = vpop.permute.xlu1 %2574  ;;  %1693 = vrot.lane.b32.xlu2 %v1645_v45, %s7280_s14  ;;  %1673 = vrot.lane.b32.xlu0 %v1591_v46, %s7282_s16  ;;  %v1117_v45 = vrot.slane %v7840_v50, 4  ;;  %v1643_v46 = vsel %vm717_vm1, 0.0, %v1642_v3 }
 0x335   : > { %12884 = vst [vmem:[#allocation18_spill] sm:$0xff] %v8105_v9 }
 0x336   : > { %v8110_v30 = vpop.permute.xlu0 %2366  ;;  %v8112_v52 = vpop.permute.xlu2 %2588  ;;  %v1118_v54 = vsel %vm717_vm1, %v1117_v45, %v7833_v38  ;;  %v1119_v45 = vrot.slane %v7833_v38, 4  ;;  %v2284_v38 = vrot.slane %v8043_v58, 4 }
 0x337   : > { %12885 = vst [vmem:[#allocation19_spill] sm:$0xff] %v8110_v30  ;;  %v8152_v30 = vperm.slane %v1118_v54, %v7428_v6  ;;  %v1131_v54 = vrot.slane %v8143_v37, 4 }
 0x33a   : > { %2313 = vrot.lane.b32.xlu1 %v2231_v55, %s7282_s16  ;;  %v2384_v55 = vrot.slane %v8052_v14, 4  ;;  %v2281_v14 = vsel %vm717_vm1, 0.0, %v2280_v26 }
 0x33c   : > { %v8129_v44 = vpop.permute.xlu1 %2580  ;;  %2305 = vrot.lane.b32.xlu2 %v2229_v62, %s7280_s14  ;;  %1685 = vrot.lane.b32.xlu0 %v1643_v46, %s7283_s20  ;;  %v2283_v46 = vsel %vm717_vm1, 0.0, %v2282_v48  ;;  %v2385_v59 = vsel %vm717_vm1, %v2384_v55, %v8090_v4  ;;  %v2286_v48 = vrot.slane %v7976_v28, 4  ;;  %v1120_v55 = vsel %vm717_vm1, %v7840_v50, %v1119_v45 }
 0x33d   : > { %v1128_v45 = vperm.slane %v1120_v55, %v7428_v6 }
 0x33e   : > { %v8137_v39 = vpop.permute.xlu0 %2372  ;;  %v8139_v3 = vpop.permute.xlu2 %1007 }
 0x33f   : > { %12887 = vst [vmem:[#allocation21_spill] sm:$0xff] %v8137_v39  ;;  %v2396_v62 = vrot.slane %v8137_v39, 4  ;;  %v1108_v39 = vsel %vm717_vm1, %v7813_v60, %v1107_v13  ;;  %v1163_v60 = vrot.slane %v7795_v5, 4  ;;  %v1176_v13 = vsel %vm717_vm1, %v7823_v35, %v1175_v16 }
 0x340   : > { %v1116_v50 = vperm.slane %v1108_v39, %v7428_v6  ;;  %v1132_v16 = vsel %vm717_vm1, %v8152_v30, %v1131_v54  ;;  %v8199_v39 = vperm.slane %v1176_v13, %v7428_v6 }
 0x341   : > { %v2397_v19 = vsel %vm717_vm1, %v2396_v62, %v8001_v0  ;;  %v2227_v62 = vsel %vm717_vm1, 0.0, %v2226_v47  ;;  %v2598_v47 = vrot.slane %v8092_v15, 4 }
 0x342   : > { %v8161_v49 = vperm.slane %v2397_v19, %v7428_v6  ;;  %2325 = vrot.lane.b32.xlu1 %v2283_v46, %s7283_s20  ;;  %v8175_v46 = vperm.slane %v2385_v59, %v7428_v6  ;;  %v1164_v59 = vsel %vm717_vm1, %v7846_v1, %v1163_v60  ;;  %v1333_v60 = vrot.slane %v7857_v24, 4 }
 0x343   : > { %v2599_v54 = vsel %vm717_vm1, %v2598_v47, %v8105_v9  ;;  %v8215_v13 = vperm.slane %v1164_v59, %v7428_v6  ;;  %v2285_v47 = vsel %vm717_vm1, 0.0, %v2284_v38  ;;  %v1141_v9 = vrot.slane %v1128_v45, 4 }
 0x344   : > { %12888 = vst [vmem:[#allocation22_spill] sm:$0xff] %v8161_v49  ;;  %v2408_v28 = vrot.slane %v8161_v49, 4  ;;  %v8178_v58 = vpop.permute.xlu1 %2586  ;;  %2317 = vrot.lane.b32.xlu2 %v2281_v14, %s7285_s22  ;;  %2297 = vrot.lane.b32.xlu0 %v2227_v62, %s7283_s20  ;;  %v1161_v62 = vrot.slane %v7846_v1, 4  ;;  %v2666_v1 = vrot.slane %v8112_v52, 4  ;;  %v2668_v38 = vrot.slane %v8129_v44, 4 }
 0x345   : > { %12889 = vst [vmem:[#allocation23_spill] sm:$0xff] %v8175_v46  ;;  %v2610_v26 = vrot.slane %v8178_v58, 4  ;;  %v1197_v59 = vrot.slane %v8199_v39, 4 }
 0x346   : > { %12890 = vst [vmem:[#allocation24_spill] sm:$0xff] %v8178_v58  ;;  %v8190_v19 = vpop.permute.xlu0 %2578  ;;  %v8192_v49 = vpop.permute.xlu2 %1043  ;;  %v8196_v14 = vsel %vm717_vm1, %v2408_v28, %v8175_v46  ;;  %v8211_v58 = vperm.slane %v1132_v16, %v7436_v22  ;;  %v2287_v28 = vsel %vm717_vm1, 0.0, %v2286_v48  ;;  %v1162_v48 = vsel %vm717_vm1, %v1161_v62, %v7795_v5 }
 0x347   : > { %12891 = vst [vmem:[#allocation25_spill] sm:$0xff] %v8190_v19  ;;  %v2611_v55 = vsel %vm717_vm1, %v2610_v26, %v8190_v19  ;;  %v1173_v26 = vrot.slane %v7823_v35, 4  ;;  %v8221_v19 = vperm.slane %v2599_v54, %v7428_v6  ;;  %v2667_v16 = vsel %vm717_vm1, %v2666_v1, %v8129_v44 }
 0x348   : > { %12892 = vst [vmem:[#allocation26_spill] sm:$0xff] %v8196_v14  ;;  %v8208_v15 = vperm.slane %v2611_v55, %v7428_v6  ;;  %v1143_v14 = vrot.slane %v1116_v50, 4  ;;  %v1321_v35 = vrot.slane %v7835_v43, 4  ;;  %v1334_v54 = vsel %vm717_vm1, %v7863_v33, %v1333_v60 }
 0x349   : > { %12894 = vst [vmem:[#allocation28_spill] sm:$0xff] %v8221_v19  ;;  %v1174_v44 = vsel %vm717_vm1, %v1173_v26, %v7827_v17  ;;  %v2656_v62 = vrot.slane %v8060_v31, 4  ;;  %v1198_v1 = vsel %vm717_vm1, %v1197_v59, %v8215_v13  ;;  %v1142_v17 = vsel %vm717_vm1, %v1141_v9, %v1116_v50 }
 0x34a   : > { %12893 = vst [vmem:[#allocation27_spill] sm:$0xff] %v8208_v15  ;;  %v2622_v55 = vrot.slane %v8208_v15, 4  ;;  %1222 = vrot.lane.b32.xlu1 %v8211_v58, %s7286_s23  ;;  %v1144_v60 = vsel %vm717_vm1, %v1128_v45, %v1143_v14  ;;  %v8250_v15 = vperm.slane %v1162_v48, %v7428_v6  ;;  %v1342_v26 = vperm.slane %v1334_v54, %v7428_v6 }
 0x34b   : > { %v2669_v59 = vsel %vm717_vm1, %v8112_v52, %v2668_v38  ;;  %v1319_v48 = vrot.slane %v7879_v53, 4  ;;  %v1377_v9 = vrot.slane %v7861_v32, 4  ;;  %v8279_v38 = vperm.slane %v1142_v17, %v7436_v22 }
 0x34c   : > { %v8235_v46 = vpop.permute.xlu1 %1015  ;;  %2341 = vrot.lane.b32.xlu2 %v2287_v28, %s7282_s16  ;;  %2333 = vrot.lane.b32.xlu0 %v2285_v47, %s7280_s14  ;;  %v8241_v5 = vsel %vm717_vm1, %v2622_v55, %v8221_v19  ;;  %v1322_v28 = vsel %vm717_vm1, %v7879_v53, %v1321_v35  ;;  %v8255_v47 = vperm.slane %v2667_v16, %v7428_v6  ;;  %v1389_v17 = vrot.slane %v7848_v51, 4 }
 0x34d   : > { %12895 = vst [vmem:[#allocation29_spill] sm:$0xff] %v8241_v5  ;;  %v8269_v16 = vperm.slane %v1198_v1, %v7436_v22  ;;  %v8272_v19 = vperm.slane %v1144_v60, %v7436_v22  ;;  %v1330_v50 = vperm.slane %v1322_v28, %v7428_v6  ;;  %v8282_v53 = vperm.slane %v2669_v59, %v7428_v6 }
 0x34e   : > { %12896 = vst [vmem:[#allocation30_spill] sm:$0xff] %v8255_v47  ;;  %v2585_v55 = vpop.permute.xlu0 %2584  ;;  %v8257_v5 = vpop.permute.xlu2 %995  ;;  %v2678_v54 = vrot.slane %v8255_v47, 4  ;;  %v1199_v60 = vrot.slane %v8215_v13, 4  ;;  %v1355_v28 = vrot.slane %v1342_v26, 4  ;;  %v1320_v59 = vsel %vm717_vm1, %v1319_v48, %v7835_v43 }
 0x34f   : > { %v2654_v45 = vrot.slane %v2585_v55, 4  ;;  %v2657_v14 = vsel %vm717_vm1, %v2585_v55, %v2656_v62  ;;  %v1187_v55 = vrot.slane %v8250_v15, 4  ;;  %v1331_v48 = vrot.slane %v7863_v33, 4 }
 0x350   : > { %v8266_v35 = vperm.slane %v2657_v14, %v7428_v6  ;;  %v1356_v43 = vsel %vm717_vm1, %v1355_v28, %v1330_v50 }
 0x351   : > { %v2655_v52 = vsel %vm717_vm1, %v2654_v45, %v8060_v31  ;;  %v1378_v31 = vsel %vm717_vm1, %v7875_v25, %v1377_v9  ;;  %v1180_v9 = vperm.slane %v1174_v44, %v7428_v6  ;;  %v8325_v44 = vperm.slane %v1356_v43, %v7436_v22 }
 0x352   : > { %12897 = vst [vmem:[#allocation31_spill] sm:$0xff] %v8266_v35  ;;  %v8286_v62 = vperm.slane %v2655_v52, %v7428_v6  ;;  %v2692_v1 = vrot.slane %v8266_v35, 4  ;;  %1258 = vrot.lane.b32.xlu1 %v8269_v16, %s7284_s21  ;;  %v1390_v52 = vsel %vm717_vm1, %v7896_v27, %v1389_v17  ;;  %v1386_v0 = vperm.slane %v1378_v31, %v7428_v6 }
 0x353   : > { %v1398_v33 = vperm.slane %v1390_v52, %v7428_v6  ;;  %v1332_v28 = vsel %vm717_vm1, %v1331_v48, %v7857_v24  ;;  %v1375_v17 = vrot.slane %v7875_v25, 4  ;;  %v1387_v43 = vrot.slane %v7896_v27, 4 }
 0x354   : > { %v8298_v45 = vpop.permute.xlu1 %1027  ;;  %1238 = vrot.lane.b32.xlu2 %v8272_v19, %s7281_s15  ;;  %1230 = vrot.lane.b32.xlu0 %v8279_v38, %s7284_s21  ;;  %v8306_v13 = vsel %vm717_vm1, %v2678_v54, %v8286_v62  ;;  %v8310_v14 = vsel %vm717_vm1, %v8282_v53, %v2692_v1  ;;  %v8319_v54 = vperm.slane %v1320_v59, %v7428_v6 }
 0x355   : > { %12898 = vst [vmem:[#allocation32_spill] sm:$0xff] %v8306_v13  ;;  %v1200_v1 = vsel %vm717_vm1, %v8199_v39, %v1199_v60  ;;  %v1413_v60 = vrot.slane %v1386_v0, 4  ;;  %v8346_v24 = vperm.slane %v1332_v28, %v7428_v6  ;;  %v1388_v13 = vsel %vm717_vm1, %v1387_v43, %v7848_v51 }
 0x356   : > { %12899 = vst [vmem:[#allocation33_spill] sm:$0xff] %v8310_v14  ;;  %v1000_v47 = vpop.permute.xlu0 %999  ;;  %v1020_v35 = vpop.permute.xlu2 %1019  ;;  %v1188_v14 = vsel %vm717_vm1, %v1180_v9, %v1187_v55  ;;  %v8334_v31 = vperm.slane %v1200_v1, %v7436_v22  ;;  %v1357_v55 = vrot.slane %v1330_v50, 4  ;;  %v1345_v59 = vrot.slane %v8319_v54, 4 }
 0x357   : > { %v8337_v39 = vperm.slane %v1188_v14, %v7436_v22  ;;  %v1414_v25 = vsel %vm717_vm1, %v1398_v33, %v1413_v60  ;;  %v1376_v14 = vsel %vm717_vm1, %v1375_v17, %v7861_v32  ;;  %v1051_v32 = vsel %vm1050_vm6, %v7873_v42, %v8257_v5 }
 0x358   : > { %v1358_v27 = vsel %vm717_vm1, %v1342_v26, %v1357_v55  ;;  %v1346_v1 = vsel %vm717_vm1, %v8346_v24, %v1345_v59  ;;  %v8357_v28 = vperm.slane %v1414_v25, %v7436_v22  ;;  %v8360_v60 = vperm.slane %v1376_v14, %v7428_v6 }
 0x359   : > { %v1053_v17 = vsel %vm1052_vm7, %v1051_v32, %v1000_v47  ;;  %v8369_v26 = vperm.slane %v1358_v27, %v7436_v22  ;;  %v8372_v51 = vperm.slane %v1346_v1, %v7436_v22  ;;  %v8375_v55 = vperm.slane %v1388_v13, %v7428_v6 }
 0x35a   : > { %1444 = vrot.lane.b32.xlu1 %v8325_v44, %s7284_s21  ;;  %v1411_v59 = vrot.slane %v1398_v33, 4  ;;  %v1185_v25 = vrot.slane %v1180_v9, 4  ;;  %v1129_v42 = vrot.slane %v8152_v30, 4  ;;  %v1157_v47 = vrot.slane %v8279_v38, 4 }
 0x35b   : > { %v1401_v13 = vrot.slane %v8360_v60, 4 }
 0x35c   : > { %v1004_v52 = vpop.permute.xlu1 %1003  ;;  %1266 = vrot.lane.b32.xlu0 %v8334_v31, %s7281_s15  ;;  %1250 = vrot.lane.b32.xlu2 %v8337_v39, %s7286_s23  ;;  %v1186_v30 = vsel %vm717_vm1, %v1185_v25, %v8250_v15  ;;  %v1412_v1 = vsel %vm717_vm1, %v1411_v59, %v1386_v0  ;;  %v1130_v32 = vsel %vm717_vm1, %v1129_v42, %v8143_v37 }
 0x35d   : > { %v1055_v43 = vsel %vm1054_vm8, %v1053_v17, %v1004_v52  ;;  %v1402_v27 = vsel %vm717_vm1, %v8375_v55, %v1401_v13  ;;  %v1158_v17 = vsel %vm717_vm1, 0.0, %v1157_v47  ;;  %v8409_v0 = vperm.slane %v1412_v1, %v7436_v22 }
 0x35e   : > { %v1036_v50 = vpop.permute.xlu0 %1035  ;;  %v1032_v48 = vpop.permute.xlu2 %1031  ;;  %v1057_v9 = vsel %vm1056_vm9, %v1055_v43, %v8139_v3  ;;  %v8402_v43 = vperm.slane %v1186_v30, %v7436_v22  ;;  %v8406_v15 = vperm.slane %v1402_v27, %v7436_v22  ;;  %v1155_v13 = vrot.slane %v8211_v58, 4 }
 0x360   : > { %v1156_v1 = vsel %vm717_vm1, 0.0, %v1155_v13  ;;  %v1211_v13 = vrot.slane %v8337_v39, 4 }
 0x362   : > { %1480 = vrot.lane.b32.xlu1 %v8357_v28, %s7281_s15 }
 0x364   : > { %v1040_v5 = vpop.permute.xlu1 %1039  ;;  %1452 = vrot.lane.b32.xlu0 %v8369_v26, %s7281_s15  ;;  %1436 = vrot.lane.b32.xlu2 %v8372_v51, %s7286_s23 }
 0x366   : > { %v1012_v33 = vpop.permute.xlu0 %1011  ;;  %v8387_v52 = vpop.permute.xlu2 %1669 }
 0x367   : > { %v1059_v14 = vsel %vm1058_vm10, %v1057_v9, %v1012_v33 }
 0x368   : > { %v1061_v38 = vsel %vm1060_vm11, %v1059_v14, %v8235_v46  ;;  %v8412_v46 = vperm.slane %v1130_v32, %v7436_v22 }
 0x369   : > { %v1063_v3 = vsel %vm1062_vm12, %v1061_v38, %v1020_v35  ;;  %v1209_v35 = vrot.slane %v8402_v43, 4  ;;  %v1343_v38 = vrot.slane %v8346_v24, 4  ;;  %v1159_v24 = vrot.slane %v8272_v19, 4 }
 0x36a   : > { %1071 = vst [vmem:[#allocation3 + $0x30] sm:$0xf] %v1063_v3  ;;  %1234 = vrot.lane.b32.xlu1 %v1158_v17, %s7280_s14  ;;  %v1153_v47 = vrot.slane %v8412_v46, 4  ;;  %v1213_v17 = vrot.slane %v8269_v16, 4 }
 0x36b   : > { %v1210_v30 = vsel %vm717_vm1, 0.0, %v1209_v35  ;;  %v1344_v3 = vsel %vm717_vm1, %v1343_v38, %v8319_v54  ;;  %v1399_v54 = vrot.slane %v8375_v55, 4  ;;  %v1369_v38 = vrot.slane %v8372_v51, 4 }
 0x36c   : > { %v8414_v37 = vpop.permute.xlu1 %1653  ;;  %1464 = vrot.lane.b32.xlu0 %v8406_v15, %s7286_s23  ;;  %1472 = vrot.lane.b32.xlu2 %v8409_v0, %s7284_s21  ;;  %v1154_v27 = vsel %vm717_vm1, 0.0, %v1153_v47 }
 0x36e   : > { %v1024_v59 = vpop.permute.xlu0 %1023  ;;  %v8421_v25 = vpop.permute.xlu2 %1681 }
 0x36f   : > { %v1064_v42 = vsel %vm1050_vm6, %v7890_v34, %v1024_v59  ;;  %v1214_v59 = vsel %vm717_vm1, 0.0, %v1213_v17 }
 0x370   : > { %v1065_v33 = vsel %vm1052_vm7, %v1064_v42, %v8298_v45  ;;  %v1215_v45 = vrot.slane %v8334_v31, 4  ;;  %v8453_v31 = vperm.slane %v1344_v3, %v7436_v22  ;;  %v1752_v3 = vrot.slane %v7881_v56, 4 }
 0x371   : > { %v1066_v9 = vsel %vm1054_vm8, %v1065_v33, %v1032_v48  ;;  %v1371_v33 = vrot.slane %v8325_v44, 4  ;;  %v1373_v44 = vrot.slane %v8369_v26, 4 }
 0x372   : > { %1246 = vrot.lane.b32.xlu1 %v1210_v30, %s7285_s22  ;;  %v1067_v14 = vsel %vm1056_vm9, %v1066_v9, %v1036_v50  ;;  %v1216_v35 = vsel %vm717_vm1, 0.0, %v1215_v45  ;;  %v1367_v19 = vrot.slane %v8453_v31, 4  ;;  %v1400_v9 = vsel %vm717_vm1, %v1399_v54, %v8360_v60 }
 0x373   : > { %v1068_v34 = vsel %vm1058_vm10, %v1067_v14, %v1040_v5  ;;  %v1212_v30 = vsel %vm717_vm1, 0.0, %v1211_v13  ;;  %v1372_v14 = vsel %vm717_vm1, 0.0, %v1371_v33  ;;  %v1750_v45 = vrot.slane %v7942_v2, 4 }
 0x374   : > { %v8437_v58 = vpop.permute.xlu1 %1689  ;;  %1218 = vrot.lane.b32.xlu0 %v1154_v27, %s7285_s22  ;;  %1226 = vrot.lane.b32.xlu2 %v1156_v1, %s7283_s20  ;;  %v1069_v50 = vsel %vm1060_vm11, %v1068_v34, %v8192_v49  ;;  %v1160_v49 = vsel %vm717_vm1, 0.0, %v1159_v24  ;;  %v1368_v55 = vsel %vm717_vm1, 0.0, %v1367_v19  ;;  %v8477_v27 = vperm.slane %v1400_v9, %v7436_v22 }
 0x375   : > { %v1370_v24 = vsel %vm717_vm1, 0.0, %v1369_v38  ;;  %v1751_v51 = vsel %vm717_vm1, %v1750_v45, %v7881_v56  ;;  %v1753_v17 = vsel %vm717_vm1, %v7942_v2, %v1752_v3  ;;  %v1429_v56 = vrot.slane %v8357_v28, 4 }
 0x376   : > { %v1048_v48 = vpop.permute.xlu0 %1047  ;;  %v8444_v32 = vpop.permute.xlu2 %2293  ;;  %v1423_v34 = vrot.slane %v8477_v27, 4  ;;  %v1427_v2 = vrot.slane %v8409_v0, 4  ;;  %v8517_v33 = vperm.slane %v1751_v51, %v7428_v6  ;;  %v1761_v9 = vperm.slane %v1753_v17, %v7428_v6 }
 0x377   : > { %v1070_v5 = vsel %vm1062_vm12, %v1069_v50, %v1048_v48  ;;  %v1764_v48 = vrot.slane %v7892_v8, 4  ;;  %v1374_v50 = vsel %vm717_vm1, 0.0, %v1373_v44  ;;  %v1430_v28 = vsel %vm717_vm1, 0.0, %v1429_v56 }
 0x378   : > { %1072 = vst [vmem:[#allocation3] sm:$0xf] %v1070_v5  ;;  %v1424_v5 = vsel %vm717_vm1, 0.0, %v1423_v34  ;;  %v1428_v0 = vsel %vm717_vm1, 0.0, %v1427_v2  ;;  %v1788_v34 = vrot.slane %v1761_v9, 4  ;;  %v1818_v38 = vrot.slane %v7971_v21, 4 }
 0x379   : > { %v1765_v26 = vsel %vm717_vm1, %v7920_v18, %v1764_v48  ;;  %v1776_v48 = vrot.slane %v8517_v33, 4  ;;  %v1960_v56 = vrot.slane %v7999_v29, 4 }
 0x37a   : > { %1270 = vrot.lane.b32.xlu1 %v1216_v35, %s7282_s16  ;;  %v1773_v54 = vperm.slane %v1765_v26, %v7428_v6  ;;  %v1819_v17 = vsel %vm717_vm1, %v1818_v38, %v7898_v57 }
 0x37c   : > { %v8459_v42 = vpop.permute.xlu1 %2301  ;;  %1242 = vrot.lane.b32.xlu0 %v1160_v49, %s7282_s16  ;;  %1262 = vrot.lane.b32.xlu2 %v1214_v59, %s7280_s14  ;;  %v1425_v49 = vrot.slane %v8406_v15, 4  ;;  %v1762_v59 = vrot.slane %v7920_v18, 4  ;;  %v1820_v15 = vrot.slane %v7898_v57, 4  ;;  %v1806_v18 = vrot.slane %v7912_v36, 4 }
 0x37d   : > { %v1786_v44 = vrot.slane %v1773_v54, 4 }
 0x37e   : > { %v8464_v16 = vpop.permute.xlu0 %1661  ;;  %v8466_v47 = vpop.permute.xlu2 %2329  ;;  %v1821_v45 = vsel %vm717_vm1, %v7971_v21, %v1820_v15 }
 0x37f   : > { %v1829_v21 = vperm.slane %v1821_v45, %v7428_v6  ;;  %v2028_v45 = vrot.slane %v8033_v41, 4 }
 0x381   : > { %v1842_v15 = vrot.slane %v1829_v21, 4 }
 0x382   : > { %1432 = vrot.lane.b32.xlu1 %v1368_v55, %s7285_s22  ;;  %v1808_v55 = vrot.slane %v7918_v23, 4 }
 0x384   : > { %v8479_v1 = vpop.permute.xlu1 %2337  ;;  %1254 = vrot.lane.b32.xlu0 %v1212_v30, %s7283_s20  ;;  %1448 = vrot.lane.b32.xlu2 %v1372_v14, %s7280_s14  ;;  %v1426_v30 = vsel %vm717_vm1, 0.0, %v1425_v49  ;;  %v1763_v14 = vsel %vm717_vm1, %v1762_v59, %v7892_v8  ;;  %v1807_v8 = vsel %vm717_vm1, %v1806_v18, %v7918_v23  ;;  %v1789_v49 = vsel %vm717_vm1, %v1773_v54, %v1788_v34 }
 0x385   : > { %v8542_v26 = vperm.slane %v1763_v14, %v7428_v6  ;;  %v8557_v59 = vperm.slane %v1807_v8, %v7428_v6  ;;  %v8570_v57 = vperm.slane %v1789_v49, %v7436_v22 }
 0x386   : > { %v8484_v39 = vpop.permute.xlu0 %1697  ;;  %v8486_v60 = vpop.permute.xlu2 %1657 }
 0x387   : > { %v1777_v23 = vsel %vm717_vm1, %v8542_v26, %v1776_v48  ;;  %v1832_v29 = vrot.slane %v8557_v59, 4 }
 0x388   : > { %v8573_v54 = vperm.slane %v1777_v23, %v7436_v22 }
 0x38a   : > { %1456 = vrot.lane.b32.xlu1 %v1374_v50, %s7282_s16  ;;  %v1809_v50 = vsel %vm717_vm1, %v7912_v36, %v1808_v55  ;;  %v8565_v55 = vperm.slane %v1819_v17, %v7428_v6 }
 0x38b   : > { %v1817_v36 = vperm.slane %v1809_v50, %v7428_v6 }
 0x38c   : > { %v8503_v35 = vpop.permute.xlu1 %1665  ;;  %1460 = vrot.lane.b32.xlu2 %v1424_v5, %s7285_s22  ;;  %1440 = vrot.lane.b32.xlu0 %v1370_v24, %s7283_s20  ;;  %v1787_v5 = vsel %vm717_vm1, %v1786_v44, %v1761_v9  ;;  %v1972_v9 = vrot.slane %v7944_v7, 4 }
 0x38d   : > { %v8561_v2 = vperm.slane %v1787_v5, %v7436_v22  ;;  %v1844_v18 = vrot.slane %v1817_v36, 4 }
 0x38e   : > { %v8510_v19 = vpop.permute.xlu0 %2309  ;;  %v8512_v13 = vpop.permute.xlu2 %1693  ;;  %v1973_v7 = vsel %vm717_vm1, %v8058_v10, %v1972_v9  ;;  %v1843_v10 = vsel %vm717_vm1, %v1842_v15, %v1817_v36 }
 0x38f   : > { %v1845_v44 = vsel %vm717_vm1, %v1829_v21, %v1844_v18  ;;  %v1981_v48 = vperm.slane %v1973_v7, %v7428_v6  ;;  %v2016_v21 = vrot.slane %v7937_v40, 4 }
 0x390   : > { %v8601_v5 = vperm.slane %v1845_v44, %v7436_v22 }
 0x392   : > { %1468 = vrot.lane.b32.xlu1 %v1426_v30, %s7283_s20  ;;  %v1961_v30 = vsel %vm717_vm1, %v7963_v11, %v1960_v56  ;;  %v1833_v11 = vsel %vm717_vm1, %v8565_v55, %v1832_v29  ;;  %v12900_v56 = vld [vmem:[#allocation8_spill] sm:$0xff]  ;;  %v1984_v29 = vrot.slane %v8082_v61, 4 }
 0x393   : > { %v1969_v38 = vperm.slane %v1961_v30, %v7428_v6  ;;  %v8611_v49 = vperm.slane %v1833_v11, %v7436_v22  ;;  %v2029_v9 = vsel %vm717_vm1, %v12900_v56, %v2028_v45  ;;  %v2026_v15 = vrot.slane %v12900_v56, 4 }
 0x394   : > { %v8535_v3 = vpop.permute.xlu1 %1677  ;;  %1484 = vrot.lane.b32.xlu2 %v1430_v28, %s7282_s16  ;;  %1476 = vrot.lane.b32.xlu0 %v1428_v0, %s7280_s14  ;;  %v2014_v28 = vrot.slane %v7973_v12, 4  ;;  %v2037_v44 = vperm.slane %v2029_v9, %v7428_v6  ;;  %v1985_v45 = vsel %vm717_vm1, %v8076_v63, %v1984_v29 }
 0x395   : > { %v1996_v23 = vrot.slane %v1969_v38, 4  ;;  %v8660_v63 = vperm.slane %v1985_v45, %v7436_v22 }
 0x396   : > { %v8546_v24 = vpop.permute.xlu0 %2321  ;;  %v8548_v51 = vpop.permute.xlu2 %2305  ;;  %v2015_v17 = vsel %vm717_vm1, %v2014_v28, %v7937_v40 }
 0x397   : > { %v1997_v30 = vsel %vm717_vm1, %v1981_v48, %v1996_v23  ;;  %v8632_v7 = vperm.slane %v2015_v17, %v7428_v6  ;;  %v12902_v17 = vld [vmem:[#allocation13_spill] sm:$0xff]  ;;  %v12903_v23 = vld [vmem:[#allocation10_spill] sm:$0xff] }
 0x398   : > { %v1711_v56 = vsel %vm1050_vm6, %v12903_v23, %v8535_v3 }
 0x39a   : > { %1875 = vrot.lane.b32.xlu1 %v8561_v2, %s7284_s21 }
 0x39c   : > { %v8580_v14 = vpop.permute.xlu1 %1701  ;;  %1883 = vrot.lane.b32.xlu0 %v8570_v57, %s7281_s15  ;;  %1867 = vrot.lane.b32.xlu2 %v8573_v54, %s7286_s23 }
 0x39e   : > { %v1650_v0 = vpop.permute.xlu0 %1649  ;;  %v8588_v34 = vpop.permute.xlu2 %2317 }
 0x39f   : > { %v1704_v50 = vsel %vm1050_vm6, %v8050_v20, %v1650_v0  ;;  %v8614_v20 = vperm.slane %v1843_v10, %v7436_v22 }
 0x3a0   : > { %v1705_v8 = vsel %vm1052_vm7, %v1704_v50, %v8414_v37  ;;  %v8648_v50 = vperm.slane %v1997_v30, %v7436_v22 }
 0x3a1   : > { %v1706_v36 = vsel %vm1054_vm8, %v1705_v8, %v8486_v60  ;;  %v1994_v60 = vrot.slane %v1981_v48, 4 }
 0x3a2   : > { %1911 = vrot.lane.b32.xlu1 %v8601_v5, %s7281_s15  ;;  %v1707_v37 = vsel %vm1056_vm9, %v1706_v36, %v8464_v16  ;;  %v2017_v16 = vsel %vm717_vm1, %v7973_v12, %v2016_v21  ;;  %v2386_v12 = vrot.slane %v8090_v4, 4  ;;  %v2050_v36 = vrot.slane %v2037_v44, 4 }
 0x3a3   : > { %v1708_v40 = vsel %vm1058_vm10, %v1707_v37, %v8503_v35  ;;  %v2027_v35 = vsel %vm717_vm1, %v2026_v15, %v8033_v41  ;;  %v1995_v10 = vsel %vm717_vm1, %v1994_v60, %v1969_v38  ;;  %v2025_v48 = vperm.slane %v2017_v16, %v7428_v6  ;;  %v12904_v60 = vld [vmem:[#allocation21_spill] sm:$0xff]  ;;  %v12905_v16 = vld [vmem:[#allocation12_spill] sm:$0xff] }
 0x3a4   : > { %v2290_v18 = vpop.permute.xlu1 %2289  ;;  %1895 = vrot.lane.b32.xlu0 %v8611_v49, %s7286_s23  ;;  %1903 = vrot.lane.b32.xlu2 %v8614_v20, %s7284_s21  ;;  %v1709_v0 = vsel %vm1060_vm11, %v1708_v40, %v8387_v52  ;;  %v8651_v8 = vperm.slane %v2027_v35, %v7428_v6  ;;  %v12901_v52 = vld [vmem:[#allocation9_spill] sm:$0xff]  ;;  %v8657_v4 = vperm.slane %v1995_v10, %v7436_v22  ;;  %v2040_v38 = vrot.slane %v8632_v7, 4 }
 0x3a5   : > { %v2398_v21 = vrot.slane %v12901_v52, 4  ;;  %v2387_v37 = vsel %vm717_vm1, %v12902_v17, %v2386_v12  ;;  %v2052_v9 = vrot.slane %v2025_v48, 4  ;;  %v2440_v29 = vrot.slane %v12905_v16, 4  ;;  %v12907_v17 = vld [vmem:[#allocation11_spill] sm:$0xff] }
 0x3a6   : > { %v1674_v28 = vpop.permute.xlu0 %1673  ;;  %v8639_v11 = vpop.permute.xlu2 %2341  ;;  %v2041_v30 = vsel %vm717_vm1, %v8651_v8, %v2040_v38  ;;  %v2395_v35 = vperm.slane %v2387_v37, %v7428_v6  ;;  %v2051_v52 = vsel %vm717_vm1, %v2050_v36, %v2025_v48  ;;  %v12908_v36 = vld [vmem:[#allocation15_spill] sm:$0xff] }
 0x3a7   : > { %v1710_v61 = vsel %vm1062_vm12, %v1709_v0, %v1674_v28  ;;  %v2399_v40 = vsel %vm717_vm1, %v12904_v60, %v2398_v21  ;;  %v1712_v28 = vsel %vm1052_vm7, %v1711_v56, %v8421_v25  ;;  %v2053_v12 = vsel %vm717_vm1, %v2037_v44, %v2052_v9 }
 0x3a8   : > { %v1720_v41 = vrot.slane %v1710_v61, 4  ;;  %v12906_v61 = vld [vmem:[#allocation19_spill] sm:$0xff]  ;;  %v2407_v45 = vperm.slane %v2399_v40, %v7428_v6  ;;  %v8692_v38 = vperm.slane %v2041_v30, %v7436_v22  ;;  %v2442_v25 = vrot.slane %v12907_v17, 4  ;;  %v12909_v40 = vld [vmem:[#allocation14_spill] sm:$0xff] }
 0x3a9   : > { %v2454_v10 = vrot.slane %v12906_v61, 4  ;;  %v2441_v37 = vsel %vm717_vm1, %v2440_v29, %v12907_v17  ;;  %v2422_v23 = vrot.slane %v2395_v35, 4  ;;  %v8707_v48 = vperm.slane %v2051_v52, %v7436_v22 }
 0x3aa   : > { %1724 = vst [vmem:[#allocation3 + $0x18] sm:$0xf0] %v1720_v41  ;;  %2091 = vrot.lane.b32.xlu1 %v8648_v50, %s7281_s15  ;;  %v2420_v60 = vrot.slane %v2407_v45, 4 }
 0x3ab   : > { %v2455_v9 = vsel %vm717_vm1, %v12908_v36, %v2454_v10 }
 0x3ac   : > { %v8670_v15 = vpop.permute.xlu1 %2313  ;;  %2083 = vrot.lane.b32.xlu2 %v8657_v4, %s7284_s21  ;;  %2075 = vrot.lane.b32.xlu0 %v8660_v63, %s7286_s23  ;;  %v2463_v52 = vperm.slane %v2455_v9, %v7428_v6 }
 0x3ae   : > { %v1686_v3 = vpop.permute.xlu0 %1685  ;;  %v8682_v0 = vpop.permute.xlu2 %1238 }
 0x3af   : > { %v1713_v41 = vsel %vm1054_vm8, %v1712_v28, %v1686_v3  ;;  %v2443_v28 = vsel %vm717_vm1, %v12905_v16, %v2442_v25  ;;  %v12911_v16 = vld [vmem:[#allocation20_spill] sm:$0xff] }
 0x3b0   : > { %v1714_v21 = vsel %vm1056_vm9, %v1713_v41, %v8437_v58  ;;  %v8704_v58 = vperm.slane %v2053_v12, %v7436_v22  ;;  %v12910_v12 = vld [vmem:[#allocation23_spill] sm:$0xff]  ;;  %v8725_v41 = vperm.slane %v2441_v37, %v7428_v6  ;;  %v2351_v25 = vsel %vm1050_vm6, %v12911_v16, %v8588_v34 }
 0x3b1   : > { %v1715_v44 = vsel %vm1058_vm10, %v1714_v21, %v8512_v13  ;;  %v2344_v13 = vsel %vm1050_vm6, %v12909_v40, %v2290_v18  ;;  %v2410_v10 = vrot.slane %v12910_v12, 4  ;;  %v2423_v18 = vsel %vm717_vm1, %v2407_v45, %v2422_v23  ;;  %v12912_v23 = vld [vmem:[#allocation22_spill] sm:$0xff] }
 0x3b2   : > { %v1716_v56 = vsel %vm1060_vm11, %v1715_v44, %v8484_v39  ;;  %2103 = vrot.lane.b32.xlu1 %v8692_v38, %s7286_s23  ;;  %v2452_v39 = vrot.slane %v12908_v36, 4  ;;  %v2345_v17 = vsel %vm1052_vm7, %v2344_v13, %v8444_v32  ;;  %v2421_v37 = vsel %vm717_vm1, %v2420_v60, %v2395_v35  ;;  %v12914_v13 = vld [vmem:[#allocation18_spill] sm:$0xff] }
 0x3b3   : > { %v1717_v29 = vsel %vm1062_vm12, %v1716_v56, %v8580_v14  ;;  %v12913_v56 = vld [vmem:[#allocation25_spill] sm:$0xff]  ;;  %v8745_v32 = vperm.slane %v2423_v18, %v7436_v22  ;;  %v2451_v40 = vperm.slane %v2443_v28, %v7428_v6  ;;  %v2352_v60 = vsel %vm1052_vm7, %v2351_v25, %v8546_v24 }
 0x3b4   : > { %v1721_v30 = vrot.slane %v1717_v29, 4  ;;  %v2326_v3 = vpop.permute.xlu1 %2325  ;;  %2119 = vrot.lane.b32.xlu2 %v8704_v58, %s7281_s15  ;;  %2111 = vrot.lane.b32.xlu0 %v8707_v48, %s7284_s21  ;;  %v2453_v14 = vsel %vm717_vm1, %v2452_v39, %v12906_v61  ;;  %v2411_v61 = vsel %vm717_vm1, %v12912_v23, %v2410_v10  ;;  %v2612_v36 = vrot.slane %v12913_v56, 4  ;;  %v12915_v10 = vld [vmem:[#allocation24_spill] sm:$0xff] }
 0x3b5   : > { %v2600_v29 = vrot.slane %v12914_v13, 4  ;;  %v8750_v34 = vperm.slane %v2453_v14, %v7428_v6  ;;  %v2466_v28 = vrot.slane %v8725_v41, 4  ;;  %v2476_v12 = vrot.slane %v2463_v52, 4 }
 0x3b6   : > { %1725 = vst [vmem:[#allocation3 + $0x10] sm:$0xf0] %v1721_v30  ;;  %v2298_v21 = vpop.permute.xlu0 %2297  ;;  %v8732_v44 = vpop.permute.xlu2 %1250  ;;  %v8764_v30 = vperm.slane %v2411_v61, %v7436_v22  ;;  %v2478_v14 = vrot.slane %v2451_v40, 4 }
 0x3b7   : > { %v2346_v45 = vsel %vm1054_vm8, %v2345_v17, %v2298_v21  ;;  %v2467_v21 = vsel %vm717_vm1, %v8750_v34, %v2466_v28  ;;  %v2477_v61 = vsel %vm717_vm1, %v2476_v12, %v2451_v40  ;;  %v12917_v40 = vld [vmem:[#allocation28_spill] sm:$0xff] }
 0x3b8   : > { %v2347_v9 = vsel %vm1056_vm9, %v2346_v45, %v8459_v42  ;;  %v8761_v42 = vperm.slane %v2421_v37, %v7436_v22  ;;  %v2479_v23 = vsel %vm717_vm1, %v2463_v52, %v2478_v14  ;;  %v8804_v52 = vperm.slane %v2477_v61, %v7436_v22 }
 0x3b9   : > { %v2348_v35 = vsel %vm1058_vm10, %v2347_v9, %v8548_v51  ;;  %v2353_v51 = vsel %vm1054_vm8, %v2352_v60, %v2326_v3  ;;  %v12916_v3 = vld [vmem:[#allocation16_spill] sm:$0xff]  ;;  %v8801_v13 = vperm.slane %v2479_v23, %v7436_v22  ;;  %v12918_v60 = vld [vmem:[#allocation27_spill] sm:$0xff] }
 0x3ba   : > { %v2349_v39 = vsel %vm1060_vm11, %v2348_v35, %v8510_v19  ;;  %2517 = vrot.lane.b32.xlu1 %v8745_v32, %s7281_s15  ;;  %v2613_v19 = vsel %vm717_vm1, %v12915_v10, %v2612_v36  ;;  %v2601_v17 = vsel %vm717_vm1, %v12916_v3, %v2600_v29  ;;  %v2354_v16 = vsel %vm1056_vm9, %v2353_v51, %v8466_v47 }
 0x3bb   : > { %v2350_v24 = vsel %vm1062_vm12, %v2349_v39, %v8670_v15  ;;  %v2621_v45 = vperm.slane %v2613_v19, %v7428_v6  ;;  %v8793_v36 = vperm.slane %v2467_v21, %v7436_v22  ;;  %v2609_v9 = vperm.slane %v2601_v17, %v7428_v6 }
 0x3bc   : > { %2358 = vst [vmem:[#allocation3 + $0x8] sm:$0xf] %v2350_v24  ;;  %v8772_v18 = vpop.permute.xlu1 %1222  ;;  %2509 = vrot.lane.b32.xlu2 %v8761_v42, %s7284_s21  ;;  %2501 = vrot.lane.b32.xlu0 %v8764_v30, %s7286_s23  ;;  %v2690_v21 = vrot.slane %v8282_v53, 4  ;;  %v2680_v3 = vrot.slane %v8286_v62, 4  ;;  %v1774_v17 = vrot.slane %v8542_v26, 4  ;;  %v1800_v62 = vrot.slane %v8573_v54, 4 }
 0x3bd   : > { %v2634_v29 = vrot.slane %v2621_v45, 4  ;;  %v12920_v26 = vld [vmem:[#allocation30_spill] sm:$0xff] }
 0x3be   : > { %v2334_v15 = vpop.permute.xlu0 %2333  ;;  %v8784_v25 = vpop.permute.xlu2 %1436  ;;  %v1775_v53 = vsel %vm717_vm1, %v1774_v17, %v8517_v33  ;;  %v2681_v61 = vsel %vm717_vm1, %v12920_v26, %v2680_v3  ;;  %v1830_v33 = vrot.slane %v8565_v55, 4  ;;  %v2038_v17 = vrot.slane %v8651_v8, 4 }
 0x3bf   : > { %v2355_v37 = vsel %vm1058_vm10, %v2354_v16, %v2334_v15  ;;  %v2635_v24 = vsel %vm717_vm1, %v2634_v29, %v2609_v9  ;;  %v12919_v16 = vld [vmem:[#allocation31_spill] sm:$0xff] }
 0x3c0   : > { %v2356_v56 = vsel %vm1060_vm11, %v2355_v37, %v8479_v1  ;;  %v2624_v1 = vrot.slane %v12917_v40, 4  ;;  %v8830_v14 = vperm.slane %v2635_v24, %v7436_v22  ;;  %v1801_v40 = vsel %vm717_vm1, 0.0, %v1800_v62 }
 0x3c1   : > { %v2357_v47 = vsel %vm1062_vm12, %v2356_v56, %v8639_v11  ;;  %v2636_v11 = vrot.slane %v2609_v9, 4  ;;  %v8854_v9 = vperm.slane %v1775_v53, %v7436_v22  ;;  %v1831_v55 = vsel %vm717_vm1, %v1830_v33, %v8557_v59 }
 0x3c2   : > { %2359 = vst [vmem:[#allocation3 + $0x20] sm:$0xf] %v2357_v47  ;;  %2529 = vrot.lane.b32.xlu1 %v8793_v36, %s7286_s23  ;;  %v2625_v39 = vsel %vm717_vm1, %v12918_v60, %v2624_v1  ;;  %v8859_v47 = vperm.slane %v2681_v61, %v7436_v22  ;;  %v1858_v60 = vrot.slane %v8614_v20, 4  ;;  %v8882_v3 = vperm.slane %v1831_v55, %v7436_v22 }
 0x3c3   : > { %v2637_v51 = vsel %vm717_vm1, %v2621_v45, %v2636_v11  ;;  %v8822_v10 = vperm.slane %v2625_v39, %v7436_v22  ;;  %v2691_v45 = vsel %vm717_vm1, %v2690_v21, %v12919_v16  ;;  %v1798_v1 = vrot.slane %v8854_v9, 4 }
 0x3c4   : > { %v8807_v35 = vpop.permute.xlu1 %1258  ;;  %2545 = vrot.lane.b32.xlu2 %v8801_v13, %s7281_s15  ;;  %2537 = vrot.lane.b32.xlu0 %v8804_v52, %s7284_s21  ;;  %v8827_v19 = vperm.slane %v2637_v51, %v7436_v22  ;;  %v8851_v56 = vperm.slane %v2691_v45, %v7436_v22  ;;  %v1802_v39 = vrot.slane %v8561_v2, 4  ;;  %v1859_v24 = vsel %vm717_vm1, 0.0, %v1858_v60 }
 0x3c5   : > { %v1799_v51 = vsel %vm717_vm1, 0.0, %v1798_v1  ;;  %v1804_v59 = vrot.slane %v8570_v57, 4  ;;  %v2010_v45 = vrot.slane %v8657_v4, 4  ;;  %v1854_v53 = vrot.slane %v8882_v3, 4 }
 0x3c6   : > { %v8815_v28 = vpop.permute.xlu0 %1230  ;;  %v8817_v12 = vpop.permute.xlu2 %1472  ;;  %v1803_v21 = vsel %vm717_vm1, 0.0, %v1802_v39  ;;  %v2039_v62 = vsel %vm717_vm1, %v2038_v17, %v8632_v7  ;;  %v1856_v4 = vrot.slane %v8611_v49, 4  ;;  %v1860_v39 = vrot.slane %v8601_v5, 4  ;;  %v12921_v5 = vld [vmem:[#allocation17_spill] sm:$0xff] }
 0x3c7   : > { %v1805_v8 = vsel %vm717_vm1, 0.0, %v1804_v59  ;;  %v2011_v26 = vsel %vm717_vm1, 0.0, %v2010_v45  ;;  %v1855_v61 = vsel %vm717_vm1, 0.0, %v1854_v53  ;;  %v8901_v57 = vperm.slane %v2039_v62, %v7436_v22 }
 0x3c8   : > { %v8924_v59 = vperm.slane %v12921_v5, %v7436_v22 }
 0x3c9   : > { %v2062_v60 = vrot.slane %v8901_v57, 4 }
 0x3ca   : > { %2715 = vrot.lane.b32.xlu1 %v8822_v10, %s7286_s23 }
 0x3cc   : > { %v8835_v15 = vpop.permute.xlu1 %1444  ;;  %2731 = vrot.lane.b32.xlu2 %v8827_v19, %s7281_s15  ;;  %2723 = vrot.lane.b32.xlu0 %v8830_v14, %s7284_s21 }
 0x3ce   : > { %v8843_v37 = vpop.permute.xlu0 %1266  ;;  %v1227_v23 = vpop.permute.xlu2 %1226 }
 0x3d2   : > { %2751 = vrot.lane.b32.xlu1 %v8851_v56, %s7284_s21 }
 0x3d4   : > { %v8863_v54 = vpop.permute.xlu1 %1480  ;;  %1871 = vrot.lane.b32.xlu0 %v1801_v40, %s7283_s20  ;;  %2743 = vrot.lane.b32.xlu2 %v8859_v47, %s7286_s23 }
 0x3d6   : > { %v8869_v29 = vpop.permute.xlu0 %1452  ;;  %v8871_v11 = vpop.permute.xlu2 %1262 }
 0x3da   : > { %1863 = vrot.lane.b32.xlu1 %v1799_v51, %s7285_s22 }
 0x3dc   : > { %v1235_v16 = vpop.permute.xlu1 %1234  ;;  %1907 = vrot.lane.b32.xlu0 %v1859_v24, %s7280_s14  ;;  %1879 = vrot.lane.b32.xlu2 %v1803_v21, %s7280_s14  ;;  %v1857_v24 = vsel %vm717_vm1, 0.0, %v1856_v4  ;;  %v2063_v21 = vsel %vm717_vm1, 0.0, %v2062_v60 }
 0x3de   : > { %v8888_v2 = vpop.permute.xlu0 %1464  ;;  %v8890_v20 = vpop.permute.xlu2 %1448 }
 0x3e2   : > { %1887 = vrot.lane.b32.xlu1 %v1805_v8, %s7282_s16  ;;  %v2006_v8 = vrot.slane %v8924_v59, 4 }
 0x3e4   : > { %v1247_v40 = vpop.permute.xlu1 %1246  ;;  %2087 = vrot.lane.b32.xlu0 %v2011_v26, %s7280_s14  ;;  %1891 = vrot.lane.b32.xlu2 %v1855_v61, %s7285_s22 }
 0x3e6   : > { %v1219_v33 = vpop.permute.xlu0 %1218  ;;  %v8906_v7 = vpop.permute.xlu2 %1460 }
 0x3e7   : > { %v1273_v1 = vsel %vm1050_vm6, %v8412_v46, %v1219_v33  ;;  %v1861_v46 = vsel %vm717_vm1, 0.0, %v1860_v39  ;;  %v2464_v33 = vrot.slane %v8750_v34, 4 }
 0x3e8   : > { %v1274_v55 = vsel %vm1052_vm7, %v1273_v1, %v8772_v18 }
 0x3e9   : > { %v1275_v51 = vsel %vm1054_vm8, %v1274_v55, %v1227_v23  ;;  %v2008_v23 = vrot.slane %v8660_v63, 4  ;;  %v1280_v63 = vsel %vm1050_vm6, %v8402_v43, %v1247_v40  ;;  %v2012_v43 = vrot.slane %v8648_v50, 4 }
 0x3ea   : > { %1899 = vrot.lane.b32.xlu1 %v1857_v24, %s7283_s20  ;;  %v1276_v49 = vsel %vm1056_vm9, %v1275_v51, %v8815_v28  ;;  %v1281_v39 = vsel %vm1052_vm7, %v1280_v63, %v8732_v44  ;;  %v2436_v51 = vrot.slane %v8761_v42, 4  ;;  %v2465_v24 = vsel %vm717_vm1, %v2464_v33, %v8725_v41 }
 0x3eb   : > { %v1277_v17 = vsel %vm1058_vm10, %v1276_v49, %v1235_v16  ;;  %v2068_v16 = vrot.slane %v8704_v58, 4  ;;  %v2009_v61 = vsel %vm717_vm1, 0.0, %v2008_v23  ;;  %v2066_v58 = vrot.slane %v8707_v48, 4 }
 0x3ec   : > { %v1271_v18 = vpop.permute.xlu1 %1270  ;;  %2099 = vrot.lane.b32.xlu0 %v2063_v21, %s7285_s22  ;;  %1915 = vrot.lane.b32.xlu2 %v1861_v46, %s7282_s16  ;;  %v1278_v28 = vsel %vm1060_vm11, %v1277_v17, %v8682_v0  ;;  %v2007_v0 = vsel %vm717_vm1, 0.0, %v2006_v8  ;;  %v2013_v50 = vsel %vm717_vm1, 0.0, %v2012_v43  ;;  %v2437_v21 = vsel %vm717_vm1, 0.0, %v2436_v51  ;;  %v12923_v43 = vld [vmem:[#allocation29_spill] sm:$0xff] }
 0x3ed   : > { %v2069_v4 = vsel %vm717_vm1, 0.0, %v2068_v16  ;;  %v2067_v49 = vsel %vm717_vm1, 0.0, %v2066_v58  ;;  %v8969_v41 = vperm.slane %v2465_v24, %v7436_v22  ;;  %v2438_v24 = vrot.slane %v8745_v32, 4 }
 0x3ee   : > { %v1243_v45 = vpop.permute.xlu0 %1242  ;;  %v8931_v53 = vpop.permute.xlu2 %1484 }
 0x3ef   : > { %v1279_v62 = vsel %vm1062_vm12, %v1278_v28, %v1243_v45  ;;  %v2488_v23 = vrot.slane %v8969_v41, 4  ;;  %v2064_v45 = vrot.slane %v8692_v38, 4 }
 0x3f0   : > { %v1289_v26 = vrot.slane %v1279_v62, 4 }
 0x3f1   : > { %v2489_v38 = vsel %vm717_vm1, 0.0, %v2488_v23 }
 0x3f2   : > { %1293 = vst [vmem:[#allocation3 + $0x30] sm:$0xf0] %v1289_v26  ;;  %2079 = vrot.lane.b32.xlu1 %v2009_v61, %s7283_s20  ;;  %v12922_v26 = vld [vmem:[#allocation26_spill] sm:$0xff] }
 0x3f3   : > { %v8997_v61 = vperm.slane %v12922_v26, %v7436_v22 }
 0x3f4   : > { %v1433_v1 = vpop.permute.xlu1 %1432  ;;  %2123 = vrot.lane.b32.xlu0 %v2069_v4, %s7282_s16  ;;  %2071 = vrot.lane.b32.xlu2 %v2007_v0, %s7285_s22 }
 0x3f5   : > { %v1487_v42 = vsel %vm1050_vm6, %v8453_v31, %v1433_v1  ;;  %v2494_v1 = vrot.slane %v8801_v13, 4  ;;  %v9022_v13 = vperm.slane %v12923_v43, %v7436_v22 }
 0x3f6   : > { %v1255_v60 = vpop.permute.xlu0 %1254  ;;  %v8948_v55 = vpop.permute.xlu2 %1867  ;;  %v1488_v31 = vsel %vm1052_vm7, %v1487_v42, %v8784_v25 }
 0x3f7   : > { %v1282_v40 = vsel %vm1054_vm8, %v1281_v39, %v1255_v60 }
 0x3f8   : > { %v1283_v34 = vsel %vm1056_vm9, %v1282_v40, %v8807_v35 }
 0x3f9   : > { %v1284_v48 = vsel %vm1058_vm10, %v1283_v34, %v8871_v11  ;;  %v2646_v34 = vrot.slane %v9022_v13, 4 }
 0x3fa   : > { %v1285_v44 = vsel %vm1060_vm11, %v1284_v48, %v8843_v37  ;;  %2115 = vrot.lane.b32.xlu1 %v2067_v49, %s7280_s14  ;;  %v2434_v37 = vrot.slane %v8764_v30, 4  ;;  %v1494_v30 = vsel %vm1050_vm6, %v8477_v27, %v8906_v7  ;;  %v2492_v7 = vrot.slane %v8804_v52, 4  ;;  %v12924_v49 = vld [vmem:[#allocation32_spill] sm:$0xff] }
 0x3fb   : > { %v1286_v35 = vsel %vm1062_vm12, %v1285_v44, %v1271_v18  ;;  %v9038_v44 = vperm.slane %v12924_v49, %v7436_v22 }
 0x3fc   : > { %v1290_v11 = vrot.slane %v1286_v35, 4  ;;  %v1457_v46 = vpop.permute.xlu1 %1456  ;;  %2513 = vrot.lane.b32.xlu0 %v2437_v21, %s7280_s14  ;;  %2095 = vrot.lane.b32.xlu2 %v2013_v50, %s7282_s16  ;;  %v2435_v25 = vsel %vm717_vm1, 0.0, %v2434_v37  ;;  %v2493_v52 = vsel %vm717_vm1, 0.0, %v2492_v7  ;;  %v2647_v50 = vsel %vm717_vm1, 0.0, %v2646_v34  ;;  %v657_v7 = vld [vmem:[%s12711_s8] sm:$0xff] }
 0x3fd   : > { %v2702_v32 = vrot.slane %v9038_v44, 4 }
 0x3fe   : > { %1294 = vst [vmem:[#allocation3] sm:$0xf0] %v1290_v11  ;;  %v1441_v17 = vpop.permute.xlu0 %1440  ;;  %v8976_v5 = vpop.permute.xlu2 %1903  ;;  %v2652_v11 = vrot.slane %v8827_v19, 4 }
 0x3ff   : > { %v1489_v18 = vsel %vm1054_vm8, %v1488_v31, %v1441_v17  ;;  %v2703_v37 = vsel %vm717_vm1, 0.0, %v2702_v32  ;;  %v12925_v17 = vld [vmem:[#allocation33_spill] sm:$0xff] }
 0x400   : > { %v1490_v28 = vsel %vm1056_vm9, %v1489_v18, %v8835_v15  ;;  %v2065_v15 = vsel %vm717_vm1, 0.0, %v2064_v45  ;;  %v2701_v31 = vperm.slane %v12925_v17, %v7436_v22  ;;  %v2653_v18 = vsel %vm717_vm1, 0.0, %v2652_v11 }
 0x401   : > { %v1491_v62 = vsel %vm1058_vm10, %v1490_v28, %v8890_v20  ;;  %v1495_v20 = vsel %vm1052_vm7, %v1494_v30, %v8888_v2  ;;  %v2432_v2 = vrot.slane %v8997_v61, 4  ;;  %v2648_v30 = vrot.slane %v8822_v10, 4 }
 0x402   : > { %v1492_v16 = vsel %vm1060_vm11, %v1491_v62, %v8869_v29  ;;  %2505 = vrot.lane.b32.xlu1 %v2435_v25, %s7283_s20  ;;  %v2708_v19 = vrot.slane %v2701_v31, 4  ;;  %v2704_v62 = vrot.slane %v8859_v47, 4  ;;  %v2706_v10 = vrot.slane %v8851_v56, 4 }
 0x403   : > { %v1493_v8 = vsel %vm1062_vm12, %v1492_v16, %v1457_v46  ;;  %v2433_v39 = vsel %vm717_vm1, 0.0, %v2432_v2  ;;  %v2490_v46 = vrot.slane %v8793_v36, 4  ;;  %v2649_v16 = vsel %vm717_vm1, 0.0, %v2648_v30 }
 0x404   : > { %1501 = vst [vmem:[#allocation3 + $0x18] sm:$0xf] %v1493_v8  ;;  %v1469_v27 = vpop.permute.xlu1 %1468  ;;  %2525 = vrot.lane.b32.xlu0 %v2489_v38, %s7285_s22  ;;  %2107 = vrot.lane.b32.xlu2 %v2065_v15, %s7283_s20  ;;  %v2709_v25 = vsel %vm717_vm1, 0.0, %v2708_v19  ;;  %v2705_v8 = vsel %vm717_vm1, 0.0, %v2704_v62  ;;  %v2707_v47 = vsel %vm717_vm1, 0.0, %v2706_v10 }
 0x405   : > { %v1496_v29 = vsel %vm1054_vm8, %v1495_v20, %v1469_v27  ;;  %v2491_v23 = vsel %vm717_vm1, 0.0, %v2490_v46 }
 0x406   : > { %v1477_v63 = vpop.permute.xlu0 %1476  ;;  %v1497_v4 = vsel %vm1056_vm9, %v1496_v29, %v8817_v12  ;;  %v9007_v0 = vpop.permute.xlu2 %2083  ;;  %v2495_v12 = vsel %vm717_vm1, 0.0, %v2494_v1 }
 0x407   : > { %v1498_v33 = vsel %vm1058_vm10, %v1497_v4, %v1477_v63 }
 0x408   : > { %v1499_v58 = vsel %vm1060_vm11, %v1498_v33, %v8863_v54  ;;  %v2650_v54 = vrot.slane %v8830_v14, 4  ;;  %v2439_v14 = vsel %vm717_vm1, 0.0, %v2438_v24  ;;  %v2847_v33 = vld [vmem:[%s475_s12] sm:$0xff]  ;;  %s483_s12 = scalar_lea.vmem %s12709_s6, %s7368_s19  ;;  %s7295_s19 = smov 1  }
 0x409   : > { %v1500_v60 = vsel %vm1062_vm12, %v1499_v58, %v8931_v53 }
 0x40a   : > { %1502 = vst [vmem:[#allocation3 + $0x10] sm:$0xf] %v1500_v60  ;;  %2541 = vrot.lane.b32.xlu1 %v2493_v52, %s7280_s14  ;;  %v2651_v48 = vsel %vm717_vm1, 0.0, %v2650_v54  ;;  %v2848_v60 = vld [vmem:[%s479_s26] sm:$0xff] }
 0x40c   : > { %v9024_v40 = vpop.permute.xlu1 %1875  ;;  %2549 = vrot.lane.b32.xlu0 %v2495_v12, %s7282_s16  ;;  %2497 = vrot.lane.b32.xlu2 %v2433_v39, %s7285_s22 }
 0x40e   : > { %v9029_v53 = vpop.permute.xlu0 %1883  ;;  %v9031_v51 = vpop.permute.xlu2 %2119 }
 0x412   : > { %2727 = vrot.lane.b32.xlu1 %v2651_v48, %s7280_s14 }
 0x414   : > { %v9043_v42 = vpop.permute.xlu1 %1911  ;;  %2711 = vrot.lane.b32.xlu0 %v2647_v50, %s7285_s22  ;;  %2521 = vrot.lane.b32.xlu2 %v2439_v14, %s7282_s16 }
 0x416   : > { %v9048_v35 = vpop.permute.xlu0 %1895  ;;  %v9050_v21 = vpop.permute.xlu2 %2509 }
 0x41a   : > { %2739 = vrot.lane.b32.xlu1 %v2703_v37, %s7285_s22 }
 0x41c   : > { %v9060_v45 = vpop.permute.xlu1 %2091  ;;  %2735 = vrot.lane.b32.xlu0 %v2653_v18, %s7282_s16  ;;  %2533 = vrot.lane.b32.xlu2 %v2491_v23, %s7283_s20 }
 0x41e   : > { %v9064_v28 = vpop.permute.xlu0 %2075  ;;  %v9066_v36 = vpop.permute.xlu2 %2545 }
 0x422   : > { %2763 = vrot.lane.b32.xlu1 %v2709_v25, %s7282_s16 }
 0x424   : > { %v2104_v38 = vpop.permute.xlu1 %2103  ;;  %2719 = vrot.lane.b32.xlu2 %v2649_v16, %s7283_s20  ;;  %2747 = vrot.lane.b32.xlu0 %v2705_v8, %s7283_s20 }
 0x426   : > { %v9076_v15 = vpop.permute.xlu0 %2111  ;;  %v9078_v26 = vpop.permute.xlu2 %2731 }
 0x42c   : > { %v9082_v27 = vpop.permute.xlu1 %2517  ;;  %2755 = vrot.lane.b32.xlu2 %v2707_v47, %s7280_s14  ;;  %2759 = vrot.lane.b32.xlu0 %v2701_v31, %s7281_s15 }
 0x42e   : > { %v9086_v20 = vpop.permute.xlu0 %2501  ;;  %v9088_v29 = vpop.permute.xlu2 %2743 }
 0x434   : > { %v9093_v63 = vpop.permute.xlu1 %2529  ;;  %2794 = vperm.xlu2 %6712, %v657_v7  }
 0x436   : > { %v9095_v56 = vpop.permute.xlu0 %2537  ;;  %v1880_v4 = vpop.permute.xlu2 %1879 }
 0x43c   : > { %v9101_v1 = vpop.permute.xlu1 %2715  ;;  %2877 = vperm.xlu2 %6712, %v2847_v33  }
 0x43e   : > { %v9103_v2 = vpop.permute.xlu0 %2723  ;;  %v1892_v58 = vpop.permute.xlu2 %1891 }
 0x444   : > { %v9109_v52 = vpop.permute.xlu1 %2751  ;;  %2884 = vperm.xlu2 %6712, %v2848_v60  }
 0x446   : > { %v1872_v12 = vpop.permute.xlu0 %1871  ;;  %v1916_v39 = vpop.permute.xlu2 %1915 }
 0x44c   : > { %v1864_v43 = vpop.permute.xlu1 %1863 }
 0x44d   : > { %v1918_v54 = vsel %vm1050_vm6, %v8854_v9, %v1864_v43 }
 0x44e   : > { %v1919_v34 = vsel %vm1052_vm7, %v1918_v54, %v8948_v55  ;;  %v1908_v24 = vpop.permute.xlu0 %1907  ;;  %v2072_v48 = vpop.permute.xlu2 %2071  ;;  %v1925_v55 = vsel %vm1050_vm6, %v8882_v3, %v1892_v58 }
 0x44f   : > { %v1920_v49 = vsel %vm1054_vm8, %v1919_v34, %v1872_v12  ;;  %v1926_v31 = vsel %vm1052_vm7, %v1925_v55, %v9048_v35  ;;  %v2126_v62 = vsel %vm1050_vm6, %v8924_v59, %v2072_v48 }
 0x450   : > { %v1921_v50 = vsel %vm1056_vm9, %v1920_v49, %v9024_v40 }
 0x451   : > { %v1922_v14 = vsel %vm1058_vm10, %v1921_v50, %v1880_v4 }
 0x452   : > { %v1923_v11 = vsel %vm1060_vm11, %v1922_v14, %v9029_v53 }
 0x454   : > { %v1888_v32 = vpop.permute.xlu1 %1887 }
 0x455   : > { %v1924_v46 = vsel %vm1062_vm12, %v1923_v11, %v1888_v32 }
 0x456   : > { %1932 = vst [vmem:[#allocation3 + $0x48] sm:$0xf] %v1924_v46  ;;  %v2088_v9 = vpop.permute.xlu0 %2087  ;;  %v2096_v37 = vpop.permute.xlu2 %2095 }
 0x45c   : > { %v1900_v17 = vpop.permute.xlu1 %1899 }
 0x45d   : > { %v1927_v40 = vsel %vm1054_vm8, %v1926_v31, %v1900_v17 }
 0x45e   : > { %v1928_v18 = vsel %vm1056_vm9, %v1927_v40, %v8976_v5  ;;  %v2100_v23 = vpop.permute.xlu0 %2099  ;;  %v2108_v19 = vpop.permute.xlu2 %2107  ;;  %v2127_v5 = vsel %vm1052_vm7, %v2126_v62, %v9064_v28 }
 0x45f   : > { %v1929_v53 = vsel %vm1058_vm10, %v1928_v18, %v1908_v24  ;;  %v2133_v35 = vsel %vm1050_vm6, %v8901_v57, %v2100_v23 }
 0x460   : > { %v1930_v30 = vsel %vm1060_vm11, %v1929_v53, %v9043_v42  ;;  %v2134_v8 = vsel %vm1052_vm7, %v2133_v35, %v2104_v38 }
 0x461   : > { %v1931_v3 = vsel %vm1062_vm12, %v1930_v30, %v1916_v39  ;;  %v2135_v57 = vsel %vm1054_vm8, %v2134_v8, %v2108_v19  ;;  %v2784_v8 = vld [vmem:[#allocation3 + $0x18] sm:$0xff] }
 0x462   : > { %1933 = vst [vmem:[#allocation3 + $0x28] sm:$0xf] %v1931_v3  ;;  %v2136_v38 = vsel %vm1056_vm9, %v2135_v57, %v9076_v15 }
 0x464   : > { %v2080_v25 = vpop.permute.xlu1 %2079 }
 0x465   : > { %v2128_v16 = vsel %vm1054_vm8, %v2127_v5, %v2080_v25 }
 0x466   : > { %v2129_v42 = vsel %vm1056_vm9, %v2128_v16, %v9007_v0  ;;  %v2124_v10 = vpop.permute.xlu0 %2123  ;;  %v2498_v47 = vpop.permute.xlu2 %2497 }
 0x467   : > { %v2130_v59 = vsel %vm1058_vm10, %v2129_v42, %v2088_v9  ;;  %v2552_v43 = vsel %vm1050_vm6, %v8997_v61, %v2498_v47 }
 0x468   : > { %v2131_v7 = vsel %vm1060_vm11, %v2130_v59, %v9060_v45  ;;  %v2553_v34 = vsel %vm1052_vm7, %v2552_v43, %v9086_v20  ;;  %v2782_v59 = vld [vmem:[#allocation3 + $0x30] sm:$0xff] }
 0x469   : > { %v2132_v4 = vsel %vm1062_vm12, %v2131_v7, %v2096_v37 }
 0x46a   : > { %v2142_v33 = vrot.slane %v2132_v4, 4 }
 0x46c   : > { %2146 = vst [vmem:[#allocation3 + $0x48] sm:$0xf0] %v2142_v33  ;;  %v2116_v28 = vpop.permute.xlu1 %2115  ;;  %v2785_v33 = vld [vmem:[#allocation3 + $0x10] sm:$0xff] }
 0x46d   : > { %v2137_v58 = vsel %vm1058_vm10, %v2136_v38, %v2116_v28  ;;  %v2783_v28 = vld [vmem:[#allocation3] sm:$0xff] }
 0x46e   : > { %v2138_v0 = vsel %vm1060_vm11, %v2137_v58, %v9031_v51  ;;  %v2514_v60 = vpop.permute.xlu0 %2513  ;;  %v2522_v12 = vpop.permute.xlu2 %2521 }
 0x46f   : > { %v2139_v39 = vsel %vm1062_vm12, %v2138_v0, %v2124_v10 }
 0x470   : > { %v2143_v45 = vrot.slane %v2139_v39, 4 }
 0x472   : > { %2147 = vst [vmem:[#allocation3 + $0x28] sm:$0xf0] %v2143_v45  ;;  %v7293_v45 = vmov 8.0  }
 0x473   : > { %v2786_v5 = vld [vmem:[#allocation3 + $0x48] sm:$0xff]  ;;  %7252 = vrcp.f32 %v7293_v45 }
 0x474   : > { %v2506_v54 = vpop.permute.xlu1 %2505 }
 0x475   : > { %v2554_v15 = vsel %vm1054_vm8, %v2553_v34, %v2506_v54 }
 0x476   : > { %v2555_v24 = vsel %vm1056_vm9, %v2554_v15, %v9050_v21  ;;  %v2526_v48 = vpop.permute.xlu0 %2525  ;;  %v2534_v14 = vpop.permute.xlu2 %2533 }
 0x477   : > { %v2556_v51 = vsel %vm1058_vm10, %v2555_v24, %v2514_v60  ;;  %v2559_v49 = vsel %vm1050_vm6, %v8969_v41, %v2526_v48  ;;  %v12926_v24 = vld [vmem:[#allocation6_spill] sm:$0xff] }
 0x478   : > { %v2557_v50 = vsel %vm1060_vm11, %v2556_v51, %v9082_v27  ;;  %v2560_v61 = vsel %vm1052_vm7, %v2559_v49, %v9093_v63 }
 0x479   : > { %v2558_v20 = vsel %vm1062_vm12, %v2557_v50, %v2522_v12  ;;  %v2561_v32 = vsel %vm1054_vm8, %v2560_v61, %v2534_v14  ;;  %v2787_v4 = vld [vmem:[#allocation3 + $0x28] sm:$0xff]  ;;  %v7253_v43 = vpop.eup %7252 }
 0x47a   : > { %v2568_v11 = vrot.slane %v2558_v20, 4  ;;  %v2562_v46 = vsel %vm1056_vm9, %v2561_v32, %v9095_v56  ;;  %v2896_v54 = vmul.f32 8.0, %v7253_v43 }
 0x47c   : > { %2572 = vst [vmem:[#allocation3 + $0x8] sm:$0xf0] %v2568_v11  ;;  %v2542_v21 = vpop.permute.xlu1 %2541  ;;  %v2897_v15 = vsub.f32 1.0, %v2896_v54  ;;  %v7294_v11 = vmov 7.0  }
 0x47d   : > { %v2563_v9 = vsel %vm1058_vm10, %v2562_v46, %v2542_v21  ;;  %7254 = vrcp.f32 %v7294_v11 }
 0x47e   : > { %v2550_v41 = vpop.permute.xlu0 %2549  ;;  %v2564_v27 = vsel %vm1060_vm11, %v2563_v9, %v9066_v36  ;;  %v2720_v40 = vpop.permute.xlu2 %2719  ;;  %v2898_v61 = vmul.f32 %v7253_v43, %v2897_v15 }
 0x47f   : > { %v2565_v37 = vsel %vm1062_vm12, %v2564_v27, %v2550_v41 }
 0x480   : > { %v2569_v63 = vrot.slane %v2565_v37, 4  ;;  %v2899_v9 = vadd.f32 %v7253_v43, %v2898_v61 }
 0x482   : > { %2573 = vst [vmem:[#allocation3 + $0x20] sm:$0xf0] %v2569_v63 }
 0x483   : > { %v2788_v25 = vld [vmem:[#allocation3 + $0x8] sm:$0xff]  ;;  %v7255_v27 = vpop.eup %7254 }
 0x484   : > { %v2728_v17 = vpop.permute.xlu1 %2727  ;;  %vm2916_vm14 = vweird.f32 %v7255_v27 }
 0x486   : > { %v2712_v55 = vpop.permute.xlu0 %2711  ;;  %v2756_v16 = vpop.permute.xlu2 %2755 }
 0x487   : > { %v2766_v31 = vsel %vm1050_vm6, %v9022_v13, %v2712_v55 }
 0x488   : > { %v2767_v18 = vsel %vm1052_vm7, %v2766_v31, %v9101_v1 }
 0x489   : > { %v2768_v56 = vsel %vm1054_vm8, %v2767_v18, %v2720_v40  ;;  %v2789_v57 = vld [vmem:[#allocation3 + $0x20] sm:$0xff] }
 0x48a   : > { %v2769_v23 = vsel %vm1056_vm9, %v2768_v56, %v9103_v2 }
 0x48b   : > { %v2770_v36 = vsel %vm1058_vm10, %v2769_v23, %v2728_v17  ;;  %v2912_v17 = vmul.f32 7.0, %v7255_v27 }
 0x48c   : > { %v2771_v53 = vsel %vm1060_vm11, %v2770_v36, %v9078_v26  ;;  %v2740_v62 = vpop.permute.xlu1 %2739 }
 0x48d   : > { %v2773_v13 = vsel %vm1050_vm6, %v9038_v44, %v2740_v62  ;;  %v2913_v18 = vsub.f32 1.0, %v2912_v17 }
 0x48e   : > { %v2736_v19 = vpop.permute.xlu0 %2735  ;;  %v2774_v1 = vsel %vm1052_vm7, %v2773_v13, %v9088_v29  ;;  %v656_v29 = vld [vmem:[%s12710_s7] sm:$0xff]  ;;  %v2795_v58 = vpop.permute.xlu2 %2794 }
 0x48f   : > { %v2772_v30 = vsel %vm1062_vm12, %v2771_v53, %v2736_v19  ;;  %v2914_v36 = vmul.f32 %v7255_v27, %v2913_v18 }
 0x490   : > { %2780 = vst [vmem:[#allocation3 + $0x40] sm:$0xf] %v2772_v30 }
 0x491   : > { %v2915_v30 = vadd.f32 %v7255_v27, %v2914_v36 }
 0x494   : > { %v2764_v10 = vpop.permute.xlu1 %2763 }
 0x496   : > { %v2748_v3 = vpop.permute.xlu0 %2747 }
 0x497   : > { %v2790_v35 = vld [vmem:[#allocation3 + $0x40] sm:$0xf]  ;;  %v2775_v2 = vsel %vm1054_vm8, %v2774_v1, %v2748_v3  ;;  %v2917_v3 = vsel %vm2916_vm14, %v7255_v27, %v2915_v30 }
 0x498   : > { %6668 = vmatpush.msk.msra.mxu0 %vm499_vm0, %v2790_v35  ;;  %v2776_v26 = vsel %vm1056_vm9, %v2775_v2, %v9109_v52 }
 0x499   : > { %v2777_v44 = vsel %vm1058_vm10, %v2776_v26, %v2756_v16 }
 0x49a   : > { %2819 = vmatpush.msra.mxu0 %v2788_v25 }
 0x49c   : > { %2820 = vmatpush.msra.mxu0 %v2786_v5 }
 0x49e   : > { %v2760_v42 = vpop.permute.xlu0 %2759  ;;  %2821 = vmatpush.msra.mxu0 %v2784_v8 }
 0x49f   : > { %v2778_v47 = vsel %vm1060_vm11, %v2777_v44, %v2760_v42 }
 0x4a0   : > { %v2779_v7 = vsel %vm1062_vm12, %v2778_v47, %v2764_v10  ;;  %2822 = vmatpush.msra.mxu0 %v2782_v59 }
 0x4a1   : > { %2781 = vst [vmem:[#allocation3 + $0x38] sm:$0xf] %v2779_v7  ;;  %6669 = vmatmul.msk.f32.vlgmr.msra.gmra.mxu0 %vm2797_vm13, %v656_v29 }
 0x4a8   : > { %v2791_v52 = vld [vmem:[#allocation3 + $0x38] sm:$0xf] }
 0x4a9   : > { %6670 = vmatpush.msk.msra.mxu1 %vm499_vm0, %v2791_v52  ;;  %vm2900_vm0 = vweird.f32 %v7253_v43 }
 0x4aa   : > { %v2901_v63 = vsel %vm2900_vm0, %v7253_v43, %v2899_v9  ;;  %v12927_v43 = vld [vmem:[#allocation7_spill] sm:$0xff] }
 0x4ab   : > { %2839 = vmatpush.msra.mxu1 %v2789_v57 }
 0x4ad   : > { %2840 = vmatpush.msra.mxu1 %v2787_v4 }
 0x4af   : > { %2841 = vmatpush.msra.mxu1 %v2785_v33 }
 0x4b1   : > { %2842 = vmatpush.msra.mxu1 %v2783_v28  ;;  %v2849_v28 = vld [vmem:[%s483_s12] sm:$0xff] }
 0x4b2   : > { %6671 = vmatmul.msk.f32.vlgmr.msra.gmra.mxu1 %vm2797_vm13, %v656_v29 }
 0x51e   : > { %v2824_v38 = vpop.f32.mrf.mxu0 }
 0x51f   : > { %v2825_v60 = vadd.f32 %v2824_v38, %v2795_v58 }
 0x52f   : > { %v2844_v0 = vpop.f32.mrf.mxu1 }
 0x530   : > { %v2845_v12 = vadd.f32 %v2844_v0, %v2795_v58 }
 0x532   : > { %v2850_v39 = vadd.f32 %v2845_v12, %v2825_v60 }
 0x534   : > { %2851 = vadd.xlane.f32.xlu0 %v2850_v39 }
 0x5a7   : > { %v2852_v34 = vpop.xlane.xlu0 %2851 }
 0x5a8   : > { %v2853_v48 = vmul.f32 %v2852_v34, %v12926_v24 }
 0x5aa   : > { %v2889_v51 = vrot.slane %v2853_v48, 4  ;;  %v9205_v49 = vsub.f32 %v2825_v60, %v2853_v48  ;;  %v9207_v50 = vsub.f32 %v2845_v12, %v2853_v48 }
 0x5ac   : > { %v2890_v14 = vadd.f32 %v2889_v51, %v2853_v48  ;;  %v2856_v20 = vmul.f32 %v9205_v49, %v9205_v49  ;;  %v2857_v32 = vmul.f32 %v9207_v50, %v9207_v50 }
 0x5ae   : > { %v2891_v21 = vrot.slane %v2890_v14, 2  ;;  %v2858_v46 = vadd.f32 %v2857_v32, %v2856_v20 }
 0x5b0   : > { %v2892_v41 = vadd.f32 %v2891_v21, %v2890_v14  ;;  %2859 = vadd.xlane.f32.xlu1 %v2858_v46  ;;  %v2878_v14 = vpop.permute.xlu2 %2877 }
 0x5b2   : > { %v2893_v37 = vrot.slane %v2892_v41, 1 }
 0x5b4   : > { %v2894_v55 = vadd.f32 %v2893_v37, %v2892_v41 }
 0x5b6   : > { %v2902_v31 = vmul.f32 %v2901_v63, %v2894_v55 }
 0x5b8   : > { %v2903_v40 = vsub.f32 %v2853_v48, %v2902_v31  ;;  %v2885_v46 = vpop.permute.xlu2 %2884 }
 0x5ba   : > { %v2904_v56 = vmul.f32 %v2903_v40, %v2903_v40  ;;  %v2932_v0 = vmul.f32 %v2903_v40, %v2849_v28 }
 0x5bc   : > { %v2905_v23 = vrot.slane %v2904_v56, 4 }
 0x5be   : > { %v2906_v19 = vadd.f32 %v2905_v23, %v2904_v56 }
 0x5c0   : > { %v2907_v53 = vrot.slane %v2906_v19, 2 }
 0x5c2   : > { %v2908_v62 = vadd.f32 %v2907_v53, %v2906_v19 }
 0x5c4   : > { %v2909_v13 = vrot.slane %v2908_v62, 1 }
 0x5c6   : > { %v2910_v1 = vadd.f32 %v2909_v13, %v2908_v62 }
 0x5c8   : > { %v2918_v35 = vmul.f32 %v2917_v3, %v2910_v1 }
 0x5ca   : > { %v2919_v2 = vadd.f32 1e-05, %v2918_v35 }
 0x5cc   : > { %7256 = vrsqrt.f32 %v2919_v2  ;;  %vm2927_vm15 = vcmp.eq.f32.partialorder %v2919_v2, inf  ;;  %v2930_v29 = vand.u32 2147483648, %v2919_v2  ;;  %vm2929_vm2 = vcmp.eq.f32.partialorder %v2919_v2, 0.0 }
 0x5d2   : > { %v7257_v25 = vpop.eup %7256 }
 0x5d3   : > { %v2921_v26 = vmul.f32 %v7257_v25, %v2919_v2 }
 0x5d5   : > { %v2922_v5 = vmul.f32 %v7257_v25, %v2921_v26 }
 0x5d7   : > { %v2923_v16 = vmul.f32 0.5, %v2922_v5 }
 0x5d9   : > { %v2924_v8 = vsub.f32 1.5, %v2923_v16 }
 0x5db   : > { %v2925_v42 = vmul.f32 %v7257_v25, %v2924_v8 }
 0x5dd   : > { %v2926_v44 = vmul.f32 %v2925_v42, %v2919_v2 }
 0x5df   : > { %v2928_v10 = vsel %vm2927_vm15, %v2919_v2, %v2926_v44 }
 0x5e0   : > { %v2931_v47 = vsel %vm2929_vm2, %v2930_v29, %v2928_v10 }
 0x5e1   : > { %7258 = vrcp.f32 %v2931_v47  ;;  %v2944_v57 = vand.u32 2147483648, %v2931_v47  ;;  %v2942_v33 = vand.u32 2147483647, %v2931_v47  ;;  %vm2938_vm4 = vweird.f32 %v2931_v47 }
 0x5e3   : > { %v2945_v58 = vor.u32 1.1754944e-38, %v2944_v57  ;;  %vm2943_vm0 = vcmp.eq.f32.partialorder %v2942_v33, 8.507059e+37 }
 0x5e7   : > { %v7259_v59 = vpop.eup %7258 }
 0x5e8   : > { %v2934_v7 = vmul.f32 %v7259_v59, %v2931_v47  ;;  %vm2939_vm3 = vweird.f32 %v7259_v59 }
 0x5e9   : > { %vm2940_vm13 = vmor %vm2938_vm4, %vm2939_vm3 }
 0x5ea   : > { %v2935_v52 = vsub.f32 1.0, %v2934_v7 }
 0x5ec   : > { %v2936_v4 = vmul.f32 %v7259_v59, %v2935_v52 }
 0x5ee   : > { %v2937_v38 = vadd.f32 %v7259_v59, %v2936_v4 }
 0x5f0   : > { %v2941_v60 = vsel %vm2940_vm13, %v7259_v59, %v2937_v38  ;;  %vm2967_vm13 = vcmask 146432  }
 0x5f1   : > { %v2946_v12 = vsel %vm2943_vm0, %v2945_v58, %v2941_v60  ;;  %vm2970_vm0 = vcmask 140288  }
 0x5f2   : > { %v2947_v39 = vmul.f32 %v2946_v12, %v2932_v0 }
 0x5f4   : > { %2950 = vperm.xlu2 %6712, %v2947_v39  }
 0x623   : > { %v2860_v45 = vpop.xlane.xlu1 %2859 }
 0x624   : > { %v2861_v54 = vmul.f32 %v2860_v45, %v12927_v43 }
 0x626   : > { %v2862_v34 = vadd.f32 1e-05, %v2861_v54 }
 0x628   : > { %7260 = vrsqrt.f32 %v2862_v34  ;;  %vm2869_vm15 = vweird.f32 %v2862_v34 }
 0x62e   : > { %v7261_v15 = vpop.eup %7260 }
 0x62f   : > { %v2864_v24 = vmul.f32 %v7261_v15, %v2862_v34  ;;  %vm2870_vm14 = vweird.f32 %v7261_v15 }
 0x630   : > { %vm2871_vm2 = vmor %vm2869_vm15, %vm2870_vm14  ;;  %vm3325_vm14 = vcmask 138248   ;;  %vm4374_vm15 = vcmask 1046528  }
 0x631   : > { %v2865_v48 = vmul.f32 %v7261_v15, %v2864_v24 }
 0x633   : > { %v2866_v51 = vmul.f32 0.5, %v2865_v48 }
 0x635   : > { %v2867_v61 = vsub.f32 1.5, %v2866_v51 }
 0x637   : > { %v2868_v20 = vmul.f32 %v7261_v15, %v2867_v61 }
 0x639   : > { %v2872_v32 = vsel %vm2871_vm2, %v7261_v15, %v2868_v20 }
 0x63a   : > { %v2873_v11 = vmul.f32 %v2872_v32, %v9205_v49  ;;  %v2874_v21 = vmul.f32 %v2872_v32, %v9207_v50 }
 0x63c   : > { %v2880_v9 = vmul.f32 %v2878_v14, %v2873_v11  ;;  %v2881_v41 = vmul.f32 %v2878_v14, %v2874_v21 }
 0x63e   : > { %v2887_v27 = vadd.f32 %v2885_v46, %v2880_v9  ;;  %v2888_v37 = vadd.f32 %v2885_v46, %v2881_v41 }
 0x64e   : > { %v2951_v63 = vpop.permute.xlu2 %2950 }
 0x64f   : > { %v2953_v55 = vadd.f32 %v2951_v63, %v2887_v27  ;;  %v2954_v17 = vadd.f32 %v2951_v63, %v2888_v37 }
 0x651   : > { %v2957_v31 = vmul.f32 1.442695, %v2953_v55  ;;  %v2959_v40 = vmul.f32 1.442695, %v2954_v17  ;;  %vm2955_vm3 = vcmp.gt.f32.partialorder %v2953_v55, 0.0  ;;  %vm2956_vm4 = vcmp.gt.f32.partialorder %v2954_v17, 0.0 }
 0x653   : > { %7262 = vpow2.f32 %v2957_v31 }
 0x654   : > { %7264 = vpow2.f32 %v2959_v40 }
 0x659   : > { %v7263_v18 = vpop.eup %7262 }
 0x65a   : > { %v6672_v56 = vadd.f32 -1.0, %v7263_v18  ;;  %v7265_v36 = vpop.eup %7264 }
 0x65b   : > { %v6673_v49 = vadd.f32 -1.0, %v7265_v36 }
 0x65c   : > { %v2963_v23 = vsel %vm2955_vm3, %v2953_v55, %v6672_v56 }
 0x65d   : > { %3006 = vrot.lane.b32.xlu1 %v2963_v23, %s7283_s20  ;;  %3000 = vrot.lane.b32.xlu0 %v2963_v23, %s7280_s14  ;;  %v9223_v50 = vsel %vm2956_vm4, %v2954_v17, %v6673_v49  ;;  %v3039_v62 = vrot.slane %v2963_v23, 4 }
 0x65e   : > { %2994 = vrot.lane.b32.xlu2 %v2963_v23, %s7282_s16  ;;  %v3151_v11 = vrot.slane %v9223_v50, 4 }
 0x665   : > { %3025 = vrot.lane.b32.xlu1 %v9223_v50, %s7284_s21  ;;  %3016 = vrot.lane.b32.xlu0 %v9223_v50, %s7282_s16 }
 0x666   : > { %2997 = vrot.lane.b32.xlu2 %v2963_v23, %s7281_s15 }
 0x66d   : > { %3034 = vrot.lane.b32.xlu1 %v9223_v50, %s7285_s22  ;;  %3022 = vrot.lane.b32.xlu0 %v9223_v50, %s7280_s14 }
 0x66e   : > { %3003 = vrot.lane.b32.xlu2 %v2963_v23, %s7284_s21 }
 0x675   : > { %3031 = vrot.lane.b32.xlu0 %v9223_v50, %s7286_s23 }
 0x676   : > { %3009 = vrot.lane.b32.xlu2 %v2963_v23, %s7286_s23 }
 0x67e   : > { %3012 = vrot.lane.b32.xlu2 %v2963_v23, %s7285_s22 }
 0x686   : > { %3019 = vrot.lane.b32.xlu2 %v9223_v50, %s7281_s15 }
 0x68e   : > { %3028 = vrot.lane.b32.xlu2 %v9223_v50, %s7283_s20 }
 0x6b8   : > { %v2995_v19 = vpop.permute.xlu2 %2994 }
 0x6b9   : > { %v3051_v3 = vrot.slane %v2995_v19, 4 }
 0x6c0   : > { %v2998_v53 = vpop.permute.xlu2 %2997 }
 0x6c1   : > { %v3040_v13 = vsel %vm717_vm1, %v2998_v53, %v3039_v62  ;;  %v3037_v10 = vrot.slane %v2998_v53, 4 }
 0x6c2   : > { %v9245_v35 = vperm.slane %v3040_v13, %v7428_v6 }
 0x6c3   : > { %v3038_v28 = vsel %vm717_vm1, %v3037_v10, %v2963_v23 }
 0x6c4   : > { %v3099_v29 = vrot.slane %v9245_v35, 4  ;;  %v9275_v34 = vperm.slane %v3038_v28, %v7428_v6 }
 0x6c8   : > { %v3004_v30 = vpop.permute.xlu2 %3003 }
 0x6c9   : > { %v3063_v16 = vrot.slane %v3004_v30, 4 }
 0x6cf   : > { %v3001_v1 = vpop.permute.xlu0 %3000  ;;  %v3007_v2 = vpop.permute.xlu1 %3006 }
 0x6d0   : > { %v3049_v25 = vrot.slane %v3001_v1, 4  ;;  %v3052_v26 = vsel %vm717_vm1, %v3001_v1, %v3051_v3  ;;  %v3010_v5 = vpop.permute.xlu2 %3009  ;;  %v3075_v52 = vrot.slane %v3007_v2, 4 }
 0x6d1   : > { %v9249_v8 = vperm.slane %v3052_v26, %v7428_v6  ;;  %v3064_v44 = vsel %vm717_vm1, %v3010_v5, %v3063_v16  ;;  %v3061_v57 = vrot.slane %v3010_v5, 4 }
 0x6d2   : > { %v3050_v42 = vsel %vm717_vm1, %v3049_v25, %v2995_v19  ;;  %v9260_v7 = vperm.slane %v3064_v44, %v7428_v6 }
 0x6d3   : > { %v9255_v47 = vperm.slane %v3050_v42, %v7428_v6  ;;  %v3100_v59 = vsel %vm717_vm1, %v9249_v8, %v3099_v29  ;;  %v3062_v43 = vsel %vm717_vm1, %v3061_v57, %v3004_v30 }
 0x6d4   : > { %v9264_v38 = vperm.slane %v3100_v59, %v7436_v22  ;;  %v3123_v12 = vrot.slane %v9260_v7, 4  ;;  %v3068_v61 = vperm.slane %v3062_v43, %v7428_v6 }
 0x6d5   : > { %v3085_v60 = vrot.slane %v9255_v47, 4 }
 0x6d6   : > { %v3147_v51 = vrot.slane %v9264_v38, 4 }
 0x6d7   : > { %v3017_v4 = vpop.permute.xlu0 %3016  ;;  %v3026_v39 = vpop.permute.xlu1 %3025  ;;  %v3086_v20 = vsel %vm717_vm1, %v3085_v60, %v9275_v34 }
 0x6d8   : > { %v3013_v33 = vpop.permute.xlu2 %3012  ;;  %v3163_v27 = vrot.slane %v3017_v4, 4  ;;  %v9297_v55 = vperm.slane %v3086_v20, %v7436_v22  ;;  %v3175_v19 = vrot.slane %v3026_v39, 4 }
 0x6d9   : > { %v3073_v58 = vrot.slane %v3013_v33, 4  ;;  %v3076_v0 = vsel %vm717_vm1, %v3013_v33, %v3075_v52 }
 0x6da   : > { %v9270_v45 = vperm.slane %v3076_v0, %v7428_v6  ;;  %v3135_v49 = vrot.slane %v9297_v55, 4  ;;  %v3111_v0 = vrot.slane %v3068_v61, 4 }
 0x6db   : > { %v3074_v54 = vsel %vm717_vm1, %v3073_v58, %v3007_v2 }
 0x6dc   : > { %v9278_v15 = vperm.slane %v3074_v54, %v7428_v6  ;;  %v3124_v24 = vsel %vm717_vm1, %v9270_v45, %v3123_v12  ;;  %v3121_v60 = vrot.slane %v9270_v45, 4 }
 0x6dd   : > { %v9283_v48 = vperm.slane %v3124_v24, %v7436_v22 }
 0x6de   : > { %v3109_v14 = vrot.slane %v9278_v15, 4 }
 0x6df   : > { %v3023_v32 = vpop.permute.xlu0 %3022  ;;  %v3148_v21 = vsel %vm717_vm1, %v9283_v48, %v3147_v51  ;;  %v3035_v23 = vpop.permute.xlu1 %3034 }
 0x6e0   : > { %v3161_v46 = vrot.slane %v3023_v32, 4  ;;  %v3020_v9 = vpop.permute.xlu2 %3019  ;;  %3305 = vrot.lane.b32.xlu1 %v3148_v21, %s7295_s19  ;;  %v3110_v41 = vsel %vm717_vm1, %v3109_v14, %v3068_v61  ;;  %v3164_v40 = vsel %vm717_vm1, %v3023_v32, %v3163_v27  ;;  %v3185_v13 = vrot.slane %v3035_v23, 4 }
 0x6e1   : > { %v3149_v37 = vrot.slane %v3020_v9, 4  ;;  %v3152_v63 = vsel %vm717_vm1, %v3020_v9, %v3151_v11  ;;  %v9307_v56 = vperm.slane %v3110_v41, %v7436_v22  ;;  %v9313_v30 = vperm.slane %v3164_v40, %v7428_v6 }
 0x6e2   : > { %v9300_v17 = vperm.slane %v3152_v63, %v7428_v6  ;;  %v3162_v31 = vsel %vm717_vm1, %v3161_v46, %v3017_v4  ;;  %v3112_v32 = vsel %vm717_vm1, %v9278_v15, %v3111_v0  ;;  %v3122_v11 = vsel %vm717_vm1, %v3121_v60, %v9260_v7 }
 0x6e3   : > { %v3150_v18 = vsel %vm717_vm1, %v3149_v37, %v9223_v50  ;;  %v3168_v53 = vperm.slane %v3162_v31, %v7428_v6  ;;  %v3136_v50 = vsel %vm717_vm1, %v9307_v56, %v3135_v49  ;;  %v3097_v37 = vrot.slane %v9249_v8, 4 }
 0x6e4   : > { %v3211_v36 = vrot.slane %v9300_v17, 4  ;;  %v3156_v62 = vperm.slane %v3150_v18, %v7428_v6  ;;  %v3120_v15 = vperm.slane %v3112_v32, %v7436_v22  ;;  %v3087_v31 = vrot.slane %v9275_v34, 4 }
 0x6e5   : > { %v3197_v44 = vrot.slane %v3168_v53, 4  ;;  %v3128_v40 = vperm.slane %v3122_v11, %v7436_v22  ;;  %v3133_v18 = vrot.slane %v9307_v56, 4  ;;  %v3209_v8 = vrot.slane %v9313_v30, 4 }
 0x6e6   : > { %v3212_v1 = vsel %vm717_vm1, %v9313_v30, %v3211_v36  ;;  %v3199_v29 = vrot.slane %v3156_v62, 4  ;;  %v3137_v36 = vrot.slane %v3120_v15, 4  ;;  %v3098_v49 = vsel %vm717_vm1, %v3097_v37, %v9245_v35 }
 0x6e7   : > { %v3032_v3 = vpop.permute.xlu0 %3031  ;;  %v9329_v33 = vperm.slane %v3212_v1, %v7436_v22  ;;  %v3198_v54 = vsel %vm717_vm1, %v3197_v44, %v3156_v62  ;;  %v3141_v34 = vrot.slane %v3128_v40, 4  ;;  %v3104_v56 = vperm.slane %v3098_v49, %v7436_v22 }
 0x6e8   : > { %v3173_v2 = vrot.slane %v3032_v3, 4  ;;  %v3176_v25 = vsel %vm717_vm1, %v3032_v3, %v3175_v19  ;;  %v3029_v26 = vpop.permute.xlu2 %3028  ;;  %3281 = vrot.lane.b32.xlu1 %v3136_v50, %s7295_s19  ;;  %v3200_v24 = vsel %vm717_vm1, %v3168_v53, %v3199_v29  ;;  %v3204_v46 = vperm.slane %v3198_v54, %v7436_v22 }
 0x6e9   : > { %v3184_v5 = vperm.slane %v3176_v25, %v7428_v6  ;;  %v3186_v16 = vsel %vm717_vm1, %v3185_v13, %v3029_v26  ;;  %v3187_v42 = vrot.slane %v3029_v26, 4  ;;  %v3259_v20 = vrot.slane %v9329_v33, 4 }
 0x6ea   : > { %v3174_v10 = vsel %vm717_vm1, %v3173_v2, %v3026_v39  ;;  %v3192_v59 = vperm.slane %v3186_v16, %v7428_v6  ;;  %v3208_v41 = vperm.slane %v3200_v24, %v7436_v22  ;;  %v3134_v53 = vsel %vm717_vm1, %v3133_v18, %v9297_v55 }
 0x6eb   : > { %v3180_v52 = vperm.slane %v3174_v10, %v7428_v6  ;;  %v3235_v57 = vrot.slane %v3184_v5, 4  ;;  %v3188_v4 = vsel %vm717_vm1, %v3035_v23, %v3187_v42  ;;  %v3088_v23 = vsel %vm717_vm1, %v9255_v47, %v3087_v31 }
 0x6ec   : > { %v3196_v28 = vperm.slane %v3188_v4, %v7428_v6  ;;  %v3221_v58 = vrot.slane %v3192_v59, 4  ;;  %v3096_v62 = vperm.slane %v3088_v23, %v7436_v22  ;;  %v3210_v47 = vsel %vm717_vm1, %v3209_v8, %v9300_v17 }
 0x6ed   : > { %v3223_v12 = vrot.slane %v3180_v52, 4  ;;  %v12928_v13 = vmov 0.0   ;;  %v3142_v35 = vsel %vm717_vm1, %v3141_v34, %v3104_v56  ;;  %v3216_v17 = vperm.slane %v3210_v47, %v7436_v22 }
 0x6ee   : > { %v3222_v43 = vsel %vm717_vm1, %v3221_v58, %v3180_v52  ;;  %v3236_v39 = vsel %vm717_vm1, %v3196_v28, %v3235_v57  ;;  %v3233_v19 = vrot.slane %v3196_v28, 4  ;;  %v3138_v30 = vsel %vm717_vm1, %v3137_v36, %v3096_v62  ;;  %2991 = vst.msk [vmem:[#allocation4 + $0xb0] sm:$0xff] %vm2967_vm13, %v12928_v13 }
 0x6ef   : > { %v3224_v51 = vsel %vm717_vm1, %v3192_v59, %v3223_v12  ;;  %v9339_v14 = vperm.slane %v3236_v39, %v7436_v22  ;;  %v3228_v61 = vperm.slane %v3222_v43, %v7436_v22  ;;  %2992 = vst.msk [vmem:[#allocation4 + $0xb8] sm:$0x3] %vm2970_vm0, %v12928_v13  ;;  %v3247_v3 = vrot.slane %v3204_v46, 4 }
 0x6f0   : > { %v3232_v45 = vperm.slane %v3224_v51, %v7436_v22  ;;  %v3234_v55 = vsel %vm717_vm1, %v3233_v19, %v3184_v5  ;;  %2968 = vst.msk [vmem:[#allocation4] sm:$0xff] %vm2967_vm13, %v12928_v13  ;;  %v3251_v2 = vrot.slane %v3208_v41, 4  ;;  %v3255_v25 = vrot.slane %v3216_v17, 4 }
 0x6f1   : > { %v3260_v21 = vsel %vm717_vm1, %v9339_v14, %v3259_v20  ;;  %v3245_v9 = vrot.slane %v3228_v61, 4  ;;  %2969 = vst.msk [vmem:[#allocation4 + $0x8] sm:$0xff] %vm2967_vm13, %v12928_v13  ;;  %v3240_v50 = vperm.slane %v3234_v55, %v7436_v22  ;;  %v3248_v1 = vsel %vm717_vm1, %v3228_v61, %v3247_v3 }
 0x6f2   : > { %3307 = vrot.lane.b32.xlu2 %v3260_v21, %s7295_s19  ;;  %v3249_v27 = vrot.slane %v3232_v45, 4  ;;  %2971 = vst.msk [vmem:[#allocation4 + $0x10] sm:$0x3] %vm2970_vm0, %v12928_v13  ;;  %v3252_v26 = vsel %vm717_vm1, %v3232_v45, %v3251_v2  ;;  %v3139_v16 = vrot.slane %v3096_v62, 4  ;;  %v3143_v44 = vrot.slane %v3104_v56, 4 }
 0x6f3   : > { %v3246_v63 = vsel %vm717_vm1, %v3245_v9, %v3204_v46  ;;  %2972 = vst.msk [vmem:[#allocation4 + $0x18] sm:$0xff] %vm2967_vm13, %v12928_v13  ;;  %v3256_v5 = vsel %vm717_vm1, %v3240_v50, %v3255_v25  ;;  %v3253_v10 = vrot.slane %v3240_v50, 4  ;;  %v3257_v59 = vrot.slane %v9339_v14, 4 }
 0x6f4   : > { %3279 = vrot.lane.b32.xlu0 %v3246_v63, %s7295_s19  ;;  %v3250_v7 = vsel %vm717_vm1, %v3249_v27, %v3208_v41  ;;  %2973 = vst.msk [vmem:[#allocation4 + $0x20] sm:$0xff] %vm2967_vm13, %v12928_v13  ;;  %v3140_v42 = vsel %vm717_vm1, %v3120_v15, %v3139_v16  ;;  %v3144_v29 = vsel %vm717_vm1, %v3128_v40, %v3143_v44  ;;  %v3145_v4 = vrot.slane %v9283_v48, 4 }
 0x6f5   : > { %3287 = vrot.lane.b32.xlu1 %v3250_v7, %s7295_s19  ;;  %2974 = vst.msk [vmem:[#allocation4 + $0x28] sm:$0x3] %vm2970_vm0, %v12928_v13  ;;  %v3254_v52 = vsel %vm717_vm1, %v3253_v10, %v3216_v17  ;;  %v3258_v57 = vsel %vm717_vm1, %v3257_v59, %v9329_v33 }
 0x6f6   : > { %2975 = vst.msk [vmem:[#allocation4 + $0x30] sm:$0xff] %vm2967_vm13, %v12928_v13  ;;  %v3146_v28 = vsel %vm717_vm1, %v3145_v4, %v9264_v38 }
 0x6f7   : > { %2976 = vst.msk [vmem:[#allocation4 + $0x38] sm:$0xff] %vm2967_vm13, %v12928_v13 }
 0x6f8   : > { %2977 = vst.msk [vmem:[#allocation4 + $0x40] sm:$0x3] %vm2970_vm0, %v12928_v13 }
 0x6f9   : > { %2978 = vst.msk [vmem:[#allocation4 + $0x48] sm:$0xff] %vm2967_vm13, %v12928_v13 }
 0x6fa   : > { %3277 = vrot.lane.b32.xlu2 %v3134_v53, %s7295_s19  ;;  %2979 = vst.msk [vmem:[#allocation4 + $0x50] sm:$0xff] %vm2967_vm13, %v12928_v13 }
 0x6fb   : > { %2980 = vst.msk [vmem:[#allocation4 + $0x58] sm:$0x3] %vm2970_vm0, %v12928_v13 }
 0x6fc   : > { %3285 = vrot.lane.b32.xlu0 %v3138_v30, %s7295_s19  ;;  %2981 = vst.msk [vmem:[#allocation4 + $0x60] sm:$0xff] %vm2967_vm13, %v12928_v13 }
 0x6fd   : > { %3293 = vrot.lane.b32.xlu1 %v3142_v35, %s7295_s19  ;;  %2982 = vst.msk [vmem:[#allocation4 + $0x68] sm:$0xff] %vm2967_vm13, %v12928_v13 }
 0x6fe   : > { %2983 = vst.msk [vmem:[#allocation4 + $0x70] sm:$0x3] %vm2970_vm0, %v12928_v13 }
 0x6ff   : > { %2984 = vst.msk [vmem:[#allocation4 + $0x78] sm:$0xff] %vm2967_vm13, %v12928_v13 }
 0x700   : > { %2985 = vst.msk [vmem:[#allocation4 + $0x80] sm:$0xff] %vm2967_vm13, %v12928_v13 }
 0x701   : > { %2986 = vst.msk [vmem:[#allocation4 + $0x88] sm:$0x3] %vm2970_vm0, %v12928_v13 }
 0x702   : > { %3283 = vrot.lane.b32.xlu2 %v3248_v1, %s7295_s19  ;;  %2987 = vst.msk [vmem:[#allocation4 + $0x90] sm:$0xff] %vm2967_vm13, %v12928_v13 }
 0x703   : > { %2988 = vst.msk [vmem:[#allocation4 + $0x98] sm:$0xff] %vm2967_vm13, %v12928_v13 }
 0x704   : > { %3291 = vrot.lane.b32.xlu0 %v3252_v26, %s7295_s19  ;;  %2989 = vst.msk [vmem:[#allocation4 + $0xa0] sm:$0x3] %vm2970_vm0, %v12928_v13 }
 0x705   : > { %3299 = vrot.lane.b32.xlu1 %v3256_v5, %s7295_s19  ;;  %2990 = vst.msk [vmem:[#allocation4 + $0xa8] sm:$0xff] %vm2967_vm13, %v12928_v13 }
 0x70a   : > { %3289 = vrot.lane.b32.xlu2 %v3140_v42, %s7295_s19 }
 0x70c   : > { %3297 = vrot.lane.b32.xlu0 %v3144_v29, %s7295_s19 }
 0x712   : > { %3295 = vrot.lane.b32.xlu2 %v3254_v52, %s7295_s19 }
 0x714   : > { %3303 = vrot.lane.b32.xlu0 %v3258_v57, %s7295_s19 }
 0x71a   : > { %3301 = vrot.lane.b32.xlu2 %v3146_v28, %s7295_s19 }
 0x74c   : > { %v3308_v58 = vpop.permute.xlu2 %3307 }
 0x74d   : > { %3341 = vst.msk [vmem:[#allocation4 + $0xb1] sm:$0xff] %vm3325_vm14, %v3308_v58 }
 0x752   : > { %v3306_v0 = vpop.permute.xlu1 %3305 }
 0x753   : > { %3340 = vst.msk [vmem:[#allocation4 + $0xa9] sm:$0xff] %vm3325_vm14, %v3306_v0 }
 0x754   : > { %v3278_v60 = vpop.permute.xlu2 %3277  ;;  %v3365_v54 = vld [vmem:[#allocation4 + $0xb8] sm:$0x3] }
 0x755   : > { %3326 = vst.msk [vmem:[#allocation4 + $0x1] sm:$0xff] %vm3325_vm14, %v3278_v60  ;;  %v4413_v61 = vrot.slane %v3365_v54, 1  ;;  %v5453_v27 = vrot.slane %v3365_v54, 2 }
 0x75a   : > { %v3282_v33 = vpop.permute.xlu1 %3281  ;;  %v9452_v12 = vld [vmem:[#allocation4 + $0xa8] sm:$0xff]  ;;  %v9454_v43 = vld [vmem:[#allocation4 + $0xb0] sm:$0xff] }
 0x75b   : > { %3328 = vst.msk [vmem:[#allocation4 + $0x19] sm:$0xff] %vm3325_vm14, %v3282_v33  ;;  %v6713_v38 = vpack.i.bf16 %v9454_v43, %v9452_v12  ;;  %v4411_v24 = vrot.slane %v9454_v43, 1  ;;  %v4410_v14 = vrot.slane %v9452_v12, 1  ;;  %v5450_v11 = vrot.slane %v9452_v12, 2 }
 0x75c   : > { %v3284_v48 = vpop.permute.xlu2 %3283  ;;  %v9469_v32 = vld [vmem:[#allocation4] sm:$0xff]  ;;  %v5451_v21 = vrot.slane %v9454_v43, 2 }
 0x75d   : > { %3329 = vst.msk [vmem:[#allocation4 + $0x21] sm:$0xff] %vm3325_vm14, %v3284_v48  ;;  %6714 = vrot.lane.b32.xlu2 %v6713_v38, %s7296_s13  ;;  %v9474_v46 = vsel %vm4374_vm15, %v4411_v24, %v4413_v61  ;;  %v9479_v41 = vsel %vm4374_vm15, %v4410_v14, %v4411_v24  ;;  %v4375_v7 = vrot.slane %v9469_v32, 1  ;;  %v5415_v34 = vrot.slane %v9469_v32, 2 }
 0x75e   : > { %v9489_v18 = vsel %vm1507_vm5, %v5450_v11, %v5451_v21  ;;  %v9492_v23 = vsel %vm1507_vm5, %v5451_v21, %v5453_v27  ;;  %v9506_v47 = vpack.i.bf16 %v9474_v46, %v9479_v41 }
 0x75f   : > { %v9517_v3 = vpack.i.bf16 %v9492_v23, %v9489_v18 }
 0x762   : > { %v9476_v9 = vld [vmem:[#allocation4 + $0x18] sm:$0xff] }
 0x763   : > { %v4380_v1 = vrot.slane %v9476_v9, 1  ;;  %v5420_v2 = vrot.slane %v9476_v9, 2 }
 0x764   : > { %v3290_v39 = vpop.permute.xlu2 %3289  ;;  %v9467_v45 = vld [vmem:[#allocation4 + $0x20] sm:$0xff]  ;;  %v3347_v37 = vld [vmem:[#allocation4 + $0x28] sm:$0x3] }
 0x765   : > { %3332 = vst.msk [vmem:[#allocation4 + $0x49] sm:$0xff] %vm3325_vm14, %v3290_v39  ;;  %6719 = vrot.lane.b32.xlu2 %v6713_v38, %s7291_s25  ;;  %v9483_v63 = vpack.i.bf16 %v9467_v45, %v9476_v9  ;;  %v4381_v36 = vrot.slane %v9467_v45, 1  ;;  %v4383_v49 = vrot.slane %v3347_v37, 1  ;;  %v5421_v30 = vrot.slane %v9467_v45, 2 }
 0x766   : > { %v3280_v51 = vpop.permute.xlu0 %3279  ;;  %v5423_v13 = vrot.slane %v3347_v37, 2 }
 0x767   : > { %3327 = vst.msk [vmem:[#allocation4 + $0x9] sm:$0xff] %vm3325_vm14, %v3280_v51  ;;  %v3288_v20 = vpop.permute.xlu1 %3287  ;;  %v9528_v5 = vsel %vm4374_vm15, %v4381_v36, %v4383_v49  ;;  %v9532_v44 = vsel %vm4374_vm15, %v4380_v1, %v4381_v36  ;;  %v9535_v29 = vsel %vm1507_vm5, %v5420_v2, %v5421_v30 }
 0x768   : > { %3331 = vst.msk [vmem:[#allocation4 + $0x39] sm:$0xff] %vm3325_vm14, %v3288_v20  ;;  %v9538_v10 = vsel %vm1507_vm5, %v5421_v30, %v5423_v13  ;;  %v4557_v0 = vrot.slane %v9528_v5, 4  ;;  %v9556_v33 = vpack.i.bf16 %v9528_v5, %v9532_v44  ;;  %v4445_v38 = vrot.slane %v9532_v44, 4 }
 0x769   : > { %v9570_v20 = vpack.i.bf16 %v9538_v10, %v9535_v29 }
 0x76a   : > { %12932 = vst [vmem:[#allocation10_spill] sm:$0xff] %v9556_v33 }
 0x76b   : > { %12933 = vst [vmem:[#allocation21_spill] sm:$0xff] %v9570_v20 }
 0x76c   : > { %v3296_v31 = vpop.permute.xlu2 %3295  ;;  %v9502_v62 = vld [vmem:[#allocation4 + $0x48] sm:$0xff] }
 0x76d   : > { %3335 = vst.msk [vmem:[#allocation4 + $0x69] sm:$0xff] %vm3325_vm14, %v3296_v31  ;;  %6729 = vrot.lane.b32.xlu2 %v9483_v63, %s7296_s13  ;;  %v3378_v26 = vrot.slane %v9502_v62, 4  ;;  %v4390_v49 = vrot.slane %v9502_v62, 1 }
 0x76e   : > { %v3286_v19 = vpop.permute.xlu0 %3285  ;;  %v9500_v53 = vld [vmem:[#allocation4 + $0x8] sm:$0xff]  ;;  %v3344_v56 = vld [vmem:[#allocation4 + $0x10] sm:$0x3] }
 0x76f   : > { %3330 = vst.msk [vmem:[#allocation4 + $0x31] sm:$0xff] %vm3325_vm14, %v3286_v19  ;;  %v3294_v35 = vpop.permute.xlu1 %3293  ;;  %v9512_v55 = vpack.i.bf16 %v9500_v53, %v9469_v32  ;;  %v5416_v25 = vrot.slane %v9500_v53, 2  ;;  %v5418_v16 = vrot.slane %v3344_v56, 2  ;;  %v4376_v52 = vrot.slane %v9500_v53, 1  ;;  %v9565_v51 = vld [vmem:[#allocation4 + $0x40] sm:$0x3] }
 0x770   : > { %3334 = vst.msk [vmem:[#allocation4 + $0x61] sm:$0xff] %vm3325_vm14, %v3294_v35  ;;  %v4378_v57 = vrot.slane %v3344_v56, 1  ;;  %v3379_v48 = vsel %vm717_vm1, %v3378_v26, %v9476_v9  ;;  %v5430_v56 = vrot.slane %v9502_v62, 2  ;;  %v4388_v35 = vrot.slane %v9565_v51, 1 }
 0x771   : > { %6724 = vrot.lane.b32.xlu1 %v9512_v55, %s7296_s13  ;;  %v9543_v4 = vsel %vm1507_vm5, %v5415_v34, %v5416_v25  ;;  %v9546_v28 = vsel %vm1507_vm5, %v5416_v25, %v5418_v16  ;;  %v4377_v31 = vsel %vm4374_vm15, %v4375_v7, %v4376_v52  ;;  %v9611_v15 = vperm.slane %v3379_v48, %v7428_v6 }
 0x772   : > { %12929 = vst [vmem:[#allocation8_spill] sm:$0xff] %v9543_v4  ;;  %v9551_v60 = vpack.i.bf16 %v9546_v28, %v9543_v4  ;;  %v4379_v36 = vsel %vm4374_vm15, %v4376_v52, %v4378_v57  ;;  %v4433_v26 = vrot.slane %v4377_v31, 4 }
 0x773   : > { %12930 = vst [vmem:[#allocation9_spill] sm:$0xff] %v9546_v28  ;;  %v4545_v2 = vrot.slane %v4379_v36, 4  ;;  %v9602_v25 = vpack.i.bf16 %v4379_v36, %v4377_v31 }
 0x774   : > { %v3302_v58 = vpop.permute.xlu2 %3301  ;;  %12931 = vst [vmem:[#allocation13_spill] sm:$0xff] %v9551_v60  ;;  %v9594_v30 = vld [vmem:[#allocation4 + $0x70] sm:$0x3] }
 0x775   : > { %3338 = vst.msk [vmem:[#allocation4 + $0x91] sm:$0xff] %vm3325_vm14, %v3302_v58 }
 0x776   : > { %v3292_v39 = vpop.permute.xlu0 %3291  ;;  %v9561_v54 = vld [vmem:[#allocation4 + $0x30] sm:$0xff]  ;;  %v9563_v24 = vld [vmem:[#allocation4 + $0x38] sm:$0xff] }
 0x777   : > { %3333 = vst.msk [vmem:[#allocation4 + $0x51] sm:$0xff] %vm3325_vm14, %v3292_v39  ;;  %v3300_v11 = vpop.permute.xlu1 %3299  ;;  %v9576_v21 = vpack.i.bf16 %v9563_v24, %v9561_v54  ;;  %v9578_v27 = vld [vmem:[#allocation4 + $0x60] sm:$0xff]  ;;  %v9580_v37 = vld [vmem:[#allocation4 + $0x68] sm:$0xff]  ;;  %v4385_v7 = vrot.slane %v9561_v54, 1  ;;  %v4386_v13 = vrot.slane %v9563_v24, 1  ;;  %v4398_v39 = vrot.slane %v9594_v30, 1 }
 0x778   : > { %3337 = vst.msk [vmem:[#allocation4 + $0x81] sm:$0xff] %vm3325_vm14, %v3300_v11  ;;  %v9589_v19 = vpack.i.bf16 %v9580_v37, %v9578_v27  ;;  %v4395_v8 = vrot.slane %v9578_v27, 1 }
 0x779   : > { %6734 = vrot.lane.b32.xlu0 %v9576_v21, %s7296_s13  ;;  %v4387_v16 = vsel %vm4374_vm15, %v4385_v7, %v4386_v13  ;;  %v4389_v52 = vsel %vm4374_vm15, %v4386_v13, %v4388_v35  ;;  %v4396_v13 = vrot.slane %v9580_v37, 1 }
 0x77a   : > { %6744 = vrot.lane.b32.xlu2 %v9589_v19, %s7296_s13  ;;  %v4543_v11 = vrot.slane %v4389_v52, 4  ;;  %v4546_v50 = vsel %vm717_vm1, %v4389_v52, %v4545_v2  ;;  %v9615_v17 = vpack.i.bf16 %v4389_v52, %v4387_v16  ;;  %v4431_v34 = vrot.slane %v4387_v16, 4 }
 0x77b   : > { %v4434_v48 = vsel %vm717_vm1, %v4387_v16, %v4433_v26  ;;  %v9662_v40 = vsel %vm4374_vm15, %v4395_v8, %v4396_v13 }
 0x77c   : > { %12934 = vst [vmem:[#allocation12_spill] sm:$0xff] %v9615_v17  ;;  %v9622_v42 = vsel %vm717_vm1, %v4543_v11, %v4379_v36  ;;  %v9635_v36 = vsel %vm717_vm1, %v4431_v34, %v4377_v31  ;;  %v9652_v34 = vsel %vm4374_vm15, %v4396_v13, %v4398_v39  ;;  %v5426_v39 = vrot.slane %v9563_v24, 2 }
 0x77d   : > { %12935 = vst [vmem:[#allocation19_spill] sm:$0xff] %v9622_v42  ;;  %v9685_v13 = vpack.i.bf16 %v9652_v34, %v9662_v40 }
 0x77e   : > { %v3298_v35 = vpop.permute.xlu0 %3297  ;;  %v9619_v57 = vld [vmem:[#allocation4 + $0x50] sm:$0xff]  ;;  %v3353_v58 = vld [vmem:[#allocation4 + $0x58] sm:$0x3] }
 0x77f   : > { %3336 = vst.msk [vmem:[#allocation4 + $0x79] sm:$0xff] %vm3325_vm14, %v3298_v35  ;;  %v9628_v2 = vpack.i.bf16 %v9619_v57, %v9502_v62  ;;  %v4391_v52 = vrot.slane %v9619_v57, 1  ;;  %v4393_v7 = vrot.slane %v3353_v58, 1  ;;  %v5431_v11 = vrot.slane %v9619_v57, 2 }
 0x780   : > { %v5433_v35 = vrot.slane %v3353_v58, 2  ;;  %v5425_v58 = vrot.slane %v9561_v54, 2  ;;  %12937 = vst [vmem:[#allocation15_spill] sm:$0xff] %v9685_v13 }
 0x781   : > { %6739 = vrot.lane.b32.xlu1 %v9628_v2, %s7296_s13  ;;  %v4392_v26 = vsel %vm4374_vm15, %v4390_v49, %v4391_v52  ;;  %v4394_v16 = vsel %vm4374_vm15, %v4391_v52, %v4393_v7  ;;  %v9655_v7 = vld [vmem:[#allocation4 + $0x90] sm:$0xff] }
 0x782   : > { %6764 = vrot.lane.b32.xlu2 %v9483_v63, %s7291_s25  ;;  %v4555_v59 = vrot.slane %v4394_v16, 4  ;;  %v4443_v14 = vrot.slane %v4392_v26, 4  ;;  %v4558_v31 = vsel %vm717_vm1, %v4394_v16, %v4557_v0  ;;  %v4446_v49 = vsel %vm717_vm1, %v4392_v26, %v4445_v38 }
 0x783   : > { %v5432_v0 = vsel %vm1507_vm5, %v5430_v56, %v5431_v11  ;;  %v5434_v38 = vsel %vm1507_vm5, %v5431_v11, %v5433_v35  ;;  %v9710_v35 = vpack.i.bf16 %v4394_v16, %v4392_v26  ;;  %v9713_v42 = vperm.slane %v4558_v31, %v7428_v6 }
 0x784   : > { %v4556_v63 = vsel %vm717_vm1, %v4555_v59, %v9528_v5  ;;  %v4444_v52 = vsel %vm717_vm1, %v4443_v14, %v9532_v44  ;;  %v5483_v1 = vrot.slane %v5432_v0, 4  ;;  %v9674_v44 = vperm.slane %v4546_v50, %v7428_v6 }
 0x785   : > { %v5595_v8 = vrot.slane %v5434_v38, 4  ;;  %v5436_v59 = vrot.slane %v9580_v37, 2  ;;  %v9691_v5 = vperm.slane %v4434_v48, %v7428_v6  ;;  %v12939_v50 = vrot.slane %v9535_v29, 4  ;;  %12941 = vst [vmem:[#allocation20_spill] sm:$0xff] %v9713_v42 }
 0x786   : > { %v3304_v60 = vpop.permute.xlu0 %3303  ;;  %v9668_v20 = vld [vmem:[#allocation4 + $0x78] sm:$0xff]  ;;  %v9670_v17 = vld [vmem:[#allocation4 + $0x80] sm:$0xff]  ;;  %12936 = vst [vmem:[#allocation11_spill] sm:$0xff] %v9674_v44  ;;  %v5484_v11 = vsel %vm717_vm1, %v5483_v1, %v9535_v29  ;;  %v9720_v1 = vperm.slane %v4444_v52, %v7428_v6  ;;  %v9727_v26 = vpack.i.bf16 %v5434_v38, %v5432_v0  ;;  %v9736_v44 = vsel %vm1507_vm5, %v5425_v58, %v5426_v39 }
 0x787   : > { %3339 = vst.msk [vmem:[#allocation4 + $0x99] sm:$0xff] %vm3325_vm14, %v3304_v60  ;;  %v9680_v14 = vpack.i.bf16 %v9670_v17, %v9668_v20  ;;  %v9693_v60 = vld [vmem:[#allocation4 + $0x88] sm:$0x3]  ;;  %v4400_v61 = vrot.slane %v9668_v20, 1  ;;  %v4401_v56 = vrot.slane %v9670_v17, 1  ;;  %v5596_v13 = vsel %vm717_vm1, %v5595_v8, %v9538_v10 }
 0x788   : > { %12938 = vst [vmem:[#allocation14_spill] sm:$0xff] %v9691_v5  ;;  %v9706_v48 = vsel %vm717_vm1, %v5432_v0, %v12939_v50  ;;  %v9717_v8 = vperm.slane %v4556_v63, %v7428_v6  ;;  %v4403_v29 = vrot.slane %v9693_v60, 1  ;;  %v9724_v50 = vperm.slane %v4446_v49, %v7428_v6 }
 0x789   : > { %6749 = vrot.lane.b32.xlu0 %v9680_v14, %s7296_s13  ;;  %12940 = vst [vmem:[#allocation23_spill] sm:$0xff] %v9706_v48  ;;  %v4402_v31 = vsel %vm4374_vm15, %v4400_v61, %v4401_v56  ;;  %v12945_v49 = vrot.slane %v9565_v51, 2  ;;  %v12949_v58 = vrot.slane %v9474_v46, 4  ;;  %v12954_v5 = vrot.slane %v9578_v27, 2 }
 0x78a   : > { %6779 = vrot.lane.b32.xlu2 %v9589_v19, %s7291_s25  ;;  %12942 = vst [vmem:[#allocation22_spill] sm:$0xff] %v9724_v50  ;;  %v4404_v33 = vsel %vm4374_vm15, %v4401_v56, %v4403_v29  ;;  %v12947_v29 = vrot.slane %v9538_v10, 4  ;;  %v4469_v61 = vrot.slane %v4402_v31, 4  ;;  %v9774_v56 = vperm.slane %v5596_v13, %v7428_v6 }
 0x78b   : > { %12943 = vst [vmem:[#allocation25_spill] sm:$0xff] %v9727_v26  ;;  %v9741_v19 = vsel %vm1507_vm5, %v5426_v39, %v12945_v49  ;;  %v4580_v51 = vsel %vm717_vm1, %v12949_v58, %v4404_v33  ;;  %v12950_v39 = vrot.slane %v9479_v41, 4  ;;  %v12955_v26 = vrot.slane %v9594_v30, 2 }
 0x78c   : > { %12944 = vst [vmem:[#allocation18_spill] sm:$0xff] %v9736_v44  ;;  %v9752_v63 = vsel %vm717_vm1, %v5434_v38, %v12947_v29  ;;  %v5445_v29 = vrot.slane %v9655_v7, 2  ;;  %v9769_v58 = vpack.i.bf16 %v9741_v19, %v9736_v44  ;;  %v9796_v13 = vperm.slane %v4580_v51, %v7428_v6 }
 0x78d   : > { %12946 = vst [vmem:[#allocation24_spill] sm:$0xff] %v9741_v19  ;;  %v4468_v49 = vsel %vm717_vm1, %v12950_v39, %v4402_v31  ;;  %v4581_v39 = vrot.slane %v4404_v33, 4  ;;  %v9793_v50 = vsel %vm1507_vm5, %v5436_v59, %v12955_v26  ;;  %v5583_v30 = vrot.slane %v9741_v19, 4 }
 0x78e   : > { %v9733_v48 = vld [vmem:[#allocation4 + $0x98] sm:$0xff]  ;;  %v3362_v52 = vld [vmem:[#allocation4 + $0xa0] sm:$0x3]  ;;  %12948 = vst [vmem:[#allocation16_spill] sm:$0xff] %v9752_v63  ;;  %v9777_v63 = vperm.slane %v5484_v11, %v7428_v6  ;;  %v9798_v11 = vpack.i.bf16 %v4404_v33, %v4402_v31  ;;  %v9830_v19 = vsel %vm717_vm1, %v9479_v41, %v4469_v61 }
 0x78f   : > { %v9745_v0 = vpack.i.bf16 %v9733_v48, %v9655_v7  ;;  %v5446_v16 = vrot.slane %v9733_v48, 2  ;;  %v5448_v42 = vrot.slane %v3362_v52, 2  ;;  %v4406_v10 = vrot.slane %v9733_v48, 1  ;;  %12951 = vst [vmem:[#allocation28_spill] sm:$0xff] %v9769_v58 }
 0x790   : > { %v4408_v38 = vrot.slane %v3362_v52, 1  ;;  %12952 = vst [vmem:[#allocation27_spill] sm:$0xff] %v9774_v56  ;;  %v9788_v58 = vsel %vm1507_vm5, %v12954_v5, %v5436_v59  ;;  %v5471_v59 = vrot.slane %v9736_v44, 4  ;;  %v9812_v26 = vsel %vm717_vm1, %v9474_v46, %v4581_v39 }
 0x791   : > { %6754 = vrot.lane.b32.xlu1 %v9745_v0, %s7296_s13  ;;  %6769 = vrot.lane.b32.xlu0 %v9576_v21, %s7291_s25  ;;  %12953 = vst [vmem:[#allocation31_spill] sm:$0xff] %v9777_v63  ;;  %v9780_v21 = vsel %vm1507_vm5, %v5445_v29, %v5446_v16  ;;  %v9783_v52 = vsel %vm1507_vm5, %v5446_v16, %v5448_v42  ;;  %v12965_v46 = vrot.slane %v9655_v7, 4  ;;  %v12967_v44 = vrot.slane %v9492_v23, 4 }
 0x792   : > { %6814 = vrot.lane.b32.xlu2 %v9602_v25, %s7296_s13  ;;  %12956 = vst [vmem:[#allocation30_spill] sm:$0xff] %v9798_v11  ;;  %v9801_v29 = vperm.slane %v4468_v49, %v7428_v6  ;;  %v5607_v42 = vrot.slane %v9783_v52, 4  ;;  %v9805_v16 = vsel %vm4374_vm15, %v4406_v10, %v4408_v38  ;;  %v5495_v5 = vrot.slane %v9780_v21, 4 }
 0x793   : > { %12957 = vst [vmem:[#allocation17_spill] sm:$0xff] %v9805_v16  ;;  %v9821_v51 = vpack.i.bf16 %v9793_v50, %v9788_v58  ;;  %v12960_v49 = vrot.slane %v9655_v7, 1  ;;  %v4567_v33 = vrot.slane %v9805_v16, 4  ;;  %v9845_v41 = vsel %vm717_vm1, %v5471_v59, %v9543_v4 }
 0x794   : > { %12958 = vst [vmem:[#allocation26_spill] sm:$0xff] %v9812_v26  ;;  %v9817_v31 = vsel %vm717_vm1, %v5607_v42, %v9793_v50  ;;  %v9835_v39 = vsel %vm717_vm1, %v5495_v5, %v9788_v58  ;;  %v3502_v42 = vrot.slane %v9733_v48, 4  ;;  %v9849_v61 = vsel %vm717_vm1, %v5583_v30, %v9546_v28 }
 0x795   : > { %12959 = vst [vmem:[#allocation29_spill] sm:$0xff] %v9821_v51  ;;  %v9826_v38 = vsel %vm4374_vm15, %v12960_v49, %v4406_v10  ;;  %v5440_v10 = vrot.slane %v9668_v20, 2  ;;  %v5443_v59 = vrot.slane %v9693_v60, 2  ;;  %v12964_v49 = vrot.slane %v9561_v54, 4 }
 0x796   : > { %12961 = vst [vmem:[#allocation32_spill] sm:$0xff] %v9835_v39  ;;  %v9856_v5 = vpack.i.bf16 %v9805_v16, %v9826_v38  ;;  %v3391_v51 = vsel %vm717_vm1, %v12965_v46, %v9578_v27  ;;  %v4568_v56 = vsel %vm717_vm1, %v4567_v33, %v9652_v34  ;;  %v12966_v60 = vrot.slane %v9452_v12, 4 }
 0x797   : > { %12962 = vst [vmem:[#allocation33_spill] sm:$0xff] %v9845_v41  ;;  %v3367_v30 = vsel %vm717_vm1, %v12964_v49, %v9469_v32  ;;  %v12970_v46 = vrot.slane %v9489_v18, 4 }
 0x798   : > { %12963 = vst [vmem:[#allocation6_spill] sm:$0xff] %v9849_v61  ;;  %v3403_v28 = vsel %vm717_vm1, %v12966_v60, %v9668_v20  ;;  %v3397_v60 = vperm.slane %v3391_v51, %v7428_v6 }
 0x799   : > { %6759 = vrot.lane.b32.xlu1 %v9512_v55, %s7291_s25  ;;  %6784 = vrot.lane.b32.xlu0 %v9680_v14, %s7291_s25  ;;  %v4455_v55 = vrot.slane %v9826_v38, 4  ;;  %v5441_v14 = vrot.slane %v9670_v17, 2 }
 0x79a   : > { %6829 = vrot.lane.b32.xlu2 %v9710_v35, %s7296_s13 }
 0x79b   : > { %v5442_v63 = vsel %vm1507_vm5, %v5440_v10, %v5441_v14  ;;  %v5444_v39 = vsel %vm1507_vm5, %v5441_v14, %v5443_v59  ;;  %v4456_v10 = vsel %vm717_vm1, %v4455_v55, %v9662_v40  ;;  %v9893_v14 = vpack.i.bf16 %v9783_v52, %v9780_v21 }
 0x79c   : > { %v9880_v49 = vsel %vm717_vm1, %v12967_v44, %v5444_v39  ;;  %v5621_v4 = vrot.slane %v5444_v39, 4  ;;  %v9882_v26 = vpack.i.bf16 %v5444_v39, %v5442_v63  ;;  %v9887_v33 = vsel %vm717_vm1, %v12970_v46, %v5442_v63 }
 0x79d   : > { %12968 = vst [vmem:[#allocation7_spill] sm:$0xff] %v9880_v49  ;;  %v5509_v59 = vrot.slane %v5442_v63, 4  ;;  %v3373_v39 = vperm.slane %v3367_v30, %v7428_v6  ;;  %v9903_v46 = vperm.slane %v4568_v56, %v7428_v6  ;;  %v12975_v63 = vrot.slane %v9563_v24, 4 }
 0x79e   : > { %12969 = vst [vmem:[#allocation34_spill] sm:$0xff] %v9882_v26  ;;  %v9897_v44 = vsel %vm717_vm1, %v9492_v23, %v5621_v4  ;;  %v3409_v26 = vperm.slane %v3403_v28, %v7428_v6  ;;  %v12976_v23 = vrot.slane %v9619_v57, 4  ;;  %v9922_v28 = vperm.slane %v4456_v10, %v7428_v6 }
 0x79f   : > { %12971 = vst [vmem:[#allocation35_spill] sm:$0xff] %v9887_v33  ;;  %v9907_v55 = vsel %vm717_vm1, %v9489_v18, %v5509_v59  ;;  %v3479_v49 = vsel %vm717_vm1, %v12975_v63, %v9500_v53  ;;  %v3416_v18 = vrot.slane %v3373_v39, 4  ;;  %v3440_v56 = vrot.slane %v3397_v60, 4 }
 0x7a0   : > { %12972 = vst [vmem:[#allocation36_spill] sm:$0xff] %v9893_v14  ;;  %v3491_v4 = vsel %vm717_vm1, %v12976_v23, %v9467_v45  ;;  %v3485_v51 = vperm.slane %v3479_v49, %v7428_v6  ;;  %v3503_v59 = vsel %vm717_vm1, %v3502_v42, %v9580_v37  ;;  %v3414_v10 = vrot.slane %v9611_v15, 4 }
 0x7a1   : > { %12973 = vst [vmem:[#allocation37_spill] sm:$0xff] %v9897_v44  ;;  %6774 = vrot.lane.b32.xlu1 %v9628_v2, %s7291_s25  ;;  %6794 = vrot.lane.b32.xlu0 %v9506_v47, %s7296_s13  ;;  %v3497_v30 = vperm.slane %v3491_v4, %v7428_v6  ;;  %v12977_v2 = vrot.slane %v9454_v43, 4  ;;  %v3417_v23 = vsel %vm717_vm1, %v9611_v15, %v3416_v18  ;;  %v3438_v61 = vrot.slane %v3409_v26, 4 }
 0x7a2   : > { %12974 = vst [vmem:[#allocation38_spill] sm:$0xff] %v9907_v55  ;;  %6844 = vrot.lane.b32.xlu2 %v9856_v5, %s7296_s13  ;;  %v3441_v49 = vsel %vm717_vm1, %v3409_v26, %v3440_v56  ;;  %v3509_v33 = vperm.slane %v3503_v59, %v7428_v6  ;;  %v3425_v4 = vperm.slane %v3417_v23, %v7436_v22  ;;  %v3528_v55 = vrot.slane %v3485_v51, 4 }
 0x7a3   : > { %v3515_v63 = vsel %vm717_vm1, %v12977_v2, %v9670_v17  ;;  %v3449_v42 = vperm.slane %v3441_v49, %v7436_v22  ;;  %v3415_v44 = vsel %vm717_vm1, %v3414_v10, %v3373_v39  ;;  %v3526_v41 = vrot.slane %v3497_v30, 4 }
 0x7a4   : > { %v3521_v14 = vperm.slane %v3515_v63, %v7428_v6  ;;  %v3552_v11 = vrot.slane %v3509_v33, 4  ;;  %v9944_v2 = vperm.slane %v3415_v44, %v7436_v22  ;;  %v3468_v15 = vrot.slane %v3425_v4, 4 }
 0x7a5   : > { %v3529_v18 = vsel %vm717_vm1, %v3497_v30, %v3528_v55  ;;  %v3466_v56 = vrot.slane %v3449_v42, 4  ;;  %v3439_v49 = vsel %vm717_vm1, %v3438_v61, %v3397_v60  ;;  %v3527_v61 = vsel %vm717_vm1, %v3526_v41, %v3485_v51 }
 0x7a6   : > { %v3550_v59 = vrot.slane %v3521_v14, 4  ;;  %v3537_v63 = vperm.slane %v3529_v18, %v7436_v22  ;;  %v3553_v23 = vsel %vm717_vm1, %v3521_v14, %v3552_v11  ;;  %v3464_v16 = vrot.slane %v9944_v2, 4 }
 0x7a7   : > { %v9952_v39 = vsel %vm717_vm1, %v3449_v42, %v3468_v15  ;;  %v3561_v44 = vperm.slane %v3553_v23, %v7436_v22  ;;  %v9956_v26 = vsel %vm717_vm1, %v3466_v56, %v3425_v4  ;;  %v9959_v55 = vperm.slane %v3439_v49, %v7436_v22 }
 0x7a8   : > { %v3580_v11 = vrot.slane %v3537_v63, 4  ;;  %v3551_v14 = vsel %vm717_vm1, %v3550_v59, %v3509_v33  ;;  %v12978_v60 = vrot.slane %v9469_v32, 4  ;;  %v12981_v51 = vrot.slane %v9578_v27, 4 }
 0x7a9   : > { %6789 = vrot.lane.b32.xlu1 %v9745_v0, %s7291_s25  ;;  %6799 = vrot.lane.b32.xlu0 %v9506_v47, %s7291_s25  ;;  %v3578_v10 = vrot.slane %v3561_v44, 4  ;;  %v9975_v0 = vsel %vm717_vm1, %v9959_v55, %v3464_v16  ;;  %v9978_v47 = vperm.slane %v3527_v61, %v7436_v22  ;;  %v9981_v41 = vperm.slane %v3551_v14, %v7436_v22 }
 0x7aa   : > { %v3369_v30 = vsel %vm717_vm1, %v9561_v54, %v12978_v60  ;;  %6849 = vrot.lane.b32.xlu2 %v9602_v25, %s7291_s25  ;;  %v9984_v33 = vsel %vm717_vm1, %v3561_v44, %v3580_v11  ;;  %v12980_v54 = vrot.slane %v9476_v9, 4  ;;  %v3393_v16 = vsel %vm717_vm1, %v9655_v7, %v12981_v51 }
 0x7ab   : > { %12979 = vst [vmem:[#allocation39_spill] sm:$0xff] %v9978_v47  ;;  %v3377_v32 = vperm.slane %v3369_v30, %v7428_v6  ;;  %v9998_v42 = vsel %vm717_vm1, %v3578_v10, %v3537_v63  ;;  %v3576_v15 = vrot.slane %v9978_v47, 4  ;;  %v12982_v27 = vrot.slane %v9668_v20, 4  ;;  %v13015_v20 = vld [vmem:[#allocation11_spill] sm:$0xff]  ;;  %v13026_v47 = vld [vmem:[#allocation16_spill] sm:$0xff] }
 0x7ac   : > { %v3381_v25 = vsel %vm717_vm1, %v9502_v62, %v12980_v54  ;;  %v3401_v62 = vperm.slane %v3393_v16, %v7428_v6  ;;  %v12983_v23 = vrot.slane %v9500_v53, 4  ;;  %v3492_v44 = vrot.slane %v9467_v45, 4  ;;  %v12984_v45 = vld [vmem:[#allocation10_spill] sm:$0xff]  ;;  %v12985_v54 = vld [vmem:[#allocation19_spill] sm:$0xff] }
 0x7ad   : > { %v3389_v18 = vperm.slane %v3381_v25, %v7428_v6  ;;  %v3405_v7 = vsel %vm717_vm1, %v9452_v12, %v12982_v27  ;;  %v3428_v56 = vrot.slane %v3377_v32, 4  ;;  %v10011_v59 = vsel %vm717_vm1, %v9981_v41, %v3576_v15 }
 0x7ae   : > { %v3413_v63 = vperm.slane %v3405_v7, %v7428_v6  ;;  %v3481_v49 = vsel %vm717_vm1, %v9563_v24, %v12983_v23  ;;  %v3452_v12 = vrot.slane %v3401_v62, 4  ;;  %v3493_v14 = vsel %vm717_vm1, %v9619_v57, %v3492_v44 }
 0x7af   : > { %v3429_v11 = vsel %vm717_vm1, %v3389_v18, %v3428_v56  ;;  %v3489_v61 = vperm.slane %v3481_v49, %v7428_v6  ;;  %v3426_v60 = vrot.slane %v3389_v18, 4  ;;  %v4438_v53 = vperm.slane %v9635_v36, %v7428_v6 }
 0x7b0   : > { %v3453_v24 = vsel %vm717_vm1, %v3413_v63, %v3452_v12  ;;  %v3501_v30 = vperm.slane %v3493_v14, %v7428_v6  ;;  %v4550_v25 = vperm.slane %v12985_v54, %v7428_v6  ;;  %v12986_v36 = vrot.slane %v9670_v17, 4 }
 0x7b1   : > { %6804 = vrot.lane.b32.xlu1 %v9517_v3, %s7291_s25  ;;  %6819 = vrot.lane.b32.xlu0 %v12984_v45, %s7296_s13  ;;  %v3540_v10 = vrot.slane %v3489_v61, 4  ;;  %v3461_v57 = vperm.slane %v3453_v24, %v7436_v22  ;;  %v3427_v16 = vsel %vm717_vm1, %v3426_v60, %v3377_v32  ;;  %v4481_v15 = vrot.slane %v4438_v53, 4 }
 0x7b2   : > { %6864 = vrot.lane.b32.xlu2 %v9710_v35, %s7291_s25  ;;  %v3517_v51 = vsel %vm717_vm1, %v9454_v43, %v12986_v36  ;;  %v5609_v18 = vrot.slane %v9793_v50, 4  ;;  %v3437_v27 = vperm.slane %v3429_v11, %v7436_v22  ;;  %v3538_v56 = vrot.slane %v3501_v30, 4 }
 0x7b3   : > { %v3541_v7 = vsel %vm717_vm1, %v3501_v30, %v3540_v10  ;;  %v3474_v23 = vrot.slane %v3461_v57, 4  ;;  %v3433_v35 = vperm.slane %v3427_v16, %v7436_v22  ;;  %v4482_v49 = vsel %vm717_vm1, %v9720_v1, %v4481_v15 }
 0x7b4   : > { %v4593_v17 = vrot.slane %v4550_v25, 4  ;;  %v5497_v44 = vrot.slane %v9788_v58, 4  ;;  %v3525_v43 = vperm.slane %v3517_v51, %v7428_v6  ;;  %v3450_v32 = vrot.slane %v3413_v63, 4 }
 0x7b5   : > { %v3539_v12 = vsel %vm717_vm1, %v3538_v56, %v3489_v61  ;;  %v4617_v50 = vrot.slane %v9903_v46, 4  ;;  %v4505_v11 = vrot.slane %v9922_v28, 4  ;;  %v10055_v14 = vsel %vm717_vm1, %v3474_v23, %v3437_v27 }
 0x7b6   : > { %v4594_v60 = vsel %vm717_vm1, %v9717_v8, %v4593_v17  ;;  %v10061_v24 = vperm.slane %v9817_v31, %v7428_v6  ;;  %v3451_v58 = vsel %vm717_vm1, %v3450_v32, %v3401_v62  ;;  %v3545_v63 = vperm.slane %v3539_v12, %v7436_v22 }
 0x7b7   : > { %v12987_v61 = vrot.slane %v9720_v1, 4  ;;  %v10068_v10 = vpop.permute.xlu2 %6714  ;;  %v10072_v54 = vsel %vm717_vm1, %v9783_v52, %v5609_v18  ;;  %v12988_v36 = vrot.slane %v9580_v37, 4  ;;  %v3457_v51 = vperm.slane %v3451_v58, %v7436_v22  ;;  %v12989_v1 = vld [vmem:[#allocation15_spill] sm:$0xff] }
 0x7b8   : > { %v3472_v62 = vrot.slane %v3433_v35, 4  ;;  %v3562_v16 = vrot.slane %v3525_v43, 4  ;;  %v12990_v37 = vrot.slane %v9717_v8, 4  ;;  %v3549_v15 = vperm.slane %v3541_v7, %v7436_v22 }
 0x7b9   : > { %v4480_v30 = vsel %vm717_vm1, %v12987_v61, %v4438_v53  ;;  %v3505_v31 = vsel %vm717_vm1, %v9733_v48, %v12988_v36  ;;  %6809 = vrot.lane.b32.xlu1 %v9517_v3, %s7296_s13  ;;  %6834 = vrot.lane.b32.xlu0 %v12989_v1, %s7296_s13  ;;  %v10085_v53 = vsel %vm717_vm1, %v9780_v21, %v5497_v44  ;;  %v3470_v18 = vrot.slane %v3457_v51, 4 }
 0x7ba   : > { %v3513_v52 = vperm.slane %v3505_v31, %v7428_v6  ;;  %v4592_v48 = vsel %vm717_vm1, %v12990_v37, %v4550_v25  ;;  %6879 = vrot.lane.b32.xlu2 %v9856_v5, %s7291_s25  ;;  %v10095_v3 = vsel %vm717_vm1, %v3457_v51, %v3472_v62  ;;  %v10098_v56 = vperm.slane %v4482_v49, %v7436_v22 }
 0x7bb   : > { %v3584_v17 = vrot.slane %v3545_v63, 4  ;;  %v10102_v8 = vperm.slane %v4480_v30, %v7436_v22  ;;  %v10106_v5 = vsel %vm717_vm1, %v3470_v18, %v3433_v35  ;;  %v10109_v7 = vperm.slane %v4592_v48, %v7436_v22 }
 0x7bc   : > { %v3564_v21 = vrot.slane %v3513_v52, 4  ;;  %v3563_v23 = vsel %vm717_vm1, %v3562_v16, %v3513_v52  ;;  %12991 = vst [vmem:[#allocation10_spill] sm:$0xff] %v10106_v5  ;;  %v3476_v44 = vrot.slane %v3437_v27, 4  ;;  %v10113_v49 = vperm.slane %v4594_v60, %v7436_v22  ;;  %v12995_v52 = vld [vmem:[#allocation22_spill] sm:$0xff]  ;;  %v12996_v16 = vld [vmem:[#allocation12_spill] sm:$0xff] }
 0x7bd   : > { %v3569_v25 = vperm.slane %v3563_v23, %v7436_v22  ;;  %v4503_v12 = vrot.slane %v9801_v29, 4  ;;  %v12992_v58 = vrot.slane %v9662_v40, 4  ;;  %v4529_v60 = vrot.slane %v10102_v8, 4 }
 0x7be   : > { %v3565_v32 = vsel %vm717_vm1, %v3525_v43, %v3564_v21  ;;  %v10125_v27 = vsel %vm717_vm1, %v3461_v57, %v3476_v44  ;;  %v4615_v31 = vrot.slane %v9796_v13, 4  ;;  %v10133_v40 = vperm.slane %v9830_v19, %v7428_v6  ;;  %v12997_v21 = vld [vmem:[#allocation25_spill] sm:$0xff]  ;;  %v13014_v43 = vld [vmem:[#allocation38_spill] sm:$0xff] }
 0x7bf   : > { %v4458_v61 = vsel %vm717_vm1, %v9826_v38, %v12992_v58  ;;  %v3573_v30 = vperm.slane %v3565_v32, %v7436_v22  ;;  %v10122_v35 = vsel %vm717_vm1, %v3569_v25, %v3584_v17  ;;  %v3582_v36 = vrot.slane %v3569_v25, 4  ;;  %12993 = vst [vmem:[#allocation19_spill] sm:$0xff] %v10125_v27  ;;  %v10150_v18 = vpop.permute.xlu2 %6719  ;;  %v12999_v58 = vld [vmem:[#allocation14_spill] sm:$0xff]  ;;  %v13016_v27 = vld [vmem:[#allocation8_spill] sm:$0xff] }
 0x7c0   : > { %v4641_v62 = vrot.slane %v10109_v7, 4  ;;  %v4491_v57 = vrot.slane %v12995_v52, 4  ;;  %v4504_v19 = vsel %vm717_vm1, %v4503_v12, %v9922_v28  ;;  %v3588_v48 = vrot.slane %v3549_v15, 4 }
 0x7c1   : > { %v3586_v38 = vrot.slane %v3573_v30, 4  ;;  %v10136_v51 = vsel %vm717_vm1, %v3582_v36, %v3545_v63  ;;  %6824 = vrot.lane.b32.xlu1 %v12996_v16, %s7296_s13  ;;  %6854 = vrot.lane.b32.xlu0 %v12984_v45, %s7291_s25  ;;  %v4616_v63 = vsel %vm717_vm1, %v4615_v31, %v9903_v46  ;;  %v4506_v45 = vsel %vm717_vm1, %v9801_v29, %v4505_v11 }
 0x7c2   : > { %12994 = vst [vmem:[#allocation15_spill] sm:$0xff] %v10136_v51  ;;  %6884 = vrot.lane.b32.xlu2 %v12997_v21, %s7291_s25  ;;  %v10160_v17 = vperm.slane %v4458_v61, %v7428_v6  ;;  %v4515_v28 = vrot.slane %v10133_v40, 4  ;;  %v4514_v44 = vperm.slane %v4506_v45, %v7436_v22  ;;  %v4618_v32 = vsel %vm717_vm1, %v9796_v13, %v4617_v50  ;;  %v13034_v51 = vld [vmem:[#allocation28_spill] sm:$0xff] }
 0x7c3   : > { %v10155_v23 = vsel %vm717_vm1, %v3586_v38, %v3549_v15  ;;  %v10171_v15 = vperm.slane %v4504_v19, %v7436_v22  ;;  %v4626_v29 = vperm.slane %v4618_v32, %v7436_v22  ;;  %v10175_v11 = vperm.slane %v4616_v63, %v7436_v22  ;;  %v13003_v19 = vld [vmem:[#allocation17_spill] sm:$0xff] }
 0x7c4   : > { %v10178_v12 = vsel %vm717_vm1, %v3573_v30, %v3588_v48  ;;  %v4492_v61 = vsel %vm717_vm1, %v4491_v57, %v12999_v58  ;;  %v4531_v36 = vrot.slane %v4514_v44, 4  ;;  %v4516_v30 = vsel %vm717_vm1, %v4515_v28, %v10160_v17  ;;  %v13006_v28 = vld [vmem:[#allocation6_spill] sm:$0xff] }
 0x7c5   : > { %12998 = vst [vmem:[#allocation22_spill] sm:$0xff] %v10178_v12  ;;  %v10184_v46 = vsel %vm717_vm1, %v10171_v15, %v4529_v60  ;;  %v4498_v50 = vperm.slane %v4492_v61, %v7436_v22  ;;  %v4643_v31 = vrot.slane %v4626_v29, 4  ;;  %v10191_v38 = vsel %vm717_vm1, %v10175_v11, %v4641_v62  ;;  %v13005_v62 = vld [vmem:[#allocation33_spill] sm:$0xff] }
 0x7c6   : > { %13000 = vst [vmem:[#allocation12_spill] sm:$0xff] %v10184_v46  ;;  %v13002_v57 = vrot.slane %v9652_v34, 4  ;;  %v10201_v60 = vsel %vm717_vm1, %v4531_v36, %v10098_v56  ;;  %v4522_v45 = vperm.slane %v4516_v30, %v7436_v22  ;;  %v10208_v61 = vperm.slane %v13005_v62, %v7428_v6  ;;  %v13008_v30 = vld [vmem:[#allocation30_spill] sm:$0xff] }
 0x7c7   : > { %13001 = vst [vmem:[#allocation25_spill] sm:$0xff] %v10191_v38  ;;  %v4537_v32 = vrot.slane %v4498_v50, 4  ;;  %v10212_v34 = vperm.slane %v13006_v28, %v7428_v6  ;;  %v13010_v28 = vld [vmem:[#allocation26_spill] sm:$0xff]  ;;  %v10243_v25 = vperm.slane %v13014_v43, %v7428_v6  ;;  %v4645_v4 = vrot.slane %v10113_v49, 4  ;;  %v10254_v38 = vpop.permute.xlu2 %6729 }
 0x7c8   : > { %v4570_v63 = vsel %vm717_vm1, %v13003_v19, %v13002_v57  ;;  %13004 = vst [vmem:[#allocation14_spill] sm:$0xff] %v10201_v60  ;;  %v10216_v57 = vsel %vm717_vm1, %v4643_v31, %v10113_v49  ;;  %v10232_v13 = vperm.slane %v13010_v28, %v7428_v6  ;;  %v13011_v31 = vld [vmem:[#allocation20_spill] sm:$0xff]  ;;  %v4535_v19 = vrot.slane %v4522_v45, 4  ;;  %v13018_v46 = vld [vmem:[#allocation18_spill] sm:$0xff] }
 0x7c9   : > { %13007 = vst [vmem:[#allocation17_spill] sm:$0xff] %v10216_v57  ;;  %v10219_v36 = vperm.slane %v4570_v63, %v7428_v6  ;;  %6869 = vrot.lane.b32.xlu0 %v12989_v1, %s7291_s25  ;;  %6839 = vrot.lane.b32.xlu1 %v13008_v30, %s7296_s13  ;;  %v10228_v62 = vsel %vm717_vm1, %v4522_v45, %v4537_v32  ;;  %v4603_v48 = vrot.slane %v13011_v31, 4  ;;  %v13012_v63 = vld [vmem:[#allocation21_spill] sm:$0xff]  ;;  %v4533_v32 = vrot.slane %v10098_v56, 4 }
 0x7ca   : > { %13009 = vst [vmem:[#allocation33_spill] sm:$0xff] %v10228_v62  ;;  %6899 = vrot.lane.b32.xlu2 %v13012_v63, %s7291_s25  ;;  %v13013_v1 = vld [vmem:[#allocation37_spill] sm:$0xff]  ;;  %v4627_v9 = vrot.slane %v10232_v13, 4  ;;  %v13017_v12 = vrot.slane %v13016_v27, 4  ;;  %v10258_v45 = vsel %vm717_vm1, %v4535_v19, %v4498_v50  ;;  %v10269_v27 = vsel %vm717_vm1, %v4626_v29, %v4645_v4 }
 0x7cb   : > { %v10239_v37 = vperm.slane %v13013_v1, %v7428_v6  ;;  %v4604_v28 = vsel %vm717_vm1, %v4603_v48, %v13015_v20  ;;  %13019 = vst [vmem:[#allocation6_spill] sm:$0xff] %v10258_v45  ;;  %v10261_v56 = vsel %vm717_vm1, %v4514_v44, %v4533_v32  ;;  %v10277_v50 = vperm.slane %v10085_v53, %v7428_v6  ;;  %v13023_v4 = vld [vmem:[#allocation9_spill] sm:$0xff] }
 0x7cc   : > { %v5474_v1 = vsel %vm717_vm1, %v13018_v46, %v13017_v12  ;;  %v4610_v43 = vperm.slane %v4604_v28, %v7436_v22  ;;  %13020 = vst [vmem:[#allocation30_spill] sm:$0xff] %v10261_v56  ;;  %v4628_v49 = vsel %vm717_vm1, %v4627_v9, %v10219_v36  ;;  %v13022_v12 = vld [vmem:[#allocation23_spill] sm:$0xff]  ;;  %v5555_v28 = vrot.slane %v10243_v25, 4 }
 0x7cd   : > { %v10264_v48 = vperm.slane %v5474_v1, %v7428_v6  ;;  %13021 = vst [vmem:[#allocation26_spill] sm:$0xff] %v10269_v27  ;;  %v10273_v46 = vperm.slane %v13022_v12, %v7428_v6  ;;  %v4634_v44 = vperm.slane %v4628_v49, %v7436_v22  ;;  %v13024_v29 = vrot.slane %v13023_v4, 4  ;;  %v13025_v1 = vld [vmem:[#allocation24_spill] sm:$0xff] }
 0x7ce   : > { %v4649_v19 = vrot.slane %v4610_v43, 4  ;;  %v10290_v60 = vperm.slane %v13026_v47, %v7428_v6  ;;  %v10294_v53 = vperm.slane %v10072_v54, %v7428_v6  ;;  %v5556_v56 = vsel %vm717_vm1, %v5555_v28, %v10277_v50 }
 0x7cf   : > { %v5531_v9 = vrot.slane %v10273_v46, 4  ;;  %v5586_v12 = vsel %vm717_vm1, %v13025_v1, %v13024_v29  ;;  %v4647_v32 = vrot.slane %v4634_v44, 4  ;;  %v13028_v29 = vld [vmem:[#allocation36_spill] sm:$0xff] }
 0x7d0   : > { %v10297_v49 = vsel %vm717_vm1, %v4634_v44, %v4649_v19  ;;  %v10302_v4 = vperm.slane %v5586_v12, %v7428_v6  ;;  %v5562_v44 = vperm.slane %v5556_v56, %v7436_v22  ;;  %v5643_v19 = vrot.slane %v10290_v60, 4  ;;  %v13032_v56 = vld [vmem:[#allocation32_spill] sm:$0xff] }
 0x7d1   : > { %13027 = vst [vmem:[#allocation20_spill] sm:$0xff] %v10297_v49  ;;  %6889 = vrot.lane.b32.xlu0 %v13028_v29, %s7291_s25  ;;  %6859 = vrot.lane.b32.xlu1 %v12996_v16, %s7291_s25  ;;  %v5532_v54 = vsel %vm717_vm1, %v5531_v9, %v10264_v48  ;;  %v10317_v28 = vsel %vm717_vm1, %v4647_v32, %v4610_v43  ;;  %v5667_v16 = vrot.slane %v10239_v37, 4  ;;  %v13030_v12 = vrot.slane %v12999_v58, 4 }
 0x7d2   : > { %6909 = vrot.lane.b32.xlu2 %v13028_v29, %s7296_s13  ;;  %13029 = vst [vmem:[#allocation21_spill] sm:$0xff] %v10317_v28  ;;  %v5538_v1 = vperm.slane %v5532_v54, %v7436_v22  ;;  %v5575_v9 = vrot.slane %v5562_v44, 4  ;;  %v5644_v27 = vsel %vm717_vm1, %v5643_v19, %v10302_v4  ;;  %v4517_v58 = vrot.slane %v10160_v17, 4 }
 0x7d3   : > { %v4494_v47 = vsel %vm717_vm1, %v12995_v52, %v13030_v12  ;;  %v5650_v32 = vperm.slane %v5644_v27, %v7436_v22  ;;  %v5668_v54 = vsel %vm717_vm1, %v5667_v16, %v10294_v53  ;;  %v13031_v52 = vrot.slane %v13015_v20, 4 }
 0x7d4   : > { %v4502_v29 = vperm.slane %v4494_v47, %v7436_v22  ;;  %v10330_v43 = vpop.permute.xlu2 %6744  ;;  %v5502_v45 = vperm.slane %v13032_v56, %v7428_v6  ;;  %v5521_v19 = vrot.slane %v10208_v61, 4  ;;  %v10344_v47 = vsel %vm717_vm1, %v5575_v9, %v5538_v1 }
 0x7d5   : > { %v4606_v12 = vsel %vm717_vm1, %v13011_v31, %v13031_v52  ;;  %v5674_v27 = vperm.slane %v5668_v54, %v7436_v22  ;;  %v5633_v28 = vrot.slane %v10212_v34, 4  ;;  %v4518_v17 = vsel %vm717_vm1, %v10133_v40, %v4517_v58  ;;  %v13033_v31 = vld [vmem:[#allocation35_spill] sm:$0xff] }
 0x7d6   : > { %v4614_v20 = vperm.slane %v4606_v12, %v7436_v22  ;;  %v4629_v16 = vrot.slane %v10219_v36, 4  ;;  %v5514_v52 = vperm.slane %v13033_v31, %v7428_v6  ;;  %v4526_v62 = vperm.slane %v4518_v17, %v7436_v22 }
 0x7d7   : > { %v5687_v56 = vrot.slane %v5674_v27, 4  ;;  %v4541_v49 = vrot.slane %v4502_v29, 4  ;;  %v5577_v57 = vrot.slane %v5538_v1, 4  ;;  %v5689_v5 = vrot.slane %v5650_v32, 4 }
 0x7d8   : > { %v4630_v9 = vsel %vm717_vm1, %v10232_v13, %v4629_v16  ;;  %v4653_v54 = vrot.slane %v4614_v20, 4  ;;  %v4539_v12 = vrot.slane %v4526_v62, 4 }
 0x7d9   : > { %6904 = vrot.lane.b32.xlu0 %v13034_v51, %s7291_s25  ;;  %6874 = vrot.lane.b32.xlu1 %v13008_v30, %s7291_s25  ;;  %v10362_v40 = vsel %vm717_vm1, %v5687_v56, %v5650_v32  ;;  %v10365_v36 = vsel %vm717_vm1, %v4526_v62, %v4541_v49  ;;  %v4638_v58 = vperm.slane %v4630_v9, %v7436_v22  ;;  %v13035_v32 = vld [vmem:[#allocation31_spill] sm:$0xff] }
 0x7da   : > { %6924 = vrot.lane.b32.xlu2 %v13012_v63, %s7296_s13  ;;  %v10373_v1 = vsel %vm717_vm1, %v5562_v44, %v5577_v57  ;;  %v10376_v30 = vsel %vm717_vm1, %v5674_v27, %v5689_v5  ;;  %v5522_v17 = vsel %vm717_vm1, %v13035_v32, %v5521_v19  ;;  %v10384_v62 = vsel %vm717_vm1, %v4539_v12, %v4502_v29  ;;  %v13036_v27 = vld [vmem:[#allocation27_spill] sm:$0xff] }
 0x7db   : > { %v10381_v49 = vsel %vm717_vm1, %v4638_v58, %v4653_v54  ;;  %v4651_v16 = vrot.slane %v4638_v58, 4  ;;  %v5530_v5 = vperm.slane %v5522_v17, %v7436_v22  ;;  %v5545_v44 = vrot.slane %v5502_v45, 4  ;;  %v13037_v56 = vld [vmem:[#allocation7_spill] sm:$0xff] }
 0x7dc   : > { %v10388_v31 = vpop.permute.xlu2 %6764  ;;  %v5634_v19 = vsel %vm717_vm1, %v13036_v27, %v5633_v28  ;;  %v5626_v9 = vperm.slane %v13037_v56, %v7428_v6  ;;  %v5657_v63 = vrot.slane %v10061_v24, 4  ;;  %v13038_v56 = vrot.slane %v13035_v32, 4 }
 0x7dd   : > { %v10398_v29 = vsel %vm717_vm1, %v4651_v16, %v4614_v20  ;;  %v5642_v54 = vperm.slane %v5634_v19, %v7436_v22  ;;  %v5546_v12 = vsel %vm717_vm1, %v5514_v52, %v5545_v44  ;;  %v5573_v57 = vrot.slane %v5530_v5, 4  ;;  %v13040_v44 = vld [vmem:[#allocation29_spill] sm:$0xff] }
 0x7de   : > { %v5554_v17 = vperm.slane %v5546_v12, %v7436_v22  ;;  %v5658_v28 = vsel %vm717_vm1, %v5626_v9, %v5657_v63  ;;  %v5520_v20 = vsel %vm717_vm1, %v13038_v56, %v10208_v61  ;;  %v5543_v16 = vrot.slane %v5514_v52, 4  ;;  %v13041_v52 = vld [vmem:[#allocation13_spill] sm:$0xff] }
 0x7df   : > { %v5685_v13 = vrot.slane %v5642_v54, 4  ;;  %v13039_v19 = vrot.slane %v13036_v27, 4  ;;  %v5666_v63 = vperm.slane %v5658_v28, %v7436_v22  ;;  %v10424_v32 = vperm.slane %v5520_v20, %v7436_v22 }
 0x7e0   : > { %v10420_v12 = vsel %vm717_vm1, %v5554_v17, %v5573_v57  ;;  %v5655_v61 = vrot.slane %v5626_v9, 4  ;;  %v5557_v56 = vrot.slane %v10277_v50, 4  ;;  %v5533_v50 = vrot.slane %v10264_v48, 4 }
 0x7e1   : > { %v5632_v58 = vsel %vm717_vm1, %v13039_v19, %v10212_v34  ;;  %6914 = vrot.lane.b32.xlu0 %v13040_v44, %s7291_s25  ;;  %6894 = vrot.lane.b32.xlu1 %v12997_v21, %s7296_s13  ;;  %v5544_v34 = vsel %vm717_vm1, %v5543_v16, %v5502_v45  ;;  %v10434_v21 = vsel %vm717_vm1, %v5666_v63, %v5685_v13  ;;  %v5569_v28 = vrot.slane %v10424_v32, 4 }
 0x7e2   : > { %6934 = vrot.lane.b32.xlu2 %v13041_v52, %s7291_s25  ;;  %v10430_v27 = vperm.slane %v5632_v58, %v7436_v22  ;;  %v10437_v57 = vperm.slane %v5544_v34, %v7436_v22  ;;  %v5656_v9 = vsel %vm717_vm1, %v5655_v61, %v10061_v24  ;;  %v10457_v19 = vsel %vm717_vm1, %v10273_v46, %v5533_v50  ;;  %v13044_v46 = vld [vmem:[#allocation34_spill] sm:$0xff] }
 0x7e3   : > { %v10447_v58 = vperm.slane %v5656_v9, %v7436_v22  ;;  %v5558_v24 = vsel %vm717_vm1, %v10243_v25, %v5557_v56  ;;  %v5645_v34 = vrot.slane %v10302_v4, 4  ;;  %v5571_v9 = vrot.slane %v5554_v17, 4  ;;  %v10481_v56 = vpop.permute.xlu1 %6724 }
 0x7e4   : > { %v10442_v20 = vpop.permute.xlu2 %6779  ;;  %v10452_v13 = vsel %vm717_vm1, %v10437_v57, %v5569_v28  ;;  %v5681_v16 = vrot.slane %v10430_v27, 4  ;;  %v5669_v28 = vrot.slane %v10294_v53, 4  ;;  %v5683_v50 = vrot.slane %v5666_v63, 4 }
 0x7e5   : > { %13042 = vst [vmem:[#allocation37_spill] sm:$0xff] %v10452_v13  ;;  %v10477_v25 = vsel %vm717_vm1, %v10290_v60, %v5645_v34  ;;  %v10484_v53 = vsel %vm717_vm1, %v5571_v9, %v5530_v5  ;;  %v12783_v60 = vunpack.i.l.bf16 %v10068_v10  ;;  %v12785_v34 = vunpack.i.h.bf16 %v10254_v38 }
 0x7e6   : > { %v10463_v61 = vsel %vm717_vm1, %v10447_v58, %v5681_v16  ;;  %v5670_v4 = vsel %vm717_vm1, %v10239_v37, %v5669_v28  ;;  %13045 = vst [vmem:[#allocation11_spill] sm:$0xff] %v10484_v53  ;;  %v12781_v16 = vunpack.i.h.bf16 %v10150_v18  ;;  %v12782_v37 = vunpack.i.l.bf16 %v10150_v18 }
 0x7e7   : > { %13043 = vst [vmem:[#allocation38_spill] sm:$0xff] %v10463_v61  ;;  %v4527_v5 = vrot.slane %v10171_v15, 4  ;;  %v10506_v9 = vrot.slane %v12783_v60, 4  ;;  %v3852_v63 = vrot.slane %v12785_v34, 4  ;;  %v13048_v45 = vpack.i.bf16 %v9984_v33, %v9952_v39 }
 0x7e8   : > { %v10518_v15 = vrot.slane %v12782_v37, 4  ;;  %v6727_v39 = vunpack.i.h.bf16 %v10481_v56  ;;  %v6726_v33 = vunpack.i.l.bf16 %v10481_v56  ;;  %v13052_v56 = vunpack.i.h.bf16 %v10330_v43 }
 0x7e9   : > { %6929 = vrot.lane.b32.xlu0 %v13034_v51, %s7296_s13  ;;  %6919 = vrot.lane.b32.xlu1 %v13044_v46, %s7291_s25  ;;  %v10487_v51 = vsel %vm717_vm1, %v5683_v50, %v5642_v54  ;;  %v12787_v54 = vunpack.i.l.bf16 %v10254_v38  ;;  %v10510_v50 = vrot.slane %v12781_v16, 4  ;;  %v10528_v16 = vsel %vm717_vm1, %v4527_v5, %v10102_v8 }
 0x7ea   : > { %6949 = vrot.lane.b32.xlu2 %v13041_v52, %s7296_s13  ;;  %13046 = vst [vmem:[#allocation8_spill] sm:$0xff] %v10487_v51  ;;  %v12784_v52 = vunpack.i.h.bf16 %v10068_v10  ;;  %v10554_v51 = vrot.slane %v13052_v56, 4  ;;  %v3728_v13 = vrot.slane %v6726_v33, 4 }
 0x7eb   : > { %v6735_v48 = vpop.permute.xlu0 %6734  ;;  %13049 = vst [vmem:[#allocation23_spill] sm:$0xff] %v10528_v16  ;;  %v10550_v16 = vperm.slane %v5558_v24, %v7436_v22 }
 0x7ec   : > { %v10489_v17 = vpop.permute.xlu2 %6814  ;;  %v10502_v28 = vrot.slane %v12784_v52, 4  ;;  %v6736_v5 = vunpack.i.l.bf16 %v6735_v48  ;;  %v5679_v52 = vrot.slane %v10447_v58, 4  ;;  %v6737_v53 = vunpack.i.h.bf16 %v6735_v48 }
 0x7ed   : > { %13047 = vst [vmem:[#allocation18_spill] sm:$0xff] %v10489_v17  ;;  %v10565_v58 = vperm.slane %v5670_v4, %v7436_v22  ;;  %v13056_v48 = vunpack.i.l.bf16 %v10388_v31 }
 0x7ee   : > { %13051 = vst [vmem:[#allocation24_spill] sm:$0xff] %v10550_v16  ;;  %v3726_v4 = vrot.slane %v6736_v5, 4 }
 0x7ef   : > { %13055 = vst [vmem:[#allocation16_spill] sm:$0xff] %v10565_v58  ;;  %v10569_v60 = vrot.slane %v13056_v48, 4  ;;  %v13060_v48 = vpack.i.bf16 %v9998_v42, %v9956_v26  ;;  %v5579_v26 = vrot.slane %v10550_v16, 4  ;;  %v10616_v16 = vperm.slane %v10477_v25, %v7436_v22 }
 0x7f0   : > { %v13067_v25 = vunpack.i.h.bf16 %v10489_v17 }
 0x7f1   : > { %6939 = vrot.lane.b32.xlu0 %v13040_v44, %s7296_s13  ;;  %6944 = vrot.lane.b32.xlu1 %v13044_v46, %s7296_s13  ;;  %v4639_v44 = vrot.slane %v10175_v11, 4  ;;  %v3740_v46 = vrot.slane %v12787_v54, 4  ;;  %v5567_v54 = vrot.slane %v10437_v57, 4  ;;  %13065 = vst [vmem:[#allocation28_spill] sm:$0xff] %v10616_v16 }
 0x7f2   : > { %6964 = vrot.lane.b32.xlu2 %v13048_v45, %s7283_s20  ;;  %v13054_v45 = vunpack.i.h.bf16 %v10388_v31 }
 0x7f3   : > { %v6740_v34 = vpop.permute.xlu1 %6739  ;;  %v10543_v11 = vsel %vm717_vm1, %v4639_v44, %v10109_v7  ;;  %v13053_v7 = vunpack.i.l.bf16 %v10330_v43  ;;  %v10573_v56 = vsel %vm717_vm1, %v5567_v54, %v10424_v32  ;;  %v13061_v32 = vpack.i.bf16 %v10011_v59, %v9975_v0 }
 0x7f4   : > { %v10539_v8 = vpop.permute.xlu2 %6829  ;;  %13050 = vst [vmem:[#allocation9_spill] sm:$0xff] %v10543_v11  ;;  %v6741_v37 = vunpack.i.l.bf16 %v6740_v34  ;;  %v10562_v57 = vrot.slane %v13054_v45, 4  ;;  %v6742_v24 = vunpack.i.h.bf16 %v6740_v34  ;;  %v3840_v11 = vrot.slane %v6727_v39, 4 }
 0x7f5   : > { %v10558_v44 = vrot.slane %v13053_v7, 4  ;;  %13057 = vst [vmem:[#allocation36_spill] sm:$0xff] %v10573_v56  ;;  %v10577_v7 = vsel %vm717_vm1, %v5679_v52, %v10430_v27  ;;  %v13059_v45 = vunpack.i.h.bf16 %v10442_v20  ;;  %v13062_v27 = vunpack.i.l.bf16 %v10442_v20 }
 0x7f6   : > { %13058 = vst [vmem:[#allocation32_spill] sm:$0xff] %v10577_v7  ;;  %v3838_v34 = vrot.slane %v6737_v53, 4  ;;  %v3741_v54 = vsel %vm717_vm1, %v6741_v37, %v3740_v46  ;;  %v10606_v0 = vperm.slane %v10457_v19, %v7436_v22  ;;  %v5691_v59 = vrot.slane %v10565_v58, 4 }
 0x7f7   : > { %v10581_v61 = vrot.slane %v13059_v45, 4  ;;  %v10593_v52 = vrot.slane %v13062_v27, 4  ;;  %v13063_v45 = vpack.i.bf16 %v10155_v23, %v10055_v14  ;;  %v3729_v46 = vsel %vm717_vm1, %v6736_v5, %v3728_v13 }
 0x7f8   : > { %13064 = vst [vmem:[#allocation35_spill] sm:$0xff] %v10606_v0  ;;  %v3841_v27 = vsel %vm717_vm1, %v6737_v53, %v3840_v11  ;;  %v3850_v14 = vrot.slane %v6742_v24, 4  ;;  %v3738_v23 = vrot.slane %v6741_v37, 4  ;;  %v3749_v42 = vperm.slane %v3741_v54, %v7428_v6 }
 0x7f9   : > { %6959 = vrot.lane.b32.xlu1 %v13060_v48, %s7286_s23  ;;  %6954 = vrot.lane.b32.xlu0 %v13061_v32, %s7285_s22  ;;  %v3462_v32 = vrot.slane %v9959_v55, 4  ;;  %v3574_v19 = vrot.slane %v9981_v41, 4  ;;  %v3839_v58 = vsel %vm717_vm1, %v3838_v34, %v6727_v39  ;;  %v12793_v55 = vunpack.i.l.bf16 %v10489_v17 }
 0x7fa   : > { %6979 = vrot.lane.b32.xlu2 %v13063_v45, %s7281_s15  ;;  %v3727_v45 = vsel %vm717_vm1, %v3726_v4, %v6726_v33  ;;  %v3853_v13 = vsel %vm717_vm1, %v6742_v24, %v3852_v63  ;;  %v10626_v53 = vsel %vm717_vm1, %v5579_v26, %v10606_v0  ;;  %v3737_v37 = vperm.slane %v3729_v46, %v7428_v6 }
 0x7fb   : > { %v10602_v48 = vpop.permute.xlu0 %6749  ;;  %v3849_v33 = vperm.slane %v3841_v27, %v7428_v6  ;;  %v10632_v11 = vrot.slane %v13067_v25, 4  ;;  %v10636_v41 = vsel %vm717_vm1, %v3462_v32, %v9944_v2  ;;  %v3733_v63 = vperm.slane %v3727_v45, %v7428_v6  ;;  %v13077_v25 = vld [vmem:[#allocation17_spill] sm:$0xff] }
 0x7fc   : > { %v10622_v5 = vpop.permute.xlu2 %6844  ;;  %13069 = vst [vmem:[#allocation7_spill] sm:$0xff] %v10636_v41  ;;  %v13070_v39 = vunpack.i.h.bf16 %v10254_v38  ;;  %v13071_v4 = vunpack.i.l.bf16 %v10254_v38  ;;  %v10647_v54 = vsel %vm717_vm1, %v5691_v59, %v10616_v16  ;;  %v3845_v26 = vperm.slane %v3839_v58, %v7428_v6  ;;  %v13073_v38 = vld [vmem:[#allocation15_spill] sm:$0xff] }
 0x7fd   : > { %13066 = vst [vmem:[#allocation31_spill] sm:$0xff] %v10622_v5  ;;  %v3861_v46 = vperm.slane %v3853_v13, %v7428_v6  ;;  %v3786_v2 = vrot.slane %v3749_v42, 4  ;;  %v6752_v32 = vunpack.i.h.bf16 %v10602_v48  ;;  %v13072_v27 = vpack.i.bf16 %v10122_v35, %v10095_v3 }
 0x7fe   : > { %13068 = vst [vmem:[#allocation27_spill] sm:$0xff] %v10632_v11  ;;  %v3851_v24 = vsel %vm717_vm1, %v3850_v14, %v13070_v39  ;;  %v3739_v34 = vsel %vm717_vm1, %v3738_v23, %v13071_v4  ;;  %v13074_v14 = vld [vmem:[#allocation10_spill] sm:$0xff]  ;;  %v10662_v59 = vrot.slane %v12793_v55, 4  ;;  %v6751_v13 = vunpack.i.l.bf16 %v10602_v48  ;;  %v13094_v11 = vld [vmem:[#allocation33_spill] sm:$0xff] }
 0x7ff   : > { %v13075_v23 = vpack.i.bf16 %v13073_v38, %v13074_v14  ;;  %v13078_v39 = vld [vmem:[#allocation14_spill] sm:$0xff]  ;;  %v3788_v35 = vrot.slane %v3737_v37, 4  ;;  %v3857_v4 = vperm.slane %v3851_v24, %v7428_v6  ;;  %v3776_v45 = vrot.slane %v3733_v63, 4 }
 0x800   : > { %13076 = vst [vmem:[#allocation29_spill] sm:$0xff] %v10662_v59  ;;  %v13079_v3 = vpack.i.bf16 %v13077_v25, %v13078_v39  ;;  %v3900_v58 = vrot.slane %v3849_v33, 4  ;;  %v3888_v25 = vrot.slane %v3845_v26, 4  ;;  %v3898_v39 = vrot.slane %v3861_v46, 4 }
 0x801   : > { %6974 = vrot.lane.b32.xlu1 %v13072_v27, %s7280_s14  ;;  %6969 = vrot.lane.b32.xlu0 %v13075_v23, %s7284_s21  ;;  %v3745_v27 = vperm.slane %v3739_v34, %v7428_v6  ;;  %v13080_v23 = vld [vmem:[#allocation39_spill] sm:$0xff]  ;;  %v3876_v24 = vrot.slane %v6752_v32, 4  ;;  %v3789_v34 = vsel %vm717_vm1, %v3749_v42, %v3788_v35  ;;  %v13082_v0 = vunpack.i.h.bf16 %v10539_v8 }
 0x802   : > { %6994 = vrot.lane.b32.xlu2 %v13079_v3, %s7286_s23  ;;  %v10677_v55 = vsel %vm717_vm1, %v3574_v19, %v13080_v23  ;;  %v3787_v3 = vsel %vm717_vm1, %v3786_v2, %v3737_v37  ;;  %v13083_v19 = vunpack.i.l.bf16 %v10539_v8  ;;  %v3764_v7 = vrot.slane %v6751_v13, 4 }
 0x803   : > { %v10673_v38 = vpop.permute.xlu0 %6769  ;;  %v6755_v14 = vpop.permute.xlu1 %6754  ;;  %13081 = vst [vmem:[#allocation13_spill] sm:$0xff] %v10677_v55  ;;  %v10685_v56 = vrot.slane %v13082_v0, 4  ;;  %v3886_v55 = vrot.slane %v3857_v4, 4  ;;  %v3774_v41 = vrot.slane %v3745_v27, 4  ;;  %v3901_v16 = vsel %vm717_vm1, %v3861_v46, %v3900_v58 }
 0x804   : > { %v6757_v48 = vunpack.i.h.bf16 %v6755_v14  ;;  %v10689_v23 = vrot.slane %v13083_v19, 4  ;;  %v6756_v59 = vunpack.i.l.bf16 %v6755_v14  ;;  %v10693_v17 = vsel %vm717_vm1, %v3745_v27, %v3776_v45  ;;  %v10702_v2 = vpop.permute.xlu2 %6849  ;;  %v13086_v14 = vld [vmem:[#allocation25_spill] sm:$0xff]  ;;  %v13093_v27 = vld [vmem:[#allocation20_spill] sm:$0xff] }
 0x805   : > { %v10696_v37 = vperm.slane %v3787_v3, %v7436_v22  ;;  %v3875_v42 = vsel %vm717_vm1, %v10502_v28, %v6752_v32  ;;  %v10705_v35 = vperm.slane %v3789_v34, %v7436_v22  ;;  %v3899_v46 = vsel %vm717_vm1, %v3898_v39, %v3849_v33  ;;  %v13087_v3 = vld [vmem:[#allocation12_spill] sm:$0xff]  ;;  %v13090_v32 = vld [vmem:[#allocation19_spill] sm:$0xff] }
 0x806   : > { %v3865_v0 = vsel %vm717_vm1, %v6757_v48, %v10554_v51  ;;  %v13085_v58 = vunpack.i.h.bf16 %v10068_v10  ;;  %v13088_v28 = vpack.i.bf16 %v13086_v14, %v13087_v3  ;;  %v13089_v51 = vld [vmem:[#allocation22_spill] sm:$0xff]  ;;  %v3763_v34 = vsel %vm717_vm1, %v10506_v9, %v6751_v13 }
 0x807   : > { %13084 = vst [vmem:[#allocation34_spill] sm:$0xff] %v10705_v35  ;;  %v13091_v19 = vpack.i.bf16 %v13089_v51, %v13090_v32  ;;  %v13092_v33 = vunpack.i.l.bf16 %v10068_v10  ;;  %v13095_v14 = vpack.i.bf16 %v13093_v27, %v13094_v11  ;;  %v10731_v3 = vsel %vm717_vm1, %v3857_v4, %v3888_v25  ;;  %v13104_v35 = vld [vmem:[#allocation6_spill] sm:$0xff] }
 0x808   : > { %v3877_v45 = vsel %vm717_vm1, %v13085_v58, %v3876_v24  ;;  %v12798_v24 = vunpack.i.l.bf16 %v10622_v5  ;;  %v3862_v58 = vrot.slane %v6757_v48, 4  ;;  %v3873_v9 = vperm.slane %v3865_v0, %v7428_v6 }
 0x809   : > { %6989 = vrot.lane.b32.xlu1 %v13088_v28, %s7285_s22  ;;  %6984 = vrot.lane.b32.xlu0 %v13091_v19, %s7282_s16  ;;  %v3765_v39 = vsel %vm717_vm1, %v13092_v33, %v3764_v7  ;;  %v10734_v28 = vperm.slane %v3875_v42, %v7428_v6  ;;  %v3750_v13 = vrot.slane %v6756_v59, 4  ;;  %v10740_v7 = vsel %vm717_vm1, %v3774_v41, %v3733_v63 }
 0x80a   : > { %7009 = vrot.lane.b32.xlu2 %v13095_v14, %s7280_s14  ;;  %v10743_v48 = vsel %vm717_vm1, %v3886_v55, %v3845_v26  ;;  %v3885_v11 = vperm.slane %v3877_v45, %v7428_v6  ;;  %v3753_v4 = vsel %vm717_vm1, %v6756_v59, %v10558_v44  ;;  %v10749_v25 = vperm.slane %v3899_v46, %v7436_v22 }
 0x80b   : > { %v6785_v10 = vpop.permute.xlu0 %6784  ;;  %v10737_v51 = vpop.permute.xlu1 %6759  ;;  %13096 = vst [vmem:[#allocation15_spill] sm:$0xff] %v10743_v48  ;;  %v10752_v42 = vperm.slane %v3901_v16, %v7436_v22  ;;  %v10755_v0 = vperm.slane %v3763_v34, %v7428_v6  ;;  %v3773_v41 = vperm.slane %v3765_v39, %v7428_v6  ;;  %v13098_v63 = vunpack.i.h.bf16 %v10622_v5  ;;  %v13106_v5 = vld [vmem:[#allocation26_spill] sm:$0xff] }
 0x80c   : > { %v10764_v26 = vrot.slane %v12798_v24, 4  ;;  %v6772_v44 = vunpack.i.h.bf16 %v10673_v38  ;;  %v13101_v59 = vunpack.i.h.bf16 %v10330_v43  ;;  %v3910_v46 = vrot.slane %v10734_v28, 4 }
 0x80d   : > { %13097 = vst [vmem:[#allocation10_spill] sm:$0xff] %v10752_v42  ;;  %v10760_v55 = vrot.slane %v13098_v63, 4  ;;  %v3924_v45 = vrot.slane %v3873_v9, 4  ;;  %v13102_v27 = vunpack.i.l.bf16 %v10330_v43  ;;  %v3761_v19 = vperm.slane %v3753_v4, %v7428_v6 }
 0x80e   : > { %13100 = vst [vmem:[#allocation14_spill] sm:$0xff] %v10764_v26  ;;  %v3863_v16 = vsel %vm717_vm1, %v3862_v58, %v13101_v59  ;;  %v3922_v34 = vrot.slane %v3885_v11, 4  ;;  %v6771_v33 = vunpack.i.l.bf16 %v10673_v38  ;;  %v6787_v39 = vunpack.i.h.bf16 %v6785_v10  ;;  %v13103_v59 = vld [vmem:[#allocation21_spill] sm:$0xff]  ;;  %v13107_v26 = vld [vmem:[#allocation30_spill] sm:$0xff] }
 0x80f   : > { %13099 = vst [vmem:[#allocation17_spill] sm:$0xff] %v10760_v55  ;;  %v3751_v32 = vsel %vm717_vm1, %v3750_v13, %v13102_v27  ;;  %v6786_v14 = vunpack.i.l.bf16 %v6785_v10  ;;  %v3798_v63 = vrot.slane %v10755_v0, 4  ;;  %v3810_v24 = vrot.slane %v3773_v41, 4  ;;  %v10786_v10 = vpop.permute.xlu2 %6864 }
 0x810   : > { %v3869_v42 = vperm.slane %v3863_v16, %v7428_v6  ;;  %v13105_v43 = vpack.i.bf16 %v13103_v59, %v13104_v35  ;;  %v4182_v13 = vrot.slane %v6772_v44, 4  ;;  %v3923_v4 = vsel %vm717_vm1, %v3922_v34, %v3873_v9 }
 0x811   : > { %v3757_v27 = vperm.slane %v3751_v32, %v7428_v6  ;;  %v13108_v16 = vpack.i.bf16 %v13106_v5, %v13107_v26  ;;  %v13109_v58 = vpack.i.bf16 %v10362_v40, %v10344_v47  ;;  %v3925_v35 = vsel %vm717_vm1, %v3885_v11, %v3924_v45 }
 0x812   : > { %7004 = vrot.lane.b32.xlu1 %v13105_v43, %s7284_s21  ;;  %v3811_v9 = vsel %vm717_vm1, %v3810_v24, %v3761_v19  ;;  %v3812_v34 = vrot.slane %v3761_v19, 4  ;;  %v6762_v32 = vunpack.i.h.bf16 %v10737_v51  ;;  %v4070_v38 = vrot.slane %v6771_v33, 4 }
 0x813   : > { %6999 = vrot.lane.b32.xlu0 %v13108_v16, %s7283_s20  ;;  %7039 = vrot.lane.b32.xlu2 %v13109_v58, %s7284_s21  ;;  %v10799_v59 = vpop.permute.xlu0 %6794  ;;  %v6775_v43 = vpop.permute.xlu1 %6774  ;;  %v4220_v55 = vrot.slane %v6787_v39, 4  ;;  %v4108_v48 = vrot.slane %v6786_v14, 4  ;;  %v6761_v5 = vunpack.i.l.bf16 %v10737_v51  ;;  %v10803_v26 = vsel %vm717_vm1, %v3910_v46, %v3869_v42 }
 0x814   : > { %13110 = vst [vmem:[#allocation39_spill] sm:$0xff] %v10803_v26  ;;  %v3912_v47 = vrot.slane %v3869_v42, 4  ;;  %v10806_v40 = vperm.slane %v3923_v4, %v7436_v22  ;;  %v13111_v24 = vunpack.i.h.bf16 %v10702_v2  ;;  %v10813_v45 = vperm.slane %v3925_v35, %v7436_v22 }
 0x815   : > { %v10816_v19 = vperm.slane %v3811_v9, %v7436_v22  ;;  %v4219_v51 = vsel %vm717_vm1, %v10510_v50, %v6787_v39  ;;  %v4107_v46 = vsel %vm717_vm1, %v10518_v15, %v6786_v14  ;;  %v3800_v42 = vrot.slane %v3757_v27, 4 }
 0x816   : > { %v10810_v11 = vrot.slane %v13111_v24, 4  ;;  %13113 = vst [vmem:[#allocation12_spill] sm:$0xff] %v10813_v45  ;;  %v3813_v58 = vsel %vm717_vm1, %v3773_v41, %v3812_v34  ;;  %v4183_v4 = vsel %vm717_vm1, %v4182_v13, %v6762_v32  ;;  %v4184_v16 = vrot.slane %v6762_v32, 4 }
 0x817   : > { %v13114_v24 = vunpack.i.h.bf16 %v10150_v18  ;;  %v4072_v45 = vrot.slane %v6761_v5, 4  ;;  %v6777_v26 = vunpack.i.h.bf16 %v6775_v43  ;;  %v10831_v50 = vsel %vm717_vm1, %v3798_v63, %v3757_v27 }
 0x818   : > { %13112 = vst [vmem:[#allocation25_spill] sm:$0xff] %v10810_v11  ;;  %v13115_v11 = vunpack.i.l.bf16 %v10150_v18  ;;  %v10834_v15 = vperm.slane %v4219_v51, %v7428_v6  ;;  %v10837_v41 = vperm.slane %v4107_v46, %v7428_v6  ;;  %v6776_v39 = vunpack.i.l.bf16 %v6775_v43 }
 0x819   : > { %v4221_v35 = vsel %vm717_vm1, %v13114_v24, %v4220_v55  ;;  %v13116_v55 = vpack.i.bf16 %v10381_v49, %v10365_v36  ;;  %v10845_v18 = vsel %vm717_vm1, %v10734_v28, %v3912_v47  ;;  %v13117_v14 = vunpack.i.l.bf16 %v10702_v2 }
 0x81a   : > { %v4109_v9 = vsel %vm717_vm1, %v13115_v11, %v4108_v48  ;;  %v10848_v48 = vperm.slane %v3813_v58, %v7436_v22  ;;  %v10855_v13 = vperm.slane %v4183_v4, %v7428_v6  ;;  %v13119_v27 = vpack.i.bf16 %v10398_v29, %v10384_v62 }
 0x81b   : > { %7019 = vrot.lane.b32.xlu1 %v13116_v55, %s7282_s16  ;;  %v10852_v63 = vrot.slane %v13117_v14, 4  ;;  %v13120_v36 = vpack.i.bf16 %v10376_v30, %v10373_v1  ;;  %v10866_v49 = vperm.slane %v4221_v35, %v7428_v6  ;;  %v10869_v28 = vperm.slane %v4109_v9, %v7428_v6  ;;  %v10879_v30 = vpop.permute.xlu2 %6879  ;;  %v10881_v47 = vpop.permute.xlu0 %6799 }
 0x81c   : > { %7014 = vrot.lane.b32.xlu0 %v13119_v27, %s7281_s15  ;;  %v4185_v34 = vsel %vm717_vm1, %v6772_v44, %v4184_v16  ;;  %v4071_v32 = vsel %vm717_vm1, %v4070_v38, %v6761_v5  ;;  %v10875_v43 = vsel %vm717_vm1, %v10755_v0, %v3800_v42  ;;  %v4073_v62 = vsel %vm717_vm1, %v6771_v33, %v4072_v45  ;;  %v6790_v5 = vpop.permute.xlu1 %6789 }
 0x81d   : > { %13118 = vst [vmem:[#allocation22_spill] sm:$0xff] %v10852_v63  ;;  %7044 = vrot.lane.b32.xlu2 %v13120_v36, %s7280_s14  ;;  %v12804_v29 = vunpack.i.h.bf16 %v10786_v10  ;;  %v4194_v1 = vrot.slane %v6777_v26, 4  ;;  %v4197_v44 = vsel %vm717_vm1, %v6777_v26, %v10562_v57  ;;  %v4082_v38 = vrot.slane %v6776_v39, 4 }
 0x81e   : > { %13121 = vst [vmem:[#allocation19_spill] sm:$0xff] %v10881_v47  ;;  %v4193_v0 = vperm.slane %v4185_v34, %v7428_v6  ;;  %v4232_v33 = vrot.slane %v10855_v13, 4  ;;  %v10890_v45 = vperm.slane %v4071_v32, %v7428_v6  ;;  %v4085_v46 = vsel %vm717_vm1, %v6776_v39, %v10569_v60 }
 0x81f   : > { %v4266_v42 = vrot.slane %v10866_v49, 4  ;;  %v4081_v4 = vperm.slane %v4073_v62, %v7428_v6  ;;  %v12808_v57 = vunpack.i.l.bf16 %v10786_v10  ;;  %v12805_v26 = vunpack.i.h.bf16 %v10799_v59 }
 0x820   : > { %v13122_v16 = vunpack.i.h.bf16 %v10388_v31  ;;  %v4205_v35 = vperm.slane %v4197_v44, %v7428_v6  ;;  %v6792_v9 = vunpack.i.h.bf16 %v6790_v5  ;;  %v10905_v60 = vrot.slane %v12804_v29, 4  ;;  %v13125_v44 = vld [vmem:[#allocation38_spill] sm:$0xff] }
 0x821   : > { %v12806_v39 = vunpack.i.l.bf16 %v10799_v59  ;;  %v13123_v55 = vunpack.i.l.bf16 %v10388_v31  ;;  %v4093_v27 = vperm.slane %v4085_v46, %v7428_v6  ;;  %v13124_v36 = vpack.i.bf16 %v10434_v21, %v10420_v12 }
 0x822   : > { %v4195_v24 = vsel %vm717_vm1, %v4194_v1, %v13122_v16  ;;  %v4244_v34 = vrot.slane %v4193_v0, 4  ;;  %v4120_v32 = vrot.slane %v10890_v45, 4  ;;  %v12807_v62 = vunpack.i.h.bf16 %v10879_v30  ;;  %v13126_v16 = vld [vmem:[#allocation37_spill] sm:$0xff] }
 0x823   : > { %v4083_v14 = vsel %vm717_vm1, %v4082_v38, %v13123_v55  ;;  %7034 = vrot.lane.b32.xlu1 %v13124_v36, %s7283_s20  ;;  %v6791_v1 = vunpack.i.l.bf16 %v6790_v5  ;;  %v13127_v29 = vpack.i.bf16 %v13125_v44, %v13126_v16  ;;  %v13128_v31 = vpack.i.bf16 %v10647_v54, %v10626_v53 }
 0x824   : > { %v4132_v38 = vrot.slane %v4081_v4, 4  ;;  %v10928_v12 = vrot.slane %v12808_v57, 4  ;;  %v4201_v21 = vperm.slane %v4195_v24, %v7428_v6  ;;  %v4209_v5 = vsel %vm717_vm1, %v6792_v9, %v10581_v61 }
 0x825   : > { %7024 = vrot.lane.b32.xlu0 %v13127_v29, %s7285_s22  ;;  %7049 = vrot.lane.b32.xlu2 %v13128_v31, %s7281_s15  ;;  %v10935_v46 = vrot.slane %v12805_v26, 4  ;;  %v4242_v29 = vrot.slane %v4205_v35, 4  ;;  %v4089_v55 = vperm.slane %v4083_v14, %v7428_v6  ;;  %v4245_v53 = vsel %vm717_vm1, %v4205_v35, %v4244_v34  ;;  %v10950_v14 = vpop.permute.xlu2 %6884  ;;  %v10952_v35 = vpop.permute.xlu0 %6819 }
 0x826   : > { %v10941_v54 = vrot.slane %v12806_v39, 4  ;;  %v4130_v36 = vrot.slane %v4093_v27, 4  ;;  %v4133_v44 = vsel %vm717_vm1, %v4093_v27, %v4132_v38  ;;  %v4206_v24 = vrot.slane %v6792_v9, 4 }
 0x827   : > { %v10946_v61 = vrot.slane %v12807_v62, 4  ;;  %v12811_v16 = vunpack.i.l.bf16 %v10879_v30  ;;  %v4217_v31 = vperm.slane %v4209_v5, %v7428_v6  ;;  %v4094_v26 = vrot.slane %v6791_v1, 4 }
 0x828   : > { %v4230_v34 = vrot.slane %v4201_v21, 4  ;;  %v10955_v39 = vperm.slane %v4245_v53, %v7436_v22  ;;  %v4097_v9 = vsel %vm717_vm1, %v6791_v1, %v10593_v52  ;;  %v10961_v27 = vperm.slane %v10693_v17, %v7436_v22 }
 0x829   : > { %v4118_v38 = vrot.slane %v4089_v55, 4  ;;  %v10964_v62 = vperm.slane %v4133_v44, %v7436_v22  ;;  %v10967_v5 = vsel %vm717_vm1, %v4201_v21, %v4232_v33  ;;  %v4243_v57 = vsel %vm717_vm1, %v4242_v29, %v4193_v0  ;;  %v13132_v21 = vld [vmem:[#allocation11_spill] sm:$0xff] }
 0x82a   : > { %v10971_v51 = vsel %vm717_vm1, %v4089_v55, %v4120_v32  ;;  %v4131_v53 = vsel %vm717_vm1, %v4130_v36, %v4081_v4  ;;  %v12810_v52 = vunpack.i.h.bf16 %v10881_v47  ;;  %v13129_v1 = vunpack.i.h.bf16 %v10442_v20  ;;  %v13131_v32 = vld [vmem:[#allocation8_spill] sm:$0xff] }
 0x82b   : > { %v4268_v58 = vrot.slane %v4217_v31, 4  ;;  %v13130_v44 = vunpack.i.l.bf16 %v10442_v20  ;;  %v4105_v33 = vperm.slane %v4097_v9, %v7428_v6  ;;  %v6822_v0 = vunpack.i.h.bf16 %v10952_v35 }
 0x82c   : > { %v4207_v17 = vsel %vm717_vm1, %v4206_v24, %v13129_v1  ;;  %v13133_v29 = vpack.i.bf16 %v13131_v32, %v13132_v21  ;;  %v10988_v4 = vperm.slane %v4243_v57, %v7436_v22  ;;  %v12809_v55 = vunpack.i.l.bf16 %v10881_v47 }
 0x82d   : > { %v4095_v11 = vsel %vm717_vm1, %v4094_v26, %v13130_v44  ;;  %v12812_v36 = vunpack.i.h.bf16 %v10950_v14  ;;  %v12813_v20 = vunpack.i.l.bf16 %v10950_v14  ;;  %v10994_v26 = vperm.slane %v4131_v53, %v7436_v22  ;;  %v11002_v44 = vpop.permute.xlu1 %6804 }
 0x82e   : > { %7029 = vrot.lane.b32.xlu0 %v13133_v29, %s7286_s23  ;;  %v10998_v24 = vsel %vm717_vm1, %v4230_v34, %v10855_v13  ;;  %v4213_v9 = vperm.slane %v4207_v17, %v7428_v6  ;;  %v4267_v1 = vsel %vm717_vm1, %v4266_v42, %v4217_v31  ;;  %13135 = vst [vmem:[#allocation33_spill] sm:$0xff] %v11002_v44  ;;  %v11010_v32 = vrot.slane %v12811_v16, 4  ;;  %v11043_v16 = vpop.permute.xlu0 %6834 }
 0x82f   : > { %13134 = vst [vmem:[#allocation20_spill] sm:$0xff] %v10998_v24  ;;  %v11006_v57 = vsel %vm717_vm1, %v4118_v38, %v10890_v45  ;;  %v4101_v53 = vperm.slane %v4095_v11, %v7428_v6  ;;  %v3809_v13 = vperm.slane %v10875_v43, %v7436_v22  ;;  %v11017_v34 = vrot.slane %v12810_v52, 4  ;;  %v6900_v52 = vpop.permute.xlu2 %6899 }
 0x830   : > { %v4269_v42 = vsel %vm717_vm1, %v10866_v49, %v4268_v58  ;;  %v4156_v31 = vrot.slane %v4105_v33, 4  ;;  %v4901_v17 = vrot.slane %v6822_v0, 4  ;;  %v11023_v45 = vrot.slane %v12809_v55, 4 }
 0x831   : > { %13136 = vst [vmem:[#allocation21_spill] sm:$0xff] %v11017_v34  ;;  %v11026_v38 = vperm.slane %v4267_v1, %v7436_v22  ;;  %v6283_v11 = vrot.slane %v12812_v36, 4  ;;  %v6171_v43 = vrot.slane %v12813_v20, 4  ;;  %v13138_v21 = vrot.slane %v10834_v15, 4 }
 0x832   : > { %13137 = vst [vmem:[#allocation6_spill] sm:$0xff] %v11023_v45  ;;  %v13140_v49 = vrot.slane %v10869_v28, 4  ;;  %v4900_v55 = vsel %vm717_vm1, %v10685_v56, %v6822_v0  ;;  %v6821_v1 = vunpack.i.l.bf16 %v10952_v35  ;;  %v4256_v36 = vrot.slane %v4213_v9, 4 }
 0x833   : > { %v11035_v29 = vsel %vm717_vm1, %v13138_v21, %v4213_v9  ;;  %v11046_v20 = vperm.slane %v4269_v42, %v7436_v22  ;;  %v13141_v45 = vrot.slane %v10837_v41, 4  ;;  %v3826_v47 = vrot.slane %v3809_v13, 4 }
 0x834   : > { %13139 = vst [vmem:[#allocation26_spill] sm:$0xff] %v11035_v29  ;;  %v4155_v58 = vsel %vm717_vm1, %v13140_v49, %v4105_v33  ;;  %v4144_v34 = vrot.slane %v4101_v53, 4  ;;  %v4157_v33 = vsel %vm717_vm1, %v10869_v28, %v4156_v31  ;;  %v13142_v56 = vunpack.i.h.bf16 %v10539_v8 }
 0x835   : > { %v11051_v21 = vsel %vm717_vm1, %v13141_v45, %v4101_v53  ;;  %v3921_v0 = vperm.slane %v10845_v18, %v7436_v22  ;;  %v11061_v9 = vperm.slane %v4900_v55, %v7428_v6  ;;  %v6901_v49 = vunpack.i.l.bf16 %v6900_v52 }
 0x836   : > { %v4902_v35 = vsel %vm717_vm1, %v13142_v56, %v4901_v17  ;;  %v4788_v53 = vsel %vm717_vm1, %v10689_v23, %v6821_v1  ;;  %v3827_v28 = vsel %vm717_vm1, %v3826_v47, %v10961_v27  ;;  %v3897_v31 = vperm.slane %v10731_v3, %v7436_v22 }
 0x837   : > { %v3938_v17 = vrot.slane %v3921_v0, 4  ;;  %v11072_v18 = vperm.slane %v4155_v58, %v7436_v22  ;;  %v11075_v55 = vperm.slane %v4902_v35, %v7428_v6  ;;  %v4789_v56 = vrot.slane %v6821_v1, 4  ;;  %v11089_v58 = vpop.permute.xlu1 %6809 }
 0x838   : > { %v6902_v42 = vunpack.i.h.bf16 %v6900_v52  ;;  %v11079_v45 = vsel %vm717_vm1, %v10834_v15, %v4256_v36  ;;  %v11083_v23 = vsel %vm717_vm1, %v10837_v41, %v4144_v34  ;;  %v11086_v47 = vperm.slane %v4157_v33, %v7436_v22  ;;  %13143 = vst [vmem:[#allocation30_spill] sm:$0xff] %v11089_v58 }
 0x839   : > { %v3939_v3 = vsel %vm717_vm1, %v3938_v17, %v3897_v31  ;;  %v11093_v1 = vperm.slane %v4788_v53, %v7428_v6  ;;  %v13144_v52 = vunpack.i.h.bf16 %v11002_v44  ;;  %v13146_v41 = vunpack.i.l.bf16 %v11002_v44 }
 0x83a   : > { %v7058_v36 = vpack.i.bf16 %v3939_v3, %v3827_v28  ;;  %v6172_v33 = vsel %vm717_vm1, %v6171_v43, %v6901_v49  ;;  %v3828_v17 = vrot.slane %v10961_v27, 4  ;;  %v3940_v63 = vrot.slane %v3897_v31, 4  ;;  %v6855_v27 = vpop.permute.xlu0 %6854 }
 0x83b   : > { %v11097_v15 = vrot.slane %v13144_v52, 4  ;;  %v11101_v34 = vrot.slane %v13146_v41, 4  ;;  %v13148_v35 = vunpack.i.l.bf16 %v10539_v8  ;;  %v6285_v24 = vrot.slane %v6902_v42, 4 }
 0x83c   : > { %7059 = vrot.lane.b32.xlu1 %v7058_v36, %s7286_s23  ;;  %v3832_v28 = vrot.slane %v10696_v37, 4  ;;  %v6173_v3 = vrot.slane %v6901_v49, 4  ;;  %v3829_v52 = vsel %vm717_vm1, %v3809_v13, %v3828_v17  ;;  %v3941_v41 = vsel %vm717_vm1, %v3921_v0, %v3940_v63  ;;  %v13152_v0 = vld [vmem:[#allocation15_spill] sm:$0xff] }
 0x83d   : > { %13145 = vst [vmem:[#allocation38_spill] sm:$0xff] %v11097_v15  ;;  %v4790_v53 = vsel %vm717_vm1, %v13148_v35, %v4789_v56  ;;  %v3944_v43 = vrot.slane %v10749_v25, 4  ;;  %v11115_v31 = vperm.slane %v6172_v33, %v7428_v6  ;;  %v6284_v8 = vsel %vm717_vm1, %v6283_v11, %v6902_v42  ;;  %v13155_v33 = vld [vmem:[#allocation39_spill] sm:$0xff] }
 0x83e   : > { %13147 = vst [vmem:[#allocation37_spill] sm:$0xff] %v11101_v34  ;;  %v7063_v29 = vpack.i.bf16 %v3941_v41, %v3829_v52  ;;  %v3833_v56 = vsel %vm717_vm1, %v10816_v19, %v3832_v28  ;;  %v11124_v13 = vperm.slane %v10740_v7, %v7436_v22  ;;  %v11128_v63 = vperm.slane %v10831_v50, %v7436_v22 }
 0x83f   : > { %13149 = vst [vmem:[#allocation8_spill] sm:$0xff] %v11115_v31  ;;  %v3945_v35 = vsel %vm717_vm1, %v10806_v40, %v3944_v43  ;;  %v11132_v49 = vperm.slane %v13152_v0, %v7436_v22  ;;  %v13154_v11 = vunpack.i.h.bf16 %v10950_v14  ;;  %v6837_v36 = vunpack.i.h.bf16 %v11043_v16  ;;  %v13179_v31 = vld [vmem:[#allocation29_spill] sm:$0xff] }
 0x840   : > { %13150 = vst [vmem:[#allocation11_spill] sm:$0xff] %v11124_v13  ;;  %7064 = vrot.lane.b32.xlu2 %v7063_v29, %s7283_s20  ;;  %v11141_v7 = vperm.slane %v13155_v33, %v7436_v22  ;;  %v6857_v17 = vunpack.i.h.bf16 %v6855_v27  ;;  %v11144_v50 = vperm.slane %v4790_v53, %v7428_v6  ;;  %v6836_v28 = vunpack.i.l.bf16 %v11043_v16 }
 0x841   : > { %13151 = vst [vmem:[#allocation40_spill] sm:$0xff] %v11128_v63  ;;  %v6286_v42 = vsel %vm717_vm1, %v13154_v11, %v6285_v24  ;;  %v3824_v52 = vrot.slane %v11124_v13, 4  ;;  %v3936_v41 = vrot.slane %v11132_v49, 4  ;;  %v13157_v24 = vunpack.i.l.bf16 %v10950_v14  ;;  %v6825_v14 = vpop.permute.xlu1 %6824 }
 0x842   : > { %13153 = vst [vmem:[#allocation15_spill] sm:$0xff] %v11132_v49  ;;  %v7073_v0 = vpack.i.bf16 %v3945_v35, %v3833_v56  ;;  %v5244_v29 = vsel %vm717_vm1, %v10905_v60, %v6857_v17  ;;  %v5245_v11 = vrot.slane %v6857_v17, 4  ;;  %v11155_v33 = vperm.slane %v6284_v8, %v7428_v6  ;;  %v13159_v49 = vld [vmem:[#allocation17_spill] sm:$0xff] }
 0x843   : > { %13156 = vst [vmem:[#allocation39_spill] sm:$0xff] %v11141_v7  ;;  %v6174_v43 = vsel %vm717_vm1, %v13157_v24, %v6173_v3  ;;  %v11158_v53 = vperm.slane %v6286_v42, %v7428_v6  ;;  %v3825_v16 = vsel %vm717_vm1, %v11128_v63, %v3824_v52  ;;  %v3937_v13 = vsel %vm717_vm1, %v11141_v7, %v3936_v41  ;;  %v13163_v41 = vld [vmem:[#allocation31_spill] sm:$0xff] }
 0x844   : > { %13158 = vst [vmem:[#allocation41_spill] sm:$0xff] %v11155_v33  ;;  %v4912_v3 = vsel %vm717_vm1, %v13159_v49, %v6837_v36  ;;  %v4913_v56 = vrot.slane %v6837_v36, 4  ;;  %7074 = vrot.lane.b32.xlu1 %v7073_v0, %s7280_s14  ;;  %v7053_v60 = vpack.i.bf16 %v3937_v13, %v3825_v16  ;;  %v13160_v8 = vunpack.i.h.bf16 %v10786_v10 }
 0x845   : > { %v11172_v17 = vperm.slane %v6174_v43, %v7428_v6  ;;  %v4801_v52 = vrot.slane %v6836_v28, 4  ;;  %v6856_v36 = vunpack.i.l.bf16 %v6855_v27  ;;  %v6827_v13 = vunpack.i.h.bf16 %v6825_v14  ;;  %v13162_v43 = vld [vmem:[#allocation14_spill] sm:$0xff]  ;;  %v13165_v27 = vld [vmem:[#allocation12_spill] sm:$0xff] }
 0x846   : > { %v5246_v35 = vsel %vm717_vm1, %v13160_v8, %v5245_v11  ;;  %7054 = vrot.lane.b32.xlu0 %v7053_v60, %s7285_s22  ;;  %v11181_v16 = vperm.slane %v4912_v3, %v7428_v6  ;;  %v4800_v8 = vsel %vm717_vm1, %v13162_v43, %v6836_v28  ;;  %v13164_v24 = vunpack.i.h.bf16 %v13163_v41  ;;  %v11199_v28 = vpop.permute.xlu2 %6909 }
 0x847   : > { %13161 = vst [vmem:[#allocation17_spill] sm:$0xff] %v11172_v17  ;;  %v3834_v60 = vrot.slane %v10848_v48, 4  ;;  %v3946_v7 = vrot.slane %v13165_v27, 4  ;;  %v13166_v11 = vunpack.i.l.bf16 %v13163_v41  ;;  %v13167_v63 = vunpack.i.h.bf16 %v11089_v58  ;;  %v11228_v17 = vpop.permute.xlu0 %6869 }
 0x848   : > { %v4914_v49 = vsel %vm717_vm1, %v13164_v24, %v4913_v56  ;;  %13169 = vst [vmem:[#allocation31_spill] sm:$0xff] %v11199_v28  ;;  %v6826_v43 = vunpack.i.l.bf16 %v6825_v14  ;;  %v11202_v42 = vperm.slane %v4800_v8, %v7428_v6  ;;  %v13170_v56 = vunpack.i.l.bf16 %v11089_v58 }
 0x849   : > { %v4802_v3 = vsel %vm717_vm1, %v13166_v11, %v4801_v52  ;;  %v11197_v15 = vrot.slane %v13167_v63, 4  ;;  %v5133_v44 = vrot.slane %v6856_v36, 4  ;;  %v4887_v0 = vrot.slane %v6827_v13, 4  ;;  %v13172_v11 = vld [vmem:[#allocation34_spill] sm:$0xff] }
 0x84a   : > { %v11206_v24 = vrot.slane %v13170_v56, 4  ;;  %v11209_v41 = vperm.slane %v4914_v49, %v7428_v6  ;;  %v5132_v63 = vsel %vm717_vm1, %v10928_v12, %v6856_v36  ;;  %v3835_v14 = vsel %vm717_vm1, %v3834_v60, %v13172_v11  ;;  %v13173_v56 = vld [vmem:[#allocation27_spill] sm:$0xff] }
 0x84b   : > { %13168 = vst [vmem:[#allocation14_spill] sm:$0xff] %v11197_v15  ;;  %v11217_v8 = vperm.slane %v4802_v3, %v7428_v6  ;;  %v13174_v15 = vld [vmem:[#allocation10_spill] sm:$0xff]  ;;  %v11226_v52 = vperm.slane %v5244_v29, %v7428_v6  ;;  %v4775_v12 = vrot.slane %v6826_v43, 4  ;;  %v13176_v60 = vunpack.i.l.bf16 %v10786_v10 }
 0x84c   : > { %13171 = vst [vmem:[#allocation12_spill] sm:$0xff] %v11206_v24  ;;  %v4890_v24 = vsel %vm717_vm1, %v6827_v13, %v13173_v56  ;;  %v3947_v49 = vsel %vm717_vm1, %v3946_v7, %v13174_v15  ;;  %v11234_v58 = vperm.slane %v5132_v63, %v7428_v6  ;;  %v13177_v13 = vld [vmem:[#allocation18_spill] sm:$0xff]  ;;  %v4153_v34 = vperm.slane %v11083_v23, %v7436_v22 }
 0x84d   : > { %13175 = vst [vmem:[#allocation34_spill] sm:$0xff] %v11226_v52  ;;  %v7078_v36 = vpack.i.bf16 %v3947_v49, %v3835_v14  ;;  %v5134_v3 = vsel %vm717_vm1, %v13176_v60, %v5133_v44  ;;  %v13178_v56 = vunpack.i.h.bf16 %v13177_v13  ;;  %v4898_v29 = vperm.slane %v4890_v24, %v7428_v6 }
 0x84e   : > { %v4778_v14 = vsel %vm717_vm1, %v6826_v43, %v13179_v31  ;;  %v11247_v10 = vperm.slane %v11079_v45, %v7436_v22  ;;  %v3830_v44 = vrot.slane %v10816_v19, 4  ;;  %v4129_v63 = vperm.slane %v10971_v51, %v7436_v22 }
 0x84f   : > { %v4888_v7 = vsel %vm717_vm1, %v4887_v0, %v13178_v56  ;;  %7079 = vrot.lane.b32.xlu2 %v7078_v36, %s7281_s15  ;;  %v4170_v0 = vrot.slane %v4153_v34, 4  ;;  %v3942_v49 = vrot.slane %v10806_v40, 4  ;;  %v6872_v23 = vunpack.i.h.bf16 %v11228_v17  ;;  %v11262_v36 = vpop.permute.xlu1 %6839 }
 0x850   : > { %v13180_v24 = vunpack.i.l.bf16 %v13177_v13  ;;  %v4241_v43 = vperm.slane %v10967_v5, %v7436_v22  ;;  %v4282_v45 = vrot.slane %v11247_v10, 4  ;;  %v3831_v19 = vsel %vm717_vm1, %v3830_v44, %v10696_v37 }
 0x851   : > { %v4171_v51 = vsel %vm717_vm1, %v4170_v0, %v4129_v63  ;;  %v3943_v40 = vsel %vm717_vm1, %v3942_v49, %v10749_v25  ;;  %v5256_v60 = vsel %vm717_vm1, %v10946_v61, %v6872_v23  ;;  %v5257_v13 = vrot.slane %v6872_v23, 4 }
 0x852   : > { %v4776_v31 = vsel %vm717_vm1, %v4775_v12, %v13180_v24  ;;  %v11270_v12 = vperm.slane %v5246_v35, %v7428_v6  ;;  %v11273_v5 = vperm.slane %v4888_v7, %v7428_v6  ;;  %v4283_v56 = vsel %vm717_vm1, %v4282_v45, %v4241_v43 }
 0x853   : > { %v7068_v37 = vpack.i.bf16 %v3943_v40, %v3831_v19  ;;  %v11277_v44 = vperm.slane %v5134_v3, %v7428_v6  ;;  %v4786_v0 = vperm.slane %v4778_v14, %v7428_v6  ;;  %v7093_v24 = vpack.i.bf16 %v4283_v56, %v4171_v51 }
 0x854   : > { %13181 = vst [vmem:[#allocation27_spill] sm:$0xff] %v11270_v12  ;;  %v13183_v25 = vunpack.i.h.bf16 %v10879_v30  ;;  %v4949_v7 = vrot.slane %v4898_v29, 4  ;;  %v11288_v23 = vperm.slane %v4776_v31, %v7428_v6  ;;  %v13184_v14 = vunpack.i.h.bf16 %v11199_v28 }
 0x855   : > { %13182 = vst [vmem:[#allocation10_spill] sm:$0xff] %v11277_v44  ;;  %7069 = vrot.lane.b32.xlu0 %v7068_v37, %s7284_s21  ;;  %v13185_v19 = vunpack.i.l.bf16 %v11199_v28  ;;  %7094 = vrot.lane.b32.xlu1 %v7093_v24, %s7286_s23  ;;  %v6841_v40 = vunpack.i.l.bf16 %v11262_v36  ;;  %v13186_v56 = vrot.slane %v11061_v9, 4  ;;  %v13187_v3 = vrot.slane %v11075_v55, 4 }
 0x856   : > { %v11283_v61 = vsel %vm717_vm1, %v13183_v25, %v5257_v13  ;;  %v11294_v45 = vrot.slane %v13184_v14, 4  ;;  %v6842_v25 = vunpack.i.h.bf16 %v11262_v36  ;;  %v13188_v35 = vrot.slane %v11144_v50, 4 }
 0x857   : > { %v11298_v51 = vrot.slane %v13185_v19, 4  ;;  %v4936_v37 = vsel %vm717_vm1, %v13186_v56, %v11273_v5  ;;  %v4948_v24 = vsel %vm717_vm1, %v13187_v3, %v4898_v29  ;;  %v4950_v31 = vsel %vm717_vm1, %v11075_v55, %v4949_v7  ;;  %v11328_v3 = vpop.permute.xlu2 %6924  ;;  %v11340_v19 = vpop.permute.xlu1 %6859 }
 0x858   : > { %v4836_v13 = vsel %vm717_vm1, %v13188_v35, %v4786_v0  ;;  %v13189_v56 = vrot.slane %v11093_v1, 4  ;;  %v6871_v14 = vunpack.i.l.bf16 %v11228_v17  ;;  %v4172_v49 = vrot.slane %v4129_v63, 4 }
 0x859   : > { %v11326_v12 = vperm.slane %v4936_v37, %v7436_v22  ;;  %v4837_v29 = vrot.slane %v4786_v0, 4  ;;  %v4812_v35 = vsel %vm717_vm1, %v10941_v54, %v6841_v40  ;;  %v11333_v55 = vperm.slane %v4948_v24, %v7436_v22 }
 0x85a   : > { %v4824_v36 = vsel %vm717_vm1, %v13189_v56, %v11288_v23  ;;  %v4924_v7 = vsel %vm717_vm1, %v10935_v46, %v6842_v25  ;;  %v4173_v17 = vsel %vm717_vm1, %v4153_v34, %v4172_v49  ;;  %v4284_v63 = vrot.slane %v4241_v43, 4  ;;  %v11338_v56 = vpop.permute.xlu0 %6889 }
 0x85b   : > { %13190 = vst [vmem:[#allocation18_spill] sm:$0xff] %v11326_v12  ;;  %v11343_v0 = vperm.slane %v4950_v31, %v7436_v22  ;;  %v11347_v54 = vperm.slane %v4824_v36, %v7436_v22  ;;  %v11350_v24 = vperm.slane %v4836_v13, %v7436_v22  ;;  %v5144_v46 = vsel %vm717_vm1, %v11010_v32, %v6871_v14  ;;  %v13194_v36 = vld [vmem:[#allocation25_spill] sm:$0xff] }
 0x85c   : > { %v11355_v34 = vperm.slane %v4812_v35, %v7428_v6  ;;  %v4285_v43 = vsel %vm717_vm1, %v11247_v10, %v4284_v63  ;;  %v4176_v49 = vrot.slane %v10994_v26, 4  ;;  %v4838_v31 = vsel %vm717_vm1, %v11144_v50, %v4837_v29 }
 0x85d   : > { %13191 = vst [vmem:[#allocation29_spill] sm:$0xff] %v11347_v54  ;;  %v4930_v37 = vperm.slane %v4924_v7, %v7428_v6  ;;  %v7098_v13 = vpack.i.bf16 %v4285_v43, %v4173_v17  ;;  %v4288_v35 = vrot.slane %v10988_v4, 4  ;;  %v3836_v28 = vrot.slane %v13172_v11, 4 }
 0x85e   : > { %v4177_v32 = vsel %vm717_vm1, %v11072_v18, %v4176_v49  ;;  %v11370_v10 = vperm.slane %v5256_v60, %v7428_v6  ;;  %v5145_v63 = vrot.slane %v6871_v14, 4  ;;  %v11373_v50 = vperm.slane %v5144_v46, %v7428_v6 }
 0x85f   : > { %7099 = vrot.lane.b32.xlu2 %v7098_v13, %s7283_s20  ;;  %v3948_v29 = vrot.slane %v13174_v15, 4  ;;  %v4847_v7 = vrot.slane %v11355_v34, 4  ;;  %v4289_v17 = vsel %vm717_vm1, %v11026_v38, %v4288_v35  ;;  %v3837_v43 = vsel %vm717_vm1, %v10848_v48, %v3836_v28 }
 0x860   : > { %13192 = vst [vmem:[#allocation42_spill] sm:$0xff] %v11370_v10  ;;  %v6862_v11 = vunpack.i.h.bf16 %v11340_v19  ;;  %v4925_v60 = vrot.slane %v6842_v25, 4  ;;  %v4959_v49 = vrot.slane %v4930_v37, 4  ;;  %v7108_v14 = vpack.i.bf16 %v4289_v17, %v4177_v32 }
 0x861   : > { %v3949_v46 = vsel %vm717_vm1, %v13165_v27, %v3948_v29  ;;  %v11387_v13 = vperm.slane %v11283_v61, %v7428_v6  ;;  %v11394_v48 = vperm.slane %v4838_v31, %v7436_v22  ;;  %v4813_v28 = vrot.slane %v6841_v40, 4 }
 0x862   : > { %v7083_v15 = vpack.i.bf16 %v3949_v46, %v3837_v43  ;;  %v5231_v52 = vrot.slane %v6862_v11, 4  ;;  %v11391_v35 = vsel %vm717_vm1, %v6862_v11, %v13194_v36  ;;  %7109 = vrot.lane.b32.xlu1 %v7108_v14, %s7280_s14  ;;  %v4178_v25 = vrot.slane %v11086_v47, 4  ;;  %v11414_v43 = vpop.permute.xlu0 %6904  ;;  %v11416_v11 = vpop.permute.xlu1 %6874 }
 0x863   : > { %13193 = vst [vmem:[#allocation43_spill] sm:$0xff] %v11387_v13  ;;  %v4290_v27 = vrot.slane %v11046_v20, 4  ;;  %v13195_v32 = vunpack.i.h.bf16 %v11328_v3  ;;  %v13196_v29 = vunpack.i.l.bf16 %v10879_v30  ;;  %v4848_v36 = vsel %vm717_vm1, %v4847_v7, %v11202_v42 }
 0x864   : > { %7084 = vrot.lane.b32.xlu0 %v7083_v15, %s7282_s16  ;;  %v13197_v40 = vunpack.i.h.bf16 %v10702_v2  ;;  %v13198_v14 = vunpack.i.l.bf16 %v11328_v3  ;;  %v13199_v30 = vunpack.i.h.bf16 %v10799_v59  ;;  %v4960_v7 = vsel %vm717_vm1, %v4959_v49, %v11181_v16 }
 0x865   : > { %v11401_v61 = vrot.slane %v13195_v32, 4  ;;  %v5146_v17 = vsel %vm717_vm1, %v13196_v29, %v5145_v63  ;;  %v4179_v15 = vsel %vm717_vm1, %v4178_v25, %v10964_v62  ;;  %v11443_v25 = vperm.slane %v4848_v36, %v7436_v22 }
 0x866   : > { %v11412_v31 = vsel %vm717_vm1, %v5231_v52, %v13197_v40  ;;  %v11420_v46 = vrot.slane %v13198_v14, 4  ;;  %v4926_v63 = vsel %vm717_vm1, %v13199_v30, %v4925_v60  ;;  %v11432_v40 = vpop.permute.xlu2 %6934  ;;  %v4291_v14 = vsel %vm717_vm1, %v4290_v27, %v10955_v39 }
 0x867   : > { %v11437_v44 = vperm.slane %v5146_v17, %v7428_v6  ;;  %v13200_v60 = vunpack.i.l.bf16 %v10799_v59  ;;  %v7113_v30 = vpack.i.bf16 %v4291_v14, %v4179_v15  ;;  %13201 = vst [vmem:[#allocation25_spill] sm:$0xff] %v11443_v25  ;;  %v4934_v52 = vperm.slane %v4926_v63, %v7428_v6  ;;  %v13205_v17 = vld [vmem:[#allocation20_spill] sm:$0xff]  ;;  %v13207_v63 = vld [vmem:[#allocation26_spill] sm:$0xff] }
 0x868   : > { %v4873_v32 = vrot.slane %v11347_v54, 4  ;;  %v11448_v29 = vperm.slane %v4960_v7, %v7436_v22  ;;  %v4985_v27 = vrot.slane %v11326_v12, 4  ;;  %v11454_v59 = vperm.slane %v11006_v57, %v7436_v22 }
 0x869   : > { %v4814_v49 = vsel %vm717_vm1, %v13200_v60, %v4813_v28  ;;  %7114 = vrot.lane.b32.xlu2 %v7113_v30, %s7281_s15  ;;  %v11458_v28 = vperm.slane %v11051_v21, %v7436_v22  ;;  %v11462_v36 = vperm.slane %v13205_v17, %v7436_v22  ;;  %v11466_v7 = vperm.slane %v13207_v63, %v7436_v22 }
 0x86a   : > { %13202 = vst [vmem:[#allocation44_spill] sm:$0xff] %v11448_v29  ;;  %v13209_v15 = vrot.slane %v11181_v16, 4  ;;  %v4822_v60 = vperm.slane %v4814_v49, %v7428_v6  ;;  %v4874_v57 = vsel %vm717_vm1, %v11443_v25, %v4873_v32  ;;  %v4986_v21 = vsel %vm717_vm1, %v11448_v29, %v4985_v27  ;;  %v11496_v29 = vpop.permute.xlu1 %6894 }
 0x86b   : > { %13203 = vst [vmem:[#allocation45_spill] sm:$0xff] %v11454_v59  ;;  %v6861_v30 = vunpack.i.l.bf16 %v11340_v19  ;;  %v7123_v17 = vpack.i.bf16 %v4986_v21, %v4874_v57  ;;  %v4168_v12 = vrot.slane %v11454_v59, 4  ;;  %v4280_v63 = vrot.slane %v11462_v36, 4 }
 0x86c   : > { %13204 = vst [vmem:[#allocation46_spill] sm:$0xff] %v11458_v28  ;;  %v4962_v14 = vsel %vm717_vm1, %v4930_v37, %v13209_v15  ;;  %v4971_v16 = vrot.slane %v4934_v52, 4  ;;  %v13210_v37 = vrot.slane %v11202_v42, 4  ;;  %v6937_v32 = vunpack.i.h.bf16 %v11432_v40 }
 0x86d   : > { %13206 = vst [vmem:[#allocation20_spill] sm:$0xff] %v11462_v36  ;;  %v6936_v15 = vunpack.i.l.bf16 %v11432_v40  ;;  %7124 = vrot.lane.b32.xlu1 %v7123_v17, %s7285_s22  ;;  %v4169_v19 = vsel %vm717_vm1, %v11458_v28, %v4168_v12  ;;  %v4281_v27 = vsel %vm717_vm1, %v11466_v7, %v4280_v63  ;;  %v6907_v57 = vunpack.i.h.bf16 %v11414_v43  ;;  %v13211_v12 = vld [vmem:[#allocation22_spill] sm:$0xff] }
 0x86e   : > { %13208 = vst [vmem:[#allocation26_spill] sm:$0xff] %v11466_v7  ;;  %v4850_v49 = vsel %vm717_vm1, %v11355_v34, %v13210_v37  ;;  %v4859_v21 = vrot.slane %v4822_v60, 4  ;;  %v7088_v34 = vpack.i.bf16 %v4281_v27, %v4169_v19  ;;  %v11494_v37 = vpop.permute.xlu0 %6914  ;;  %v11499_v40 = vperm.slane %v4962_v14, %v7436_v22  ;;  %v11519_v59 = vpop.permute.xlu2 %6949 }
 0x86f   : > { %v5119_v17 = vrot.slane %v6861_v30, 4  ;;  %v5122_v25 = vsel %vm717_vm1, %v6861_v30, %v13211_v12  ;;  %v6906_v63 = vunpack.i.l.bf16 %v11414_v43  ;;  %v4972_v36 = vsel %vm717_vm1, %v4971_v16, %v11209_v41 }
 0x870   : > { %v13212_v42 = vrot.slane %v11209_v41, 4  ;;  %v11512_v27 = vperm.slane %v4850_v49, %v7436_v22  ;;  %v13213_v14 = vrot.slane %v11217_v8, 4  ;;  %7089 = vrot.lane.b32.xlu0 %v7088_v34, %s7285_s22  ;;  %v6273_v43 = vrot.slane %v6937_v32, 4 }
 0x871   : > { %v6161_v30 = vrot.slane %v6936_v15, 4  ;;  %v11524_v41 = vperm.slane %v11391_v35, %v7428_v6  ;;  %v4860_v16 = vsel %vm717_vm1, %v4859_v21, %v11217_v8  ;;  %v13215_v49 = vunpack.i.h.bf16 %v11338_v56 }
 0x872   : > { %v11509_v19 = vsel %vm717_vm1, %v4934_v52, %v13212_v42  ;;  %v11517_v54 = vsel %vm717_vm1, %v4822_v60, %v13213_v14  ;;  %v6271_v52 = vrot.slane %v6907_v57, 4  ;;  %v13216_v60 = vunpack.i.l.bf16 %v11338_v56 }
 0x873   : > { %13214 = vst [vmem:[#allocation22_spill] sm:$0xff] %v11524_v41  ;;  %v11530_v42 = vrot.slane %v13215_v49, 4  ;;  %v11537_v34 = vperm.slane %v5122_v25, %v7428_v6  ;;  %v11541_v14 = vperm.slane %v11412_v31, %v7428_v6  ;;  %v13218_v35 = vunpack.i.l.bf16 %v10702_v2 }
 0x874   : > { %v11534_v12 = vrot.slane %v13216_v60, 4  ;;  %v12846_v8 = vunpack.i.h.bf16 %v11519_v59  ;;  %v6159_v21 = vrot.slane %v6906_v63, 4  ;;  %v6274_v49 = vsel %vm717_vm1, %v6907_v57, %v6273_v43 }
 0x875   : > { %13217 = vst [vmem:[#allocation47_spill] sm:$0xff] %v11541_v14  ;;  %v5120_v7 = vsel %vm717_vm1, %v5119_v17, %v13218_v35  ;;  %v13219_v28 = vrot.slane %v11288_v23, 4  ;;  %v4875_v25 = vrot.slane %v11512_v27, 4  ;;  %v13220_v13 = vrot.slane %v11273_v5, 4  ;;  %v13228_v14 = vld [vmem:[#allocation21_spill] sm:$0xff] }
 0x876   : > { %v6272_v17 = vsel %vm717_vm1, %v6271_v52, %v6937_v32  ;;  %v6162_v35 = vsel %vm717_vm1, %v6906_v63, %v6161_v30  ;;  %v11564_v23 = vperm.slane %v5120_v7, %v7428_v6  ;;  %v4987_v5 = vrot.slane %v11499_v40, 4 }
 0x877   : > { %v4826_v60 = vsel %vm717_vm1, %v11093_v1, %v13219_v28  ;;  %v4938_v31 = vsel %vm717_vm1, %v11061_v9, %v13220_v13  ;;  %v6282_v9 = vperm.slane %v6274_v49, %v7428_v6  ;;  %v6160_v13 = vsel %vm717_vm1, %v6159_v21, %v6936_v15  ;;  %v11585_v49 = vpop.permute.xlu1 %6919 }
 0x878   : > { %v11561_v57 = vperm.slane %v4826_v60, %v7436_v22  ;;  %v11568_v28 = vperm.slane %v4938_v31, %v7436_v22  ;;  %v6877_v32 = vunpack.i.h.bf16 %v11416_v11  ;;  %v11577_v43 = vperm.slane %v6272_v17, %v7428_v6  ;;  %v11583_v60 = vpop.permute.xlu0 %6929 }
 0x879   : > { %v6170_v7 = vperm.slane %v6162_v35, %v7428_v6  ;;  %v4866_v52 = vperm.slane %v4860_v16, %v7436_v22  ;;  %v4978_v21 = vperm.slane %v4972_v36, %v7436_v22  ;;  %v4174_v31 = vrot.slane %v11072_v18, 4 }
 0x87a   : > { %v4876_v63 = vsel %vm717_vm1, %v4875_v25, %v11561_v57  ;;  %v4988_v30 = vsel %vm717_vm1, %v4987_v5, %v11568_v28  ;;  %v4286_v25 = vrot.slane %v11026_v38, 4  ;;  %v11592_v17 = vrot.slane %v12846_v8, 4 }
 0x87b   : > { %v7128_v15 = vpack.i.bf16 %v4988_v30, %v4876_v63  ;;  %v11596_v5 = vperm.slane %v6160_v13, %v7428_v6  ;;  %v4879_v16 = vrot.slane %v4866_v52, 4  ;;  %v13221_v2 = vrot.slane %v11158_v53, 4 }
 0x87c   : > { %v4991_v36 = vrot.slane %v4978_v21, 4  ;;  %v4175_v38 = vsel %vm717_vm1, %v4174_v31, %v10994_v26  ;;  %v4287_v18 = vsel %vm717_vm1, %v4286_v25, %v10988_v4  ;;  %v6333_v30 = vrot.slane %v6282_v9, 4  ;;  %v13223_v4 = vld [vmem:[#allocation8_spill] sm:$0xff] }
 0x87d   : > { %v6332_v63 = vsel %vm717_vm1, %v13221_v2, %v6282_v9  ;;  %7129 = vrot.lane.b32.xlu2 %v7128_v15, %s7286_s23  ;;  %v5269_v1 = vrot.slane %v6877_v32, 4  ;;  %v4880_v13 = vsel %vm717_vm1, %v4879_v16, %v11350_v24  ;;  %v7103_v8 = vpack.i.bf16 %v4287_v18, %v4175_v38 }
 0x87e   : > { %v13222_v2 = vrot.slane %v11155_v33, 4  ;;  %v6221_v41 = vrot.slane %v6170_v7, 4  ;;  %v4992_v26 = vsel %vm717_vm1, %v4991_v36, %v11333_v55  ;;  %v13224_v9 = vrot.slane %v13223_v4, 4  ;;  %v13226_v36 = vld [vmem:[#allocation17_spill] sm:$0xff] }
 0x87f   : > { %v6876_v16 = vunpack.i.l.bf16 %v11416_v11  ;;  %v7138_v38 = vpack.i.bf16 %v4992_v26, %v4880_v13  ;;  %7104 = vrot.lane.b32.xlu0 %v7103_v8, %s7284_s21  ;;  %v13225_v18 = vunpack.i.l.bf16 %v11519_v59  ;;  %v13227_v10 = vrot.slane %v13226_v36, 4  ;;  %v13230_v13 = vld [vmem:[#allocation19_spill] sm:$0xff] }
 0x880   : > { %v6320_v15 = vsel %vm717_vm1, %v13222_v2, %v11577_v43  ;;  %v6208_v25 = vsel %vm717_vm1, %v13224_v9, %v11596_v5  ;;  %v11627_v2 = vperm.slane %v6332_v63, %v7436_v22  ;;  %v5268_v33 = vsel %vm717_vm1, %v13228_v14, %v6877_v32  ;;  %v11654_v32 = vpop.permute.xlu2 %6964 }
 0x881   : > { %v11624_v35 = vrot.slane %v13225_v18, 4  ;;  %v6220_v31 = vsel %vm717_vm1, %v13227_v10, %v6170_v7  ;;  %v11636_v11 = vperm.slane %v6320_v15, %v7436_v22  ;;  %v11640_v8 = vsel %vm717_vm1, %v11158_v53, %v6333_v30  ;;  %7139 = vrot.lane.b32.xlu1 %v7138_v38, %s7284_s21  ;;  %v11662_v18 = vpop.permute.xlu0 %6939 }
 0x882   : > { %13229 = vst [vmem:[#allocation8_spill] sm:$0xff] %v11640_v8  ;;  %v13231_v26 = vunpack.i.h.bf16 %v13230_v13  ;;  %v11648_v7 = vperm.slane %v6208_v25, %v7436_v22  ;;  %v11652_v14 = vsel %vm717_vm1, %v13226_v36, %v6221_v41  ;;  %v4881_v53 = vrot.slane %v11350_v24, 4  ;;  %v11664_v25 = vpop.permute.xlu1 %6944  ;;  %v13235_v36 = vld [vmem:[#allocation6_spill] sm:$0xff] }
 0x883   : > { %13232 = vst [vmem:[#allocation17_spill] sm:$0xff] %v11652_v14  ;;  %v11658_v30 = vperm.slane %v6220_v31, %v7436_v22  ;;  %v5157_v15 = vrot.slane %v6876_v16, 4  ;;  %v4993_v38 = vrot.slane %v11333_v55, 4  ;;  %v5156_v24 = vsel %vm717_vm1, %v13235_v36, %v6876_v16 }
 0x884   : > { %v5270_v63 = vsel %vm717_vm1, %v13231_v26, %v5269_v1  ;;  %v6917_v1 = vunpack.i.h.bf16 %v11494_v37  ;;  %v11667_v26 = vperm.slane %v5268_v33, %v7428_v6  ;;  %v4882_v31 = vsel %vm717_vm1, %v4866_v52, %v4881_v53 }
 0x885   : > { %v11670_v41 = vperm.slane %v5270_v63, %v7428_v6  ;;  %v6916_v9 = vunpack.i.l.bf16 %v11494_v37  ;;  %v6897_v10 = vunpack.i.h.bf16 %v11496_v29  ;;  %v4994_v55 = vsel %vm717_vm1, %v4978_v21, %v4993_v38 }
 0x886   : > { %13233 = vst [vmem:[#allocation21_spill] sm:$0xff] %v11667_v26  ;;  %v11680_v8 = vperm.slane %v11517_v54, %v7436_v22  ;;  %v6896_v33 = vunpack.i.l.bf16 %v11496_v29  ;;  %v7143_v14 = vpack.i.bf16 %v4994_v55, %v4882_v31  ;;  %v4885_v63 = vrot.slane %v11394_v48, 4 }
 0x887   : > { %13234 = vst [vmem:[#allocation19_spill] sm:$0xff] %v11670_v41  ;;  %v11686_v16 = vperm.slane %v11509_v19, %v7436_v22  ;;  %v13236_v52 = vunpack.i.l.bf16 %v13230_v13  ;;  %v6297_v53 = vrot.slane %v6917_v1, 4  ;;  %v4997_v21 = vrot.slane %v11343_v0, 4 }
 0x888   : > { %v4180_v38 = vrot.slane %v10964_v62, 4  ;;  %7144 = vrot.lane.b32.xlu2 %v7143_v14, %s7280_s14  ;;  %v4886_v54 = vsel %vm717_vm1, %v11680_v8, %v4885_v63  ;;  %v4292_v29 = vrot.slane %v10955_v39, 4  ;;  %v6932_v36 = vunpack.i.h.bf16 %v11583_v60 }
 0x889   : > { %v5158_v37 = vsel %vm717_vm1, %v13236_v52, %v5157_v15  ;;  %v6931_v19 = vunpack.i.l.bf16 %v11583_v60  ;;  %v6184_v13 = vsel %vm717_vm1, %v11534_v12, %v6916_v9  ;;  %v6185_v15 = vrot.slane %v6916_v9, 4 }
 0x88a   : > { %v4998_v31 = vsel %vm717_vm1, %v11686_v16, %v4997_v21  ;;  %v4181_v62 = vsel %vm717_vm1, %v11086_v47, %v4180_v38  ;;  %v5939_v14 = vrot.slane %v6897_v10, 4  ;;  %v5827_v55 = vrot.slane %v6896_v33, 4  ;;  %v11716_v38 = vpop.permute.xlu2 %6979 }
 0x88b   : > { %v7153_v52 = vpack.i.bf16 %v4998_v31, %v4886_v54  ;;  %v4293_v39 = vsel %vm717_vm1, %v11046_v20, %v4292_v29  ;;  %v11709_v60 = vperm.slane %v5156_v24, %v7428_v6  ;;  %v5942_v21 = vsel %vm717_vm1, %v6897_v10, %v11401_v61  ;;  %13237 = vst [vmem:[#allocation6_spill] sm:$0xff] %v11716_v38  ;;  %v11731_v10 = vpop.permute.xlu1 %6959 }
 0x88c   : > { %v7118_v9 = vpack.i.bf16 %v4293_v39, %v4181_v62  ;;  %v5830_v47 = vsel %vm717_vm1, %v6896_v33, %v11420_v46  ;;  %v5927_v54 = vrot.slane %v6932_v36, 4  ;;  %v5815_v20 = vrot.slane %v6931_v19, 4  ;;  %v11729_v46 = vpop.permute.xlu0 %6954 }
 0x88d   : > { %7154 = vrot.lane.b32.xlu1 %v7153_v52, %s7282_s16  ;;  %v11720_v29 = vperm.slane %v5158_v37, %v7428_v6  ;;  %v11724_v31 = vperm.slane %v6184_v13, %v7428_v6  ;;  %v6296_v61 = vsel %vm717_vm1, %v11530_v42, %v6917_v1  ;;  %v13238_v33 = vunpack.i.l.bf16 %v11338_v56 }
 0x88e   : > { %7119 = vrot.lane.b32.xlu0 %v7118_v9, %s7282_s16  ;;  %v13239_v37 = vunpack.i.h.bf16 %v11338_v56  ;;  %v13240_v13 = vunpack.i.h.bf16 %v11328_v3  ;;  %v13241_v42 = vunpack.i.l.bf16 %v11328_v3  ;;  %v11746_v9 = vperm.slane %v5942_v21, %v7428_v6 }
 0x88f   : > { %v6186_v62 = vsel %vm717_vm1, %v13238_v33, %v6185_v15  ;;  %v11749_v63 = vperm.slane %v5830_v47, %v7428_v6  ;;  %v5930_v15 = vsel %vm717_vm1, %v6932_v36, %v11592_v17  ;;  %v5818_v56 = vsel %vm717_vm1, %v6931_v19, %v11624_v35 }
 0x890   : > { %v6298_v52 = vsel %vm717_vm1, %v13239_v37, %v6297_v53  ;;  %v5940_v39 = vsel %vm717_vm1, %v5939_v14, %v13240_v13  ;;  %v5828_v1 = vsel %vm717_vm1, %v5827_v55, %v13241_v42  ;;  %13242 = vst [vmem:[#allocation48_spill] sm:$0xff] %v11746_v9  ;;  %v13244_v53 = vunpack.i.h.bf16 %v11519_v59 }
 0x891   : > { %13243 = vst [vmem:[#allocation49_spill] sm:$0xff] %v11749_v63  ;;  %v13245_v3 = vunpack.i.l.bf16 %v11519_v59  ;;  %v6922_v21 = vunpack.i.h.bf16 %v11585_v49  ;;  %v6921_v33 = vunpack.i.l.bf16 %v11585_v49  ;;  %v5191_v47 = vrot.slane %v11709_v60, 4 }
 0x892   : > { %v5928_v14 = vsel %vm717_vm1, %v5927_v54, %v13244_v53  ;;  %v11765_v37 = vperm.slane %v6296_v61, %v7428_v6  ;;  %v11768_v17 = vperm.slane %v5940_v39, %v7428_v6  ;;  %v11771_v35 = vperm.slane %v5828_v1, %v7428_v6 }
 0x893   : > { %v5816_v55 = vsel %vm717_vm1, %v5815_v20, %v13245_v3  ;;  %v11774_v36 = vperm.slane %v6186_v62, %v7428_v6  ;;  %v11777_v59 = vperm.slane %v6298_v52, %v7428_v6  ;;  %v11780_v19 = vperm.slane %v5930_v15, %v7428_v6 }
 0x894   : > { %v11783_v49 = vperm.slane %v5818_v56, %v7428_v6  ;;  %v6233_v20 = vrot.slane %v11724_v31, 4  ;;  %v11788_v61 = vperm.slane %v5928_v14, %v7428_v6  ;;  %v11791_v13 = vperm.slane %v5816_v55, %v7428_v6  ;;  %v11802_v3 = vpop.permute.xlu0 %6969  ;;  %v11804_v55 = vpop.permute.xlu1 %6974 }
 0x895   : > { %13246 = vst [vmem:[#allocation50_spill] sm:$0xff] %v11780_v19  ;;  %v5987_v62 = vrot.slane %v11746_v9, 4  ;;  %v5875_v52 = vrot.slane %v11749_v63, 4  ;;  %v6309_v39 = vrot.slane %v6922_v21, 4  ;;  %v6197_v42 = vrot.slane %v6921_v33, 4 }
 0x896   : > { %13247 = vst [vmem:[#allocation51_spill] sm:$0xff] %v11783_v49  ;;  %v6345_v1 = vrot.slane %v11765_v37, 4  ;;  %v5975_v15 = vrot.slane %v11768_v17, 4  ;;  %v5863_v56 = vrot.slane %v11771_v35, 4  ;;  %v13248_v53 = vrot.slane %v11373_v50, 4 }
 0x897   : > { %13249 = vst [vmem:[#allocation52_spill] sm:$0xff] %v11804_v55  ;;  %v6245_v12 = vrot.slane %v11774_v36, 4  ;;  %v6357_v24 = vrot.slane %v11777_v59, 4  ;;  %v11810_v54 = vsel %vm717_vm1, %v5875_v52, %v11783_v49  ;;  %v11814_v38 = vsel %vm717_vm1, %v5987_v62, %v11780_v19  ;;  %v11826_v52 = vpop.permute.xlu2 %6994  ;;  %v13254_v49 = vld [vmem:[#allocation33_spill] sm:$0xff]  ;;  %v13256_v19 = vld [vmem:[#allocation38_spill] sm:$0xff] }
 0x898   : > { %v5194_v14 = vsel %vm717_vm1, %v11709_v60, %v13248_v53  ;;  %13250 = vst [vmem:[#allocation53_spill] sm:$0xff] %v11810_v54  ;;  %v5864_v9 = vsel %vm717_vm1, %v5863_v56, %v11791_v13  ;;  %v5976_v60 = vsel %vm717_vm1, %v5975_v15, %v11788_v61  ;;  %v13252_v53 = vld [vmem:[#allocation37_spill] sm:$0xff]  ;;  %v13253_v63 = vrot.slane %v11564_v23, 4 }
 0x899   : > { %13251 = vst [vmem:[#allocation54_spill] sm:$0xff] %v11814_v38  ;;  %v6196_v55 = vsel %vm717_vm1, %v13252_v53, %v6921_v33  ;;  %v13255_v54 = vunpack.i.l.bf16 %v13254_v49  ;;  %v6308_v56 = vsel %vm717_vm1, %v13256_v19, %v6922_v21  ;;  %v13257_v38 = vunpack.i.h.bf16 %v13254_v49 }
 0x89a   : > { %v5170_v26 = vsel %vm717_vm1, %v11234_v58, %v13253_v63  ;;  %v11837_v33 = vperm.slane %v5194_v14, %v7436_v22  ;;  %v13258_v53 = vrot.slane %v11234_v58, 4  ;;  %v5192_v41 = vsel %vm717_vm1, %v5191_v47, %v11373_v50 }
 0x89b   : > { %v6198_v62 = vsel %vm717_vm1, %v13255_v54, %v6197_v42  ;;  %v6310_v15 = vsel %vm717_vm1, %v13257_v38, %v6309_v39  ;;  %v4877_v54 = vrot.slane %v11561_v57, 4  ;;  %v4989_v42 = vrot.slane %v11568_v28, 4 }
 0x89c   : > { %v5168_v63 = vsel %vm717_vm1, %v13258_v53, %v11564_v23  ;;  %v11848_v21 = vperm.slane %v5170_v26, %v7436_v22  ;;  %v5219_v38 = vrot.slane %v11837_v33, 4  ;;  %v11855_v49 = vperm.slane %v5192_v41, %v7436_v22  ;;  %v11874_v53 = vpop.permute.xlu1 %6989 }
 0x89d   : > { %v11852_v19 = vperm.slane %v5168_v63, %v7436_v22  ;;  %v6202_v58 = vperm.slane %v6196_v55, %v7428_v6  ;;  %v4878_v50 = vsel %vm717_vm1, %v11512_v27, %v4877_v54  ;;  %v4990_v57 = vsel %vm717_vm1, %v11499_v40, %v4989_v42  ;;  %v11872_v40 = vpop.permute.xlu0 %6984 }
 0x89e   : > { %13260 = vst [vmem:[#allocation33_spill] sm:$0xff] %v11855_v49  ;;  %v12864_v23 = vunpack.i.h.bf16 %v11664_v25  ;;  %v6314_v28 = vperm.slane %v6308_v56, %v7428_v6  ;;  %v5220_v26 = vsel %vm717_vm1, %v5219_v38, %v11848_v21  ;;  %v7133_v39 = vpack.i.bf16 %v4990_v57, %v4878_v50  ;;  %v13262_v50 = vld [vmem:[#allocation14_spill] sm:$0xff] }
 0x89f   : > { %13259 = vst [vmem:[#allocation37_spill] sm:$0xff] %v11852_v19  ;;  %v5217_v47 = vrot.slane %v11852_v19, 4  ;;  %v6206_v55 = vperm.slane %v6198_v62, %v7428_v6  ;;  %v6318_v27 = vperm.slane %v6310_v15, %v7428_v6  ;;  %5348 = vrot.lane.b32.xlu2 %v5220_v26, %s7286_s23  ;;  %v6942_v63 = vunpack.i.h.bf16 %v11662_v18 }
 0x8a0   : > { %13261 = vst [vmem:[#allocation38_spill] sm:$0xff] %v11872_v40  ;;  %7134 = vrot.lane.b32.xlu0 %v7133_v39, %s7283_s20  ;;  %v6941_v54 = vunpack.i.l.bf16 %v11662_v18  ;;  %v12863_v42 = vunpack.i.l.bf16 %v11664_v25  ;;  %v11883_v62 = vperm.slane %v5864_v9, %v7436_v22  ;;  %v11886_v15 = vperm.slane %v5976_v60, %v7436_v22  ;;  %v13263_v9 = vld [vmem:[#allocation12_spill] sm:$0xff] }
 0x8a1   : > { %v5218_v56 = vsel %vm717_vm1, %v11855_v49, %v5217_v47  ;;  %v6231_v38 = vrot.slane %v6202_v58, 4  ;;  %v5964_v57 = vsel %vm717_vm1, %v13262_v50, %v12864_v23  ;;  %v6234_v26 = vsel %vm717_vm1, %v6202_v58, %v6233_v20  ;;  %v11906_v50 = vpop.permute.xlu2 %7009  ;;  %v13270_v49 = vld [vmem:[#allocation7_spill] sm:$0xff] }
 0x8a2   : > { %5344 = vrot.lane.b32.xlu1 %v5218_v56, %s7285_s22  ;;  %v6343_v47 = vrot.slane %v6314_v28, 4  ;;  %v6346_v18 = vsel %vm717_vm1, %v6314_v28, %v6345_v1  ;;  %v5852_v39 = vsel %vm717_vm1, %v13263_v9, %v12863_v42  ;;  %v6246_v60 = vsel %vm717_vm1, %v6206_v55, %v6245_v12  ;;  %13264 = vst [vmem:[#allocation14_spill] sm:$0xff] %v11906_v50 }
 0x8a3   : > { %v6355_v41 = vrot.slane %v6318_v27, 4  ;;  %v11901_v56 = vperm.slane %v5852_v39, %v7428_v6  ;;  %v11904_v14 = vperm.slane %v5964_v57, %v7428_v6  ;;  %v6243_v20 = vrot.slane %v6206_v55, 4  ;;  %v13265_v57 = vld [vmem:[#allocation10_spill] sm:$0xff] }
 0x8a4   : > { %v6358_v58 = vsel %vm717_vm1, %v6318_v27, %v6357_v24  ;;  %v5952_v1 = vsel %vm717_vm1, %v11294_v45, %v6942_v63  ;;  %v5840_v28 = vsel %vm717_vm1, %v11298_v51, %v6941_v54  ;;  %v11914_v12 = vperm.slane %v6234_v26, %v7436_v22 }
 0x8a5   : > { %v5887_v9 = vrot.slane %v11901_v56, 4  ;;  %v5999_v39 = vrot.slane %v11904_v14, 4  ;;  %v13266_v42 = vrot.slane %v13265_v57, 4  ;;  %v11924_v24 = vsel %vm717_vm1, %v6231_v38, %v11724_v31 }
 0x8a6   : > { %v11927_v45 = vperm.slane %v6246_v60, %v7436_v22  ;;  %v11931_v51 = vsel %vm717_vm1, %v6343_v47, %v11765_v37  ;;  %v11934_v27 = vperm.slane %v6346_v18, %v7436_v22  ;;  %v11938_v26 = vsel %vm717_vm1, %v6355_v41, %v11777_v59  ;;  %v11945_v60 = vpop.permute.xlu0 %6999  ;;  %v11952_v59 = vpop.permute.xlu1 %7004 }
 0x8a7   : > { %v5180_v55 = vsel %vm717_vm1, %v13266_v42, %v11537_v34  ;;  %v11941_v42 = vperm.slane %v6358_v58, %v7436_v22  ;;  %v5958_v31 = vperm.slane %v5952_v1, %v7428_v6  ;;  %v5846_v38 = vperm.slane %v5840_v28, %v7428_v6 }
 0x8a8   : > { %v6244_v37 = vsel %vm717_vm1, %v6243_v20, %v11774_v36  ;;  %v5186_v23 = vperm.slane %v5180_v55, %v7436_v22  ;;  %v11954_v41 = vrot.slane %v6942_v63, 4  ;;  %v13269_v28 = vrot.slane %v11720_v29, 4 }
 0x8a9   : > { %13267 = vst [vmem:[#allocation12_spill] sm:$0xff] %v11941_v42  ;;  %v5888_v58 = vsel %vm717_vm1, %v5887_v9, %v5846_v38  ;;  %v6000_v1 = vsel %vm717_vm1, %v5999_v39, %v5958_v31  ;;  %v4883_v47 = vrot.slane %v11680_v8, 4  ;;  %v4995_v55 = vrot.slane %v11686_v16, 4  ;;  %v11981_v42 = vpop.permute.xlu2 %7039 }
 0x8aa   : > { %13268 = vst [vmem:[#allocation10_spill] sm:$0xff] %v11954_v41  ;;  %v5204_v40 = vsel %vm717_vm1, %v13269_v28, %v11437_v44  ;;  %v5225_v20 = vrot.slane %v5186_v23, 4  ;;  %v6957_v18 = vunpack.i.h.bf16 %v11729_v46  ;;  %v6956_v63 = vunpack.i.l.bf16 %v11729_v46  ;;  %v13271_v41 = vld [vmem:[#allocation13_spill] sm:$0xff] }
 0x8ab   : > { %v5210_v36 = vperm.slane %v5204_v40, %v7436_v22  ;;  %v6962_v9 = vunpack.i.h.bf16 %v11731_v10  ;;  %v6961_v39 = vunpack.i.l.bf16 %v11731_v10  ;;  %v4884_v28 = vsel %vm717_vm1, %v4883_v47, %v11394_v48 }
 0x8ac   : > { %v4996_v40 = vsel %vm717_vm1, %v4995_v55, %v11343_v0  ;;  %v11974_v8 = vrot.slane %v6941_v54, 4  ;;  %v3646_v46 = vsel %vm1050_vm6, %v13270_v49, %v6956_v63  ;;  %v3653_v10 = vsel %vm1050_vm6, %v13271_v41, %v6957_v18 }
 0x8ad   : > { %v5226_v50 = vsel %vm717_vm1, %v5210_v36, %v5225_v20  ;;  %v5223_v19 = vrot.slane %v5210_v36, 4  ;;  %v7148_v16 = vpack.i.bf16 %v4996_v40, %v4884_v28  ;;  %v5889_v36 = vrot.slane %v5846_v38, 4 }
 0x8ae   : > { %5360 = vrot.lane.b32.xlu2 %v5226_v50, %s7280_s14  ;;  %v3654_v48 = vsel %vm1052_vm7, %v3653_v10, %v6962_v9  ;;  %v3647_v0 = vsel %vm1052_vm7, %v3646_v46, %v6961_v39  ;;  %v11989_v54 = vperm.slane %v5888_v58, %v7436_v22  ;;  %v5913_v49 = vrot.slane %v11883_v62, 4  ;;  %v11996_v47 = vpop.permute.xlu0 %7014  ;;  %v12019_v40 = vpop.permute.xlu1 %7019 }
 0x8af   : > { %v5224_v20 = vsel %vm717_vm1, %v5223_v19, %v5186_v23  ;;  %7149 = vrot.lane.b32.xlu0 %v7148_v16, %s7281_s15  ;;  %v11993_v50 = vperm.slane %v6000_v1, %v7436_v22  ;;  %v6025_v38 = vrot.slane %v11886_v15, 4  ;;  %v6001_v19 = vrot.slane %v5958_v31, 4 }
 0x8b0   : > { %5356 = vrot.lane.b32.xlu1 %v5224_v20, %s7284_s21  ;;  %v13272_v23 = vrot.slane %v11537_v34, 4  ;;  %v13273_v41 = vrot.slane %v11437_v44, 4  ;;  %v6972_v55 = vunpack.i.h.bf16 %v11802_v3  ;;  %v13274_v1 = vunpack.i.h.bf16 %v11664_v25 }
 0x8b1   : > { %v5914_v9 = vsel %vm717_vm1, %v11989_v54, %v5913_v49  ;;  %v6026_v31 = vsel %vm717_vm1, %v11993_v50, %v6025_v38  ;;  %v6971_v44 = vunpack.i.l.bf16 %v11802_v3  ;;  %v13276_v16 = vunpack.i.l.bf16 %v11664_v25 }
 0x8b2   : > { %v5182_v18 = vsel %vm717_vm1, %v13265_v57, %v13272_v23  ;;  %v5206_v58 = vsel %vm717_vm1, %v11720_v29, %v13273_v41  ;;  %v5965_v63 = vrot.slane %v13274_v1, 4  ;;  %v7168_v39 = vpack.i.bf16 %v6026_v31, %v5914_v9  ;;  %v13280_v41 = vld [vmem:[#allocation41_spill] sm:$0xff] }
 0x8b3   : > { %v5190_v34 = vperm.slane %v5182_v18, %v7436_v22  ;;  %v5214_v57 = vperm.slane %v5206_v58, %v7436_v22  ;;  %v13275_v29 = vunpack.i.l.bf16 %v11654_v32  ;;  %v5853_v46 = vrot.slane %v13276_v16, 4 }
 0x8b4   : > { %v5890_v10 = vsel %vm717_vm1, %v11901_v56, %v5889_v36  ;;  %v5221_v20 = vrot.slane %v11848_v21, 4  ;;  %v13277_v49 = vunpack.i.h.bf16 %v11654_v32  ;;  %v6002_v3 = vsel %vm717_vm1, %v11904_v14, %v6001_v19 }
 0x8b5   : > { %v3648_v28 = vsel %vm1054_vm8, %v3647_v0, %v13275_v29  ;;  %v5229_v23 = vrot.slane %v5190_v34, 4  ;;  %v6250_v21 = vperm.slane %v6244_v37, %v7436_v22  ;;  %v6362_v32 = vperm.slane %v11938_v26, %v7436_v22  ;;  %v13281_v37 = vld [vmem:[#allocation30_spill] sm:$0xff] }
 0x8b6   : > { %v3655_v38 = vsel %vm1054_vm8, %v3654_v48, %v13277_v49  ;;  %v12032_v0 = vsel %vm1056_vm9, %v3648_v28, %v6971_v44  ;;  %7169 = vrot.lane.b32.xlu2 %v7168_v39, %s7285_s22  ;;  %v5222_v25 = vsel %vm717_vm1, %v11837_v33, %v5221_v20  ;;  %v13278_v56 = vrot.slane %v11596_v5, 4  ;;  %v12064_v31 = vpop.permute.xlu0 %7024 }
 0x8b7   : > { %v12035_v18 = vsel %vm1056_vm9, %v3655_v38, %v6972_v55  ;;  %v5230_v36 = vsel %vm717_vm1, %v5214_v57, %v5229_v23  ;;  %v6259_v48 = vrot.slane %v11914_v12, 4  ;;  %v13279_v19 = vrot.slane %v11577_v43, 4  ;;  %5352 = vrot.lane.b32.xlu0 %v5222_v25, %s7283_s20  ;;  %v13284_v38 = vld [vmem:[#allocation9_spill] sm:$0xff] }
 0x8b8   : > { %v6210_v14 = vsel %vm717_vm1, %v13223_v4, %v13278_v56  ;;  %v6371_v33 = vrot.slane %v11934_v27, 4  ;;  %v13282_v55 = vunpack.i.l.bf16 %v13281_v37  ;;  %v13283_v5 = vunpack.i.h.bf16 %v13281_v37  ;;  %5368 = vrot.lane.b32.xlu1 %v5230_v36, %s7282_s16  ;;  %v12062_v4 = vpop.permute.xlu2 %7044  ;;  %v12106_v37 = vpop.permute.xlu1 %7034 }
 0x8b9   : > { %v6322_v58 = vsel %vm717_vm1, %v13280_v41, %v13279_v19  ;;  %v6263_v43 = vrot.slane %v6250_v21, 4  ;;  %v6375_v9 = vrot.slane %v6362_v32, 4  ;;  %v12067_v39 = vperm.slane %v5890_v10, %v7436_v22 }
 0x8ba   : > { %v5854_v26 = vsel %vm717_vm1, %v13282_v55, %v5853_v46  ;;  %v5966_v1 = vsel %vm717_vm1, %v13283_v5, %v5965_v63  ;;  %v12070_v44 = vperm.slane %v6210_v14, %v7436_v22  ;;  %v12073_v29 = vperm.slane %v6322_v58, %v7436_v22 }
 0x8bb   : > { %v6992_v63 = vunpack.i.h.bf16 %v11874_v53  ;;  %v12077_v28 = vperm.slane %v6002_v3, %v7436_v22  ;;  %v6264_v16 = vsel %vm717_vm1, %v6263_v43, %v11658_v30  ;;  %v6376_v46 = vsel %vm717_vm1, %v6375_v9, %v11627_v2 }
 0x8bc   : > { %v5227_v20 = vrot.slane %v5214_v57, 4  ;;  %v6260_v10 = vsel %vm717_vm1, %v6259_v48, %v12070_v44  ;;  %v6372_v49 = vsel %vm717_vm1, %v6371_v33, %v12073_v29  ;;  %v6991_v25 = vunpack.i.l.bf16 %v11874_v53  ;;  %v13285_v57 = vld [vmem:[#allocation23_spill] sm:$0xff] }
 0x8bd   : > { %v4718_v23 = vsel %vm1050_vm6, %v13284_v38, %v6992_v63  ;;  %v12091_v3 = vperm.slane %v5966_v1, %v7428_v6  ;;  %v7183_v56 = vpack.i.bf16 %v6376_v46, %v6264_v16  ;;  %v6265_v14 = vrot.slane %v11658_v30, 4 }
 0x8be   : > { %v6377_v36 = vrot.slane %v11627_v2, 4  ;;  %v4711_v19 = vsel %vm1050_vm6, %v13285_v57, %v6991_v25  ;;  %v13286_v48 = vrot.slane %v11791_v13, 4  ;;  %v5915_v58 = vrot.slane %v12067_v39, 4  ;;  %v12130_v1 = vpop.permute.xlu0 %7029 }
 0x8bf   : > { %v13287_v53 = vrot.slane %v11788_v61, 4  ;;  %v12109_v30 = vperm.slane %v5854_v26, %v7428_v6  ;;  %7184 = vrot.lane.b32.xlu2 %v7183_v56, %s7284_s21  ;;  %v7163_v2 = vpack.i.bf16 %v6372_v49, %v6260_v10  ;;  %v5228_v13 = vsel %vm717_vm1, %v5227_v20, %v5190_v34 }
 0x8c0   : > { %v5866_v41 = vsel %vm717_vm1, %v11771_v35, %v13286_v48  ;;  %v6266_v55 = vsel %vm717_vm1, %v6250_v21, %v6265_v14  ;;  %v6378_v35 = vsel %vm717_vm1, %v6362_v32, %v6377_v36  ;;  %v6027_v61 = vrot.slane %v12077_v28, 4  ;;  %5364 = vrot.lane.b32.xlu0 %v5228_v13, %s7281_s15  ;;  %v12138_v46 = vpop.permute.xlu2 %7049  ;;  %v13290_v36 = vld [vmem:[#allocation31_spill] sm:$0xff] }
 0x8c1   : > { %v5978_v33 = vsel %vm717_vm1, %v11768_v17, %v13287_v53  ;;  %v5874_v5 = vperm.slane %v5866_v41, %v7436_v22  ;;  %v12119_v17 = vperm.slane %v11924_v24, %v7436_v22  ;;  %7164 = vrot.lane.b32.xlu1 %v7163_v2, %s7286_s23  ;;  %v6257_v34 = vrot.slane %v11648_v7, 4  ;;  %v13294_v2 = vld [vmem:[#allocation12_spill] sm:$0xff] }
 0x8c2   : > { %v5986_v26 = vperm.slane %v5978_v33, %v7436_v22  ;;  %v12127_v21 = vperm.slane %v11931_v51, %v7436_v22  ;;  %v7002_v32 = vunpack.i.h.bf16 %v11945_v60  ;;  %v6369_v24 = vrot.slane %v11636_v11, 4 }
 0x8c3   : > { %v5916_v43 = vsel %vm717_vm1, %v5915_v58, %v5874_v5  ;;  %v7001_v9 = vunpack.i.l.bf16 %v11945_v60  ;;  %v13288_v63 = vunpack.i.l.bf16 %v11826_v52  ;;  %v6258_v51 = vsel %vm717_vm1, %v12119_v17, %v6257_v34 }
 0x8c4   : > { %v6028_v20 = vsel %vm717_vm1, %v6027_v61, %v5986_v26  ;;  %v13289_v10 = vunpack.i.h.bf16 %v11826_v52  ;;  %v7007_v38 = vunpack.i.h.bf16 %v11952_v59  ;;  %v6370_v60 = vsel %vm717_vm1, %v12127_v21, %v6369_v24  ;;  %v13297_v24 = vld [vmem:[#allocation19_spill] sm:$0xff] }
 0x8c5   : > { %v4712_v16 = vsel %vm1052_vm7, %v4711_v19, %v13288_v63  ;;  %v7006_v14 = vunpack.i.l.bf16 %v11952_v59  ;;  %v13291_v57 = vunpack.i.l.bf16 %v13290_v36  ;;  %v7193_v48 = vpack.i.bf16 %v6378_v35, %v6266_v55  ;;  %v13293_v59 = vld [vmem:[#allocation8_spill] sm:$0xff] }
 0x8c6   : > { %v4719_v49 = vsel %vm1052_vm7, %v4718_v23, %v13289_v10  ;;  %v4713_v25 = vsel %vm1054_vm8, %v4712_v16, %v7001_v9  ;;  %v13292_v23 = vld [vmem:[#allocation17_spill] sm:$0xff]  ;;  %v6267_v53 = vrot.slane %v11927_v45, 4  ;;  %v12169_v33 = vperm.slane %v13293_v59, %v7436_v22 }
 0x8c7   : > { %v4720_v56 = vsel %vm1054_vm8, %v4719_v49, %v7002_v32  ;;  %v5842_v19 = vsel %vm717_vm1, %v13291_v57, %v11974_v8  ;;  %v12161_v41 = vperm.slane %v13292_v23, %v7436_v22  ;;  %v12164_v58 = vsel %vm1056_vm9, %v4713_v25, %v7006_v14  ;;  %v13295_v8 = vld [vmem:[#allocation10_spill] sm:$0xff]  ;;  %7194 = vrot.lane.b32.xlu2 %v7193_v48, %s7280_s14  ;;  %v12184_v49 = vpop.permute.xlu1 %7059 }
 0x8c8   : > { %v12157_v52 = vsel %vm1056_vm9, %v4720_v56, %v7007_v38  ;;  %v6379_v13 = vrot.slane %v13294_v2, 4  ;;  %v13296_v55 = vunpack.i.h.bf16 %v13290_v36  ;;  %v5899_v61 = vrot.slane %v12109_v30, 4  ;;  %v13298_v38 = vld [vmem:[#allocation54_spill] sm:$0xff] }
 0x8c9   : > { %v7178_v34 = vpack.i.bf16 %v6028_v20, %v5916_v43  ;;  %v7158_v32 = vpack.i.bf16 %v6370_v60, %v6258_v51  ;;  %v6011_v63 = vrot.slane %v12091_v3, 4  ;;  %v6268_v16 = vsel %vm717_vm1, %v6267_v53, %v12161_v41  ;;  %v12191_v51 = vpop.permute.xlu0 %7054  ;;  %v13299_v60 = vld [vmem:[#allocation53_spill] sm:$0xff] }
 0x8ca   : > { %v5954_v35 = vsel %vm717_vm1, %v13296_v55, %v13295_v8  ;;  %v6380_v10 = vsel %vm717_vm1, %v6379_v13, %v12169_v33  ;;  %v5994_v25 = vperm.slane %v13298_v38, %v7436_v22  ;;  %v5850_v56 = vperm.slane %v5842_v19, %v7428_v6  ;;  %v13301_v8 = vld [vmem:[#allocation34_spill] sm:$0xff] }
 0x8cb   : > { %7179 = vrot.lane.b32.xlu1 %v7178_v34, %s7286_s23  ;;  %7159 = vrot.lane.b32.xlu0 %v7158_v32, %s7285_s22  ;;  %v5917_v43 = vrot.slane %v5874_v5, 4  ;;  %v6029_v20 = vrot.slane %v5986_v26, 4  ;;  %v5882_v14 = vperm.slane %v13299_v60, %v7436_v22  ;;  %v5962_v36 = vperm.slane %v5954_v35, %v7428_v6  ;;  %v13303_v35 = vld [vmem:[#allocation42_spill] sm:$0xff] }
 0x8cc   : > { %v6261_v57 = vrot.slane %v12070_v44, 4  ;;  %v6373_v48 = vrot.slane %v12073_v29, 4  ;;  %v7203_v23 = vpack.i.bf16 %v6380_v10, %v6268_v16  ;;  %v5900_v5 = vsel %vm717_vm1, %v5899_v61, %v5850_v56  ;;  %v12209_v29 = vpop.permute.xlu2 %7064  ;;  %v13304_v61 = vld [vmem:[#allocation21_spill] sm:$0xff] }
 0x8cd   : > { %v5918_v19 = vsel %vm717_vm1, %v12067_v39, %v5917_v43  ;;  %v6030_v53 = vsel %vm717_vm1, %v12077_v28, %v6029_v20  ;;  %v5906_v6 = vperm.slane %v5900_v5, %v7436_v22  ;;  %v6012_v44 = vsel %vm717_vm1, %v6011_v63, %v5962_v36  ;;  %v13300_v39 = vld [vmem:[#allocation47_spill] sm:$0xff]  ;;  %v13306_v20 = vld [vmem:[#allocation32_spill] sm:$0xff] }
 0x8ce   : > { %v6262_v26 = vsel %vm717_vm1, %v11914_v12, %v6261_v57  ;;  %v6374_v59 = vsel %vm717_vm1, %v11934_v27, %v6373_v48  ;;  %v6018_v13 = vperm.slane %v6012_v44, %v7436_v22  ;;  %v13302_v55 = vrot.slane %v13301_v8, 4 }
 0x8cf   : > { %v13305_v34 = vrot.slane %v13304_v61, 4  ;;  %v7027_v27 = vunpack.i.h.bf16 %v12064_v31  ;;  %v6013_v32 = vrot.slane %v5962_v36, 4  ;;  %v5901_v16 = vrot.slane %v5850_v56, 4  ;;  %7204 = vrot.lane.b32.xlu2 %v7203_v23, %s7281_s15  ;;  %v13308_v56 = vld [vmem:[#allocation51_spill] sm:$0xff] }
 0x8d0   : > { %v5280_v28 = vsel %vm717_vm1, %v13302_v55, %v13300_v39  ;;  %v5921_v10 = vrot.slane %v5882_v14, 4  ;;  %v6033_v63 = vrot.slane %v5994_v25, 4  ;;  %v7188_v38 = vpack.i.bf16 %v6030_v53, %v5918_v19  ;;  %v13310_v19 = vld [vmem:[#allocation36_spill] sm:$0xff] }
 0x8d1   : > { %v5304_v12 = vsel %vm717_vm1, %v13305_v34, %v13303_v35  ;;  %v7173_v43 = vpack.i.bf16 %v6374_v59, %v6262_v26  ;;  %v5758_v60 = vsel %vm1050_vm6, %v13306_v20, %v7027_v27  ;;  %v7026_v57 = vunpack.i.l.bf16 %v12064_v31  ;;  %v13307_v34 = vld [vmem:[#allocation50_spill] sm:$0xff]  ;;  %v13314_v27 = vld [vmem:[#allocation27_spill] sm:$0xff] }
 0x8d2   : > { %v5922_v48 = vsel %vm717_vm1, %v5906_v6, %v5921_v10  ;;  %v6034_v5 = vsel %vm717_vm1, %v6018_v13, %v6033_v63  ;;  %v5919_v44 = vrot.slane %v5906_v6, 4  ;;  %v6031_v55 = vrot.slane %v6018_v13, 4  ;;  %v13312_v6 = vld [vmem:[#allocation22_spill] sm:$0xff]  ;;  %v12247_v63 = vpop.permute.xlu1 %7074 }
 0x8d3   : > { %v5989_v36 = vrot.slane %v13307_v34, 4  ;;  %v5877_v9 = vrot.slane %v13308_v56, 4  ;;  %7189 = vrot.lane.b32.xlu1 %v7188_v38, %s7283_s20  ;;  %7174 = vrot.lane.b32.xlu0 %v7173_v43, %s7283_s20  ;;  %v12232_v23 = vperm.slane %v5280_v28, %v7436_v22  ;;  %v5751_v31 = vsel %vm1050_vm6, %v13310_v19, %v7026_v57  ;;  %v13315_v38 = vld [vmem:[#allocation43_spill] sm:$0xff] }
 0x8d4   : > { %v5902_v53 = vsel %vm717_vm1, %v12109_v30, %v5901_v16  ;;  %v6014_v26 = vsel %vm717_vm1, %v12091_v3, %v6013_v32  ;;  %v12241_v59 = vperm.slane %v5304_v12, %v7436_v22  ;;  %v13313_v13 = vrot.slane %v13312_v6, 4  ;;  %v12261_v16 = vpop.permute.xlu0 %7069 }
 0x8d5   : > { %13309 = vst [vmem:[#allocation7_spill] sm:$0xff] %v12232_v23  ;;  %v7208_v28 = vpack.i.bf16 %v6034_v5, %v5922_v48  ;;  %v13316_v43 = vrot.slane %v13315_v38, 4  ;;  %v13317_v30 = vrot.slane %v13300_v39, 4  ;;  %v13318_v12 = vrot.slane %v13303_v35, 4 }
 0x8d6   : > { %13311 = vst [vmem:[#allocation13_spill] sm:$0xff] %v12241_v59  ;;  %v5294_v10 = vsel %vm717_vm1, %v13314_v27, %v13313_v13  ;;  %v5920_v57 = vsel %vm717_vm1, %v5919_v44, %v5882_v14  ;;  %v6032_v48 = vsel %vm717_vm1, %v6031_v55, %v5994_v25  ;;  %v5329_v39 = vrot.slane %v12232_v23, 4  ;;  %v12278_v44 = vpop.permute.xlu2 %7079 }
 0x8d7   : > { %v5318_v20 = vsel %vm717_vm1, %v13297_v24, %v13316_v43  ;;  %v5282_v3 = vsel %vm717_vm1, %v13301_v8, %v13317_v30  ;;  %v5306_v32 = vsel %vm717_vm1, %v13304_v61, %v13318_v12  ;;  %v7032_v35 = vunpack.i.h.bf16 %v12130_v1  ;;  %7209 = vrot.lane.b32.xlu2 %v7208_v28, %s7280_s14  ;;  %v13319_v12 = vld [vmem:[#allocation49_spill] sm:$0xff] }
 0x8d8   : > { %v12266_v5 = vperm.slane %v5318_v20, %v7436_v22  ;;  %v5314_v34 = vperm.slane %v5306_v32, %v7436_v22  ;;  %v5290_v8 = vperm.slane %v5282_v3, %v7436_v22  ;;  %v7031_v56 = vunpack.i.l.bf16 %v12130_v1  ;;  %v13320_v32 = vld [vmem:[#allocation48_spill] sm:$0xff] }
 0x8d9   : > { %v7036_v61 = vunpack.i.l.bf16 %v12106_v37  ;;  %v12275_v19 = vperm.slane %v5294_v10, %v7436_v22  ;;  %v7198_v55 = vpack.i.bf16 %v6032_v48, %v5920_v57  ;;  %v7037_v13 = vunpack.i.h.bf16 %v12106_v37 }
 0x8da   : > { %v5339_v25 = vrot.slane %v12266_v5, 4  ;;  %v5331_v14 = vrot.slane %v5314_v34, 4  ;;  %v5752_v43 = vsel %vm1052_vm7, %v5751_v31, %v7031_v56  ;;  %v5759_v20 = vsel %vm1052_vm7, %v5758_v60, %v7032_v35  ;;  %v13321_v56 = vld [vmem:[#allocation40_spill] sm:$0xff] }
 0x8db   : > { %v5330_v1 = vsel %vm717_vm1, %v12241_v59, %v5329_v39  ;;  %v12290_v3 = vsel %vm1054_vm8, %v5752_v43, %v7036_v61  ;;  %v5878_v28 = vsel %vm717_vm1, %v13319_v12, %v5877_v9  ;;  %v5990_v37 = vsel %vm717_vm1, %v13320_v32, %v5989_v36  ;;  %7199 = vrot.lane.b32.xlu1 %v7198_v55, %s7284_s21  ;;  %v12319_v55 = vpop.permute.xlu1 %7094 }
 0x8dc   : > { %v5340_v10 = vsel %vm717_vm1, %v5339_v25, %v12275_v19  ;;  %v5332_v30 = vsel %vm717_vm1, %v5331_v14, %v5290_v8  ;;  %5372 = vrot.lane.b32.xlu0 %v5330_v1, %s7285_s22  ;;  %v12299_v60 = vsel %vm1054_vm8, %v5759_v20, %v7037_v13  ;;  %v5333_v31 = vrot.slane %v5290_v8, 4  ;;  %v13322_v25 = vld [vmem:[#allocation39_spill] sm:$0xff] }
 0x8dd   : > { %v12302_v57 = vperm.slane %v5902_v53, %v7436_v22  ;;  %v12305_v48 = vperm.slane %v6014_v26, %v7436_v22  ;;  %v6269_v39 = vrot.slane %v12161_v41, 4  ;;  %v6381_v9 = vrot.slane %v12169_v33, 4  ;;  %v13323_v13 = vld [vmem:[#allocation15_spill] sm:$0xff] }
 0x8de   : > { %v7067_v36 = vunpack.i.h.bf16 %v12209_v29  ;;  %v5334_v35 = vsel %vm717_vm1, %v5314_v34, %v5333_v31  ;;  %v3822_v61 = vrot.slane %v13321_v56, 4  ;;  %v3934_v14 = vrot.slane %v13322_v25, 4  ;;  %v13324_v20 = vld [vmem:[#allocation11_spill] sm:$0xff] }
 0x8df   : > { %v6270_v8 = vsel %vm717_vm1, %v11927_v45, %v6269_v39  ;;  %v6382_v53 = vsel %vm717_vm1, %v13294_v2, %v6381_v9  ;;  %v7057_v26 = vunpack.i.h.bf16 %v12191_v51  ;;  %v7056_v41 = vunpack.i.l.bf16 %v12191_v51  ;;  %v12327_v45 = vpop.permute.xlu0 %7084  ;;  %5392 = vrot.lane.b32.xlu2 %v5340_v10, %s7281_s15 }
 0x8e0   : > { %v7062_v33 = vunpack.i.h.bf16 %v12184_v49  ;;  %v7061_v34 = vunpack.i.l.bf16 %v12184_v49  ;;  %v3935_v43 = vsel %vm717_vm1, %v3934_v14, %v13323_v13  ;;  %v3823_v1 = vsel %vm717_vm1, %v3822_v61, %v13324_v20  ;;  %v7100_v14 = vpop.permute.xlu2 %7099 }
 0x8e1   : > { %v7066_v2 = vunpack.i.l.bf16 %v12209_v29  ;;  %v4013_v12 = vsel %vm1050_vm6, %v3935_v43, %v7057_v26  ;;  %v4006_v51 = vsel %vm1050_vm6, %v3823_v1, %v7056_v41  ;;  %v13325_v32 = vrot.slane %v13314_v27, 4 }
 0x8e2   : > { %v7213_v49 = vpack.i.bf16 %v6382_v53, %v6270_v8  ;;  %v4014_v39 = vsel %vm1052_vm7, %v4013_v12, %v7062_v33  ;;  %v4007_v9 = vsel %vm1052_vm7, %v4006_v51, %v7061_v34  ;;  %v13326_v56 = vrot.slane %v13297_v24, 4 }
 0x8e3   : > { %v5292_v31 = vsel %vm717_vm1, %v13325_v32, %v13312_v6  ;;  %v5923_v61 = vrot.slane %v12302_v57, 4  ;;  %v6035_v25 = vrot.slane %v12305_v48, 4  ;;  %5376 = vrot.lane.b32.xlu1 %v5332_v30, %s7286_s23  ;;  %v7072_v10 = vunpack.i.h.bf16 %v12261_v16  ;;  %v12365_v20 = vpop.permute.xlu1 %7109 }
 0x8e4   : > { %v5316_v29 = vsel %vm717_vm1, %v13326_v56, %v13315_v38  ;;  %v5298_v27 = vperm.slane %v5292_v31, %v7436_v22  ;;  %7214 = vrot.lane.b32.xlu0 %v7213_v49, %s7282_s16  ;;  %v7071_v8 = vunpack.i.l.bf16 %v12261_v16  ;;  %v4008_v24 = vsel %vm1054_vm8, %v4007_v9, %v7066_v2  ;;  %v13327_v31 = vld [vmem:[#allocation46_spill] sm:$0xff] }
 0x8e5   : > { %v5322_v6 = vperm.slane %v5316_v29, %v7436_v22  ;;  %v5886_v38 = vperm.slane %v5878_v28, %v7436_v22  ;;  %v5998_v53 = vperm.slane %v5990_v37, %v7436_v22  ;;  %v4015_v41 = vsel %vm1054_vm8, %v4014_v39, %v7067_v36  ;;  %v13328_v39 = vld [vmem:[#allocation26_spill] sm:$0xff] }
 0x8e6   : > { %v12356_v33 = vsel %vm1056_vm9, %v4008_v24, %v7071_v8  ;;  %v12359_v30 = vsel %vm1056_vm9, %v4015_v41, %v7072_v10  ;;  %v5337_v43 = vrot.slane %v5298_v27, 4  ;;  %v5341_v22 = vrot.slane %v12275_v19, 4 }
 0x8e7   : > { %v5335_v26 = vrot.slane %v5322_v6, 4  ;;  %v5924_v34 = vsel %vm717_vm1, %v5923_v61, %v5886_v38  ;;  %v6036_v13 = vsel %vm717_vm1, %v6035_v25, %v5998_v53  ;;  %v7090_v36 = vpop.permute.xlu0 %7089  ;;  %v7102_v1 = vunpack.i.h.bf16 %v7100_v14 }
 0x8e8   : > { %v5338_v28 = vsel %vm717_vm1, %v5322_v6, %v5337_v43  ;;  %v7218_v37 = vpack.i.bf16 %v6036_v13, %v5924_v34  ;;  %v7101_v2 = vunpack.i.l.bf16 %v7100_v14  ;;  %v5925_v12 = vrot.slane %v5886_v38, 4  ;;  %v13330_v14 = vld [vmem:[#allocation20_spill] sm:$0xff] }
 0x8e9   : > { %v5336_v16 = vsel %vm717_vm1, %v5335_v26, %v5298_v27  ;;  %v5342_v51 = vsel %vm717_vm1, %v12266_v5, %v5341_v22  ;;  %v6037_v32 = vrot.slane %v5998_v53, 4  ;;  %v4166_v49 = vrot.slane %v13327_v31, 4  ;;  %v12377_v27 = vpop.permute.xlu2 %7114  ;;  %v13332_v43 = vld [vmem:[#allocation28_spill] sm:$0xff] }
 0x8ea   : > { %v4278_v9 = vrot.slane %v13328_v39, 4  ;;  %v7092_v56 = vunpack.i.h.bf16 %v7090_v36  ;;  %v7097_v19 = vunpack.i.h.bf16 %v12319_v55  ;;  %v7096_v29 = vunpack.i.l.bf16 %v12319_v55 }
 0x8eb   : > { %5380 = vrot.lane.b32.xlu1 %v5334_v35, %s7283_s20  ;;  %v7091_v61 = vunpack.i.l.bf16 %v7090_v36  ;;  %v5911_v25 = vrot.slane %v11989_v54, 4  ;;  %v5926_v5 = vsel %vm717_vm1, %v12302_v57, %v5925_v12  ;;  %v13329_v35 = vld [vmem:[#allocation45_spill] sm:$0xff]  ;;  %v6023_v8 = vrot.slane %v11993_v50, 4  ;;  %v7125_v34 = vpop.permute.xlu1 %7124  ;;  %v13334_v12 = vld [vmem:[#allocation44_spill] sm:$0xff] }
 0x8ec   : > { %7219 = vrot.lane.b32.xlu0 %v7218_v37, %s7281_s15  ;;  %v4167_v6 = vsel %vm717_vm1, %v4166_v49, %v13329_v35  ;;  %v4279_v10 = vsel %vm717_vm1, %v4278_v9, %v13330_v14  ;;  %v6038_v24 = vsel %vm717_vm1, %v12305_v48, %v6037_v32  ;;  %v5693_v22 = vrot.slane %v13332_v43, 4  ;;  %v13333_v37 = vld [vmem:[#allocation25_spill] sm:$0xff]  ;;  %v13335_v49 = vld [vmem:[#allocation24_spill] sm:$0xff] }
 0x8ed   : > { %v4357_v55 = vsel %vm1050_vm6, %v4279_v10, %v7092_v56  ;;  %v4350_v54 = vsel %vm1050_vm6, %v4167_v6, %v7091_v61  ;;  %v12392_v38 = vsel %vm717_vm1, %v5911_v25, %v11883_v62  ;;  %v12398_v26 = vsel %vm717_vm1, %v6023_v8, %v11886_v15  ;;  %v13331_v62 = vld [vmem:[#allocation35_spill] sm:$0xff]  ;;  %v13337_v56 = vld [vmem:[#allocation29_spill] sm:$0xff] }
 0x8ee   : > { %v4358_v57 = vsel %vm1052_vm7, %v4357_v55, %v7097_v19  ;;  %v4351_v53 = vsel %vm1052_vm7, %v4350_v54, %v7096_v29  ;;  %v7223_v41 = vpack.i.bf16 %v6038_v24, %v5926_v5  ;;  %v5581_v13 = vrot.slane %v13331_v62, 4  ;;  %v13338_v29 = vld [vmem:[#allocation18_spill] sm:$0xff]  ;;  %v13340_v43 = vld [vmem:[#allocation37_spill] sm:$0xff] }
 0x8ef   : > { %v4352_v50 = vsel %vm1054_vm8, %v4351_v53, %v7101_v2  ;;  %v4359_v48 = vsel %vm1054_vm8, %v4358_v57, %v7102_v1  ;;  %v4871_v36 = vrot.slane %v13333_v37, 4  ;;  %v4983_v32 = vrot.slane %v13334_v12, 4  ;;  %v13336_v1 = vld [vmem:[#allocation16_spill] sm:$0xff]  ;;  %v2966_v53 = vld [vmem:[%s12713_s10] sm:$0xff] }
 0x8f0   : > { %v7127_v15 = vunpack.i.h.bf16 %v7125_v34  ;;  %v7126_v31 = vunpack.i.l.bf16 %v7125_v34  ;;  %v5582_v2 = vsel %vm717_vm1, %v13335_v49, %v5581_v13  ;;  %v5694_v39 = vsel %vm717_vm1, %v13336_v1, %v5693_v22 }
 0x8f1   : > { %v7130_v9 = vpop.permute.xlu2 %7129  ;;  %v4872_v19 = vsel %vm717_vm1, %v4871_v36, %v13337_v56  ;;  %v4984_v61 = vsel %vm717_vm1, %v4983_v32, %v13338_v29  ;;  %v7228_v35 = vpack.i.bf16 %v5694_v39, %v5582_v2 }
 0x8f2   : > { %v5062_v6 = vsel %vm1050_vm6, %v4984_v61, %v7127_v15  ;;  %v5055_v14 = vsel %vm1050_vm6, %v4872_v19, %v7126_v31  ;;  %v7132_v10 = vunpack.i.h.bf16 %v7130_v9  ;;  %v7131_v8 = vunpack.i.l.bf16 %v7130_v9 }
 0x8f3   : > { %5384 = vrot.lane.b32.xlu1 %v5336_v16, %s7284_s21  ;;  %v7105_v16 = vpop.permute.xlu0 %7104  ;;  %s6679_s21 = sshll.u32 %s13365_s18, 4 }
 0x8f4   : > { %7224 = vrot.lane.b32.xlu0 %v7223_v41, %s7282_s16  ;;  %v7107_v25 = vunpack.i.h.bf16 %v7105_v16  ;;  %v7106_v5 = vunpack.i.l.bf16 %v7105_v16  ;;  %v5056_v54 = vsel %vm1052_vm7, %v5055_v14, %v7131_v8  ;;  %v5063_v57 = vsel %vm1052_vm7, %v5062_v6, %v7132_v10  ;;  %v13341_v14 = vld [vmem:[#allocation6_spill] sm:$0xff]  ;;  %s488_s25 = scalar_lea.vmem %s12714_s11, %s6679_s21 }
 0x8f6   : > { %v12419_v24 = vsel %vm1056_vm9, %v4352_v50, %v7106_v5  ;;  %v12422_v55 = vsel %vm1056_vm9, %v4359_v48, %v7107_v25  ;;  %v12432_v50 = vpop.permute.xlu1 %7139 }
 0x8f9   : > { %v12438_v34 = vpop.permute.xlu2 %7144 }
 0x8fb   : > { %7229 = vrot.lane.b32.xlu1 %v7228_v35, %s7282_s16 }
 0x8fc   : > { %5388 = vrot.lane.b32.xlu0 %v5338_v28, %s7280_s14  ;;  %v13339_v28 = vld [vmem:[#allocation33_spill] sm:$0xff] }
 0x8fd   : > { %v5215_v62 = vrot.slane %v13339_v28, 4  ;;  %v7042_v28 = vunpack.i.h.bf16 %v11981_v42 }
 0x8ff   : > { %v12436_v48 = vpop.permute.xlu1 %7154  ;;  %v5216_v22 = vsel %vm717_vm1, %v5215_v62, %v13340_v43  ;;  %v7041_v62 = vunpack.i.l.bf16 %v11981_v42  ;;  %v13343_v43 = vld [vmem:[#allocation52_spill] sm:$0xff] }
 0x900   : > { %v12434_v41 = vpop.permute.xlu0 %7119 }
 0x901   : > { %v5349_v32 = vpop.permute.xlu2 %5348 }
 0x903   : > { %6475 = vperm.xlu1 %6711, %v2966_v53   ;;  %v7116_v53 = vunpack.i.l.bf16 %v12377_v27 }
 0x904   : > { %5396 = vrot.lane.b32.xlu0 %v5342_v51, %s7282_s16 }
 0x909   : > { %v5361_v39 = vpop.permute.xlu2 %5360 }
 0x911   : > { %v12457_v29 = vpop.permute.xlu2 %7169 }
 0x912   : > { %v7135_v13 = vpop.permute.xlu0 %7134 }
 0x913   : > { %v7137_v36 = vunpack.i.h.bf16 %v7135_v13  ;;  %v7136_v12 = vunpack.i.l.bf16 %v7135_v13  ;;  %v6255_v13 = vrot.slane %v12119_v17, 4  ;;  %v7052_v17 = vunpack.i.h.bf16 %v12138_v46 }
 0x914   : > { %v5345_v37 = vpop.permute.xlu1 %5344 }
 0x915   : > { %v5399_v51 = vsel %vm1050_vm6, %v5216_v22, %v5345_v37  ;;  %v12445_v15 = vsel %vm1054_vm8, %v5063_v57, %v7137_v36  ;;  %v12448_v31 = vsel %vm1054_vm8, %v5056_v54, %v7136_v12  ;;  %v13342_v54 = vld [vmem:[#allocation14_spill] sm:$0xff]  ;;  %v6367_v36 = vrot.slane %v12127_v21, 4 }
 0x916   : > { %v5400_v49 = vsel %vm1052_vm7, %v5399_v51, %v5349_v32  ;;  %v7051_v22 = vunpack.i.l.bf16 %v12138_v46 }
 0x919   : > { %v12459_v5 = vpop.permute.xlu2 %7184 }
 0x921   : > { %v12451_v1 = vpop.permute.xlu0 %7149  ;;  %v7195_v21 = vpop.permute.xlu2 %7194 }
 0x922   : > { %v5357_v2 = vpop.permute.xlu1 %5356 }
 0x929   : > { %v5353_v16 = vpop.permute.xlu0 %5352 }
 0x92a   : > { %v12453_v9 = vpop.permute.xlu1 %5368  ;;  %v5401_v56 = vsel %vm1054_vm8, %v5400_v49, %v5353_v16  ;;  %v7047_v49 = vunpack.i.h.bf16 %v12062_v4  ;;  %v13344_v16 = vld [vmem:[#allocation38_spill] sm:$0xff] }
 0x92b   : > { %v5402_v19 = vsel %vm1056_vm9, %v5401_v56, %v5357_v2  ;;  %v7046_v2 = vunpack.i.l.bf16 %v12062_v4  ;;  %v6256_v4 = vsel %vm717_vm1, %v6255_v13, %v11648_v7  ;;  %v6368_v56 = vsel %vm717_vm1, %v6367_v36, %v11636_v11 }
 0x92c   : > { %v7111_v36 = vunpack.i.l.bf16 %v12365_v20 }
 0x932   : > { %v5365_v25 = vpop.permute.xlu0 %5364 }
 0x933   : > { %v7165_v61 = vpop.permute.xlu1 %7164 }
 0x934   : > { %v7166_v23 = vunpack.i.l.bf16 %v7165_v61  ;;  %v7167_v13 = vunpack.i.h.bf16 %v7165_v61  ;;  %v7186_v61 = vunpack.i.l.bf16 %v12459_v5 }
 0x93d   : > { %v12461_v35 = vpop.permute.xlu1 %7179  ;;  %v7160_v6 = vpop.permute.xlu0 %7159 }
 0x93e   : > { %v7161_v12 = vunpack.i.l.bf16 %v7160_v6  ;;  %v7162_v10 = vunpack.i.h.bf16 %v7160_v6  ;;  %v7076_v6 = vunpack.i.l.bf16 %v12247_v63 }
 0x940   : > { %v6439_v42 = vsel %vm1050_vm6, %v6256_v4, %v7161_v12  ;;  %v6446_v37 = vsel %vm1050_vm6, %v6368_v56, %v7162_v10  ;;  %v7087_v4 = vunpack.i.h.bf16 %v12327_v45  ;;  %v5403_v10 = vsel %vm1058_vm10, %v5402_v19, %v5361_v39 }
 0x941   : > { %v6440_v12 = vsel %vm1052_vm7, %v6439_v42, %v7166_v23  ;;  %v6447_v56 = vsel %vm1052_vm7, %v6446_v37, %v7167_v13  ;;  %v5404_v11 = vsel %vm1060_vm11, %v5403_v10, %v5365_v25  ;;  %v5754_v23 = vsel %vm1056_vm9, %v12290_v3, %v7041_v62  ;;  %v7205_v10 = vpop.permute.xlu2 %7204 }
 0x942   : > { %v7147_v42 = vunpack.i.h.bf16 %v12438_v34  ;;  %v7086_v39 = vunpack.i.l.bf16 %v12327_v45  ;;  %v7187_v19 = vunpack.i.h.bf16 %v12459_v5  ;;  %v5755_v37 = vsel %vm1058_vm10, %v5754_v23, %v7046_v2 }
 0x943   : > { %v7142_v13 = vunpack.i.h.bf16 %v12432_v50  ;;  %v12521_v25 = vsel %vm1060_vm11, %v5755_v37, %v7051_v22  ;;  %v5761_v62 = vsel %vm1056_vm9, %v12299_v60, %v7042_v28  ;;  %v12528_v5 = vsel %vm1062_vm12, %v5404_v11, %v12453_v9 }
 0x944   : > { %v7157_v2 = vunpack.i.h.bf16 %v12436_v48  ;;  %v7156_v22 = vunpack.i.l.bf16 %v12436_v48  ;;  %v7122_v60 = vunpack.i.h.bf16 %v12434_v41  ;;  %v7121_v9 = vunpack.i.l.bf16 %v12434_v41 }
 0x945   : > { %v12473_v32 = vpop.permute.xlu1 %7189  ;;  %v7175_v51 = vpop.permute.xlu0 %7174  ;;  %v7206_v28 = vunpack.i.l.bf16 %v7205_v10  ;;  %v7207_v11 = vunpack.i.h.bf16 %v7205_v10  ;;  %v13345_v37 = vunpack.i.l.bf16 %v13342_v54 }
 0x946   : > { %v7176_v46 = vunpack.i.l.bf16 %v7175_v51  ;;  %v7177_v59 = vunpack.i.h.bf16 %v7175_v51 }
 0x948   : > { %v6441_v51 = vsel %vm1054_vm8, %v6440_v12, %v7176_v46  ;;  %v6448_v8 = vsel %vm1054_vm8, %v6447_v56, %v7177_v59  ;;  %v7146_v46 = vunpack.i.l.bf16 %v12438_v34  ;;  %v7196_v59 = vunpack.i.l.bf16 %v7195_v21 }
 0x949   : > { %v6442_v12 = vsel %vm1056_vm9, %v6441_v51, %v7186_v61  ;;  %v6449_v3 = vsel %vm1056_vm9, %v6448_v8, %v7187_v19  ;;  %v7141_v34 = vunpack.i.l.bf16 %v12432_v50  ;;  %v7197_v56 = vunpack.i.h.bf16 %v7195_v21 }
 0x94a   : > { %v5762_v51 = vsel %vm1058_vm10, %v5761_v62, %v7047_v49  ;;  %v7151_v61 = vunpack.i.l.bf16 %v12451_v1  ;;  %v6443_v8 = vsel %vm1058_vm10, %v6442_v12, %v7196_v59  ;;  %v7152_v21 = vunpack.i.h.bf16 %v12451_v1 }
 0x94b   : > { %v12537_v23 = vsel %vm1060_vm11, %v5762_v51, %v7052_v17  ;;  %v6450_v50 = vsel %vm1058_vm10, %v6449_v3, %v7197_v56  ;;  %v5058_v19 = vsel %vm1056_vm9, %v12448_v31, %v7141_v34  ;;  %v4715_v17 = vsel %vm1058_vm10, %v12164_v58, %v13345_v37 }
 0x94c   : > { %v6444_v41 = vsel %vm1060_vm11, %v6443_v8, %v7206_v28  ;;  %v5059_v3 = vsel %vm1058_vm10, %v5058_v19, %v7146_v46  ;;  %v6451_v1 = vsel %vm1060_vm11, %v6450_v50, %v7207_v11  ;;  %v13346_v62 = vunpack.i.l.bf16 %v11996_v47 }
 0x94d   : > { %v12504_v57 = vpop.permute.xlu1 %7199  ;;  %v5060_v10 = vsel %vm1060_vm11, %v5059_v3, %v7151_v61  ;;  %v4354_v31 = vsel %vm1058_vm10, %v12419_v24, %v7111_v36  ;;  %v13347_v46 = vunpack.i.l.bf16 %v12019_v40  ;;  %v7172_v61 = vunpack.i.h.bf16 %v12457_v29 }
 0x94e   : > { %v12506_v7 = vpop.permute.xlu0 %5372  ;;  %v4716_v56 = vsel %vm1060_vm11, %v4715_v17, %v13346_v62  ;;  %v12563_v51 = vsel %vm1062_vm12, %v5060_v10, %v7156_v22  ;;  %v4355_v24 = vsel %vm1060_vm11, %v4354_v31, %v7116_v53  ;;  %v5065_v36 = vsel %vm1056_vm9, %v12445_v15, %v7142_v13 }
 0x94f   : > { %v12568_v8 = vsel %vm1062_vm12, %v4716_v56, %v13347_v46  ;;  %v4010_v22 = vsel %vm1058_vm10, %v12356_v33, %v7076_v6  ;;  %v7171_v28 = vunpack.i.l.bf16 %v12457_v29  ;;  %v12582_v50 = vsel %vm1062_vm12, %v4355_v24, %v7121_v9 }
 0x950   : > { %v5066_v11 = vsel %vm1058_vm10, %v5065_v36, %v7147_v42  ;;  %v13349_v13 = vunpack.i.h.bf16 %v13342_v54  ;;  %v13350_v29 = vunpack.i.l.bf16 %v13343_v43  ;;  %v7182_v42 = vunpack.i.h.bf16 %v12461_v35 }
 0x951   : > { %v5067_v53 = vsel %vm1060_vm11, %v5066_v11, %v7152_v21  ;;  %v13351_v21 = vunpack.i.h.bf16 %v11996_v47  ;;  %v13352_v37 = vunpack.i.l.bf16 %v13341_v14  ;;  %v13355_v47 = vunpack.i.h.bf16 %v12365_v20 }
 0x952   : > { %v4722_v33 = vsel %vm1058_vm10, %v12157_v52, %v13349_v13  ;;  %v3650_v6 = vsel %vm1058_vm10, %v12032_v0, %v13350_v29  ;;  %v12602_v9 = vsel %vm1062_vm12, %v5067_v53, %v7157_v2  ;;  %v7181_v52 = vunpack.i.l.bf16 %v12461_v35 }
 0x953   : > { %v3651_v54 = vsel %vm1060_vm11, %v3650_v6, %v13352_v37  ;;  %v13354_v2 = vunpack.i.l.bf16 %v13344_v16  ;;  %v4361_v3 = vsel %vm1058_vm10, %v12422_v55, %v13355_v47  ;;  %v7191_v35 = vunpack.i.l.bf16 %v12473_v32  ;;  %v13363_v37 = vld [vmem:[#allocation7_spill] sm:$0xff] }
 0x954   : > { %v7202_v10 = vunpack.i.h.bf16 %v12504_v57  ;;  %v7201_v56 = vunpack.i.l.bf16 %v12504_v57  ;;  %v13358_v55 = vunpack.i.h.bf16 %v13343_v43  ;;  %v13359_v57 = vunpack.i.h.bf16 %v12278_v44 }
 0x955   : > { %v12543_v49 = vpop.permute.xlu1 %5376 }
 0x956   : > { %v7215_v48 = vpop.permute.xlu0 %7214 }
 0x957   : > { %v7217_v12 = vunpack.i.h.bf16 %v7215_v48  ;;  %v7216_v59 = vunpack.i.l.bf16 %v7215_v48  ;;  %v13348_v48 = vunpack.i.l.bf16 %v12278_v44 }
 0x959   : > { %v6445_v34 = vsel %vm1062_vm12, %v6444_v41, %v7216_v59  ;;  %v6452_v58 = vsel %vm1062_vm12, %v6451_v1, %v7217_v12  ;;  %v4011_v19 = vsel %vm1060_vm11, %v4010_v22, %v13348_v48  ;;  %v13353_v59 = vunpack.i.h.bf16 %v12019_v40 }
 0x95a   : > { %6489 = vmatpush.msra.mxu2 %v6445_v34  ;;  %6509 = vmatpush.msra.mxu3 %v6452_v58  ;;  %v12590_v15 = vsel %vm1062_vm12, %v4011_v19, %v7086_v39  ;;  %v4723_v39 = vsel %vm1060_vm11, %v4722_v33, %v13351_v21  ;;  %v12619_v41 = vsel %vm1062_vm12, %v3651_v54, %v13354_v2  ;;  %v7192_v1 = vunpack.i.h.bf16 %v12473_v32  ;;  %v13362_v21 = vld [vmem:[#allocation13_spill] sm:$0xff] }
 0x95b   : > { %v12614_v0 = vsel %vm1062_vm12, %v4723_v39, %v13353_v59  ;;  %v13356_v40 = vunpack.i.h.bf16 %v12377_v27  ;;  %v13357_v34 = vunpack.i.h.bf16 %v12247_v63  ;;  %v3657_v32 = vsel %vm1058_vm10, %v12035_v18, %v13358_v55 }
 0x95c   : > { %v6102_v58 = vsel %vm1050_vm6, %v12398_v26, %v7172_v61  ;;  %v6095_v27 = vsel %vm1050_vm6, %v12392_v38, %v7171_v28  ;;  %v13360_v63 = vunpack.i.h.bf16 %v13341_v14  ;;  %v13361_v26 = vunpack.i.h.bf16 %v13344_v16 }
 0x95d   : > { %v5381_v17 = vpop.permute.xlu1 %5380  ;;  %v4362_v62 = vsel %vm1060_vm11, %v4361_v3, %v13356_v40  ;;  %v4017_v20 = vsel %vm1058_vm10, %v12359_v30, %v13357_v34  ;;  %v7210_v30 = vpop.permute.xlu2 %7209  ;;  %v6103_v43 = vsel %vm1052_vm7, %v6102_v58, %v7182_v42  ;;  %v6096_v24 = vsel %vm1052_vm7, %v6095_v27, %v7181_v52 }
 0x95e   : > { %v7220_v12 = vpop.permute.xlu0 %7219  ;;  %v4363_v31 = vsel %vm1062_vm12, %v4362_v62, %v7122_v60  ;;  %v4018_v60 = vsel %vm1060_vm11, %v4017_v20, %v13359_v57  ;;  %v3658_v46 = vsel %vm1060_vm11, %v3657_v32, %v13360_v63  ;;  %v6097_v44 = vsel %vm1054_vm8, %v6096_v24, %v7191_v35 }
 0x95f   : > { %v4019_v18 = vsel %vm1062_vm12, %v4018_v60, %v7087_v4  ;;  %v3659_v38 = vsel %vm1062_vm12, %v3658_v46, %v13361_v26  ;;  %v6104_v61 = vsel %vm1054_vm8, %v6103_v43, %v7192_v1  ;;  %v6098_v14 = vsel %vm1056_vm9, %v6097_v44, %v7201_v56 }
 0x960   : > { %v6105_v36 = vsel %vm1056_vm9, %v6104_v61, %v7202_v10  ;;  %v7222_v22 = vunpack.i.h.bf16 %v7220_v12  ;;  %v7221_v28 = vunpack.i.l.bf16 %v7220_v12  ;;  %v7212_v11 = vunpack.i.h.bf16 %v7210_v30 }
 0x961   : > { %v7211_v48 = vunpack.i.l.bf16 %v7210_v30  ;;  %v5327_v39 = vrot.slane %v13362_v21, 4 }
 0x962   : > { %v6106_v13 = vsel %vm1058_vm10, %v6105_v36, %v7212_v11 }
 0x963   : > { %v6099_v16 = vsel %vm1058_vm10, %v6098_v14, %v7211_v48  ;;  %v6107_v29 = vsel %vm1060_vm11, %v6106_v13, %v7222_v22  ;;  %v5328_v54 = vsel %vm717_vm1, %v5327_v39, %v13363_v37  ;;  %vm6478_vm1 = vcmask 588800  }
 0x964   : > { %v6100_v33 = vsel %vm1060_vm11, %v6099_v16, %v7221_v28  ;;  %v5406_v59 = vsel %vm1050_vm6, %v5328_v54, %v12506_v7 }
 0x965   : > { %v5385_v19 = vpop.permute.xlu1 %5384  ;;  %v5407_v3 = vsel %vm1052_vm7, %v5406_v59, %v12543_v49  ;;  %v5393_v7 = vpop.permute.xlu2 %5392 }
 0x966   : > { %v7225_v45 = vpop.permute.xlu0 %7224  ;;  %v5408_v1 = vsel %vm1054_vm8, %v5407_v3, %v5381_v17 }
 0x967   : > { %v7227_v53 = vunpack.i.h.bf16 %v7225_v45  ;;  %v7226_v4 = vunpack.i.l.bf16 %v7225_v45  ;;  %v5409_v40 = vsel %vm1056_vm9, %v5408_v1, %v5385_v19 }
 0x969   : > { %v6101_v6 = vsel %vm1062_vm12, %v6100_v33, %v7226_v4  ;;  %v6108_v42 = vsel %vm1062_vm12, %v6107_v29, %v7227_v53 }
 0x96a   : > { %6490 = vmatpush.msra.mxu2 %v6101_v6  ;;  %6510 = vmatpush.msra.mxu3 %v6108_v42 }
 0x96d   : > { %v7230_v52 = vpop.permute.xlu1 %7229 }
 0x96e   : > { %v5389_v12 = vpop.permute.xlu0 %5388  ;;  %v7232_v2 = vunpack.i.h.bf16 %v7230_v52  ;;  %v7231_v47 = vunpack.i.l.bf16 %v7230_v52 }
 0x96f   : > { %v5410_v62 = vsel %vm1058_vm10, %v5409_v40, %v5389_v12 }
 0x970   : > { %v5757_v35 = vsel %vm1062_vm12, %v12521_v25, %v7231_v47  ;;  %v5764_v10 = vsel %vm1062_vm12, %v12537_v23, %v7232_v2  ;;  %v5411_v49 = vsel %vm1060_vm11, %v5410_v62, %v5393_v7 }
 0x971   : > { %6491 = vmatpush.msra.mxu2 %v5757_v35  ;;  %6511 = vmatpush.msra.mxu3 %v5764_v10 }
 0x973   : > { %6492 = vmatpush.msra.mxu2 %v12528_v5  ;;  %v2965_v5 = vld [vmem:[%s12712_s9] sm:$0xff] }
 0x975   : > { %6493 = vmatpush.msra.mxu2 %v12563_v51  ;;  %v6476_v23 = vpop.permute.xlu1 %6475 }
 0x976   : > { %v5397_v56 = vpop.permute.xlu0 %5396 }
 0x977   : > { %v5412_v25 = vsel %vm1062_vm12, %v5411_v49, %v5397_v56  ;;  %6494 = vmatpush.msra.mxu2 %v12568_v8 }
 0x978   : > { %6512 = vmatpush.msra.mxu3 %v5412_v25 }
 0x979   : > { %6495 = vmatpush.msra.mxu2 %v12582_v50 }
 0x97a   : > { %6513 = vmatpush.msra.mxu3 %v12602_v9 }
 0x97b   : > { %6496 = vmatpush.msra.mxu2 %v12590_v15 }
 0x97c   : > { %6514 = vmatpush.msra.mxu3 %v12614_v0 }
 0x97d   : > { %6497 = vmatpush.msra.mxu2 %v12619_v41 }
 0x97e   : > { %6515 = vmatpush.msra.mxu3 %v4363_v31  ;;  %6674 = vmatmul.msk.f32.vlgmr.msra.gmra.mxu2 %vm6478_vm1, %v2965_v5 }
 0x980   : > { %6516 = vmatpush.msra.mxu3 %v4019_v18 }
 0x982   : > { %6517 = vmatpush.msra.mxu3 %v3659_v38 }
 0x983   : > { %6675 = vmatmul.msk.f32.vlgmr.msra.gmra.mxu3 %vm6478_vm1, %v2965_v5 }
 0xa01   : > { %v6499_v51 = vpop.f32.mrf.mxu2 }
 0xa02   : > { %v6500_v8 = vadd.f32 %v6499_v51, %v6476_v23 }
 0xa04   : > { %6522 = vst [vmem:[%s488_s25] sm:$0xff] %v6500_v8 }
 0xa06   : > { %v6519_v50 = vpop.f32.mrf.mxu3 }
 0xa07   : > { %v6520_v15 = vadd.f32 %v6519_v50, %v6476_v23 }
 0xa09   : > { %6523 = vst [vmem:[%s488_s25 + $0x8] sm:$0xff] %v6520_v15 }
 0xa0a PF: > { %s21_s17 = sadd.s32 1, %s7272_s17  }
 0xa0b   : > { %p18_p4 = scmp.ge.s32.totalorder %s21_s17, 4  }
 0xa0d   :  { %20 = sbr.rel (!%p18_p4) target bundleno = 1 (0x1), region = 112 }

</bundles_post_ra>
